<compile_context>
chip_gen: v7x
topology: tpu7x:2x2x1
jax: 0.10.0
libtpu: 0.0.40
codegen_flags: <defaults>
</compile_context>

<pallas_src>
import functools

import jax
import jax.numpy as jnp
from jax import lax
from jax.experimental import pallas as pl
from jax.experimental.pallas import tpu as pltpu


# ------------------- Kernel 1: fused KxK conv + 1x1 qkv GEMMs -------------------

def _proj_kernel(xpad_ref, xflat_ref, wconv_ref, bconv_ref, wqkv_ref, bqkv_ref,
                 conv_ref, qkv_ref, *, tap_offsets, hwp):
    # KxK conv: accumulate shifted 1x1 GEMMs over the padded row-flattened input.
    acc = None
    for t, off in enumerate(tap_offsets):
        slab = xpad_ref[:, off:off + hwp]                        # (Cin, H*Wp)
        part = jnp.dot(wconv_ref[t], slab,
                       preferred_element_type=jnp.float32)       # (Co, H*Wp)
        acc = part if acc is None else acc + part
    conv_ref[...] = (acc + bconv_ref[...]).astype(conv_ref.dtype)

    # 1x1 qkv projection on the compact grid (q-scale already folded into weights).
    qkv_ref[...] = (jnp.dot(wqkv_ref[...], xflat_ref[...],
                            preferred_element_type=jnp.float32)
                    + bqkv_ref[...]).astype(qkv_ref.dtype)


def fused_projections(x_pad_flat, x_flat, w_conv_taps, b_conv, w_qkv, b_qkv,
                      *, Wp, K, hwp):
    B, Cin, Lpad = x_pad_flat.shape
    HW = x_flat.shape[-1]
    Co = w_conv_taps.shape[1]
    Nqkv = w_qkv.shape[0]
    taps = tuple(kh * Wp + kw for kh in range(K) for kw in range(K))
    kernel = functools.partial(_proj_kernel, tap_offsets=taps, hwp=hwp)

    flops = 2 * B * (K * K * Cin * Co * hwp + Cin * Nqkv * HW)
    bytes_accessed = 4 * (x_pad_flat.size + x_flat.size + w_conv_taps.size
                          + w_qkv.size + B * Co * hwp + B * Nqkv * HW)

    return pl.pallas_call(
        kernel,
        grid=(B,),
        in_specs=[
            pl.BlockSpec((None, Cin, Lpad), lambda b: (b, 0, 0)),
            pl.BlockSpec((None, Cin, HW), lambda b: (b, 0, 0)),
            pl.BlockSpec((K * K, Co, Cin), lambda b: (0, 0, 0)),
            pl.BlockSpec((Co, 1), lambda b: (0, 0)),
            pl.BlockSpec((Nqkv, Cin), lambda b: (0, 0)),
            pl.BlockSpec((Nqkv, 1), lambda b: (0, 0)),
        ],
        out_specs=[
            pl.BlockSpec((None, Co, hwp), lambda b: (b, 0, 0)),
            pl.BlockSpec((None, Nqkv, HW), lambda b: (b, 0, 0)),
        ],
        out_shape=[
            jax.ShapeDtypeStruct((B, Co, hwp), jnp.float32),
            jax.ShapeDtypeStruct((B, Nqkv, HW), jnp.float32),
        ],
        compiler_params=pltpu.CompilerParams(
            dimension_semantics=("parallel",),
            vmem_limit_bytes=32 * 1024 * 1024),
        cost_estimate=pl.CostEstimate(flops=int(flops), transcendentals=0,
                                      bytes_accessed=int(bytes_accessed)),
    )(x_pad_flat, x_flat, w_conv_taps, b_conv, w_qkv, b_qkv)


# ------------- Kernel 2: all-head flash attention (online softmax) --------------

def _flash_attn_kernel(q_ref, k_ref, v_ref, o_ref, m_ref, l_ref, acc_ref):
    ki = pl.program_id(1)

    @pl.when(ki == 0)
    def _():
        m_ref[...] = jnp.full(m_ref.shape, -jnp.inf, jnp.float32)
        l_ref[...] = jnp.zeros(l_ref.shape, jnp.float32)
        acc_ref[...] = jnp.zeros(acc_ref.shape, jnp.float32)

    q = q_ref[...]                                   # (nh, HW, dkh), pre-scaled
    k = k_ref[...]                                   # (nh, TK, dkh)
    v = v_ref[...]                                   # (nh, TK, dvh)
    s = jnp.einsum('nqd,nkd->nqk', q, k,
                   preferred_element_type=jnp.float32)           # (nh, HW, TK)

    m_prev = m_ref[...]
    m_new = jnp.maximum(m_prev, jnp.max(s, axis=-1, keepdims=True))
    alpha = jnp.exp(m_prev - m_new)
    p = jnp.exp(s - m_new)
    l_ref[...] = alpha * l_ref[...] + jnp.sum(p, axis=-1, keepdims=True)
    acc_ref[...] = alpha * acc_ref[...] + jnp.einsum(
        'nqk,nkd->nqd', p, v, preferred_element_type=jnp.float32)
    m_ref[...] = m_new

    @pl.when(ki == pl.num_programs(1) - 1)
    def _():
        o_ref[...] = (acc_ref[...] *
                      pl.reciprocal(l_ref[...], approx=True)).astype(o_ref.dtype)


def flash_attention(q, k, v, *, kv_tile):
    """q, k: (B, nh, HW, dkh); v: (B, nh, HW, dvh) -> (B, nh, HW, dvh)."""
    B, nh, HW, dkh = q.shape
    dvh = v.shape[-1]
    nkv = HW // kv_tile
    flops = 2 * B * nh * HW * HW * (dkh + dvh)
    bytes_accessed = 4 * (q.size + k.size + v.size + B * nh * HW * dvh)

    return pl.pallas_call(
        _flash_attn_kernel,
        grid=(B, nkv),
        in_specs=[
            pl.BlockSpec((None, nh, HW, dkh), lambda b, ki: (b, 0, 0, 0)),
            pl.BlockSpec((None, nh, kv_tile, dkh), lambda b, ki: (b, 0, ki, 0)),
            pl.BlockSpec((None, nh, kv_tile, dvh), lambda b, ki: (b, 0, ki, 0)),
        ],
        out_specs=pl.BlockSpec((None, nh, HW, dvh), lambda b, ki: (b, 0, 0, 0)),
        out_shape=jax.ShapeDtypeStruct((B, nh, HW, dvh), jnp.float32),
        scratch_shapes=[
            pltpu.VMEM((nh, HW, 1), jnp.float32),     # running max
            pltpu.VMEM((nh, HW, 1), jnp.float32),     # running denom
            pltpu.VMEM((nh, HW, dvh), jnp.float32),   # output accumulator
        ],
        compiler_params=pltpu.CompilerParams(
            dimension_semantics=("parallel", "arbitrary"),
            vmem_limit_bytes=32 * 1024 * 1024),
        cost_estimate=pl.CostEstimate(flops=int(flops),
                                      transcendentals=int(B * nh * HW * HW),
                                      bytes_accessed=int(bytes_accessed)),
    )(q, k, v)


# ---------------- Kernel 3: 1x1 projection of the attention output --------------

def _attn_proj_kernel(y_ref, w_ref, b_ref, o_ref):
    o_ref[...] = (jnp.dot(w_ref[...], y_ref[...],
                          preferred_element_type=jnp.float32)
                  + b_ref[...]).astype(o_ref.dtype)


def attn_projection(y, w, b):
    """y: (B, dv, HW); w: (dv, dv); b: (dv, 1) -> (B, dv, HW)."""
    B, dv, HW = y.shape
    return pl.pallas_call(
        _attn_proj_kernel,
        grid=(B,),
        in_specs=[pl.BlockSpec((None, dv, HW), lambda b: (b, 0, 0)),
                  pl.BlockSpec((dv, dv), lambda b: (0, 0)),
                  pl.BlockSpec((dv, 1), lambda b: (0, 0))],
        out_specs=pl.BlockSpec((None, dv, HW), lambda b: (b, 0, 0)),
        out_shape=jax.ShapeDtypeStruct((B, dv, HW), jnp.float32),
        compiler_params=pltpu.CompilerParams(
            dimension_semantics=("parallel",),
            vmem_limit_bytes=32 * 1024 * 1024),
    )(y, w, b)


# ----------------------------------- forward ------------------------------------

def aaconv_forward(x, params, *, dk, dv, nh, kernel_size, stride=1):
    assert stride == 1, "TODO(synk): stride=2 not implemented in the Pallas path."
    B, Cin, H, W = x.shape
    K = kernel_size
    pad = (K - 1) // 2
    Hp, Wp = H + 2 * pad, W + 2 * pad
    HW, HWp = H * W, H * Wp
    dkh, dvh = dk // nh, dv // nh
    Co = params['conv_w'].shape[0]
    Nqkv = 2 * dk + dv

    # ---- constant-time parameter prep (tap layout + folded q-scale) ----
    w_conv_taps = jnp.transpose(params['conv_w'], (2, 3, 0, 1)).reshape(K * K, Co, Cin)
    b_conv = params['conv_b'].reshape(Co, 1)
    scale = jnp.concatenate([jnp.full((dk,), dkh ** -0.5, jnp.float32),
                             jnp.ones((dk + dv,), jnp.float32)])
    w_qkv = params['qkv_w'].reshape(Nqkv, Cin) * scale[:, None]
    b_qkv = (params['qkv_b'] * scale).reshape(Nqkv, 1)
    w_attn = params['attn_w'].reshape(dv, dv)
    b_attn = params['attn_b'].reshape(dv, 1)

    # ---- channels-first activations with flattened (lane-dense) spatial axis ----
    x_flat = x.reshape(B, Cin, HW)
    x_pad = jnp.pad(x, ((0, 0), (0, 0), (pad, pad), (pad, pad)))
    x_pad_flat = jnp.pad(x_pad.reshape(B, Cin, Hp * Wp), ((0, 0), (0, 0), (0, K - 1)))

    conv_wide, qkv = fused_projections(x_pad_flat, x_flat, w_conv_taps, b_conv,
                                       w_qkv, b_qkv, Wp=Wp, K=K, hwp=HWp)
    conv_out = conv_wide.reshape(B, Co, H, Wp)[:, :, :, :W]       # drop pad columns

    q, k, v = qkv[:, :dk], qkv[:, dk:2 * dk], qkv[:, 2 * dk:]
    q_h = q.reshape(B, nh, dkh, HW).transpose(0, 1, 3, 2)         # (B, nh, HW, dkh)
    k_h = k.reshape(B, nh, dkh, HW).transpose(0, 1, 3, 2)
    v_h = v.reshape(B, nh, dvh, HW).transpose(0, 1, 3, 2)         # (B, nh, HW, dvh)

    kv_tile = 128 if HW % 128 == 0 else HW
    attn = flash_attention(q_h, k_h, v_h, kv_tile=kv_tile)        # (B, nh, HW, dvh)

    # Mirror torch's raw .view(B, dv, H, W): free reinterpretation of the
    # contiguous row-major (B, nh, HW, dvh) result.
    attn_view = attn.reshape(B, dv, HW)
    attn_out = attn_projection(attn_view, w_attn, b_attn).reshape(B, dv, H, W)

    return jnp.concatenate([conv_out, attn_out], axis=1)


# ------------------------------ pure-JAX reference -------------------------------

def aaconv_reference(x, params, *, dk, dv, nh, kernel_size, stride=1):
    pad = (kernel_size - 1) // 2
    dn = ('NCHW', 'OIHW', 'NCHW')
    conv_out = lax.conv_general_dilated(
        x, params['conv_w'], (stride, stride), [(pad, pad), (pad, pad)],
        dimension_numbers=dn) + params['conv_b'][None, :, None, None]
    qkv = lax.conv_general_dilated(
        x, params['qkv_w'], (stride, stride), 'VALID',
        dimension_numbers=dn) + params['qkv_b'][None, :, None, None]
    B, _, H, W = qkv.shape
    dkh, dvh = dk // nh, dv // nh
    q, k, v = qkv[:, :dk], qkv[:, dk:2 * dk], qkv[:, 2 * dk:]
    q = q.reshape(B, nh, dkh, H * W) * dkh ** -0.5
    k = k.reshape(B, nh, dkh, H * W)
    v = v.reshape(B, nh, dvh, H * W)
    logits = jnp.einsum('bndi,bndj->bnij', q, k)
    w = jax.nn.softmax(logits, axis=-1)
    attn = jnp.einsum('bnij,bndj->bnid', w, v)          # (B, nh, HW, dvh)
    attn = attn.reshape(B, dv, H, W)                    # raw .view, same as torch
    attn = lax.conv_general_dilated(
        attn, params['attn_w'], (1, 1), 'VALID',
        dimension_numbers=dn) + params['attn_b'][None, :, None, None]
    return jnp.concatenate([conv_out, attn], axis=1)


# ------------------------------------- main ---------------------------------------

if __name__ == "__main__":
    # Module config (relative=False, stride=1)
    in_channels, out_channels = 4, 8
    kernel_size = 3
    dk, dv, nh = 8, 4, 2
    B, H, W = 2, 16, 16

    key = jax.random.PRNGKey(0)
    ks = jax.random.split(key, 7)
    params = {
        'conv_w': 0.1 * jax.random.normal(
            ks[0], (out_channels - dv, in_channels, kernel_size, kernel_size),
            jnp.float32),
        'conv_b': 0.1 * jax.random.normal(ks[1], (out_channels - dv,), jnp.float32),
        'qkv_w': 0.1 * jax.random.normal(
            ks[2], (2 * dk + dv, in_channels, 1, 1), jnp.float32),
        'qkv_b': 0.1 * jax.random.normal(ks[3], (2 * dk + dv,), jnp.float32),
        'attn_w': 0.1 * jax.random.normal(ks[4], (dv, dv, 1, 1), jnp.float32),
        'attn_b': 0.1 * jax.random.normal(ks[5], (dv,), jnp.float32),
    }
    x = jax.random.normal(ks[6], (B, in_channels, H, W), jnp.float32)

    fwd = jax.jit(functools.partial(aaconv_forward, dk=dk, dv=dv, nh=nh,
                                    kernel_size=kernel_size, stride=1))
    out = jax.block_until_ready(fwd(x, params))

    ref = jax.block_until_ready(
        aaconv_reference(x, params, dk=dk, dv=dv, nh=nh,
                         kernel_size=kernel_size, stride=1))

    assert out.shape == (B, out_channels, H, W), out.shape
    assert jnp.allclose(out, ref, atol=2e-3, rtol=2e-3), \
        float(jnp.max(jnp.abs(out - ref)))
    print("KERNEL_OK")
</pallas_src>

<mosaic_0001>
module attributes {stable_mosaic.version = 11 : i64} {
  func.func @_proj_kernel(%arg0: i32, %arg1: memref<1x4x326xf32, #tpu.memory_space<vmem>>, %arg2: memref<1x4x256xf32, #tpu.memory_space<vmem>>, %arg3: memref<9x4x4xf32, #tpu.memory_space<vmem>>, %arg4: memref<4x1xf32, #tpu.memory_space<vmem>>, %arg5: memref<20x4xf32, #tpu.memory_space<vmem>>, %arg6: memref<20x1xf32, #tpu.memory_space<vmem>>, %arg7: memref<1x4x288xf32, #tpu.memory_space<vmem>>, %arg8: memref<1x20x256xf32, #tpu.memory_space<vmem>>) attributes {dimension_semantics = [#tpu.dimension_semantics<parallel>], iteration_bounds = array<i64: 2>, scalar_prefetch = 0 : i64, scratch_operands = 0 : i64, tpu.core_type = #tpu.core_type<tc>, window_params = [{transform_indices = @transform_0, window_bounds = array<i64: 1, 4, 326>}, {transform_indices = @transform_1, window_bounds = array<i64: 1, 4, 256>}, {pipeline_mode = #tpu.pipeline_mode<synchronous>, transform_indices = @transform_2, window_bounds = array<i64: 9, 4, 4>}, {pipeline_mode = #tpu.pipeline_mode<synchronous>, transform_indices = @transform_3, window_bounds = array<i64: 4, 1>}, {pipeline_mode = #tpu.pipeline_mode<synchronous>, transform_indices = @transform_4, window_bounds = array<i64: 20, 4>}, {pipeline_mode = #tpu.pipeline_mode<synchronous>, transform_indices = @transform_5, window_bounds = array<i64: 20, 1>}, {transform_indices = @transform_6, window_bounds = array<i64: 1, 4, 288>}, {transform_indices = @transform_7, window_bounds = array<i64: 1, 20, 256>}]} {
    %c0 = arith.constant 0 : index
    %c0_0 = arith.constant 0 : index
    %c0_1 = arith.constant 0 : index
    %0 = vector.load %arg1[%c0, %c0_0, %c0_1] : memref<1x4x326xf32, #tpu.memory_space<vmem>>, vector<1x4x288xf32>
    %1 = vector.shape_cast %0 : vector<1x4x288xf32> to vector<4x288xf32>
    %c0_2 = arith.constant 0 : index
    %c0_3 = arith.constant 0 : index
    %c0_4 = arith.constant 0 : index
    %2 = vector.load %arg3[%c0_2, %c0_3, %c0_4] : memref<9x4x4xf32, #tpu.memory_space<vmem>>, vector<1x4x4xf32>
    %3 = vector.shape_cast %2 : vector<1x4x4xf32> to vector<4x4xf32>
    %cst = arith.constant dense<0.000000e+00> : vector<4x288xf32>
    %4 = tpu.matmul %3, %1, %cst {dimension_numbers = #tpu.dot_dimension_numbers<[1], [0], [0], [1], [0, 0, 1, 1], [], []>} : vector<4x4xf32>, vector<4x288xf32>, vector<4x288xf32> -> vector<4x288xf32>
    %c0_5 = arith.constant 0 : index
    %c0_6 = arith.constant 0 : index
    %c1 = arith.constant 1 : index
    %5 = vector.load %arg1[%c0_5, %c0_6, %c1] : memref<1x4x326xf32, #tpu.memory_space<vmem>>, vector<1x4x288xf32>
    %6 = vector.shape_cast %5 : vector<1x4x288xf32> to vector<4x288xf32>
    %c1_7 = arith.constant 1 : index
    %c0_8 = arith.constant 0 : index
    %c0_9 = arith.constant 0 : index
    %7 = vector.load %arg3[%c1_7, %c0_8, %c0_9] : memref<9x4x4xf32, #tpu.memory_space<vmem>>, vector<1x4x4xf32>
    %8 = vector.shape_cast %7 : vector<1x4x4xf32> to vector<4x4xf32>
    %cst_10 = arith.constant dense<0.000000e+00> : vector<4x288xf32>
    %9 = tpu.matmul %8, %6, %cst_10 {dimension_numbers = #tpu.dot_dimension_numbers<[1], [0], [0], [1], [0, 0, 1, 1], [], []>} : vector<4x4xf32>, vector<4x288xf32>, vector<4x288xf32> -> vector<4x288xf32>
    %10 = arith.addf %4, %9 : vector<4x288xf32>
    %c0_11 = arith.constant 0 : index
    %c0_12 = arith.constant 0 : index
    %c2 = arith.constant 2 : index
    %11 = vector.load %arg1[%c0_11, %c0_12, %c2] : memref<1x4x326xf32, #tpu.memory_space<vmem>>, vector<1x4x288xf32>
    %12 = vector.shape_cast %11 : vector<1x4x288xf32> to vector<4x288xf32>
    %c2_13 = arith.constant 2 : index
    %c0_14 = arith.constant 0 : index
    %c0_15 = arith.constant 0 : index
    %13 = vector.load %arg3[%c2_13, %c0_14, %c0_15] : memref<9x4x4xf32, #tpu.memory_space<vmem>>, vector<1x4x4xf32>
    %14 = vector.shape_cast %13 : vector<1x4x4xf32> to vector<4x4xf32>
    %cst_16 = arith.constant dense<0.000000e+00> : vector<4x288xf32>
    %15 = tpu.matmul %14, %12, %cst_16 {dimension_numbers = #tpu.dot_dimension_numbers<[1], [0], [0], [1], [0, 0, 1, 1], [], []>} : vector<4x4xf32>, vector<4x288xf32>, vector<4x288xf32> -> vector<4x288xf32>
    %16 = arith.addf %10, %15 : vector<4x288xf32>
    %c0_17 = arith.constant 0 : index
    %c0_18 = arith.constant 0 : index
    %c18 = arith.constant 18 : index
    %17 = vector.load %arg1[%c0_17, %c0_18, %c18] : memref<1x4x326xf32, #tpu.memory_space<vmem>>, vector<1x4x288xf32>
    %18 = vector.shape_cast %17 : vector<1x4x288xf32> to vector<4x288xf32>
    %c3 = arith.constant 3 : index
    %c0_19 = arith.constant 0 : index
    %c0_20 = arith.constant 0 : index
    %19 = vector.load %arg3[%c3, %c0_19, %c0_20] : memref<9x4x4xf32, #tpu.memory_space<vmem>>, vector<1x4x4xf32>
    %20 = vector.shape_cast %19 : vector<1x4x4xf32> to vector<4x4xf32>
    %cst_21 = arith.constant dense<0.000000e+00> : vector<4x288xf32>
    %21 = tpu.matmul %20, %18, %cst_21 {dimension_numbers = #tpu.dot_dimension_numbers<[1], [0], [0], [1], [0, 0, 1, 1], [], []>} : vector<4x4xf32>, vector<4x288xf32>, vector<4x288xf32> -> vector<4x288xf32>
    %22 = arith.addf %16, %21 : vector<4x288xf32>
    %c0_22 = arith.constant 0 : index
    %c0_23 = arith.constant 0 : index
    %c19 = arith.constant 19 : index
    %23 = vector.load %arg1[%c0_22, %c0_23, %c19] : memref<1x4x326xf32, #tpu.memory_space<vmem>>, vector<1x4x288xf32>
    %24 = vector.shape_cast %23 : vector<1x4x288xf32> to vector<4x288xf32>
    %c4 = arith.constant 4 : index
    %c0_24 = arith.constant 0 : index
    %c0_25 = arith.constant 0 : index
    %25 = vector.load %arg3[%c4, %c0_24, %c0_25] : memref<9x4x4xf32, #tpu.memory_space<vmem>>, vector<1x4x4xf32>
    %26 = vector.shape_cast %25 : vector<1x4x4xf32> to vector<4x4xf32>
    %cst_26 = arith.constant dense<0.000000e+00> : vector<4x288xf32>
    %27 = tpu.matmul %26, %24, %cst_26 {dimension_numbers = #tpu.dot_dimension_numbers<[1], [0], [0], [1], [0, 0, 1, 1], [], []>} : vector<4x4xf32>, vector<4x288xf32>, vector<4x288xf32> -> vector<4x288xf32>
    %28 = arith.addf %22, %27 : vector<4x288xf32>
    %c0_27 = arith.constant 0 : index
    %c0_28 = arith.constant 0 : index
    %c20 = arith.constant 20 : index
    %29 = vector.load %arg1[%c0_27, %c0_28, %c20] : memref<1x4x326xf32, #tpu.memory_space<vmem>>, vector<1x4x288xf32>
    %30 = vector.shape_cast %29 : vector<1x4x288xf32> to vector<4x288xf32>
    %c5 = arith.constant 5 : index
    %c0_29 = arith.constant 0 : index
    %c0_30 = arith.constant 0 : index
    %31 = vector.load %arg3[%c5, %c0_29, %c0_30] : memref<9x4x4xf32, #tpu.memory_space<vmem>>, vector<1x4x4xf32>
    %32 = vector.shape_cast %31 : vector<1x4x4xf32> to vector<4x4xf32>
    %cst_31 = arith.constant dense<0.000000e+00> : vector<4x288xf32>
    %33 = tpu.matmul %32, %30, %cst_31 {dimension_numbers = #tpu.dot_dimension_numbers<[1], [0], [0], [1], [0, 0, 1, 1], [], []>} : vector<4x4xf32>, vector<4x288xf32>, vector<4x288xf32> -> vector<4x288xf32>
    %34 = arith.addf %28, %33 : vector<4x288xf32>
    %c0_32 = arith.constant 0 : index
    %c0_33 = arith.constant 0 : index
    %c36 = arith.constant 36 : index
    %35 = vector.load %arg1[%c0_32, %c0_33, %c36] : memref<1x4x326xf32, #tpu.memory_space<vmem>>, vector<1x4x288xf32>
    %36 = vector.shape_cast %35 : vector<1x4x288xf32> to vector<4x288xf32>
    %c6 = arith.constant 6 : index
    %c0_34 = arith.constant 0 : index
    %c0_35 = arith.constant 0 : index
    %37 = vector.load %arg3[%c6, %c0_34, %c0_35] : memref<9x4x4xf32, #tpu.memory_space<vmem>>, vector<1x4x4xf32>
    %38 = vector.shape_cast %37 : vector<1x4x4xf32> to vector<4x4xf32>
    %cst_36 = arith.constant dense<0.000000e+00> : vector<4x288xf32>
    %39 = tpu.matmul %38, %36, %cst_36 {dimension_numbers = #tpu.dot_dimension_numbers<[1], [0], [0], [1], [0, 0, 1, 1], [], []>} : vector<4x4xf32>, vector<4x288xf32>, vector<4x288xf32> -> vector<4x288xf32>
    %40 = arith.addf %34, %39 : vector<4x288xf32>
    %c0_37 = arith.constant 0 : index
    %c0_38 = arith.constant 0 : index
    %c37 = arith.constant 37 : index
    %41 = vector.load %arg1[%c0_37, %c0_38, %c37] : memref<1x4x326xf32, #tpu.memory_space<vmem>>, vector<1x4x288xf32>
    %42 = vector.shape_cast %41 : vector<1x4x288xf32> to vector<4x288xf32>
    %c7 = arith.constant 7 : index
    %c0_39 = arith.constant 0 : index
    %c0_40 = arith.constant 0 : index
    %43 = vector.load %arg3[%c7, %c0_39, %c0_40] : memref<9x4x4xf32, #tpu.memory_space<vmem>>, vector<1x4x4xf32>
    %44 = vector.shape_cast %43 : vector<1x4x4xf32> to vector<4x4xf32>
    %cst_41 = arith.constant dense<0.000000e+00> : vector<4x288xf32>
    %45 = tpu.matmul %44, %42, %cst_41 {dimension_numbers = #tpu.dot_dimension_numbers<[1], [0], [0], [1], [0, 0, 1, 1], [], []>} : vector<4x4xf32>, vector<4x288xf32>, vector<4x288xf32> -> vector<4x288xf32>
    %46 = arith.addf %40, %45 : vector<4x288xf32>
    %c0_42 = arith.constant 0 : index
    %c0_43 = arith.constant 0 : index
    %c38 = arith.constant 38 : index
    %47 = vector.load %arg1[%c0_42, %c0_43, %c38] : memref<1x4x326xf32, #tpu.memory_space<vmem>>, vector<1x4x288xf32>
    %48 = vector.shape_cast %47 : vector<1x4x288xf32> to vector<4x288xf32>
    %c8 = arith.constant 8 : index
    %c0_44 = arith.constant 0 : index
    %c0_45 = arith.constant 0 : index
    %49 = vector.load %arg3[%c8, %c0_44, %c0_45] : memref<9x4x4xf32, #tpu.memory_space<vmem>>, vector<1x4x4xf32>
    %50 = vector.shape_cast %49 : vector<1x4x4xf32> to vector<4x4xf32>
    %cst_46 = arith.constant dense<0.000000e+00> : vector<4x288xf32>
    %51 = tpu.matmul %50, %48, %cst_46 {dimension_numbers = #tpu.dot_dimension_numbers<[1], [0], [0], [1], [0, 0, 1, 1], [], []>} : vector<4x4xf32>, vector<4x288xf32>, vector<4x288xf32> -> vector<4x288xf32>
    %52 = arith.addf %46, %51 : vector<4x288xf32>
    %c0_47 = arith.constant 0 : index
    %c0_48 = arith.constant 0 : index
    %53 = vector.load %arg4[%c0_47, %c0_48] : memref<4x1xf32, #tpu.memory_space<vmem>>, vector<4x1xf32>
    %54 = vector.broadcast %53 : vector<4x1xf32> to vector<4x288xf32>
    %55 = arith.addf %52, %54 : vector<4x288xf32>
    %c0_49 = arith.constant 0 : index
    %c0_50 = arith.constant 0 : index
    %c0_51 = arith.constant 0 : index
    %56 = vector.load %arg7[%c0_49, %c0_50, %c0_51] : memref<1x4x288xf32, #tpu.memory_space<vmem>>, vector<1x4x288xf32>
    %57 = vector.shape_cast %56 : vector<1x4x288xf32> to vector<4x288xf32>
    %58 = vector.shape_cast %55 : vector<4x288xf32> to vector<1x4x288xf32>
    tpu.vector_store %arg7[%c0_49, %c0_50, %c0_51], %58 {strides = array<i32>} : memref<1x4x288xf32, #tpu.memory_space<vmem>>, vector<1x4x288xf32>,
    %c0_52 = arith.constant 0 : index
    %c0_53 = arith.constant 0 : index
    %59 = vector.load %arg5[%c0_52, %c0_53] : memref<20x4xf32, #tpu.memory_space<vmem>>, vector<20x4xf32>
    %c0_54 = arith.constant 0 : index
    %c0_55 = arith.constant 0 : index
    %c0_56 = arith.constant 0 : index
    %60 = vector.load %arg2[%c0_54, %c0_55, %c0_56] : memref<1x4x256xf32, #tpu.memory_space<vmem>>, vector<1x4x256xf32>
    %61 = vector.shape_cast %60 : vector<1x4x256xf32> to vector<4x256xf32>
    %cst_57 = arith.constant dense<0.000000e+00> : vector<20x256xf32>
    %62 = tpu.matmul %59, %61, %cst_57 {dimension_numbers = #tpu.dot_dimension_numbers<[1], [0], [0], [1], [0, 0, 1, 1], [], []>} : vector<20x4xf32>, vector<4x256xf32>, vector<20x256xf32> -> vector<20x256xf32>
    %c0_58 = arith.constant 0 : index
    %c0_59 = arith.constant 0 : index
    %63 = vector.load %arg6[%c0_58, %c0_59] : memref<20x1xf32, #tpu.memory_space<vmem>>, vector<20x1xf32>
    %64 = vector.broadcast %63 : vector<20x1xf32> to vector<20x256xf32>
    %65 = arith.addf %62, %64 : vector<20x256xf32>
    %c0_60 = arith.constant 0 : index
    %c0_61 = arith.constant 0 : index
    %c0_62 = arith.constant 0 : index
    %66 = vector.load %arg8[%c0_60, %c0_61, %c0_62] : memref<1x20x256xf32, #tpu.memory_space<vmem>>, vector<1x20x256xf32>
    %67 = vector.shape_cast %66 : vector<1x20x256xf32> to vector<20x256xf32>
    %68 = vector.shape_cast %65 : vector<20x256xf32> to vector<1x20x256xf32>
    tpu.vector_store %arg8[%c0_60, %c0_61, %c0_62], %68 {strides = array<i32>} : memref<1x20x256xf32, #tpu.memory_space<vmem>>, vector<1x20x256xf32>,
    return
  }
  func.func @transform_0(%arg0: i32) -> (i32, i32, i32) {
    %c0_i32 = arith.constant 0 : i32
    %c0_i32_0 = arith.constant 0 : i32
    %c0_i32_1 = arith.constant 0 : i32
    return %arg0, %c0_i32, %c0_i32_0 : i32, i32, i32
  }
  func.func @transform_1(%arg0: i32) -> (i32, i32, i32) {
    %c0_i32 = arith.constant 0 : i32
    %c0_i32_0 = arith.constant 0 : i32
    %c0_i32_1 = arith.constant 0 : i32
    return %arg0, %c0_i32, %c0_i32_0 : i32, i32, i32
  }
  func.func @transform_2(%arg0: i32) -> (i32, i32, i32) {
    %c0_i32 = arith.constant 0 : i32
    %c0_i32_0 = arith.constant 0 : i32
    %c0_i32_1 = arith.constant 0 : i32
    %c0_i32_2 = arith.constant 0 : i32
    return %c0_i32, %c0_i32_0, %c0_i32_1 : i32, i32, i32
  }
  func.func @transform_3(%arg0: i32) -> (i32, i32) {
    %c0_i32 = arith.constant 0 : i32
    %c0_i32_0 = arith.constant 0 : i32
    %c0_i32_1 = arith.constant 0 : i32
    return %c0_i32, %c0_i32_0 : i32, i32
  }
  func.func @transform_4(%arg0: i32) -> (i32, i32) {
    %c0_i32 = arith.constant 0 : i32
    %c0_i32_0 = arith.constant 0 : i32
    %c0_i32_1 = arith.constant 0 : i32
    return %c0_i32, %c0_i32_0 : i32, i32
  }
  func.func @transform_5(%arg0: i32) -> (i32, i32) {
    %c0_i32 = arith.constant 0 : i32
    %c0_i32_0 = arith.constant 0 : i32
    %c0_i32_1 = arith.constant 0 : i32
    return %c0_i32, %c0_i32_0 : i32, i32
  }
  func.func @transform_6(%arg0: i32) -> (i32, i32, i32) {
    %c0_i32 = arith.constant 0 : i32
    %c0_i32_0 = arith.constant 0 : i32
    %c0_i32_1 = arith.constant 0 : i32
    return %arg0, %c0_i32, %c0_i32_0 : i32, i32, i32
  }
  func.func @transform_7(%arg0: i32) -> (i32, i32, i32) {
    %c0_i32 = arith.constant 0 : i32
    %c0_i32_0 = arith.constant 0 : i32
    %c0_i32_1 = arith.constant 0 : i32
    return %arg0, %c0_i32, %c0_i32_0 : i32, i32, i32
  }
}

module attributes {stable_mosaic.version = 11 : i64} {
  func.func @_flash_attn_kernel(%arg0: i32, %arg1: i32, %arg2: memref<1x2x256x4xf32, #tpu.memory_space<vmem>>, %arg3: memref<1x2x128x4xf32, #tpu.memory_space<vmem>>, %arg4: memref<1x2x128x2xf32, #tpu.memory_space<vmem>>, %arg5: memref<1x2x256x2xf32, #tpu.memory_space<vmem>>, %arg6: memref<2x256x1xf32, #tpu.memory_space<vmem>>, %arg7: memref<2x256x1xf32, #tpu.memory_space<vmem>>, %arg8: memref<2x256x2xf32, #tpu.memory_space<vmem>>) attributes {dimension_semantics = [#tpu.dimension_semantics<parallel>, #tpu.dimension_semantics<arbitrary>], iteration_bounds = array<i64: 2, 2>, scalar_prefetch = 0 : i64, scratch_operands = 3 : i64, tpu.core_type = #tpu.core_type<tc>, window_params = [{transform_indices = @transform_0, window_bounds = array<i64: 1, 2, 256, 4>}, {transform_indices = @transform_1, window_bounds = array<i64: 1, 2, 128, 4>}, {transform_indices = @transform_2, window_bounds = array<i64: 1, 2, 128, 2>}, {transform_indices = @transform_3, window_bounds = array<i64: 1, 2, 256, 2>}]} {
    %c0_i32 = arith.constant 0 : i32
    %0 = arith.cmpi eq, %arg1, %c0_i32 : i32
    %1 = arith.extui %0 : i1 to i32
    %c0_i32_0 = arith.constant 0 : i32
    %2 = arith.cmpi ne, %1, %c0_i32_0 : i32
    scf.if %2 {
      %cst_34 = arith.constant 0xFF800000 : f32
      %35 = vector.broadcast %cst_34 : f32 to vector<2x256x1xf32>
      %c0_35 = arith.constant 0 : index
      %c0_36 = arith.constant 0 : index
      %c0_37 = arith.constant 0 : index
      %36 = vector.load %arg6[%c0_35, %c0_36, %c0_37] : memref<2x256x1xf32, #tpu.memory_space<vmem>>, vector<2x256x1xf32>
      tpu.vector_store %arg6[%c0_35, %c0_36, %c0_37], %35 {strides = array<i32>} : memref<2x256x1xf32, #tpu.memory_space<vmem>>, vector<2x256x1xf32>,
      %cst_38 = arith.constant 0.000000e+00 : f32
      %37 = vector.broadcast %cst_38 : f32 to vector<2x256x1xf32>
      %c0_39 = arith.constant 0 : index
      %c0_40 = arith.constant 0 : index
      %c0_41 = arith.constant 0 : index
      %38 = vector.load %arg7[%c0_39, %c0_40, %c0_41] : memref<2x256x1xf32, #tpu.memory_space<vmem>>, vector<2x256x1xf32>
      tpu.vector_store %arg7[%c0_39, %c0_40, %c0_41], %37 {strides = array<i32>} : memref<2x256x1xf32, #tpu.memory_space<vmem>>, vector<2x256x1xf32>,
      %cst_42 = arith.constant 0.000000e+00 : f32
      %39 = vector.broadcast %cst_42 : f32 to vector<2x256x2xf32>
      %c0_43 = arith.constant 0 : index
      %c0_44 = arith.constant 0 : index
      %c0_45 = arith.constant 0 : index
      %40 = vector.load %arg8[%c0_43, %c0_44, %c0_45] : memref<2x256x2xf32, #tpu.memory_space<vmem>>, vector<2x256x2xf32>
      tpu.vector_store %arg8[%c0_43, %c0_44, %c0_45], %39 {strides = array<i32>} : memref<2x256x2xf32, #tpu.memory_space<vmem>>, vector<2x256x2xf32>,
    } else {
    }
    %c0 = arith.constant 0 : index
    %c0_1 = arith.constant 0 : index
    %c0_2 = arith.constant 0 : index
    %c0_3 = arith.constant 0 : index
    %3 = vector.load %arg2[%c0, %c0_1, %c0_2, %c0_3] : memref<1x2x256x4xf32, #tpu.memory_space<vmem>>, vector<1x2x256x4xf32>
    %4 = vector.shape_cast %3 : vector<1x2x256x4xf32> to vector<2x256x4xf32>
    %c0_4 = arith.constant 0 : index
    %c0_5 = arith.constant 0 : index
    %c0_6 = arith.constant 0 : index
    %c0_7 = arith.constant 0 : index
    %5 = vector.load %arg3[%c0_4, %c0_5, %c0_6, %c0_7] : memref<1x2x128x4xf32, #tpu.memory_space<vmem>>, vector<1x2x128x4xf32>
    %6 = vector.shape_cast %5 : vector<1x2x128x4xf32> to vector<2x128x4xf32>
    %c0_8 = arith.constant 0 : index
    %c0_9 = arith.constant 0 : index
    %c0_10 = arith.constant 0 : index
    %c0_11 = arith.constant 0 : index
    %7 = vector.load %arg4[%c0_8, %c0_9, %c0_10, %c0_11] : memref<1x2x128x2xf32, #tpu.memory_space<vmem>>, vector<1x2x128x2xf32>
    %8 = vector.shape_cast %7 : vector<1x2x128x2xf32> to vector<2x128x2xf32>
    "tpu.trace_start"() <{level = 10 : i32, message = "nqd,nkd->nqk"}> : () -> ()
    %cst = arith.constant dense<0.000000e+00> : vector<2x256x128xf32>
    %9 = tpu.matmul %4, %6, %cst {dimension_numbers = #tpu.dot_dimension_numbers<[2], [2], [1], [1], [0, 0, 0, 1, 1, 1], [0], [0]>} : vector<2x256x4xf32>, vector<2x128x4xf32>, vector<2x256x128xf32> -> vector<2x256x128xf32>
    "tpu.trace_stop"() : () -> ()
    %c0_12 = arith.constant 0 : index
    %c0_13 = arith.constant 0 : index
    %c0_14 = arith.constant 0 : index
    %10 = vector.load %arg6[%c0_12, %c0_13, %c0_14] : memref<2x256x1xf32, #tpu.memory_space<vmem>>, vector<2x256x1xf32>
    %cst_15 = arith.constant dense<0xFF800000> : vector<2x256xf32>
    %11 = vector.multi_reduction <maximumf>, %9, %cst_15 [2] : vector<2x256x128xf32> to vector<2x256xf32>
    %12 = vector.shape_cast %11 : vector<2x256xf32> to vector<2x256x1xf32>
    %13 = arith.maximumf %10, %12 : vector<2x256x1xf32>
    %14 = arith.subf %10, %13 : vector<2x256x1xf32>
    %15 = math.exp %14 : vector<2x256x1xf32>
    %16 = vector.broadcast %13 : vector<2x256x1xf32> to vector<2x256x128xf32>
    %17 = arith.subf %9, %16 : vector<2x256x128xf32>
    %18 = math.exp %17 : vector<2x256x128xf32>
    %c0_16 = arith.constant 0 : index
    %c0_17 = arith.constant 0 : index
    %c0_18 = arith.constant 0 : index
    %19 = vector.load %arg7[%c0_16, %c0_17, %c0_18] : memref<2x256x1xf32, #tpu.memory_space<vmem>>, vector<2x256x1xf32>
    %20 = arith.mulf %15, %19 : vector<2x256x1xf32>
    %cst_19 = arith.constant dense<0.000000e+00> : vector<2x256xf32>
    %21 = vector.multi_reduction <add>, %18, %cst_19 [2] : vector<2x256x128xf32> to vector<2x256xf32>
    %22 = vector.shape_cast %21 : vector<2x256xf32> to vector<2x256x1xf32>
    %23 = arith.addf %20, %22 : vector<2x256x1xf32>
    %c0_20 = arith.constant 0 : index
    %c0_21 = arith.constant 0 : index
    %c0_22 = arith.constant 0 : index
    %24 = vector.load %arg7[%c0_20, %c0_21, %c0_22] : memref<2x256x1xf32, #tpu.memory_space<vmem>>, vector<2x256x1xf32>
    tpu.vector_store %arg7[%c0_20, %c0_21, %c0_22], %23 {strides = array<i32>} : memref<2x256x1xf32, #tpu.memory_space<vmem>>, vector<2x256x1xf32>,
    %c0_23 = arith.constant 0 : index
    %c0_24 = arith.constant 0 : index
    %c0_25 = arith.constant 0 : index
    %25 = vector.load %arg8[%c0_23, %c0_24, %c0_25] : memref<2x256x2xf32, #tpu.memory_space<vmem>>, vector<2x256x2xf32>
    %26 = vector.broadcast %15 : vector<2x256x1xf32> to vector<2x256x2xf32>
    %27 = arith.mulf %26, %25 : vector<2x256x2xf32>
    "tpu.trace_start"() <{level = 10 : i32, message = "nqk,nkd->nqd"}> : () -> ()
    %cst_26 = arith.constant dense<0.000000e+00> : vector<2x256x2xf32>
    %28 = tpu.matmul %18, %8, %cst_26 {dimension_numbers = #tpu.dot_dimension_numbers<[2], [1], [1], [2], [0, 0, 0, 1, 1, 2], [0], [0]>} : vector<2x256x128xf32>, vector<2x128x2xf32>, vector<2x256x2xf32> -> vector<2x256x2xf32>
    "tpu.trace_stop"() : () -> ()
    %29 = arith.addf %27, %28 : vector<2x256x2xf32>
    %c0_27 = arith.constant 0 : index
    %c0_28 = arith.constant 0 : index
    %c0_29 = arith.constant 0 : index
    %30 = vector.load %arg8[%c0_27, %c0_28, %c0_29] : memref<2x256x2xf32, #tpu.memory_space<vmem>>, vector<2x256x2xf32>
    tpu.vector_store %arg8[%c0_27, %c0_28, %c0_29], %29 {strides = array<i32>} : memref<2x256x2xf32, #tpu.memory_space<vmem>>, vector<2x256x2xf32>,
    %c0_30 = arith.constant 0 : index
    %c0_31 = arith.constant 0 : index
    %c0_32 = arith.constant 0 : index
    %31 = vector.load %arg6[%c0_30, %c0_31, %c0_32] : memref<2x256x1xf32, #tpu.memory_space<vmem>>, vector<2x256x1xf32>
    tpu.vector_store %arg6[%c0_30, %c0_31, %c0_32], %13 {strides = array<i32>} : memref<2x256x1xf32, #tpu.memory_space<vmem>>, vector<2x256x1xf32>,
    %c1_i32 = arith.constant 1 : i32
    %32 = arith.cmpi eq, %arg1, %c1_i32 : i32
    %33 = arith.extui %32 : i1 to i32
    %c0_i32_33 = arith.constant 0 : i32
    %34 = arith.cmpi ne, %33, %c0_i32_33 : i32
    scf.if %34 {
      %c0_34 = arith.constant 0 : index
      %c0_35 = arith.constant 0 : index
      %c0_36 = arith.constant 0 : index
      %35 = vector.load %arg8[%c0_34, %c0_35, %c0_36] : memref<2x256x2xf32, #tpu.memory_space<vmem>>, vector<2x256x2xf32>
      %c0_37 = arith.constant 0 : index
      %c0_38 = arith.constant 0 : index
      %c0_39 = arith.constant 0 : index
      %36 = vector.load %arg7[%c0_37, %c0_38, %c0_39] : memref<2x256x1xf32, #tpu.memory_space<vmem>>, vector<2x256x1xf32>
      %37 = tpu.reciprocal %36 {approx = true} : vector<2x256x1xf32> -> vector<2x256x1xf32>
      %38 = vector.broadcast %37 : vector<2x256x1xf32> to vector<2x256x2xf32>
      %39 = arith.mulf %35, %38 : vector<2x256x2xf32>
      %c0_40 = arith.constant 0 : index
      %c0_41 = arith.constant 0 : index
      %c0_42 = arith.constant 0 : index
      %c0_43 = arith.constant 0 : index
      %40 = vector.load %arg5[%c0_40, %c0_41, %c0_42, %c0_43] : memref<1x2x256x2xf32, #tpu.memory_space<vmem>>, vector<1x2x256x2xf32>
      %41 = vector.shape_cast %40 : vector<1x2x256x2xf32> to vector<2x256x2xf32>
      %42 = vector.shape_cast %39 : vector<2x256x2xf32> to vector<1x2x256x2xf32>
      tpu.vector_store %arg5[%c0_40, %c0_41, %c0_42, %c0_43], %42 {strides = array<i32>} : memref<1x2x256x2xf32, #tpu.memory_space<vmem>>, vector<1x2x256x2xf32>,
    } else {
    }
    return
  }
  func.func @transform_0(%arg0: i32, %arg1: i32) -> (i32, i32, i32, i32) {
    %c0_i32 = arith.constant 0 : i32
    %c0_i32_0 = arith.constant 0 : i32
    %c0_i32_1 = arith.constant 0 : i32
    %c0_i32_2 = arith.constant 0 : i32
    return %arg0, %c0_i32, %c0_i32_0, %c0_i32_1 : i32, i32, i32, i32
  }
  func.func @transform_1(%arg0: i32, %arg1: i32) -> (i32, i32, i32, i32) {
    %c0_i32 = arith.constant 0 : i32
    %c0_i32_0 = arith.constant 0 : i32
    %c0_i32_1 = arith.constant 0 : i32
    return %arg0, %c0_i32, %arg1, %c0_i32_0 : i32, i32, i32, i32
  }
  func.func @transform_2(%arg0: i32, %arg1: i32) -> (i32, i32, i32, i32) {
    %c0_i32 = arith.constant 0 : i32
    %c0_i32_0 = arith.constant 0 : i32
    %c0_i32_1 = arith.constant 0 : i32
    return %arg0, %c0_i32, %arg1, %c0_i32_0 : i32, i32, i32, i32
  }
  func.func @transform_3(%arg0: i32, %arg1: i32) -> (i32, i32, i32, i32) {
    %c0_i32 = arith.constant 0 : i32
    %c0_i32_0 = arith.constant 0 : i32
    %c0_i32_1 = arith.constant 0 : i32
    %c0_i32_2 = arith.constant 0 : i32
    return %arg0, %c0_i32, %c0_i32_0, %c0_i32_1 : i32, i32, i32, i32
  }
}

module attributes {stable_mosaic.version = 11 : i64} {
  func.func @_attn_proj_kernel(%arg0: i32, %arg1: memref<1x4x256xf32, #tpu.memory_space<vmem>>, %arg2: memref<4x4xf32, #tpu.memory_space<vmem>>, %arg3: memref<4x1xf32, #tpu.memory_space<vmem>>, %arg4: memref<1x4x256xf32, #tpu.memory_space<vmem>>) attributes {dimension_semantics = [#tpu.dimension_semantics<parallel>], iteration_bounds = array<i64: 2>, scalar_prefetch = 0 : i64, scratch_operands = 0 : i64, tpu.core_type = #tpu.core_type<tc>, window_params = [{transform_indices = @transform_0, window_bounds = array<i64: 1, 4, 256>}, {pipeline_mode = #tpu.pipeline_mode<synchronous>, transform_indices = @transform_1, window_bounds = array<i64: 4, 4>}, {pipeline_mode = #tpu.pipeline_mode<synchronous>, transform_indices = @transform_2, window_bounds = array<i64: 4, 1>}, {transform_indices = @transform_3, window_bounds = array<i64: 1, 4, 256>}]} {
    %c0 = arith.constant 0 : index
    %c0_0 = arith.constant 0 : index
    %0 = vector.load %arg2[%c0, %c0_0] : memref<4x4xf32, #tpu.memory_space<vmem>>, vector<4x4xf32>
    %c0_1 = arith.constant 0 : index
    %c0_2 = arith.constant 0 : index
    %c0_3 = arith.constant 0 : index
    %1 = vector.load %arg1[%c0_1, %c0_2, %c0_3] : memref<1x4x256xf32, #tpu.memory_space<vmem>>, vector<1x4x256xf32>
    %2 = vector.shape_cast %1 : vector<1x4x256xf32> to vector<4x256xf32>
    %cst = arith.constant dense<0.000000e+00> : vector<4x256xf32>
    %3 = tpu.matmul %0, %2, %cst {dimension_numbers = #tpu.dot_dimension_numbers<[1], [0], [0], [1], [0, 0, 1, 1], [], []>} : vector<4x4xf32>, vector<4x256xf32>, vector<4x256xf32> -> vector<4x256xf32>
    %c0_4 = arith.constant 0 : index
    %c0_5 = arith.constant 0 : index
    %4 = vector.load %arg3[%c0_4, %c0_5] : memref<4x1xf32, #tpu.memory_space<vmem>>, vector<4x1xf32>
    %5 = vector.broadcast %4 : vector<4x1xf32> to vector<4x256xf32>
    %6 = arith.addf %3, %5 : vector<4x256xf32>
    %c0_6 = arith.constant 0 : index
    %c0_7 = arith.constant 0 : index
    %c0_8 = arith.constant 0 : index
    %7 = vector.load %arg4[%c0_6, %c0_7, %c0_8] : memref<1x4x256xf32, #tpu.memory_space<vmem>>, vector<1x4x256xf32>
    %8 = vector.shape_cast %7 : vector<1x4x256xf32> to vector<4x256xf32>
    %9 = vector.shape_cast %6 : vector<4x256xf32> to vector<1x4x256xf32>
    tpu.vector_store %arg4[%c0_6, %c0_7, %c0_8], %9 {strides = array<i32>} : memref<1x4x256xf32, #tpu.memory_space<vmem>>, vector<1x4x256xf32>,
    return
  }
  func.func @transform_0(%arg0: i32) -> (i32, i32, i32) {
    %c0_i32 = arith.constant 0 : i32
    %c0_i32_0 = arith.constant 0 : i32
    %c0_i32_1 = arith.constant 0 : i32
    return %arg0, %c0_i32, %c0_i32_0 : i32, i32, i32
  }
  func.func @transform_1(%arg0: i32) -> (i32, i32) {
    %c0_i32 = arith.constant 0 : i32
    %c0_i32_0 = arith.constant 0 : i32
    %c0_i32_1 = arith.constant 0 : i32
    return %c0_i32, %c0_i32_0 : i32, i32
  }
  func.func @transform_2(%arg0: i32) -> (i32, i32) {
    %c0_i32 = arith.constant 0 : i32
    %c0_i32_0 = arith.constant 0 : i32
    %c0_i32_1 = arith.constant 0 : i32
    return %c0_i32, %c0_i32_0 : i32, i32
  }
  func.func @transform_3(%arg0: i32) -> (i32, i32, i32) {
    %c0_i32 = arith.constant 0 : i32
    %c0_i32_0 = arith.constant 0 : i32
    %c0_i32_1 = arith.constant 0 : i32
    return %arg0, %c0_i32, %c0_i32_0 : i32, i32, i32
  }
}

</mosaic_0001>

<bundles_post_ra>
// kernel: aaconv_forward.5
= control target key start
LH: loop header
LB: loop body
LE: loop exit
PB: predicated region body
PF: predicated region fallthrough
CT: control target
= control target key end

     0   :  { %s379_s12 = smov 0   ;;  %s402_s0 = inlined_call_operand.vmem [shape: f32[2,4,256], index: 0, kind: input, shape index: {}]   ;;  %s403_s1 = inlined_call_operand.vmem [shape: f32[4,4], index: 1, kind: input, shape index: {}]   ;;  %s404_s2 = inlined_call_operand.vmem [shape: f32[4,1], index: 2, kind: input, shape index: {}]   ;;  %s405_s3 = inlined_call_operand.vmem [shape: f32[2,4,256], index: 3, kind: output, shape index: {}]  }
   0x1 LB: > { %s321_s13 = sadd.s32 4294967295, %s355_s12   ;;  %p325_p0 = scmp.ge.s32.totalorder %s355_s12, 1  ;;  %s355_s12 = sphi %s379_s12, %s13_s12  }
   0x2   : > { %p137_p1 = scmp.lt.s32.totalorder %s355_s12, 3 }
   0x4   : > { %p138_p2 = pnand %p325_p0, %p137_p1 }
   0x5   : > { %p161_p3 = scmp.lt.s32.totalorder (!%p138_p2), %s321_s13, 1  ;;  %v357_v0 = vmov (!%p138_p2), 0.0   ;;  %v173_v1 = vld [vmem:[%s404_s2] sm:$0xf] (!%p138_p2)  ;;  %v358_v2 = vmov (!%p138_p2), 0   ;;  %vm185_vm0 = vcmask (!%p138_p2), 1043456  }
   0x6   : > { %141 = sbr.rel (%p138_p2) target bundleno = 239 (0xef), region = 32  ;;  %254 = vmatprep.mubr.f32.mxu0 (!%p138_p2), %v357_v0  ;;  %347 = vset.pattern.permute.xlu0 (!%p138_p2), %v358_v2  ;;  %v171_v5 = vld [vmem:[%s403_s1] sm:$0xf] (!%p138_p2)  ;;  %vm181_vm1 = vcmask (!%p138_p2), 31744  }
   0x7   : > { %176 = vperm.xlu0 (!%p138_p2), %347, %v173_v1  }
   0xd   : > { %s407_s13 = smov (!%p161_p3, %s321_s13), 1 }
   0xe   : > { %s335_s16 = sshll.u32 %s407_s13, 3 }
   0xf   : > { %s165_s19 = scalar_lea.vmem %s402_s0, %s335_s16  ;;  %s170_s24 = scalar_lea.vmem %s405_s3, %s335_s16 }
  0x10   : > { %v172_v3 = vld [vmem:[%s165_s19] sm:$0xff] }
  0x11   : > { %v180_v4 = vcombine.high %v172_v3, %v172_v3 }
  0x13   : > { %330 = vmatprep.subr.msk.mxu0 %vm185_vm0, %v180_v4 }
  0x14   : > { %331 = vmatpush1.msk.msra.mxu0 %vm185_vm0, %v172_v3 }
  0x15   : > { %332 = vmatmul.mubr.msk.f32.vlgmr.msra.gmra.mrb[0].mxu0 %vm181_vm1, %v171_v5 }
  0x86   : > { %v177_v6 = vpop.permute.xlu0 %176 }
  0xe8   : > { %v256_v7 = vpop.f32.mrb[0].mxu0 }
  0xe9   : > { %v257_v8 = vadd.f32 %v256_v7, %v177_v6  ;;  %v258_v9 = vpop.f32.mrb[1].mxu0 }
  0xea   : > { %v259_v10 = vadd.f32 %v258_v9, %v177_v6 }
  0xec   : > { %v263_v11 = vcombine.low %v257_v8, %v259_v10 }
  0xee   : > { %265 = vst [vmem:[%s170_s24] sm:$0xff] %v263_v11 }
  0xef PF: > { %s13_s12 = sadd.s32 1, %s355_s12  }
  0xf0   : > { %p10_p4 = scmp.ge.s32.totalorder %s13_s12, 4  }
  0xf2   :  { %12 = sbr.rel (!%p10_p4) target bundleno = 1 (0x1), region = 62 }

// kernel: aaconv_forward.3
= control target key start
LH: loop header
LB: loop body
LE: loop exit
PB: predicated region body
PF: predicated region fallthrough
CT: control target
= control target key end

     0   :  { %s2290_s24 = smov 0   ;;  %s2502_s0 = inlined_call_operand.vmem [shape: f32[2,4,326], index: 0, kind: input, shape index: {}]   ;;  %s2503_s1 = inlined_call_operand.vmem [shape: f32[2,4,256], index: 1, kind: input, shape index: {}]   ;;  %s2504_s2 = inlined_call_operand.vmem [shape: f32[9,4,4], index: 2, kind: input, shape index: {}]   ;;  %s2505_s3 = inlined_call_operand.vmem [shape: f32[4,1], index: 3, kind: input, shape index: {}]   ;;  %s2506_s4 = inlined_call_operand.vmem [shape: f32[20,4], index: 4, kind: input, shape index: {}]   ;;  %s2507_s5 = inlined_call_operand.vmem [shape: f32[20,1], index: 5, kind: input, shape index: {}]   ;;  %s2508_s6 = inlined_call_operand.vmem [shape: f32[2,4,288], index: 6, kind: output, shape index: {0}]   ;;  %s2509_s7 = inlined_call_operand.vmem [shape: f32[2,20,256], index: 7, kind: output, shape index: {1}]  }
   0x1 LB: > { %s2056_s25 = sadd.s32 4294967295, %s2237_s24   ;;  %p2060_p0 = scmp.ge.s32.totalorder %s2237_s24, 1  ;;  %s2237_s24 = sphi %s2290_s24, %s18_s24  }
   0x2   : > { %p250_p1 = scmp.lt.s32.totalorder %s2237_s24, 3 }
   0x4   : > { %p251_p2 = pnand %p2060_p0, %p250_p1 }
   0x5   : > { %p292_p3 = scmp.lt.s32.totalorder (!%p251_p2), %s2056_s25, 1  ;;  %v2239_v0 = vmov (!%p251_p2), 0.0   ;;  %vm333_vm0 = vcmask (!%p251_p2), 1043456   ;;  %s2240_s30 = smov (!%p251_p2), 126   ;;  %v2314_v3 = vld [vmem:[%s2504_s2] sm:$0xf] (!%p251_p2) }
   0x6   : > { %254 = sbr.rel (%p251_p2) target bundleno = 419 (0x1a3), region = 44  ;;  %554 = vmatprep.mubr.f32.mxu0 (!%p251_p2), %v2239_v0  ;;  %404 = vmatprep.mubr.f32.mxu1 (!%p251_p2), %v2239_v0  ;;  %vm329_vm1 = vcmask (!%p251_p2), 31744   ;;  %s2241_s10 = smov (!%p251_p2), 110   ;;  %v1814_v12 = vld [vmem:[%s2505_s3] sm:$0xf] (!%p251_p2)  ;;  %v2248_v14 = vmov (!%p251_p2), 0  }
   0x7   : > { %s2242_s11 = smov (!%p251_p2), 109   ;;  %s2243_s12 = smov (!%p251_p2), 127   ;;  %v1834_v13 = vld [vmem:[%s2507_s5] sm:$0xff] (!%p251_p2)  ;;  %2227 = vset.pattern.permute.xlu0 (!%p251_p2), %v2248_v14  ;;  %2228 = vset.pattern.permute.xlu1 (!%p251_p2), %v2248_v14  ;;  %v1835_v15 = vld [vmem:[%s2507_s5 + $0x8] sm:$0xff] (!%p251_p2)  ;;  %v1836_v16 = vld [vmem:[%s2507_s5 + $0x10] sm:$0xf] (!%p251_p2) }
   0x8   : > { %s2244_s13 = smov (!%p251_p2), 108   ;;  %s2245_s14 = smov (!%p251_p2), 92   ;;  %vm644_vm2 = vcmask (!%p251_p2), 1031168   ;;  %vm813_vm3 = vcmask (!%p251_p2), 900096   ;;  %v2350_v22 = vld [vmem:[%s2504_s2 + $0x8] sm:$0xf] (!%p251_p2) }
   0x9   : > { %s2246_s15 = smov (!%p251_p2), 91   ;;  %s2247_s16 = smov (!%p251_p2), 90   ;;  %vm982_vm4 = vcmask (!%p251_p2), 891904   ;;  %v2368_v31 = vld [vmem:[%s2504_s2 + $0xc] sm:$0xf] (!%p251_p2)  ;;  %vm326_vm5 = vcmask (!%p251_p2), 1039360  }
   0xa   : > { %v2066_v39 = vld [vmem:[%s2504_s2 + $0x4] sm:$0xf] (!%p251_p2)  ;;  %v2089_v40 = vld [vmem:[%s2504_s2 + $0x10] sm:$0xf] (!%p251_p2)  ;;  %vm1151_vm6 = vcmask (!%p251_p2), 883712   ;;  %vm2249_vm7 = vmmov (!%p251_p2), 0  }
   0xb   : > { %vm1320_vm8 = vcmask (!%p251_p2), 752640   ;;  %v2095_v47 = vld [vmem:[%s2504_s2 + $0x14] sm:$0xf] (!%p251_p2)  ;;  %vm1489_vm9 = vcmask (!%p251_p2), 744448   ;;  %v2101_v55 = vld [vmem:[%s2504_s2 + $0x18] sm:$0xf] (!%p251_p2) }
   0xc   : > { %vm1658_vm10 = vcmask (!%p251_p2), 736256   ;;  %v2107_v63 = vld [vmem:[%s2504_s2 + $0x1c] sm:$0xf] (!%p251_p2)  ;;  %vm1828_vm11 = vcmask (!%p251_p2), 257024  }
   0xd   : > { %s2511_s25 = smov (!%p292_p3, %s2056_s25), 1 }
   0xe   : > { %s2206_s26 = smul.u32 12, %s2511_s25  ;;  %s2126_s17 = sshll.u32 %s2511_s25, 3 }
   0xf   : > { %s301_s20 = scalar_lea.vmem %s2503_s1, %s2126_s17 }
  0x10   : > { %s2308_s29 = scalar_lea.vmem %s2502_s0, %s2206_s26  ;;  %v1833_v62 = vld [vmem:[%s301_s20] sm:$0xff]  ;;  %s306_s17 = scalar_lea.vmem %s2508_s6, %s2206_s26 }
  0x11   : > { %v631_v1 = vld [vmem:[%s2308_s29] sm:$0xff]  ;;  %v632_v4 = vld [vmem:[%s2308_s29 + $0x8] sm:$0xf] }
  0x12   : > { %638 = vrot.lane.b32.xlu1 %v631_v1, %s2240_s30  ;;  %v637_v2 = vcombine.high %v631_v1, %v631_v1  ;;  %v801_v5 = vld [vmem:[%s2308_s29 + $0x8] sm:$0xf] }
  0x13   : > { %v970_v6 = vld [vmem:[%s2308_s29 + $0x8] sm:$0xf] }
  0x14   : > { %640 = vrot.lane.b32.xlu0 %v637_v2, %s2240_s30  ;;  %2072 = vmatprep.subr.msk.mxu0 %vm333_vm0, %v637_v2  ;;  %v2325_v7 = vld [vmem:[%s2308_s29 + $0x8] sm:$0xf] }
  0x15   : > { %2073 = vmatpush1.msk.msra.mxu0 %vm333_vm0, %v631_v1  ;;  %v1139_v8 = vld [vmem:[%s2308_s29 + $0x8] sm:$0xf] }
  0x16   : > { %807 = vrot.lane.b32.xlu1 %v631_v1, %s2241_s10  ;;  %2074 = vmatmul.mubr.msk.f32.vlgmr.msra.gmra.mrb[0].mxu0 %vm329_vm1, %v2314_v3  ;;  %v1308_v9 = vld [vmem:[%s2308_s29 + $0x8] sm:$0xf] }
  0x17   : > { %720 = vmatprep.mubr.f32.mxu0 %v2239_v0  ;;  %v1477_v10 = vld [vmem:[%s2308_s29 + $0x8] sm:$0xf] }
  0x18   : > { %642 = vrot.lane.b32.xlu0 %v632_v4, %s2240_s30  ;;  %v1646_v11 = vld [vmem:[%s2308_s29 + $0x8] sm:$0xf]  ;;  %v1830_v4 = vld [vmem:[%s2506_s4] sm:$0xff] }
  0x1a   : > { %809 = vrot.lane.b32.xlu1 %v637_v2, %s2241_s10 }
  0x1c   : > { %811 = vrot.lane.b32.xlu0 %v801_v5, %s2241_s10  ;;  %v1831_v5 = vld [vmem:[%s2506_s4 + $0x8] sm:$0xff] }
  0x1e   : > { %980 = vrot.lane.b32.xlu1 %v970_v6, %s2242_s11  ;;  %v1832_v6 = vld [vmem:[%s2506_s4 + $0x10] sm:$0xf] }
  0x20   : > { %978 = vrot.lane.b32.xlu0 %v637_v2, %s2242_s11 }
  0x22   : > { %322 = vrot.lane.b32.xlu1 %v637_v2, %s2243_s12 }
  0x24   : > { %976 = vrot.lane.b32.xlu0 %v631_v1, %s2242_s11  ;;  %s2207_s11 = smul.u32 48, %s2511_s25 }
  0x26   : > { %320 = vrot.lane.b32.xlu1 %v631_v1, %s2243_s12 }
  0x28   : > { %324 = vrot.lane.b32.xlu0 %v2325_v7, %s2243_s12 }
  0x2a   : > { %1149 = vrot.lane.b32.xlu1 %v1139_v8, %s2244_s13 }
  0x2c   : > { %1147 = vrot.lane.b32.xlu0 %v637_v2, %s2244_s13 }
  0x2e   : > { %1316 = vrot.lane.b32.xlu1 %v637_v2, %s2245_s14 }
  0x30   : > { %1145 = vrot.lane.b32.xlu0 %v631_v1, %s2244_s13 }
  0x32   : > { %1314 = vrot.lane.b32.xlu1 %v631_v1, %s2245_s14 }
  0x34   : > { %1318 = vrot.lane.b32.xlu0 %v1308_v9, %s2245_s14  ;;  %s311_s14 = scalar_lea.vmem %s2509_s7, %s2207_s11 }
  0x36   : > { %1487 = vrot.lane.b32.xlu1 %v1477_v10, %s2246_s15 }
  0x38   : > { %1485 = vrot.lane.b32.xlu0 %v637_v2, %s2246_s15 }
  0x3a   : > { %1654 = vrot.lane.b32.xlu1 %v637_v2, %s2247_s16  ;;  %v1853_v2 = vcombine.high %v1833_v62, %v1833_v62 }
  0x3c   : > { %1483 = vrot.lane.b32.xlu0 %v631_v1, %s2246_s15 }
  0x3e   : > { %1652 = vrot.lane.b32.xlu1 %v631_v1, %s2247_s16 }
  0x40   : > { %1656 = vrot.lane.b32.xlu0 %v1646_v11, %s2247_s16 }
  0x42   : > { %1839 = vperm.xlu1 %2228, %v1834_v13  }
  0x44   : > { %1817 = vperm.xlu0 %2227, %v1814_v12  }
  0x46   : > { %1844 = vperm.xlu1 %2228, %v1835_v15  }
  0x48   : > { %1849 = vperm.xlu0 %2227, %v1836_v16  }
  0x84   : > { %v639_v17 = vpop.permute.xlu1 %638 }
  0x86   : > { %v641_v18 = vpop.permute.xlu0 %640 }
  0x87   : > { %v645_v23 = vsel %vm644_vm2, %v639_v17, %v641_v18 }
  0x88   : > { %v808_v19 = vpop.permute.xlu1 %807 }
  0x8a   : > { %v2344_v20 = vpop.permute.xlu0 %642 }
  0x8b   : > { %v646_v21 = vsel %vm644_vm2, %v641_v18, %v2344_v20 }
  0x8c   : > { %2078 = vmatprep.subr.msk.mxu0 %vm333_vm0, %v646_v21  ;;  %v810_v24 = vpop.permute.xlu1 %809 }
  0x8d   : > { %2079 = vmatpush1.msk.msra.mxu0 %vm333_vm0, %v645_v23  ;;  %v814_v25 = vsel %vm813_vm3, %v808_v19, %v810_v24 }
  0x8e   : > { %v2354_v26 = vpop.permute.xlu0 %811  ;;  %2080 = vmatmul.mubr.msk.f32.vlgmr.msra.gmra.mrb[0].mxu0 %vm329_vm1, %v2350_v22 }
  0x8f   : > { %v815_v27 = vsel %vm813_vm3, %v810_v24, %v2354_v26  ;;  %889 = vmatprep.mubr.f32.mxu0 %v2239_v0 }
  0x90   : > { %2084 = vmatprep.subr.msk.mxu0 %vm333_vm0, %v815_v27  ;;  %v2361_v28 = vpop.permute.xlu1 %980 }
  0x91   : > { %2085 = vmatpush1.msk.msra.mxu0 %vm333_vm0, %v814_v25 }
  0x92   : > { %v979_v29 = vpop.permute.xlu0 %978 }
  0x93   : > { %v984_v30 = vsel %vm982_vm4, %v979_v29, %v2361_v28 }
  0x94   : > { %2090 = vmatprep.subr.msk.mxu0 %vm333_vm0, %v984_v30  ;;  %v323_v32 = vpop.permute.xlu1 %322 }
  0x96   : > { %v977_v33 = vpop.permute.xlu0 %976  ;;  %2086 = vmatmul.mubr.msk.f32.vlgmr.msra.gmra.mrb[0].mxu0 %vm329_vm1, %v2368_v31 }
  0x97   : > { %v983_v34 = vsel %vm982_vm4, %v977_v33, %v979_v29  ;;  %1058 = vmatprep.mubr.f32.mxu0 %v2239_v0 }
  0x98   : > { %2091 = vmatpush1.msk.msra.mxu0 %vm333_vm0, %v983_v34  ;;  %v321_v35 = vpop.permute.xlu1 %320 }
  0x99   : > { %v327_v37 = vsel %vm326_vm5, %v321_v35, %v323_v32 }
  0x9a   : > { %v325_v36 = vpop.permute.xlu0 %324 }
  0x9b   : > { %v328_v38 = vsel %vm326_vm5, %v323_v32, %v325_v36 }
  0x9c   : > { %2067 = vmatprep.subr.msk.mxu1 %vm333_vm0, %v328_v38  ;;  %v1150_v41 = vpop.permute.xlu1 %1149 }
  0x9d   : > { %2068 = vmatpush1.msk.msra.mxu1 %vm333_vm0, %v327_v37 }
  0x9e   : > { %v1148_v42 = vpop.permute.xlu0 %1147  ;;  %2069 = vmatmul.mubr.msk.f32.vlgmr.msra.gmra.mrb[0].mxu1 %vm329_vm1, %v2066_v39  ;;  %2145 = vmatprep.subr.mxu1 %v2239_v0 }
  0x9f   : > { %2092 = vmatmul.mubr.msk.f32.vlgmr.msra.gmra.mrb[0].mxu0 %vm329_vm1, %v2089_v40  ;;  %2146 = vmatpush3.msk.msra.mxu1 %vm333_vm0, %v325_v36  ;;  %v1153_v43 = vsel %vm1151_vm6, %v1148_v42, %v1150_v41 }
  0xa0   : > { %2147 = vmatprep.mubr.msk.f32.mxu1 %vm2249_vm7, %v2239_v0  ;;  %2096 = vmatprep.subr.msk.mxu0 %vm333_vm0, %v1153_v43  ;;  %v1317_v44 = vpop.permute.xlu1 %1316 }
  0xa1   : > { %2150 = vmatprep.subr.mxu1 %v2239_v0  ;;  %1227 = vmatprep.mubr.f32.mxu0 %v2239_v0 }
  0xa2   : > { %v1146_v45 = vpop.permute.xlu0 %1145  ;;  %2148 = vmatmul.mubr.msk.f32.vlgmr.msra.gmra.mrb[2].mxu1 %vm329_vm1, %v2066_v39 }
  0xa3   : > { %v1152_v46 = vsel %vm1151_vm6, %v1146_v45, %v1148_v42  ;;  %2151 = vmatpush3.msk.msra.mxu1 %vm333_vm0, %v2325_v7  ;;  %2152 = vmatprep.mubr.msk.f32.mxu1 %vm2249_vm7, %v2239_v0 }
  0xa4   : > { %2097 = vmatpush1.msk.msra.mxu0 %vm333_vm0, %v1152_v46  ;;  %2155 = vmatprep.subr.mxu1 %v2239_v0  ;;  %v1315_v48 = vpop.permute.xlu1 %1314 }
  0xa5   : > { %v1321_v50 = vsel %vm1320_vm8, %v1315_v48, %v1317_v44 }
  0xa6   : > { %v1319_v49 = vpop.permute.xlu0 %1318  ;;  %2153 = vmatmul.mubr.msk.f32.vlgmr.msra.gmra.mrb[4].mxu1 %vm329_vm1, %v2314_v3  ;;  %v2113_v3 = vld [vmem:[%s2504_s2 + $0x20] sm:$0xf] }
  0xa7   : > { %v1322_v51 = vsel %vm1320_vm8, %v1317_v44, %v1319_v49  ;;  %2156 = vmatpush3.msk.msra.mxu1 %vm333_vm0, %v2344_v20  ;;  %2098 = vmatmul.mubr.msk.f32.vlgmr.msra.gmra.mrb[0].mxu0 %vm329_vm1, %v2095_v47 }
  0xa8   : > { %2102 = vmatprep.subr.msk.mxu0 %vm333_vm0, %v1322_v51  ;;  %2157 = vmatprep.mubr.msk.f32.mxu1 %vm2249_vm7, %v2239_v0  ;;  %v1488_v52 = vpop.permute.xlu1 %1487 }
  0xa9   : > { %2160 = vmatprep.subr.mxu1 %v2239_v0  ;;  %2103 = vmatpush1.msk.msra.mxu0 %vm333_vm0, %v1321_v50 }
  0xaa   : > { %2158 = vmatmul.mubr.msk.f32.vlgmr.msra.gmra.mrb[6].mxu1 %vm329_vm1, %v2350_v22  ;;  %v1486_v53 = vpop.permute.xlu0 %1485  ;;  %1396 = vmatprep.mubr.f32.mxu0 %v2239_v0 }
  0xab   : > { %2161 = vmatpush3.msk.msra.mxu1 %vm333_vm0, %v2354_v26  ;;  %2162 = vmatprep.mubr.msk.f32.mxu1 %vm2249_vm7, %v2239_v0  ;;  %v1491_v54 = vsel %vm1489_vm9, %v1486_v53, %v1488_v52 }
  0xac   : > { %2165 = vmatprep.subr.mxu1 %v2239_v0  ;;  %2108 = vmatprep.subr.msk.mxu0 %vm333_vm0, %v1491_v54  ;;  %v1655_v56 = vpop.permute.xlu1 %1654 }
  0xae   : > { %2163 = vmatmul.mubr.msk.f32.vlgmr.msra.gmra.mrb[8].mxu1 %vm329_vm1, %v2368_v31  ;;  %v1484_v57 = vpop.permute.xlu0 %1483 }
  0xaf   : > { %2166 = vmatpush3.msk.msra.mxu1 %vm333_vm0, %v2361_v28  ;;  %2104 = vmatmul.mubr.msk.f32.vlgmr.msra.gmra.mrb[0].mxu0 %vm329_vm1, %v2101_v55  ;;  %v1490_v58 = vsel %vm1489_vm9, %v1484_v57, %v1486_v53 }
  0xb0   : > { %2167 = vmatprep.mubr.msk.f32.mxu1 %vm2249_vm7, %v2239_v0  ;;  %2170 = vmatprep.subr.mxu1 %v2239_v0  ;;  %v1653_v61 = vpop.permute.xlu1 %1652 }
  0xb1   : > { %2109 = vmatpush1.msk.msra.mxu0 %vm333_vm0, %v1490_v58  ;;  %1565 = vmatprep.mubr.f32.mxu0 %v2239_v0  ;;  %v1659_v1 = vsel %vm1658_vm10, %v1653_v61, %v1655_v56 }
  0xb2   : > { %2168 = vmatmul.mubr.msk.f32.vlgmr.msra.gmra.mrb[10].mxu1 %vm329_vm1, %v2089_v40  ;;  %v1657_v59 = vpop.permute.xlu0 %1656 }
  0xb3   : > { %2171 = vmatpush3.msk.msra.mxu1 %vm333_vm0, %v1150_v41  ;;  %2172 = vmatprep.mubr.msk.f32.mxu1 %vm2249_vm7, %v2239_v0  ;;  %v1660_v60 = vsel %vm1658_vm10, %v1655_v56, %v1657_v59 }
  0xb4   : > { %2175 = vmatprep.subr.mxu1 %v2239_v0  ;;  %2114 = vmatprep.subr.msk.mxu0 %vm333_vm0, %v1660_v60 }
  0xb6   : > { %2173 = vmatmul.mubr.msk.f32.vlgmr.msra.gmra.mrb[12].mxu1 %vm329_vm1, %v2095_v47 }
  0xb7   : > { %2176 = vmatpush3.msk.msra.mxu1 %vm333_vm0, %v1319_v49  ;;  %2110 = vmatmul.mubr.msk.f32.vlgmr.msra.gmra.mrb[0].mxu0 %vm329_vm1, %v2107_v63 }
  0xb8   : > { %2177 = vmatprep.mubr.msk.f32.mxu1 %vm2249_vm7, %v2239_v0  ;;  %2180 = vmatprep.subr.mxu1 %v2239_v0 }
  0xb9   : > { %2115 = vmatpush1.msk.msra.mxu0 %vm333_vm0, %v1659_v1  ;;  %1734 = vmatprep.mubr.f32.mxu0 %v2239_v0 }
  0xba   : > { %2178 = vmatmul.mubr.msk.f32.vlgmr.msra.gmra.mrb[14].mxu1 %vm329_vm1, %v2101_v55  ;;  %2119 = vmatprep.subr.msk.mxu0 %vm333_vm0, %v1853_v2 }
  0xbb   : > { %2181 = vmatpush3.msk.msra.mxu1 %vm333_vm0, %v1488_v52  ;;  %2182 = vmatprep.mubr.msk.f32.mxu1 %vm2249_vm7, %v2239_v0 }
  0xbc   : > { %2185 = vmatprep.subr.mxu1 %v2239_v0 }
  0xbe   : > { %2183 = vmatmul.mubr.msk.f32.vlgmr.msra.gmra.mrb[16].mxu1 %vm329_vm1, %v2107_v63 }
  0xbf   : > { %2116 = vmatmul.mubr.msk.f32.vlgmr.msra.gmra.mrb[0].mxu0 %vm329_vm1, %v2113_v3  ;;  %2186 = vmatpush3.msk.msra.mxu1 %vm333_vm0, %v1657_v59 }
  0xc0   : > { %2187 = vmatprep.mubr.msk.f32.mxu1 %vm2249_vm7, %v2239_v0  ;;  %2120 = vmatpush1.msk.msra.mxu0 %vm333_vm0, %v1833_v62 }
  0xc1   : > { %1931 = vmatprep.mubr.f32.mxu0 %v2239_v0  ;;  %v1840_v30 = vpop.permute.xlu1 %1839 }
  0xc2   : > { %2188 = vmatmul.mubr.msk.f32.vlgmr.msra.gmra.mrb[18].mxu1 %vm329_vm1, %v2113_v3 }
  0xc3   : > { %2121 = vmatmul.mubr.msk.f32.vlgmr.msra.gmra.mrb[2].mxu0 %vm329_vm1, %v1830_v4  ;;  %v1818_v28 = vpop.permute.xlu0 %1817 }
  0xc4   : > { %1937 = vmatprep.mubr.f32.mxu0 %v2239_v0 }
  0xc5   : > { %v1845_v48 = vpop.permute.xlu1 %1844 }
  0xc7   : > { %2122 = vmatmul.mubr.msk.f32.gmra.mrb[4].mxu0 %vm329_vm1, %v1831_v5  ;;  %v1850_v54 = vpop.permute.xlu0 %1849 }
  0xc8   : > { %1943 = vmatprep.mubr.f32.mxu0 %v2239_v0 }
  0xcb   : > { %2123 = vmatmul.mubr.msk.f32.gmra.mrb[6].mxu0 %vm329_vm1, %v1832_v6 }
 0x171   : > { %v406_v7 = vpop.f32.mrb[0].mxu1 }
 0x172   : > { %v408_v8 = vpop.f32.mrb[1].mxu1 }
 0x175   : > { %v477_v9 = vpop.f32.mrb[2].mxu1 }
 0x176   : > { %v2149_v10 = vpop.f32.mrb[3].mxu1 }
 0x179   : > { %v627_v11 = vpop.f32.mrb[4].mxu1 }
 0x17a   : > { %v628_v12 = vadd.f32 %v627_v11, %v477_v9  ;;  %v2154_v13 = vpop.f32.mrb[5].mxu1 }
 0x17d   : > { %v793_v14 = vpop.f32.mrb[6].mxu1 }
 0x17e   : > { %v799_v15 = vadd.f32 %v793_v14, %v628_v12  ;;  %v2159_v16 = vpop.f32.mrb[7].mxu1 }
 0x181   : > { %v962_v17 = vpop.f32.mrb[8].mxu1 }
 0x182   : > { %v968_v18 = vadd.f32 %v962_v17, %v799_v15  ;;  %v2164_v19 = vpop.f32.mrb[9].mxu1 }
 0x185   : > { %v1131_v0 = vpop.f32.mrb[10].mxu1 }
 0x186   : > { %v1137_v20 = vadd.f32 %v1131_v0, %v968_v18  ;;  %v2169_v21 = vpop.f32.mrb[11].mxu1 }
 0x189   : > { %v1300_v22 = vpop.f32.mrb[12].mxu1 }
 0x18a   : > { %v1306_v23 = vadd.f32 %v1300_v22, %v1137_v20  ;;  %v2174_v24 = vpop.f32.mrb[13].mxu1 }
 0x18d   : > { %v1469_v25 = vpop.f32.mrb[14].mxu1 }
 0x18e   : > { %v1475_v26 = vadd.f32 %v1469_v25, %v1306_v23  ;;  %v2179_v27 = vpop.f32.mrb[15].mxu1 }
 0x191   : > { %v1638_v29 = vpop.f32.mrb[16].mxu1 }
 0x192   : > { %v1644_v31 = vadd.f32 %v1638_v29, %v1475_v26  ;;  %v1736_v32 = vpop.f32.mrb[0].mxu0  ;;  %v2184_v33 = vpop.f32.mrb[17].mxu1 }
 0x193   : > { %v2190_v34 = vadd.f32 %v1736_v32, %v406_v7  ;;  %v1738_v35 = vpop.f32.mrb[1].mxu0 }
 0x194   : > { %v2191_v36 = vadd.f32 %v1738_v35, %v408_v8 }
 0x195   : > { %v1820_v37 = vadd.f32 %v2190_v34, %v1818_v28  ;;  %v1807_v38 = vpop.f32.mrb[18].mxu1 }
 0x196   : > { %v1821_v39 = vadd.f32 %v2191_v36, %v1818_v28  ;;  %v1813_v40 = vadd.f32 %v1807_v38, %v1644_v31  ;;  %v1933_v41 = vpop.f32.mrb[2].mxu0  ;;  %v2189_v42 = vpop.f32.mrb[19].mxu1 }
 0x197   : > { %v1934_v43 = vadd.f32 %v1933_v41, %v1840_v30  ;;  %v1935_v44 = vpop.f32.mrb[3].mxu0 }
 0x198   : > { %v1825_v45 = vcombine.low %v1820_v37, %v1821_v39  ;;  %v1822_v46 = vadd.f32 %v1818_v28, %v1813_v40  ;;  %v1936_v47 = vadd.f32 %v1935_v44, %v1840_v30 }
 0x199   : > { %1950 = vst [vmem:[%s311_s14] sm:$0xff] %v1934_v43 }
 0x19a   : > { %1827 = vst [vmem:[%s306_s17] sm:$0xff] %v1825_v45  ;;  %1829 = vst.msk [vmem:[%s306_s17 + $0x8] sm:$0xf] %vm1828_vm11, %v1822_v46  ;;  %v1939_v49 = vpop.f32.mrb[4].mxu0 }
 0x19b   : > { %1951 = vst [vmem:[%s311_s14 + $0x8] sm:$0xff] %v1936_v47  ;;  %v1941_v50 = vpop.f32.mrb[5].mxu0  ;;  %v1940_v51 = vadd.f32 %v1939_v49, %v1845_v48 }
 0x19c   : > { %v1942_v52 = vadd.f32 %v1941_v50, %v1845_v48 }
 0x19d   : > { %1952 = vst [vmem:[%s311_s14 + $0x10] sm:$0xff] %v1940_v51 }
 0x19e   : > { %1953 = vst [vmem:[%s311_s14 + $0x18] sm:$0xff] %v1942_v52  ;;  %v1945_v53 = vpop.f32.mrb[6].mxu0 }
 0x19f   : > { %v1946_v55 = vadd.f32 %v1945_v53, %v1850_v54  ;;  %v1947_v56 = vpop.f32.mrb[7].mxu0 }
 0x1a0   : > { %v1948_v57 = vadd.f32 %v1947_v56, %v1850_v54 }
 0x1a1   : > { %1954 = vst [vmem:[%s311_s14 + $0x20] sm:$0xf] %v1946_v55 }
 0x1a2   : > { %1955 = vst [vmem:[%s311_s14 + $0x28] sm:$0xf] %v1948_v57 }
 0x1a3 PF: > { %s18_s24 = sadd.s32 1, %s2237_s24  }
 0x1a4   : > { %p15_p4 = scmp.ge.s32.totalorder %s18_s24, 4  }
 0x1a6   :  { %17 = sbr.rel (!%p15_p4) target bundleno = 1 (0x1), region = 97 }

// kernel: aaconv_forward.4
= control target key start
LH: loop header
LB: loop body
LE: loop exit
PB: predicated region body
PF: predicated region fallthrough
CT: control target
= control target key end

     0   :  { %s6125_s12 = smov 0   ;;  %s6127_s13 = smov 0   ;;  %s8975_s0 = inlined_call_operand.vmem [shape: f32[2,2,256,4], index: 0, kind: input, shape index: {}]   ;;  %s8976_s1 = inlined_call_operand.vmem [shape: f32[2,2,256,4], index: 1, kind: input, shape index: {}]   ;;  %s8977_s2 = inlined_call_operand.vmem [shape: f32[2,2,256,2], index: 2, kind: input, shape index: {}]   ;;  %s8978_s3 = inlined_call_operand.vmem [shape: f32[2,2,256,2], index: 3, kind: output, shape index: {}]  }
   0x1   :  { %s6129_s14 = smov 0   ;;  %s6131_s15 = smov 0  }
   0x2   :  { %s6133_s16 = smov 0   ;;  %s6135_s17 = smov 0  }
   0x3   :  { %s6137_s18 = smov 0  }
   0x4 LB: > { %s22_s19 = sadd.s32 1, %s6091_s16  ;;  %s25_s20 = sadd.s32 1, %s6095_s17  ;;  %s6099_s18 = sphi %s6137_s18, %s13_s18   ;;  %s6095_s17 = sphi %s6135_s17, %s9513_s17   ;;  %s6091_s16 = sphi %s6133_s16, %s9512_s16   ;;  %s6087_s15 = sphi %s6131_s15, %s9511_s15   ;;  %s6083_s14 = sphi %s6129_s14, %s9510_s14   ;;  %s6079_s13 = sphi %s6127_s13, %s9509_s13   ;;  %s6075_s12 = sphi %s6125_s12, %s9508_s12  }
   0x5   : > { %p23_p0 = scmp.ge.s32.totalorder %s22_s19, 2  ;;  %p67_p1 = scmp.ne.s32.totalorder %s6079_s13, %s6075_s12 }
   0x6   : > { %p68_p2 = scmp.eq.s32.totalorder %s6099_s18, 0  ;;  %s60_s25 = sadd.s32 1, %s6079_s13 }
   0x7   : > { %s9515_s19 = smov (%p23_p0, %s22_s19), 0  ;;  %s9517_s20 = smov (!%p23_p0, %s25_s20), %s6095_s17 }
   0x8   : > { %p6168_p3 = por %p68_p2, %p67_p1  ;;  %p27_p4 = scmp.ge.s32.totalorder %s9517_s20, 2 }
   0x9   : > { %s56_s22 = ssub.s32 %s6091_s16, %s9515_s19  ;;  %p4807_p6 = scmp.ge.s32.totalorder %s6099_s18, 4 }
   0xa   : > { %s9519_s20 = smov (%p27_p4, %s9517_s20), 0 }
   0xb   : > { %s55_s23 = ssub.s32 %s6095_s17, %s9519_s20  ;;  %147 = sbr.rel (%p4807_p6) target bundleno = 64 (0x40), region = 16 }
   0xc   : > { %s57_s24 = sor.u32 %s56_s22, %s55_s23 }
   0xd   : > { %p58_p5 = scmp.eq.s32.totalorder %s57_s24, 0 }
   0xf   : > { %s6180_s26 = scalar_select %p58_p5, %s6079_s13, %s60_s25  }
  0x12   : > { %158 = sbr.rel (!%p6168_p3) target bundleno = 41 (0x29), region = 24  ;;  %s160_s27 = sand.u32 (%p6168_p3), 1, %s6079_s13  }
  0x13   : > { %s4809_s28 = sshll.u32 (%p6168_p3), %s6091_s16, 4  ;;  %s4808_s29 = sshll.u32 (%p6168_p3), %s160_s27, 8 }
  0x14   : > { %s4810_s30 = sshll.u32 (%p6168_p3), %s6095_s17, 6  ;;  %s6196_s9 = scalar_lea.vmem (%p6168_p3), [#allocation5], %s4808_s29 }
  0x15   : > { %s165_s4 = sadd.s32 (%p6168_p3), %s4810_s30, %s4809_s28 }
  0x16   : > { %s4811_s5 = sshll.u32 (%p6168_p3), %s165_s4, 3 }
  0x17   : > { %s6191_s8 = scalar_lea.vmem (%p6168_p3), %s8976_s1, %s4811_s5 }
  0x18   : > { %v257_v0 = vld [vmem:[%s6191_s8] sm:$0xff] (%p6168_p3)  ;;  %v259_v1 = vld [vmem:[%s6191_s8 + $0x8] sm:$0xff] (%p6168_p3)  ;;  %v261_v2 = vld [vmem:[%s6191_s8 + $0x10] sm:$0xff] (%p6168_p3) }
  0x19   : > { %258 = vst [vmem:[%s6196_s9] sm:$0xff] %v257_v0  ;;  %260 = vst [vmem:[%s6196_s9 + $0x8] sm:$0xff] %v259_v1  ;;  %v263_v3 = vld [vmem:[%s6191_s8 + $0x18] sm:$0xff]  ;;  %v265_v4 = vld [vmem:[%s6191_s8 + $0x20] sm:$0xff] }
  0x1a   : > { %262 = vst [vmem:[%s6196_s9 + $0x10] sm:$0xff] %v261_v2  ;;  %v267_v5 = vld [vmem:[%s6191_s8 + $0x28] sm:$0xff]  ;;  %264 = vst [vmem:[%s6196_s9 + $0x18] sm:$0xff] %v263_v3  ;;  %v269_v6 = vld [vmem:[%s6191_s8 + $0x30] sm:$0xff] }
  0x1b   : > { %266 = vst [vmem:[%s6196_s9 + $0x20] sm:$0xff] %v265_v4  ;;  %268 = vst [vmem:[%s6196_s9 + $0x28] sm:$0xff] %v267_v5  ;;  %v271_v7 = vld [vmem:[%s6191_s8 + $0x38] sm:$0xff]  ;;  %v273_v8 = vld [vmem:[%s6191_s8 + $0x40] sm:$0xff] }
  0x1c   : > { %270 = vst [vmem:[%s6196_s9 + $0x30] sm:$0xff] %v269_v6  ;;  %272 = vst [vmem:[%s6196_s9 + $0x38] sm:$0xff] %v271_v7  ;;  %v275_v9 = vld [vmem:[%s6191_s8 + $0x48] sm:$0xff]  ;;  %v277_v10 = vld [vmem:[%s6191_s8 + $0x50] sm:$0xff] }
  0x1d   : > { %274 = vst [vmem:[%s6196_s9 + $0x40] sm:$0xff] %v273_v8  ;;  %v279_v11 = vld [vmem:[%s6191_s8 + $0x58] sm:$0xff]  ;;  %276 = vst [vmem:[%s6196_s9 + $0x48] sm:$0xff] %v275_v9  ;;  %v281_v12 = vld [vmem:[%s6191_s8 + $0x60] sm:$0xff] }
  0x1e   : > { %278 = vst [vmem:[%s6196_s9 + $0x50] sm:$0xff] %v277_v10  ;;  %280 = vst [vmem:[%s6196_s9 + $0x58] sm:$0xff] %v279_v11  ;;  %v283_v13 = vld [vmem:[%s6191_s8 + $0x68] sm:$0xff]  ;;  %v285_v14 = vld [vmem:[%s6191_s8 + $0x70] sm:$0xff] }
  0x1f   : > { %282 = vst [vmem:[%s6196_s9 + $0x60] sm:$0xff] %v281_v12  ;;  %284 = vst [vmem:[%s6196_s9 + $0x68] sm:$0xff] %v283_v13  ;;  %v287_v15 = vld [vmem:[%s6191_s8 + $0x78] sm:$0xff]  ;;  %v289_v16 = vld [vmem:[%s6191_s8 + $0x100] sm:$0xff] }
  0x20   : > { %286 = vst [vmem:[%s6196_s9 + $0x70] sm:$0xff] %v285_v14  ;;  %v291_v17 = vld [vmem:[%s6191_s8 + $0x108] sm:$0xff]  ;;  %288 = vst [vmem:[%s6196_s9 + $0x78] sm:$0xff] %v287_v15  ;;  %v293_v18 = vld [vmem:[%s6191_s8 + $0x110] sm:$0xff] }
  0x21   : > { %290 = vst [vmem:[%s6196_s9 + $0x80] sm:$0xff] %v289_v16  ;;  %292 = vst [vmem:[%s6196_s9 + $0x88] sm:$0xff] %v291_v17  ;;  %v295_v19 = vld [vmem:[%s6191_s8 + $0x118] sm:$0xff]  ;;  %v297_v20 = vld [vmem:[%s6191_s8 + $0x120] sm:$0xff] }
  0x22   : > { %294 = vst [vmem:[%s6196_s9 + $0x90] sm:$0xff] %v293_v18  ;;  %296 = vst [vmem:[%s6196_s9 + $0x98] sm:$0xff] %v295_v19  ;;  %v299_v21 = vld [vmem:[%s6191_s8 + $0x128] sm:$0xff]  ;;  %v301_v22 = vld [vmem:[%s6191_s8 + $0x130] sm:$0xff] }
  0x23   : > { %298 = vst [vmem:[%s6196_s9 + $0xa0] sm:$0xff] %v297_v20  ;;  %v303_v23 = vld [vmem:[%s6191_s8 + $0x138] sm:$0xff]  ;;  %300 = vst [vmem:[%s6196_s9 + $0xa8] sm:$0xff] %v299_v21  ;;  %v305_v24 = vld [vmem:[%s6191_s8 + $0x140] sm:$0xff] }
  0x24   : > { %302 = vst [vmem:[%s6196_s9 + $0xb0] sm:$0xff] %v301_v22  ;;  %304 = vst [vmem:[%s6196_s9 + $0xb8] sm:$0xff] %v303_v23  ;;  %v307_v25 = vld [vmem:[%s6191_s8 + $0x148] sm:$0xff]  ;;  %v309_v26 = vld [vmem:[%s6191_s8 + $0x150] sm:$0xff] }
  0x25   : > { %306 = vst [vmem:[%s6196_s9 + $0xc0] sm:$0xff] %v305_v24  ;;  %308 = vst [vmem:[%s6196_s9 + $0xc8] sm:$0xff] %v307_v25  ;;  %v311_v27 = vld [vmem:[%s6191_s8 + $0x158] sm:$0xff]  ;;  %v313_v28 = vld [vmem:[%s6191_s8 + $0x160] sm:$0xff] }
  0x26   : > { %310 = vst [vmem:[%s6196_s9 + $0xd0] sm:$0xff] %v309_v26  ;;  %v315_v29 = vld [vmem:[%s6191_s8 + $0x168] sm:$0xff]  ;;  %312 = vst [vmem:[%s6196_s9 + $0xd8] sm:$0xff] %v311_v27  ;;  %v317_v30 = vld [vmem:[%s6191_s8 + $0x170] sm:$0xff] }
  0x27   : > { %314 = vst [vmem:[%s6196_s9 + $0xe0] sm:$0xff] %v313_v28  ;;  %316 = vst [vmem:[%s6196_s9 + $0xe8] sm:$0xff] %v315_v29  ;;  %v319_v31 = vld [vmem:[%s6191_s8 + $0x178] sm:$0xff] }
  0x28   : > { %318 = vst [vmem:[%s6196_s9 + $0xf0] sm:$0xff] %v317_v30  ;;  %320 = vst [vmem:[%s6196_s9 + $0xf8] sm:$0xff] %v319_v31 }
  0x29 PF: > { %326 = sbr.rel (!%p6168_p3) target bundleno = 64 (0x40), region = 62  ;;  %s328_s10 = sand.u32 (%p6168_p3), 1, %s6079_s13  }
  0x2a   : > { %s4813_s11 = sshll.u32 (%p6168_p3), %s6091_s16, 4  ;;  %s4812_s22 = sshll.u32 (%p6168_p3), %s328_s10, 8 }
  0x2b   : > { %s4814_s23 = sshll.u32 (%p6168_p3), %s6095_s17, 6  ;;  %s6272_s21 = scalar_lea.vmem (%p6168_p3), [#allocation6], %s4812_s22 }
  0x2c   : > { %s333_s24 = sadd.s32 (%p6168_p3), %s4814_s23, %s4813_s11 }
  0x2d   : > { %s4815_s25 = sshll.u32 (%p6168_p3), %s333_s24, 3 }
  0x2e   : > { %s6267_s29 = scalar_lea.vmem (%p6168_p3), %s8977_s2, %s4815_s25 }
  0x2f   : > { %v425_v32 = vld [vmem:[%s6267_s29] sm:$0xff] (%p6168_p3)  ;;  %v427_v33 = vld [vmem:[%s6267_s29 + $0x8] sm:$0xff] (%p6168_p3)  ;;  %v429_v34 = vld [vmem:[%s6267_s29 + $0x10] sm:$0xff] (%p6168_p3) }
  0x30   : > { %426 = vst [vmem:[%s6272_s21] sm:$0xff] %v425_v32  ;;  %428 = vst [vmem:[%s6272_s21 + $0x8] sm:$0xff] %v427_v33  ;;  %v431_v35 = vld [vmem:[%s6267_s29 + $0x18] sm:$0xff]  ;;  %v433_v36 = vld [vmem:[%s6267_s29 + $0x20] sm:$0xff] }
  0x31   : > { %430 = vst [vmem:[%s6272_s21 + $0x10] sm:$0xff] %v429_v34  ;;  %v435_v37 = vld [vmem:[%s6267_s29 + $0x28] sm:$0xff]  ;;  %432 = vst [vmem:[%s6272_s21 + $0x18] sm:$0xff] %v431_v35  ;;  %v437_v38 = vld [vmem:[%s6267_s29 + $0x30] sm:$0xff] }
  0x32   : > { %434 = vst [vmem:[%s6272_s21 + $0x20] sm:$0xff] %v433_v36  ;;  %436 = vst [vmem:[%s6272_s21 + $0x28] sm:$0xff] %v435_v37  ;;  %v439_v39 = vld [vmem:[%s6267_s29 + $0x38] sm:$0xff]  ;;  %v441_v40 = vld [vmem:[%s6267_s29 + $0x40] sm:$0xff] }
  0x33   : > { %438 = vst [vmem:[%s6272_s21 + $0x30] sm:$0xff] %v437_v38  ;;  %440 = vst [vmem:[%s6272_s21 + $0x38] sm:$0xff] %v439_v39  ;;  %v443_v41 = vld [vmem:[%s6267_s29 + $0x48] sm:$0xff]  ;;  %v445_v42 = vld [vmem:[%s6267_s29 + $0x50] sm:$0xff] }
  0x34   : > { %442 = vst [vmem:[%s6272_s21 + $0x40] sm:$0xff] %v441_v40  ;;  %v447_v43 = vld [vmem:[%s6267_s29 + $0x58] sm:$0xff]  ;;  %444 = vst [vmem:[%s6272_s21 + $0x48] sm:$0xff] %v443_v41  ;;  %v449_v44 = vld [vmem:[%s6267_s29 + $0x60] sm:$0xff] }
  0x35   : > { %446 = vst [vmem:[%s6272_s21 + $0x50] sm:$0xff] %v445_v42  ;;  %448 = vst [vmem:[%s6272_s21 + $0x58] sm:$0xff] %v447_v43  ;;  %v451_v45 = vld [vmem:[%s6267_s29 + $0x68] sm:$0xff]  ;;  %v453_v46 = vld [vmem:[%s6267_s29 + $0x70] sm:$0xff] }
  0x36   : > { %450 = vst [vmem:[%s6272_s21 + $0x60] sm:$0xff] %v449_v44  ;;  %452 = vst [vmem:[%s6272_s21 + $0x68] sm:$0xff] %v451_v45  ;;  %v455_v47 = vld [vmem:[%s6267_s29 + $0x78] sm:$0xff]  ;;  %v457_v48 = vld [vmem:[%s6267_s29 + $0x100] sm:$0xff] }
  0x37   : > { %454 = vst [vmem:[%s6272_s21 + $0x70] sm:$0xff] %v453_v46  ;;  %v459_v49 = vld [vmem:[%s6267_s29 + $0x108] sm:$0xff]  ;;  %456 = vst [vmem:[%s6272_s21 + $0x78] sm:$0xff] %v455_v47  ;;  %v461_v50 = vld [vmem:[%s6267_s29 + $0x110] sm:$0xff] }
  0x38   : > { %458 = vst [vmem:[%s6272_s21 + $0x80] sm:$0xff] %v457_v48  ;;  %460 = vst [vmem:[%s6272_s21 + $0x88] sm:$0xff] %v459_v49  ;;  %v463_v51 = vld [vmem:[%s6267_s29 + $0x118] sm:$0xff]  ;;  %v465_v52 = vld [vmem:[%s6267_s29 + $0x120] sm:$0xff] }
  0x39   : > { %462 = vst [vmem:[%s6272_s21 + $0x90] sm:$0xff] %v461_v50  ;;  %464 = vst [vmem:[%s6272_s21 + $0x98] sm:$0xff] %v463_v51  ;;  %v467_v53 = vld [vmem:[%s6267_s29 + $0x128] sm:$0xff]  ;;  %v469_v54 = vld [vmem:[%s6267_s29 + $0x130] sm:$0xff] }
  0x3a   : > { %466 = vst [vmem:[%s6272_s21 + $0xa0] sm:$0xff] %v465_v52  ;;  %v471_v55 = vld [vmem:[%s6267_s29 + $0x138] sm:$0xff]  ;;  %468 = vst [vmem:[%s6272_s21 + $0xa8] sm:$0xff] %v467_v53  ;;  %v473_v56 = vld [vmem:[%s6267_s29 + $0x140] sm:$0xff] }
  0x3b   : > { %470 = vst [vmem:[%s6272_s21 + $0xb0] sm:$0xff] %v469_v54  ;;  %472 = vst [vmem:[%s6272_s21 + $0xb8] sm:$0xff] %v471_v55  ;;  %v475_v57 = vld [vmem:[%s6267_s29 + $0x148] sm:$0xff]  ;;  %v477_v58 = vld [vmem:[%s6267_s29 + $0x150] sm:$0xff] }
  0x3c   : > { %474 = vst [vmem:[%s6272_s21 + $0xc0] sm:$0xff] %v473_v56  ;;  %476 = vst [vmem:[%s6272_s21 + $0xc8] sm:$0xff] %v475_v57  ;;  %v479_v59 = vld [vmem:[%s6267_s29 + $0x158] sm:$0xff]  ;;  %v481_v60 = vld [vmem:[%s6267_s29 + $0x160] sm:$0xff] }
  0x3d   : > { %478 = vst [vmem:[%s6272_s21 + $0xd0] sm:$0xff] %v477_v58  ;;  %v483_v61 = vld [vmem:[%s6267_s29 + $0x168] sm:$0xff]  ;;  %480 = vst [vmem:[%s6272_s21 + $0xd8] sm:$0xff] %v479_v59  ;;  %v485_v62 = vld [vmem:[%s6267_s29 + $0x170] sm:$0xff] }
  0x3e   : > { %482 = vst [vmem:[%s6272_s21 + $0xe0] sm:$0xff] %v481_v60  ;;  %484 = vst [vmem:[%s6272_s21 + $0xe8] sm:$0xff] %v483_v61  ;;  %v487_v63 = vld [vmem:[%s6267_s29 + $0x178] sm:$0xff] }
  0x3f   : > { %486 = vst [vmem:[%s6272_s21 + $0xf0] sm:$0xff] %v485_v62  ;;  %488 = vst [vmem:[%s6272_s21 + $0xf8] sm:$0xff] %v487_v63 }
  0x40 PF: > { %p4816_p7 = scmp.ge.s32.totalorder %s6099_s18, 1  ;;  %p493_p8 = scmp.lt.s32.totalorder %s6099_s18, 5 }
  0x42   : > { %p494_p9 = pnand %p4816_p7, %p493_p8 }
  0x44   : > { %497 = sbr.rel (%p494_p9) target bundleno = 1411 (0x583), region = 100 }
  0x4b   : > { %s500_s30 = sand.u32 1, %s6075_s12   ;;  %p539_p10 = scmp.lt.s32.totalorder %s6087_s15, 1 }
  0x4c   : > { %s4817_s4 = sshll.u32 %s500_s30, 8  ;;  %p4823_p11 = scmp.ne.s32.totalorder %s6083_s14, 0 }
  0x4d   : > { %s9521_s15 = smov (!%p539_p10, %s6087_s15), 1  ;;  %s6350_s22 = scalar_lea.vmem [#allocation5], %s4817_s4  ;;  %vm555_vm0 = vcmask (!%p4823_p11), 7168   ;;  %vm684_vm1 = vcmask (!%p4823_p11), 15360   ;;  %v6101_v0 = vmov (!%p4823_p11), -inf   ;;  %v6102_v1 = vmov (!%p4823_p11), 0.0  }
  0x4e   : > { %s4923_s5 = sshll.u32 %s9521_s15, 9  ;;  %s6352_s23 = scalar_lea.vmem [#allocation6], %s4817_s4  ;;  %556 = vst.msk [vmem:[#allocation2] sm:$0xff] (!%p4823_p11), %vm555_vm0, %v6101_v0  ;;  %557 = vst.msk [vmem:[#allocation2 + $0x8] sm:$0xff] (!%p4823_p11), %vm555_vm0, %v6101_v0 }
  0x4f   : > { %s6343_s8 = scalar_lea.vmem %s8975_s0, %s4923_s5  ;;  %s6348_s11 = scalar_lea.vmem %s8978_s3, %s4923_s5  ;;  %558 = vst.msk [vmem:[#allocation2 + $0x10] sm:$0xff] (!%p4823_p11), %vm555_vm0, %v6101_v0  ;;  %559 = vst.msk [vmem:[#allocation2 + $0x18] sm:$0xff] (!%p4823_p11), %vm555_vm0, %v6101_v0 }
  0x50   : > { %554 = sbr.rel (%p4823_p11) target bundleno = 174 (0xae), region = 112  ;;  %560 = vst.msk [vmem:[#allocation2 + $0x20] sm:$0xff] (!%p4823_p11), %vm555_vm0, %v6101_v0  ;;  %561 = vst.msk [vmem:[#allocation2 + $0x28] sm:$0xff] (!%p4823_p11), %vm555_vm0, %v6101_v0 }
  0x51   : > { %562 = vst.msk [vmem:[#allocation2 + $0x30] sm:$0xff] (!%p4823_p11), %vm555_vm0, %v6101_v0  ;;  %563 = vst.msk [vmem:[#allocation2 + $0x38] sm:$0xff] (!%p4823_p11), %vm555_vm0, %v6101_v0 }
  0x52   : > { %564 = vst.msk [vmem:[#allocation2 + $0x40] sm:$0xff] (!%p4823_p11), %vm555_vm0, %v6101_v0  ;;  %565 = vst.msk [vmem:[#allocation2 + $0x48] sm:$0xff] (!%p4823_p11), %vm555_vm0, %v6101_v0 }
  0x53   : > { %566 = vst.msk [vmem:[#allocation2 + $0x50] sm:$0xff] (!%p4823_p11), %vm555_vm0, %v6101_v0  ;;  %567 = vst.msk [vmem:[#allocation2 + $0x58] sm:$0xff] (!%p4823_p11), %vm555_vm0, %v6101_v0 }
  0x54   : > { %568 = vst.msk [vmem:[#allocation2 + $0x60] sm:$0xff] (!%p4823_p11), %vm555_vm0, %v6101_v0  ;;  %569 = vst.msk [vmem:[#allocation2 + $0x68] sm:$0xff] (!%p4823_p11), %vm555_vm0, %v6101_v0 }
  0x55   : > { %570 = vst.msk [vmem:[#allocation2 + $0x70] sm:$0xff] (!%p4823_p11), %vm555_vm0, %v6101_v0  ;;  %571 = vst.msk [vmem:[#allocation2 + $0x78] sm:$0xff] (!%p4823_p11), %vm555_vm0, %v6101_v0 }
  0x56   : > { %572 = vst.msk [vmem:[#allocation2 + $0x80] sm:$0xff] (!%p4823_p11), %vm555_vm0, %v6101_v0  ;;  %573 = vst.msk [vmem:[#allocation2 + $0x88] sm:$0xff] (!%p4823_p11), %vm555_vm0, %v6101_v0 }
  0x57   : > { %574 = vst.msk [vmem:[#allocation2 + $0x90] sm:$0xff] %vm555_vm0, %v6101_v0  ;;  %575 = vst.msk [vmem:[#allocation2 + $0x98] sm:$0xff] %vm555_vm0, %v6101_v0 }
  0x58   : > { %576 = vst.msk [vmem:[#allocation2 + $0xa0] sm:$0xff] %vm555_vm0, %v6101_v0  ;;  %577 = vst.msk [vmem:[#allocation2 + $0xa8] sm:$0xff] %vm555_vm0, %v6101_v0 }
  0x59   : > { %578 = vst.msk [vmem:[#allocation2 + $0xb0] sm:$0xff] %vm555_vm0, %v6101_v0  ;;  %579 = vst.msk [vmem:[#allocation2 + $0xb8] sm:$0xff] %vm555_vm0, %v6101_v0 }
  0x5a   : > { %580 = vst.msk [vmem:[#allocation2 + $0xc0] sm:$0xff] %vm555_vm0, %v6101_v0  ;;  %581 = vst.msk [vmem:[#allocation2 + $0xc8] sm:$0xff] %vm555_vm0, %v6101_v0 }
  0x5b   : > { %582 = vst.msk [vmem:[#allocation2 + $0xd0] sm:$0xff] %vm555_vm0, %v6101_v0  ;;  %583 = vst.msk [vmem:[#allocation2 + $0xd8] sm:$0xff] %vm555_vm0, %v6101_v0 }
  0x5c   : > { %584 = vst.msk [vmem:[#allocation2 + $0xe0] sm:$0xff] %vm555_vm0, %v6101_v0  ;;  %585 = vst.msk [vmem:[#allocation2 + $0xe8] sm:$0xff] %vm555_vm0, %v6101_v0 }
  0x5d   : > { %586 = vst.msk [vmem:[#allocation2 + $0xf0] sm:$0xff] %vm555_vm0, %v6101_v0  ;;  %587 = vst.msk [vmem:[#allocation2 + $0xf8] sm:$0xff] %vm555_vm0, %v6101_v0 }
  0x5e   : > { %588 = vst.msk [vmem:[#allocation2 + $0x100] sm:$0xff] %vm555_vm0, %v6101_v0  ;;  %589 = vst.msk [vmem:[#allocation2 + $0x108] sm:$0xff] %vm555_vm0, %v6101_v0 }
  0x5f   : > { %590 = vst.msk [vmem:[#allocation2 + $0x110] sm:$0xff] %vm555_vm0, %v6101_v0  ;;  %591 = vst.msk [vmem:[#allocation2 + $0x118] sm:$0xff] %vm555_vm0, %v6101_v0 }
  0x60   : > { %592 = vst.msk [vmem:[#allocation2 + $0x120] sm:$0xff] %vm555_vm0, %v6101_v0  ;;  %593 = vst.msk [vmem:[#allocation2 + $0x128] sm:$0xff] %vm555_vm0, %v6101_v0 }
  0x61   : > { %594 = vst.msk [vmem:[#allocation2 + $0x130] sm:$0xff] %vm555_vm0, %v6101_v0  ;;  %595 = vst.msk [vmem:[#allocation2 + $0x138] sm:$0xff] %vm555_vm0, %v6101_v0 }
  0x62   : > { %596 = vst.msk [vmem:[#allocation2 + $0x140] sm:$0xff] %vm555_vm0, %v6101_v0  ;;  %597 = vst.msk [vmem:[#allocation2 + $0x148] sm:$0xff] %vm555_vm0, %v6101_v0 }
  0x63   : > { %598 = vst.msk [vmem:[#allocation2 + $0x150] sm:$0xff] %vm555_vm0, %v6101_v0  ;;  %599 = vst.msk [vmem:[#allocation2 + $0x158] sm:$0xff] %vm555_vm0, %v6101_v0 }
  0x64   : > { %600 = vst.msk [vmem:[#allocation2 + $0x160] sm:$0xff] %vm555_vm0, %v6101_v0  ;;  %601 = vst.msk [vmem:[#allocation2 + $0x168] sm:$0xff] %vm555_vm0, %v6101_v0 }
  0x65   : > { %602 = vst.msk [vmem:[#allocation2 + $0x170] sm:$0xff] %vm555_vm0, %v6101_v0  ;;  %603 = vst.msk [vmem:[#allocation2 + $0x178] sm:$0xff] %vm555_vm0, %v6101_v0 }
  0x66   : > { %604 = vst.msk [vmem:[#allocation2 + $0x180] sm:$0xff] %vm555_vm0, %v6101_v0  ;;  %605 = vst.msk [vmem:[#allocation2 + $0x188] sm:$0xff] %vm555_vm0, %v6101_v0 }
  0x67   : > { %606 = vst.msk [vmem:[#allocation2 + $0x190] sm:$0xff] %vm555_vm0, %v6101_v0  ;;  %607 = vst.msk [vmem:[#allocation2 + $0x198] sm:$0xff] %vm555_vm0, %v6101_v0 }
  0x68   : > { %608 = vst.msk [vmem:[#allocation2 + $0x1a0] sm:$0xff] %vm555_vm0, %v6101_v0  ;;  %609 = vst.msk [vmem:[#allocation2 + $0x1a8] sm:$0xff] %vm555_vm0, %v6101_v0 }
  0x69   : > { %610 = vst.msk [vmem:[#allocation2 + $0x1b0] sm:$0xff] %vm555_vm0, %v6101_v0  ;;  %611 = vst.msk [vmem:[#allocation2 + $0x1b8] sm:$0xff] %vm555_vm0, %v6101_v0 }
  0x6a   : > { %612 = vst.msk [vmem:[#allocation2 + $0x1c0] sm:$0xff] %vm555_vm0, %v6101_v0  ;;  %613 = vst.msk [vmem:[#allocation2 + $0x1c8] sm:$0xff] %vm555_vm0, %v6101_v0 }
  0x6b   : > { %614 = vst.msk [vmem:[#allocation2 + $0x1d0] sm:$0xff] %vm555_vm0, %v6101_v0  ;;  %615 = vst.msk [vmem:[#allocation2 + $0x1d8] sm:$0xff] %vm555_vm0, %v6101_v0 }
  0x6c   : > { %616 = vst.msk [vmem:[#allocation2 + $0x1e0] sm:$0xff] %vm555_vm0, %v6101_v0  ;;  %617 = vst.msk [vmem:[#allocation2 + $0x1e8] sm:$0xff] %vm555_vm0, %v6101_v0 }
  0x6d   : > { %618 = vst.msk [vmem:[#allocation2 + $0x1f0] sm:$0xff] %vm555_vm0, %v6101_v0  ;;  %619 = vst.msk [vmem:[#allocation2 + $0x1f8] sm:$0xff] %vm555_vm0, %v6101_v0 }
  0x6e   : > { %620 = vst.msk [vmem:[#allocation3] sm:$0xff] %vm555_vm0, %v6102_v1  ;;  %621 = vst.msk [vmem:[#allocation3 + $0x8] sm:$0xff] %vm555_vm0, %v6102_v1 }
  0x6f   : > { %622 = vst.msk [vmem:[#allocation3 + $0x10] sm:$0xff] %vm555_vm0, %v6102_v1  ;;  %623 = vst.msk [vmem:[#allocation3 + $0x18] sm:$0xff] %vm555_vm0, %v6102_v1 }
  0x70   : > { %624 = vst.msk [vmem:[#allocation3 + $0x20] sm:$0xff] %vm555_vm0, %v6102_v1  ;;  %625 = vst.msk [vmem:[#allocation3 + $0x28] sm:$0xff] %vm555_vm0, %v6102_v1 }
  0x71   : > { %626 = vst.msk [vmem:[#allocation3 + $0x30] sm:$0xff] %vm555_vm0, %v6102_v1  ;;  %627 = vst.msk [vmem:[#allocation3 + $0x38] sm:$0xff] %vm555_vm0, %v6102_v1 }
  0x72   : > { %628 = vst.msk [vmem:[#allocation3 + $0x40] sm:$0xff] %vm555_vm0, %v6102_v1  ;;  %629 = vst.msk [vmem:[#allocation3 + $0x48] sm:$0xff] %vm555_vm0, %v6102_v1 }
  0x73   : > { %630 = vst.msk [vmem:[#allocation3 + $0x50] sm:$0xff] %vm555_vm0, %v6102_v1  ;;  %631 = vst.msk [vmem:[#allocation3 + $0x58] sm:$0xff] %vm555_vm0, %v6102_v1 }
  0x74   : > { %632 = vst.msk [vmem:[#allocation3 + $0x60] sm:$0xff] %vm555_vm0, %v6102_v1  ;;  %633 = vst.msk [vmem:[#allocation3 + $0x68] sm:$0xff] %vm555_vm0, %v6102_v1 }
  0x75   : > { %634 = vst.msk [vmem:[#allocation3 + $0x70] sm:$0xff] %vm555_vm0, %v6102_v1  ;;  %635 = vst.msk [vmem:[#allocation3 + $0x78] sm:$0xff] %vm555_vm0, %v6102_v1 }
  0x76   : > { %636 = vst.msk [vmem:[#allocation3 + $0x80] sm:$0xff] %vm555_vm0, %v6102_v1  ;;  %637 = vst.msk [vmem:[#allocation3 + $0x88] sm:$0xff] %vm555_vm0, %v6102_v1 }
  0x77   : > { %638 = vst.msk [vmem:[#allocation3 + $0x90] sm:$0xff] %vm555_vm0, %v6102_v1  ;;  %639 = vst.msk [vmem:[#allocation3 + $0x98] sm:$0xff] %vm555_vm0, %v6102_v1 }
  0x78   : > { %640 = vst.msk [vmem:[#allocation3 + $0xa0] sm:$0xff] %vm555_vm0, %v6102_v1  ;;  %641 = vst.msk [vmem:[#allocation3 + $0xa8] sm:$0xff] %vm555_vm0, %v6102_v1 }
  0x79   : > { %642 = vst.msk [vmem:[#allocation3 + $0xb0] sm:$0xff] %vm555_vm0, %v6102_v1  ;;  %643 = vst.msk [vmem:[#allocation3 + $0xb8] sm:$0xff] %vm555_vm0, %v6102_v1 }
  0x7a   : > { %644 = vst.msk [vmem:[#allocation3 + $0xc0] sm:$0xff] %vm555_vm0, %v6102_v1  ;;  %645 = vst.msk [vmem:[#allocation3 + $0xc8] sm:$0xff] %vm555_vm0, %v6102_v1 }
  0x7b   : > { %646 = vst.msk [vmem:[#allocation3 + $0xd0] sm:$0xff] %vm555_vm0, %v6102_v1  ;;  %647 = vst.msk [vmem:[#allocation3 + $0xd8] sm:$0xff] %vm555_vm0, %v6102_v1 }
  0x7c   : > { %648 = vst.msk [vmem:[#allocation3 + $0xe0] sm:$0xff] %vm555_vm0, %v6102_v1  ;;  %649 = vst.msk [vmem:[#allocation3 + $0xe8] sm:$0xff] %vm555_vm0, %v6102_v1 }
  0x7d   : > { %650 = vst.msk [vmem:[#allocation3 + $0xf0] sm:$0xff] %vm555_vm0, %v6102_v1  ;;  %651 = vst.msk [vmem:[#allocation3 + $0xf8] sm:$0xff] %vm555_vm0, %v6102_v1 }
  0x7e   : > { %652 = vst.msk [vmem:[#allocation3 + $0x100] sm:$0xff] %vm555_vm0, %v6102_v1  ;;  %653 = vst.msk [vmem:[#allocation3 + $0x108] sm:$0xff] %vm555_vm0, %v6102_v1 }
  0x7f   : > { %654 = vst.msk [vmem:[#allocation3 + $0x110] sm:$0xff] %vm555_vm0, %v6102_v1  ;;  %655 = vst.msk [vmem:[#allocation3 + $0x118] sm:$0xff] %vm555_vm0, %v6102_v1 }
  0x80   : > { %656 = vst.msk [vmem:[#allocation3 + $0x120] sm:$0xff] %vm555_vm0, %v6102_v1  ;;  %657 = vst.msk [vmem:[#allocation3 + $0x128] sm:$0xff] %vm555_vm0, %v6102_v1 }
  0x81   : > { %658 = vst.msk [vmem:[#allocation3 + $0x130] sm:$0xff] %vm555_vm0, %v6102_v1  ;;  %659 = vst.msk [vmem:[#allocation3 + $0x138] sm:$0xff] %vm555_vm0, %v6102_v1 }
  0x82   : > { %660 = vst.msk [vmem:[#allocation3 + $0x140] sm:$0xff] %vm555_vm0, %v6102_v1  ;;  %661 = vst.msk [vmem:[#allocation3 + $0x148] sm:$0xff] %vm555_vm0, %v6102_v1 }
  0x83   : > { %662 = vst.msk [vmem:[#allocation3 + $0x150] sm:$0xff] %vm555_vm0, %v6102_v1  ;;  %663 = vst.msk [vmem:[#allocation3 + $0x158] sm:$0xff] %vm555_vm0, %v6102_v1 }
  0x84   : > { %664 = vst.msk [vmem:[#allocation3 + $0x160] sm:$0xff] %vm555_vm0, %v6102_v1  ;;  %665 = vst.msk [vmem:[#allocation3 + $0x168] sm:$0xff] %vm555_vm0, %v6102_v1 }
  0x85   : > { %666 = vst.msk [vmem:[#allocation3 + $0x170] sm:$0xff] %vm555_vm0, %v6102_v1  ;;  %667 = vst.msk [vmem:[#allocation3 + $0x178] sm:$0xff] %vm555_vm0, %v6102_v1 }
  0x86   : > { %668 = vst.msk [vmem:[#allocation3 + $0x180] sm:$0xff] %vm555_vm0, %v6102_v1  ;;  %669 = vst.msk [vmem:[#allocation3 + $0x188] sm:$0xff] %vm555_vm0, %v6102_v1 }
  0x87   : > { %670 = vst.msk [vmem:[#allocation3 + $0x190] sm:$0xff] %vm555_vm0, %v6102_v1  ;;  %671 = vst.msk [vmem:[#allocation3 + $0x198] sm:$0xff] %vm555_vm0, %v6102_v1 }
  0x88   : > { %672 = vst.msk [vmem:[#allocation3 + $0x1a0] sm:$0xff] %vm555_vm0, %v6102_v1  ;;  %673 = vst.msk [vmem:[#allocation3 + $0x1a8] sm:$0xff] %vm555_vm0, %v6102_v1 }
  0x89   : > { %674 = vst.msk [vmem:[#allocation3 + $0x1b0] sm:$0xff] %vm555_vm0, %v6102_v1  ;;  %675 = vst.msk [vmem:[#allocation3 + $0x1b8] sm:$0xff] %vm555_vm0, %v6102_v1 }
  0x8a   : > { %676 = vst.msk [vmem:[#allocation3 + $0x1c0] sm:$0xff] %vm555_vm0, %v6102_v1  ;;  %677 = vst.msk [vmem:[#allocation3 + $0x1c8] sm:$0xff] %vm555_vm0, %v6102_v1 }
  0x8b   : > { %678 = vst.msk [vmem:[#allocation3 + $0x1d0] sm:$0xff] %vm555_vm0, %v6102_v1  ;;  %679 = vst.msk [vmem:[#allocation3 + $0x1d8] sm:$0xff] %vm555_vm0, %v6102_v1 }
  0x8c   : > { %680 = vst.msk [vmem:[#allocation3 + $0x1e0] sm:$0xff] %vm555_vm0, %v6102_v1  ;;  %681 = vst.msk [vmem:[#allocation3 + $0x1e8] sm:$0xff] %vm555_vm0, %v6102_v1 }
  0x8d   : > { %682 = vst.msk [vmem:[#allocation3 + $0x1f0] sm:$0xff] %vm555_vm0, %v6102_v1  ;;  %683 = vst.msk [vmem:[#allocation3 + $0x1f8] sm:$0xff] %vm555_vm0, %v6102_v1 }
  0x8e   : > { %685 = vst.msk [vmem:[#allocation4] sm:$0xff] %vm684_vm1, %v6102_v1  ;;  %686 = vst.msk [vmem:[#allocation4 + $0x8] sm:$0xff] %vm684_vm1, %v6102_v1 }
  0x8f   : > { %687 = vst.msk [vmem:[#allocation4 + $0x10] sm:$0xff] %vm684_vm1, %v6102_v1  ;;  %688 = vst.msk [vmem:[#allocation4 + $0x18] sm:$0xff] %vm684_vm1, %v6102_v1 }
  0x90   : > { %689 = vst.msk [vmem:[#allocation4 + $0x20] sm:$0xff] %vm684_vm1, %v6102_v1  ;;  %690 = vst.msk [vmem:[#allocation4 + $0x28] sm:$0xff] %vm684_vm1, %v6102_v1 }
  0x91   : > { %691 = vst.msk [vmem:[#allocation4 + $0x30] sm:$0xff] %vm684_vm1, %v6102_v1  ;;  %692 = vst.msk [vmem:[#allocation4 + $0x38] sm:$0xff] %vm684_vm1, %v6102_v1 }
  0x92   : > { %693 = vst.msk [vmem:[#allocation4 + $0x40] sm:$0xff] %vm684_vm1, %v6102_v1  ;;  %694 = vst.msk [vmem:[#allocation4 + $0x48] sm:$0xff] %vm684_vm1, %v6102_v1 }
  0x93   : > { %695 = vst.msk [vmem:[#allocation4 + $0x50] sm:$0xff] %vm684_vm1, %v6102_v1  ;;  %696 = vst.msk [vmem:[#allocation4 + $0x58] sm:$0xff] %vm684_vm1, %v6102_v1 }
  0x94   : > { %697 = vst.msk [vmem:[#allocation4 + $0x60] sm:$0xff] %vm684_vm1, %v6102_v1  ;;  %698 = vst.msk [vmem:[#allocation4 + $0x68] sm:$0xff] %vm684_vm1, %v6102_v1 }
  0x95   : > { %699 = vst.msk [vmem:[#allocation4 + $0x70] sm:$0xff] %vm684_vm1, %v6102_v1  ;;  %700 = vst.msk [vmem:[#allocation4 + $0x78] sm:$0xff] %vm684_vm1, %v6102_v1 }
  0x96   : > { %701 = vst.msk [vmem:[#allocation4 + $0x80] sm:$0xff] %vm684_vm1, %v6102_v1  ;;  %702 = vst.msk [vmem:[#allocation4 + $0x88] sm:$0xff] %vm684_vm1, %v6102_v1 }
  0x97   : > { %703 = vst.msk [vmem:[#allocation4 + $0x90] sm:$0xff] %vm684_vm1, %v6102_v1  ;;  %704 = vst.msk [vmem:[#allocation4 + $0x98] sm:$0xff] %vm684_vm1, %v6102_v1 }
  0x98   : > { %705 = vst.msk [vmem:[#allocation4 + $0xa0] sm:$0xff] %vm684_vm1, %v6102_v1  ;;  %706 = vst.msk [vmem:[#allocation4 + $0xa8] sm:$0xff] %vm684_vm1, %v6102_v1 }
  0x99   : > { %707 = vst.msk [vmem:[#allocation4 + $0xb0] sm:$0xff] %vm684_vm1, %v6102_v1  ;;  %708 = vst.msk [vmem:[#allocation4 + $0xb8] sm:$0xff] %vm684_vm1, %v6102_v1 }
  0x9a   : > { %709 = vst.msk [vmem:[#allocation4 + $0xc0] sm:$0xff] %vm684_vm1, %v6102_v1  ;;  %710 = vst.msk [vmem:[#allocation4 + $0xc8] sm:$0xff] %vm684_vm1, %v6102_v1 }
  0x9b   : > { %711 = vst.msk [vmem:[#allocation4 + $0xd0] sm:$0xff] %vm684_vm1, %v6102_v1  ;;  %712 = vst.msk [vmem:[#allocation4 + $0xd8] sm:$0xff] %vm684_vm1, %v6102_v1 }
  0x9c   : > { %713 = vst.msk [vmem:[#allocation4 + $0xe0] sm:$0xff] %vm684_vm1, %v6102_v1  ;;  %714 = vst.msk [vmem:[#allocation4 + $0xe8] sm:$0xff] %vm684_vm1, %v6102_v1 }
  0x9d   : > { %715 = vst.msk [vmem:[#allocation4 + $0xf0] sm:$0xff] %vm684_vm1, %v6102_v1  ;;  %716 = vst.msk [vmem:[#allocation4 + $0xf8] sm:$0xff] %vm684_vm1, %v6102_v1 }
  0x9e   : > { %717 = vst.msk [vmem:[#allocation4 + $0x100] sm:$0xff] %vm684_vm1, %v6102_v1  ;;  %718 = vst.msk [vmem:[#allocation4 + $0x108] sm:$0xff] %vm684_vm1, %v6102_v1 }
  0x9f   : > { %719 = vst.msk [vmem:[#allocation4 + $0x110] sm:$0xff] %vm684_vm1, %v6102_v1  ;;  %720 = vst.msk [vmem:[#allocation4 + $0x118] sm:$0xff] %vm684_vm1, %v6102_v1 }
  0xa0   : > { %721 = vst.msk [vmem:[#allocation4 + $0x120] sm:$0xff] %vm684_vm1, %v6102_v1  ;;  %722 = vst.msk [vmem:[#allocation4 + $0x128] sm:$0xff] %vm684_vm1, %v6102_v1 }
  0xa1   : > { %723 = vst.msk [vmem:[#allocation4 + $0x130] sm:$0xff] %vm684_vm1, %v6102_v1  ;;  %724 = vst.msk [vmem:[#allocation4 + $0x138] sm:$0xff] %vm684_vm1, %v6102_v1 }
  0xa2   : > { %725 = vst.msk [vmem:[#allocation4 + $0x140] sm:$0xff] %vm684_vm1, %v6102_v1  ;;  %726 = vst.msk [vmem:[#allocation4 + $0x148] sm:$0xff] %vm684_vm1, %v6102_v1 }
  0xa3   : > { %727 = vst.msk [vmem:[#allocation4 + $0x150] sm:$0xff] %vm684_vm1, %v6102_v1  ;;  %728 = vst.msk [vmem:[#allocation4 + $0x158] sm:$0xff] %vm684_vm1, %v6102_v1 }
  0xa4   : > { %729 = vst.msk [vmem:[#allocation4 + $0x160] sm:$0xff] %vm684_vm1, %v6102_v1  ;;  %730 = vst.msk [vmem:[#allocation4 + $0x168] sm:$0xff] %vm684_vm1, %v6102_v1 }
  0xa5   : > { %731 = vst.msk [vmem:[#allocation4 + $0x170] sm:$0xff] %vm684_vm1, %v6102_v1  ;;  %732 = vst.msk [vmem:[#allocation4 + $0x178] sm:$0xff] %vm684_vm1, %v6102_v1 }
  0xa6   : > { %733 = vst.msk [vmem:[#allocation4 + $0x180] sm:$0xff] %vm684_vm1, %v6102_v1  ;;  %734 = vst.msk [vmem:[#allocation4 + $0x188] sm:$0xff] %vm684_vm1, %v6102_v1 }
  0xa7   : > { %735 = vst.msk [vmem:[#allocation4 + $0x190] sm:$0xff] %vm684_vm1, %v6102_v1  ;;  %736 = vst.msk [vmem:[#allocation4 + $0x198] sm:$0xff] %vm684_vm1, %v6102_v1 }
  0xa8   : > { %737 = vst.msk [vmem:[#allocation4 + $0x1a0] sm:$0xff] %vm684_vm1, %v6102_v1  ;;  %738 = vst.msk [vmem:[#allocation4 + $0x1a8] sm:$0xff] %vm684_vm1, %v6102_v1 }
  0xa9   : > { %739 = vst.msk [vmem:[#allocation4 + $0x1b0] sm:$0xff] %vm684_vm1, %v6102_v1  ;;  %740 = vst.msk [vmem:[#allocation4 + $0x1b8] sm:$0xff] %vm684_vm1, %v6102_v1 }
  0xaa   : > { %741 = vst.msk [vmem:[#allocation4 + $0x1c0] sm:$0xff] %vm684_vm1, %v6102_v1  ;;  %742 = vst.msk [vmem:[#allocation4 + $0x1c8] sm:$0xff] %vm684_vm1, %v6102_v1 }
  0xab   : > { %743 = vst.msk [vmem:[#allocation4 + $0x1d0] sm:$0xff] %vm684_vm1, %v6102_v1  ;;  %744 = vst.msk [vmem:[#allocation4 + $0x1d8] sm:$0xff] %vm684_vm1, %v6102_v1 }
  0xac   : > { %745 = vst.msk [vmem:[#allocation4 + $0x1e0] sm:$0xff] %vm684_vm1, %v6102_v1  ;;  %746 = vst.msk [vmem:[#allocation4 + $0x1e8] sm:$0xff] %vm684_vm1, %v6102_v1 }
  0xad   : > { %747 = vst.msk [vmem:[#allocation4 + $0x1f0] sm:$0xff] %vm684_vm1, %v6102_v1  ;;  %748 = vst.msk [vmem:[#allocation4 + $0x1f8] sm:$0xff] %vm684_vm1, %v6102_v1 }
  0xae PF: > { %v813_v2 = vld [vmem:[%s6350_s22] sm:$0xff]  ;;  %v814_v3 = vld [vmem:[%s6350_s22 + $0x8] sm:$0xff]  ;;  %vm877_vm2 = vcmask 31744   ;;  %v815_v8 = vld [vmem:[%s6350_s22 + $0x10] sm:$0xff]  ;;  %vm2896_vm4 = vcmask 7168   ;;  %vm3923_vm5 = vcmask 15360  }
  0xaf   : > { %v829_v4 = vld [vmem:[%s6350_s22 + $0x80] sm:$0xff]  ;;  %v5437_v5 = vpack.c.bf16 %v814_v3, %v813_v2  ;;  %vm6744_vm3 = vmpackc.low %vm877_vm2, %vm877_vm2  ;;  %v830_v7 = vld [vmem:[%s6350_s22 + $0x88] sm:$0xff]  ;;  %p4920_p12 = scmp.ne.s32.totalorder %s6083_s14, 1 }
  0xb0   : > { %v5485_v9 = vpack.c.bf16 %v830_v7, %v829_v4  ;;  %v816_v10 = vld [vmem:[%s6350_s22 + $0x18] sm:$0xff]  ;;  %v831_v11 = vld [vmem:[%s6350_s22 + $0x90] sm:$0xff]  ;;  %v817_v15 = vld [vmem:[%s6350_s22 + $0x20] sm:$0xff] }
  0xb1   : > { %v832_v12 = vld [vmem:[%s6350_s22 + $0x98] sm:$0xff]  ;;  %5439 = vmatprep.subr.msk.bf16.mxu0 %vm6744_vm3, %v5437_v5  ;;  %v5443_v13 = vpack.c.bf16 %v816_v10, %v815_v8  ;;  %v818_v16 = vld [vmem:[%s6350_s22 + $0x28] sm:$0xff]  ;;  %v833_v17 = vld [vmem:[%s6350_s22 + $0xa0] sm:$0xff] }
  0xb2   : > { %v5491_v14 = vpack.c.bf16 %v832_v12, %v831_v11  ;;  %5487 = vmatprep.subr.msk.bf16.mxu1 %vm6744_vm3, %v5485_v9  ;;  %5442 = vmatpush3.bf16.xpose.msk.msra.mxu0 %vm6744_vm3, %v5437_v5  ;;  %v834_v18 = vld [vmem:[%s6350_s22 + $0xa8] sm:$0xff]  ;;  %v5449_v19 = vpack.c.bf16 %v818_v16, %v817_v15  ;;  %v749_v21 = vld [vmem:[%s6343_s8] sm:$0xff]  ;;  %v819_v23 = vld [vmem:[%s6350_s22 + $0x30] sm:$0xff] }
  0xb3   : > { %5490 = vmatpush3.bf16.xpose.msk.msra.mxu1 %vm6744_vm3, %v5485_v9  ;;  %5445 = vmatprep.subr.msk.bf16.mxu0 %vm6744_vm3, %v5443_v13  ;;  %v5497_v20 = vpack.c.bf16 %v834_v18, %v833_v17  ;;  %v781_v22 = vld [vmem:[%s6343_s8 + $0x100] sm:$0xff]  ;;  %v820_v24 = vld [vmem:[%s6350_s22 + $0x38] sm:$0xff]  ;;  %v835_v25 = vld [vmem:[%s6350_s22 + $0xb0] sm:$0xff] }
  0xb4   : > { %5493 = vmatprep.subr.msk.bf16.mxu1 %vm6744_vm3, %v5491_v14  ;;  %5149 = vmatprep.mubr.msk.f32.mxu0 %vm877_vm2, %v749_v21  ;;  %v836_v26 = vld [vmem:[%s6350_s22 + $0xb8] sm:$0xff]  ;;  %v5455_v27 = vpack.c.bf16 %v820_v24, %v819_v23  ;;  %v821_v29 = vld [vmem:[%s6350_s22 + $0x40] sm:$0xff]  ;;  %v822_v30 = vld [vmem:[%s6350_s22 + $0x48] sm:$0xff] }
  0xb5   : > { %5229 = vmatprep.mubr.msk.f32.mxu1 %vm877_vm2, %v781_v22  ;;  %v5503_v28 = vpack.c.bf16 %v836_v26, %v835_v25  ;;  %v837_v31 = vld [vmem:[%s6350_s22 + $0xc0] sm:$0xff]  ;;  %v838_v32 = vld [vmem:[%s6350_s22 + $0xc8] sm:$0xff]  ;;  %v5461_v33 = vpack.c.bf16 %v822_v30, %v821_v29  ;;  %v823_v35 = vld [vmem:[%s6350_s22 + $0x50] sm:$0xff] }
  0xb6   : > { %v5509_v34 = vpack.c.bf16 %v838_v32, %v837_v31  ;;  %v824_v36 = vld [vmem:[%s6350_s22 + $0x58] sm:$0xff]  ;;  %v839_v37 = vld [vmem:[%s6350_s22 + $0xd0] sm:$0xff]  ;;  %v825_v41 = vld [vmem:[%s6350_s22 + $0x60] sm:$0xff] }
  0xb7   : > { %v840_v38 = vld [vmem:[%s6350_s22 + $0xd8] sm:$0xff]  ;;  %v5467_v39 = vpack.c.bf16 %v824_v36, %v823_v35  ;;  %v826_v42 = vld [vmem:[%s6350_s22 + $0x68] sm:$0xff]  ;;  %v841_v43 = vld [vmem:[%s6350_s22 + $0xe0] sm:$0xff] }
  0xb8   : > { %v5515_v40 = vpack.c.bf16 %v840_v38, %v839_v37  ;;  %v842_v44 = vld [vmem:[%s6350_s22 + $0xe8] sm:$0xff]  ;;  %v5473_v45 = vpack.c.bf16 %v826_v42, %v825_v41  ;;  %v827_v47 = vld [vmem:[%s6350_s22 + $0x70] sm:$0xff]  ;;  %v828_v48 = vld [vmem:[%s6350_s22 + $0x78] sm:$0xff] }
  0xb9   : > { %v5521_v46 = vpack.c.bf16 %v842_v44, %v841_v43  ;;  %v843_v49 = vld [vmem:[%s6350_s22 + $0xf0] sm:$0xff]  ;;  %v844_v50 = vld [vmem:[%s6350_s22 + $0xf8] sm:$0xff]  ;;  %v5479_v51 = vpack.c.bf16 %v828_v48, %v827_v47  ;;  %v750_v53 = vld [vmem:[%s6343_s8 + $0x8] sm:$0xff] }
  0xba   : > { %5448 = vmatpush3.bf16.xpose.msk.msra.mxu0 %vm6744_vm3, %v5443_v13  ;;  %v5527_v52 = vpack.c.bf16 %v844_v50, %v843_v49  ;;  %v782_v54 = vld [vmem:[%s6343_s8 + $0x108] sm:$0xff]  ;;  %v751_v55 = vld [vmem:[%s6343_s8 + $0x10] sm:$0xff]  ;;  %v752_v57 = vld [vmem:[%s6343_s8 + $0x18] sm:$0xff] }
  0xbb   : > { %5496 = vmatpush3.bf16.xpose.msk.msra.mxu1 %vm6744_vm3, %v5491_v14  ;;  %5451 = vmatprep.subr.msk.bf16.mxu0 %vm6744_vm3, %v5449_v19  ;;  %v783_v56 = vld [vmem:[%s6343_s8 + $0x110] sm:$0xff]  ;;  %v784_v58 = vld [vmem:[%s6343_s8 + $0x118] sm:$0xff]  ;;  %v753_v59 = vld [vmem:[%s6343_s8 + $0x20] sm:$0xff] }
  0xbc   : > { %5499 = vmatprep.subr.msk.bf16.mxu1 %vm6744_vm3, %v5497_v20  ;;  %v785_v60 = vld [vmem:[%s6343_s8 + $0x120] sm:$0xff]  ;;  %v754_v61 = vld [vmem:[%s6343_s8 + $0x28] sm:$0xff]  ;;  %v755_v63 = vld [vmem:[%s6343_s8 + $0x30] sm:$0xff] }
  0xbd   : > { %v786_v62 = vld [vmem:[%s6343_s8 + $0x128] sm:$0xff]  ;;  %v787_v0 = vld [vmem:[%s6343_s8 + $0x130] sm:$0xff]  ;;  %v756_v1 = vld [vmem:[%s6343_s8 + $0x38] sm:$0xff] }
  0xbe   : > { %v788_v2 = vld [vmem:[%s6343_s8 + $0x138] sm:$0xff]  ;;  %v757_v3 = vld [vmem:[%s6343_s8 + $0x40] sm:$0xff]  ;;  %v758_v5 = vld [vmem:[%s6343_s8 + $0x48] sm:$0xff] }
  0xbf   : > { %v789_v4 = vld [vmem:[%s6343_s8 + $0x140] sm:$0xff]  ;;  %v790_v6 = vld [vmem:[%s6343_s8 + $0x148] sm:$0xff]  ;;  %v759_v7 = vld [vmem:[%s6343_s8 + $0x50] sm:$0xff] }
  0xc0   : > { %v791_v8 = vld [vmem:[%s6343_s8 + $0x150] sm:$0xff]  ;;  %v760_v9 = vld [vmem:[%s6343_s8 + $0x58] sm:$0xff]  ;;  %v761_v11 = vld [vmem:[%s6343_s8 + $0x60] sm:$0xff] }
  0xc1   : > { %v792_v10 = vld [vmem:[%s6343_s8 + $0x158] sm:$0xff]  ;;  %v793_v12 = vld [vmem:[%s6343_s8 + $0x160] sm:$0xff]  ;;  %v762_v13 = vld [vmem:[%s6343_s8 + $0x68] sm:$0xff] }
  0xc2   : > { %5454 = vmatpush3.bf16.xpose.msk.msra.mxu0 %vm6744_vm3, %v5449_v19  ;;  %v794_v14 = vld [vmem:[%s6343_s8 + $0x168] sm:$0xff]  ;;  %v763_v15 = vld [vmem:[%s6343_s8 + $0x70] sm:$0xff]  ;;  %v764_v17 = vld [vmem:[%s6343_s8 + $0x78] sm:$0xff] }
  0xc3   : > { %5502 = vmatpush3.bf16.xpose.msk.msra.mxu1 %vm6744_vm3, %v5497_v20  ;;  %5457 = vmatprep.subr.msk.bf16.mxu0 %vm6744_vm3, %v5455_v27  ;;  %v795_v16 = vld [vmem:[%s6343_s8 + $0x170] sm:$0xff]  ;;  %v796_v18 = vld [vmem:[%s6343_s8 + $0x178] sm:$0xff]  ;;  %v765_v19 = vld [vmem:[%s6343_s8 + $0x80] sm:$0xff] }
  0xc4   : > { %5505 = vmatprep.subr.msk.bf16.mxu1 %vm6744_vm3, %v5503_v28  ;;  %v797_v20 = vld [vmem:[%s6343_s8 + $0x180] sm:$0xff]  ;;  %v766_v21 = vld [vmem:[%s6343_s8 + $0x88] sm:$0xff]  ;;  %v767_v23 = vld [vmem:[%s6343_s8 + $0x90] sm:$0xff] }
  0xc5   : > { %v798_v22 = vld [vmem:[%s6343_s8 + $0x188] sm:$0xff]  ;;  %v799_v24 = vld [vmem:[%s6343_s8 + $0x190] sm:$0xff]  ;;  %v768_v25 = vld [vmem:[%s6343_s8 + $0x98] sm:$0xff] }
  0xc6   : > { %v800_v26 = vld [vmem:[%s6343_s8 + $0x198] sm:$0xff]  ;;  %v770_v29 = vld [vmem:[%s6343_s8 + $0xa8] sm:$0xff]  ;;  %v771_v31 = vld [vmem:[%s6343_s8 + $0xb0] sm:$0xff] }
  0xc7   : > { %v802_v30 = vld [vmem:[%s6343_s8 + $0x1a8] sm:$0xff]  ;;  %v803_v32 = vld [vmem:[%s6343_s8 + $0x1b0] sm:$0xff]  ;;  %v773_v35 = vld [vmem:[%s6343_s8 + $0xc0] sm:$0xff] }
  0xc8   : > { %v805_v36 = vld [vmem:[%s6343_s8 + $0x1c0] sm:$0xff]  ;;  %v774_v37 = vld [vmem:[%s6343_s8 + $0xc8] sm:$0xff]  ;;  %v776_v41 = vld [vmem:[%s6343_s8 + $0xd8] sm:$0xff] }
  0xc9   : > { %v806_v38 = vld [vmem:[%s6343_s8 + $0x1c8] sm:$0xff]  ;;  %v808_v42 = vld [vmem:[%s6343_s8 + $0x1d8] sm:$0xff]  ;;  %v777_v43 = vld [vmem:[%s6343_s8 + $0xe0] sm:$0xff] }
  0xca   : > { %5460 = vmatpush3.bf16.xpose.msk.msra.mxu0 %vm6744_vm3, %v5455_v27  ;;  %v769_v27 = vld [vmem:[%s6343_s8 + $0xa0] sm:$0xff]  ;;  %v779_v47 = vld [vmem:[%s6343_s8 + $0xf0] sm:$0xff]  ;;  %v780_v49 = vld [vmem:[%s6343_s8 + $0xf8] sm:$0xff] }
  0xcb   : > { %5508 = vmatpush3.bf16.xpose.msk.msra.mxu1 %vm6744_vm3, %v5503_v28  ;;  %5463 = vmatprep.subr.msk.bf16.mxu0 %vm6744_vm3, %v5461_v33  ;;  %v801_v28 = vld [vmem:[%s6343_s8 + $0x1a0] sm:$0xff]  ;;  %v811_v48 = vld [vmem:[%s6343_s8 + $0x1f0] sm:$0xff]  ;;  %v812_v50 = vld [vmem:[%s6343_s8 + $0x1f8] sm:$0xff] }
  0xcc   : > { %5511 = vmatprep.subr.msk.bf16.mxu1 %vm6744_vm3, %v5509_v34  ;;  %v809_v44 = vld [vmem:[%s6343_s8 + $0x1e0] sm:$0xff] }
  0xd2   : > { %5466 = vmatpush3.bf16.xpose.msk.msra.mxu0 %vm6744_vm3, %v5461_v33  ;;  %v772_v33 = vld [vmem:[%s6343_s8 + $0xb8] sm:$0xff] }
  0xd3   : > { %5514 = vmatpush3.bf16.xpose.msk.msra.mxu1 %vm6744_vm3, %v5509_v34  ;;  %5469 = vmatprep.subr.msk.bf16.mxu0 %vm6744_vm3, %v5467_v39  ;;  %v804_v34 = vld [vmem:[%s6343_s8 + $0x1b8] sm:$0xff] }
  0xd4   : > { %5517 = vmatprep.subr.msk.bf16.mxu1 %vm6744_vm3, %v5515_v40 }
  0xda   : > { %5472 = vmatpush3.bf16.xpose.msk.msra.mxu0 %vm6744_vm3, %v5467_v39  ;;  %v775_v39 = vld [vmem:[%s6343_s8 + $0xd0] sm:$0xff] }
  0xdb   : > { %5520 = vmatpush3.bf16.xpose.msk.msra.mxu1 %vm6744_vm3, %v5515_v40  ;;  %5475 = vmatprep.subr.msk.bf16.mxu0 %vm6744_vm3, %v5473_v45  ;;  %v807_v40 = vld [vmem:[%s6343_s8 + $0x1d0] sm:$0xff] }
  0xdc   : > { %5523 = vmatprep.subr.msk.bf16.mxu1 %vm6744_vm3, %v5521_v46 }
  0xe2   : > { %5478 = vmatpush3.bf16.xpose.msk.msra.mxu0 %vm6744_vm3, %v5473_v45  ;;  %v778_v45 = vld [vmem:[%s6343_s8 + $0xe8] sm:$0xff] }
  0xe3   : > { %5526 = vmatpush3.bf16.xpose.msk.msra.mxu1 %vm6744_vm3, %v5521_v46  ;;  %5481 = vmatprep.subr.msk.bf16.mxu0 %vm6744_vm3, %v5479_v51  ;;  %v810_v46 = vld [vmem:[%s6343_s8 + $0x1e8] sm:$0xff] }
  0xe4   : > { %5529 = vmatprep.subr.msk.bf16.mxu1 %vm6744_vm3, %v5527_v52 }
  0xea   : > { %5484 = vmatpush3.bf16.xpose.msk.msra.mxu0 %vm6744_vm3, %v5479_v51 }
  0xeb   : > { %5532 = vmatpush3.bf16.xpose.msk.msra.mxu1 %vm6744_vm3, %v5527_v52 }
  0xf1   : > { %5150 = vmatmul.mubr.msk.f32.vlgmr.msra.gmra.mrb[0].mxu0 %vm877_vm2, %v750_v53 }
  0xf2   : > { %5230 = vmatmul.mubr.msk.f32.vlgmr.msra.gmra.mrb[0].mxu1 %vm877_vm2, %v782_v54  ;;  %5152 = vmatprep.mubr.msk.f32.mxu0 %vm877_vm2, %v751_v55 }
  0xf3   : > { %5232 = vmatprep.mubr.msk.f32.mxu1 %vm877_vm2, %v783_v56 }
  0xf5   : > { %5153 = vmatmul.mubr.msk.f32.gmra.mrb[2].mxu0 %vm877_vm2, %v752_v57 }
  0xf6   : > { %5233 = vmatmul.mubr.msk.f32.gmra.mrb[2].mxu1 %vm877_vm2, %v784_v58  ;;  %5155 = vmatprep.mubr.msk.f32.mxu0 %vm877_vm2, %v753_v59 }
  0xf7   : > { %5235 = vmatprep.mubr.msk.f32.mxu1 %vm877_vm2, %v785_v60 }
  0xf9   : > { %5156 = vmatmul.mubr.msk.f32.gmra.mrb[4].mxu0 %vm877_vm2, %v754_v61 }
  0xfa   : > { %5236 = vmatmul.mubr.msk.f32.gmra.mrb[4].mxu1 %vm877_vm2, %v786_v62  ;;  %5158 = vmatprep.mubr.msk.f32.mxu0 %vm877_vm2, %v755_v63 }
  0xfb   : > { %5238 = vmatprep.mubr.msk.f32.mxu1 %vm877_vm2, %v787_v0 }
  0xfd   : > { %5159 = vmatmul.mubr.msk.f32.gmra.mrb[6].mxu0 %vm877_vm2, %v756_v1 }
  0xfe   : > { %5239 = vmatmul.mubr.msk.f32.gmra.mrb[6].mxu1 %vm877_vm2, %v788_v2  ;;  %5161 = vmatprep.mubr.msk.f32.mxu0 %vm877_vm2, %v757_v3 }
  0xff   : > { %5241 = vmatprep.mubr.msk.f32.mxu1 %vm877_vm2, %v789_v4 }
 0x101   : > { %5162 = vmatmul.mubr.msk.f32.gmra.mrb[8].mxu0 %vm877_vm2, %v758_v5 }
 0x102   : > { %5242 = vmatmul.mubr.msk.f32.gmra.mrb[8].mxu1 %vm877_vm2, %v790_v6  ;;  %5164 = vmatprep.mubr.msk.f32.mxu0 %vm877_vm2, %v759_v7  ;;  %v6103_v6 = vmov 0  }
 0x103   : > { %5244 = vmatprep.mubr.msk.f32.mxu1 %vm877_vm2, %v791_v8  ;;  %5657 = vset.pattern.permute.xlu1 %v6103_v6 }
 0x104   : > { %5658 = vset.pattern.permute.xlu0 %v6103_v6 }
 0x105   : > { %5165 = vmatmul.mubr.msk.f32.gmra.mrb[10].mxu0 %vm877_vm2, %v760_v9 }
 0x106   : > { %5245 = vmatmul.mubr.msk.f32.gmra.mrb[10].mxu1 %vm877_vm2, %v792_v10  ;;  %5167 = vmatprep.mubr.msk.f32.mxu0 %vm877_vm2, %v761_v11 }
 0x107   : > { %5247 = vmatprep.mubr.msk.f32.mxu1 %vm877_vm2, %v793_v12 }
 0x109   : > { %5168 = vmatmul.mubr.msk.f32.gmra.mrb[12].mxu0 %vm877_vm2, %v762_v13 }
 0x10a   : > { %5248 = vmatmul.mubr.msk.f32.gmra.mrb[12].mxu1 %vm877_vm2, %v794_v14  ;;  %5170 = vmatprep.mubr.msk.f32.mxu0 %vm877_vm2, %v763_v15 }
 0x10b   : > { %5250 = vmatprep.mubr.msk.f32.mxu1 %vm877_vm2, %v795_v16 }
 0x10d   : > { %5171 = vmatmul.mubr.msk.f32.gmra.mrb[14].mxu0 %vm877_vm2, %v764_v17 }
 0x10e   : > { %5251 = vmatmul.mubr.msk.f32.gmra.mrb[14].mxu1 %vm877_vm2, %v796_v18  ;;  %5173 = vmatprep.mubr.msk.f32.mxu0 %vm877_vm2, %v765_v19 }
 0x10f   : > { %5253 = vmatprep.mubr.msk.f32.mxu1 %vm877_vm2, %v797_v20 }
 0x111   : > { %5174 = vmatmul.mubr.msk.f32.gmra.mrb[16].mxu0 %vm877_vm2, %v766_v21 }
 0x112   : > { %5254 = vmatmul.mubr.msk.f32.gmra.mrb[16].mxu1 %vm877_vm2, %v798_v22  ;;  %5176 = vmatprep.mubr.msk.f32.mxu0 %vm877_vm2, %v767_v23 }
 0x113   : > { %5256 = vmatprep.mubr.msk.f32.mxu1 %vm877_vm2, %v799_v24 }
 0x115   : > { %5177 = vmatmul.mubr.msk.f32.gmra.mrb[18].mxu0 %vm877_vm2, %v768_v25 }
 0x116   : > { %5257 = vmatmul.mubr.msk.f32.gmra.mrb[18].mxu1 %vm877_vm2, %v800_v26  ;;  %5179 = vmatprep.mubr.msk.f32.mxu0 %vm877_vm2, %v769_v27 }
 0x117   : > { %5259 = vmatprep.mubr.msk.f32.mxu1 %vm877_vm2, %v801_v28 }
 0x119   : > { %5180 = vmatmul.mubr.msk.f32.gmra.mrb[20].mxu0 %vm877_vm2, %v770_v29 }
 0x11a   : > { %5260 = vmatmul.mubr.msk.f32.gmra.mrb[20].mxu1 %vm877_vm2, %v802_v30  ;;  %5182 = vmatprep.mubr.msk.f32.mxu0 %vm877_vm2, %v771_v31 }
 0x11b   : > { %5262 = vmatprep.mubr.msk.f32.mxu1 %vm877_vm2, %v803_v32 }
 0x11d   : > { %5183 = vmatmul.mubr.msk.f32.gmra.mrb[22].mxu0 %vm877_vm2, %v772_v33 }
 0x11e   : > { %5263 = vmatmul.mubr.msk.f32.gmra.mrb[22].mxu1 %vm877_vm2, %v804_v34  ;;  %5185 = vmatprep.mubr.msk.f32.mxu0 %vm877_vm2, %v773_v35 }
 0x11f   : > { %5265 = vmatprep.mubr.msk.f32.mxu1 %vm877_vm2, %v805_v36 }
 0x121   : > { %5186 = vmatmul.mubr.msk.f32.gmra.mrb[24].mxu0 %vm877_vm2, %v774_v37 }
 0x122   : > { %5266 = vmatmul.mubr.msk.f32.gmra.mrb[24].mxu1 %vm877_vm2, %v806_v38  ;;  %5188 = vmatprep.mubr.msk.f32.mxu0 %vm877_vm2, %v775_v39 }
 0x123   : > { %5268 = vmatprep.mubr.msk.f32.mxu1 %vm877_vm2, %v807_v40 }
 0x125   : > { %5189 = vmatmul.mubr.msk.f32.gmra.mrb[26].mxu0 %vm877_vm2, %v776_v41 }
 0x126   : > { %5269 = vmatmul.mubr.msk.f32.gmra.mrb[26].mxu1 %vm877_vm2, %v808_v42  ;;  %5191 = vmatprep.mubr.msk.f32.mxu0 %vm877_vm2, %v777_v43 }
 0x127   : > { %5271 = vmatprep.mubr.msk.f32.mxu1 %vm877_vm2, %v809_v44 }
 0x129   : > { %5192 = vmatmul.mubr.msk.f32.gmra.mrb[28].mxu0 %vm877_vm2, %v778_v45 }
 0x12a   : > { %5272 = vmatmul.mubr.msk.f32.gmra.mrb[28].mxu1 %vm877_vm2, %v810_v46  ;;  %5194 = vmatprep.mubr.msk.f32.mxu0 %vm877_vm2, %v779_v47 }
 0x12b   : > { %5274 = vmatprep.mubr.msk.f32.mxu1 %vm877_vm2, %v811_v48 }
 0x12d   : > { %5195 = vmatmul.mubr.msk.f32.gmra.mrb[30].mxu0 %vm877_vm2, %v780_v49 }
 0x12e   : > { %5275 = vmatmul.mubr.msk.f32.gmra.mrb[30].mxu1 %vm877_vm2, %v812_v50 }
 0x1c4   : > { %v6969_v51 = vpop.f32.mrb[0].mxu0 }
 0x1c5   : > { %v6971_v52 = vpop.f32.mrb[0].mxu1  ;;  %1682 = vmax.xlane.f32.xlu0 %v6969_v51  ;;  %v6974_v53 = vpop.f32.mrb[1].mxu0 }
 0x1c6   : > { %1746 = vmax.xlane.f32.xlu1 %v6971_v52  ;;  %v6977_v54 = vpop.f32.mrb[1].mxu1 }
 0x1c8   : > { %v6979_v55 = vpop.f32.mrb[2].mxu0 }
 0x1c9   : > { %1680 = vmax.xlane.f32.xlu0 %v6974_v53  ;;  %v6982_v56 = vpop.f32.mrb[3].mxu0  ;;  %v6984_v57 = vpop.f32.mrb[2].mxu1 }
 0x1ca   : > { %1686 = vmax.xlane.f32.xlu1 %v6979_v55  ;;  %v6987_v58 = vpop.f32.mrb[3].mxu1 }
 0x1cc   : > { %v6989_v59 = vpop.f32.mrb[4].mxu0 }
 0x1cd   : > { %1744 = vmax.xlane.f32.xlu0 %v6977_v54  ;;  %v6992_v60 = vpop.f32.mrb[5].mxu0  ;;  %v6994_v61 = vpop.f32.mrb[4].mxu1 }
 0x1ce   : > { %9134 = vst [vmem:[#allocation7_spill] sm:$0xff] %v6994_v61  ;;  %1750 = vmax.xlane.f32.xlu1 %v6984_v57  ;;  %v6997_v62 = vpop.f32.mrb[5].mxu1 }
 0x1cf   : > { %9135 = vst [vmem:[#allocation8_spill] sm:$0xff] %v6997_v62 }
 0x1d0   : > { %v6999_v63 = vpop.f32.mrb[6].mxu0 }
 0x1d1   : > { %9136 = vst [vmem:[#allocation9_spill] sm:$0xff] %v6999_v63  ;;  %1748 = vmax.xlane.f32.xlu0 %v6987_v58  ;;  %v7002_v0 = vpop.f32.mrb[7].mxu0  ;;  %v7004_v1 = vpop.f32.mrb[6].mxu1 }
 0x1d2   : > { %9137 = vst [vmem:[#allocation10_spill] sm:$0xff] %v7002_v0  ;;  %9138 = vst [vmem:[#allocation11_spill] sm:$0xff] %v7004_v1  ;;  %1684 = vmax.xlane.f32.xlu1 %v6982_v56  ;;  %v7007_v2 = vpop.f32.mrb[7].mxu1 }
 0x1d3   : > { %9139 = vst [vmem:[#allocation12_spill] sm:$0xff] %v7007_v2 }
 0x1d4   : > { %v7009_v3 = vpop.f32.mrb[8].mxu0 }
 0x1d5   : > { %9140 = vst [vmem:[#allocation13_spill] sm:$0xff] %v7009_v3  ;;  %1688 = vmax.xlane.f32.xlu0 %v6992_v60  ;;  %v7012_v4 = vpop.f32.mrb[9].mxu0  ;;  %v7014_v5 = vpop.f32.mrb[8].mxu1 }
 0x1d6   : > { %9141 = vst [vmem:[#allocation14_spill] sm:$0xff] %v7012_v4  ;;  %9142 = vst [vmem:[#allocation15_spill] sm:$0xff] %v7014_v5  ;;  %1690 = vmax.xlane.f32.xlu1 %v6989_v59  ;;  %v7017_v7 = vpop.f32.mrb[9].mxu1 }
 0x1d7   : > { %9143 = vst [vmem:[#allocation16_spill] sm:$0xff] %v7017_v7 }
 0x1d8   : > { %v7019_v8 = vpop.f32.mrb[10].mxu0 }
 0x1d9   : > { %9144 = vst [vmem:[#allocation17_spill] sm:$0xff] %v7019_v8  ;;  %1752 = vmax.xlane.f32.xlu0 %v6997_v62  ;;  %v7022_v9 = vpop.f32.mrb[11].mxu0  ;;  %v7024_v10 = vpop.f32.mrb[10].mxu1 }
 0x1da   : > { %9145 = vst [vmem:[#allocation18_spill] sm:$0xff] %v7022_v9  ;;  %9146 = vst [vmem:[#allocation19_spill] sm:$0xff] %v7024_v10  ;;  %1754 = vmax.xlane.f32.xlu1 %v6994_v61  ;;  %v7027_v11 = vpop.f32.mrb[11].mxu1 }
 0x1db   : > { %9147 = vst [vmem:[#allocation20_spill] sm:$0xff] %v7027_v11 }
 0x1dc   : > { %v7029_v12 = vpop.f32.mrb[12].mxu0 }
 0x1dd   : > { %9148 = vst [vmem:[#allocation21_spill] sm:$0xff] %v7029_v12  ;;  %1692 = vmax.xlane.f32.xlu0 %v7002_v0  ;;  %v7032_v13 = vpop.f32.mrb[13].mxu0  ;;  %v7034_v14 = vpop.f32.mrb[12].mxu1 }
 0x1de   : > { %9149 = vst [vmem:[#allocation22_spill] sm:$0xff] %v7032_v13  ;;  %9150 = vst [vmem:[#allocation23_spill] sm:$0xff] %v7034_v14  ;;  %1694 = vmax.xlane.f32.xlu1 %v6999_v63  ;;  %v7037_v15 = vpop.f32.mrb[13].mxu1 }
 0x1df   : > { %9151 = vst [vmem:[#allocation24_spill] sm:$0xff] %v7037_v15 }
 0x1e0   : > { %v7039_v16 = vpop.f32.mrb[14].mxu0 }
 0x1e1   : > { %9152 = vst [vmem:[#allocation25_spill] sm:$0xff] %v7039_v16  ;;  %1756 = vmax.xlane.f32.xlu0 %v7007_v2  ;;  %v7042_v17 = vpop.f32.mrb[15].mxu0  ;;  %v7044_v18 = vpop.f32.mrb[14].mxu1 }
 0x1e2   : > { %9153 = vst [vmem:[#allocation26_spill] sm:$0xff] %v7042_v17  ;;  %9154 = vst [vmem:[#allocation27_spill] sm:$0xff] %v7044_v18  ;;  %1758 = vmax.xlane.f32.xlu1 %v7004_v1  ;;  %v7047_v19 = vpop.f32.mrb[15].mxu1 }
 0x1e3   : > { %9155 = vst [vmem:[#allocation28_spill] sm:$0xff] %v7047_v19 }
 0x1e4   : > { %v7049_v20 = vpop.f32.mrb[16].mxu0 }
 0x1e5   : > { %9156 = vst [vmem:[#allocation29_spill] sm:$0xff] %v7049_v20  ;;  %1696 = vmax.xlane.f32.xlu0 %v7012_v4  ;;  %v7052_v21 = vpop.f32.mrb[17].mxu0  ;;  %v7054_v22 = vpop.f32.mrb[16].mxu1  ;;  %v7421_v4 = vld [vmem:[#allocation2 + $0x160] sm:$0xff] }
 0x1e6   : > { %9157 = vst [vmem:[#allocation30_spill] sm:$0xff] %v7052_v21  ;;  %9158 = vst [vmem:[#allocation31_spill] sm:$0xff] %v7054_v22  ;;  %1698 = vmax.xlane.f32.xlu1 %v7009_v3  ;;  %v7057_v23 = vpop.f32.mrb[17].mxu1 }
 0x1e7   : > { %9159 = vst [vmem:[#allocation32_spill] sm:$0xff] %v7057_v23  ;;  %9191 = vst [vmem:[#allocation64_spill] sm:$0xff] %v7421_v4 }
 0x1e8   : > { %v7059_v24 = vpop.f32.mrb[18].mxu0 }
 0x1e9   : > { %9160 = vst [vmem:[#allocation33_spill] sm:$0xff] %v7059_v24  ;;  %1760 = vmax.xlane.f32.xlu0 %v7017_v7  ;;  %v7062_v25 = vpop.f32.mrb[19].mxu0  ;;  %v7064_v26 = vpop.f32.mrb[18].mxu1 }
 0x1ea   : > { %9161 = vst [vmem:[#allocation34_spill] sm:$0xff] %v7062_v25  ;;  %9162 = vst [vmem:[#allocation35_spill] sm:$0xff] %v7064_v26  ;;  %1762 = vmax.xlane.f32.xlu1 %v7014_v5  ;;  %v7067_v27 = vpop.f32.mrb[19].mxu1 }
 0x1eb   : > { %9163 = vst [vmem:[#allocation36_spill] sm:$0xff] %v7067_v27 }
 0x1ec   : > { %v7069_v28 = vpop.f32.mrb[20].mxu0 }
 0x1ed   : > { %9164 = vst [vmem:[#allocation37_spill] sm:$0xff] %v7069_v28  ;;  %1700 = vmax.xlane.f32.xlu0 %v7022_v9  ;;  %v7072_v29 = vpop.f32.mrb[21].mxu0  ;;  %v7074_v30 = vpop.f32.mrb[20].mxu1 }
 0x1ee   : > { %9165 = vst [vmem:[#allocation38_spill] sm:$0xff] %v7072_v29  ;;  %9166 = vst [vmem:[#allocation39_spill] sm:$0xff] %v7074_v30  ;;  %1702 = vmax.xlane.f32.xlu1 %v7019_v8  ;;  %v7077_v31 = vpop.f32.mrb[21].mxu1 }
 0x1ef   : > { %9167 = vst [vmem:[#allocation40_spill] sm:$0xff] %v7077_v31 }
 0x1f0   : > { %v7079_v32 = vpop.f32.mrb[22].mxu0 }
 0x1f1   : > { %9168 = vst [vmem:[#allocation41_spill] sm:$0xff] %v7079_v32  ;;  %1764 = vmax.xlane.f32.xlu0 %v7027_v11  ;;  %v7082_v33 = vpop.f32.mrb[23].mxu0  ;;  %v7084_v34 = vpop.f32.mrb[22].mxu1 }
 0x1f2   : > { %9169 = vst [vmem:[#allocation42_spill] sm:$0xff] %v7082_v33  ;;  %9170 = vst [vmem:[#allocation43_spill] sm:$0xff] %v7084_v34  ;;  %1766 = vmax.xlane.f32.xlu1 %v7024_v10  ;;  %v7087_v35 = vpop.f32.mrb[23].mxu1  ;;  %v7359_v10 = vld [vmem:[#allocation2 + $0x50] sm:$0xff] }
 0x1f3   : > { %9171 = vst [vmem:[#allocation44_spill] sm:$0xff] %v7087_v35 }
 0x1f4   : > { %v7089_v36 = vpop.f32.mrb[24].mxu0 }
 0x1f5   : > { %9172 = vst [vmem:[#allocation45_spill] sm:$0xff] %v7089_v36  ;;  %1704 = vmax.xlane.f32.xlu0 %v7032_v13  ;;  %v7092_v37 = vpop.f32.mrb[25].mxu0  ;;  %v7094_v38 = vpop.f32.mrb[24].mxu1  ;;  %v7335_v13 = vld [vmem:[#allocation2 + $0x140] sm:$0xff] }
 0x1f6   : > { %9173 = vst [vmem:[#allocation46_spill] sm:$0xff] %v7092_v37  ;;  %9174 = vst [vmem:[#allocation47_spill] sm:$0xff] %v7094_v38  ;;  %1706 = vmax.xlane.f32.xlu1 %v7029_v12  ;;  %v7097_v39 = vpop.f32.mrb[25].mxu1 }
 0x1f7   : > { %9175 = vst [vmem:[#allocation48_spill] sm:$0xff] %v7097_v39 }
 0x1f8   : > { %v7099_v40 = vpop.f32.mrb[26].mxu0 }
 0x1f9   : > { %9176 = vst [vmem:[#allocation49_spill] sm:$0xff] %v7099_v40  ;;  %1768 = vmax.xlane.f32.xlu0 %v7037_v15  ;;  %v7102_v41 = vpop.f32.mrb[27].mxu0  ;;  %v7104_v42 = vpop.f32.mrb[26].mxu1 }
 0x1fa   : > { %9177 = vst [vmem:[#allocation50_spill] sm:$0xff] %v7102_v41  ;;  %9178 = vst [vmem:[#allocation51_spill] sm:$0xff] %v7104_v42  ;;  %1770 = vmax.xlane.f32.xlu1 %v7034_v14  ;;  %v7107_v43 = vpop.f32.mrb[27].mxu1 }
 0x1fb   : > { %9179 = vst [vmem:[#allocation52_spill] sm:$0xff] %v7107_v43 }
 0x1fc   : > { %v7109_v44 = vpop.f32.mrb[28].mxu0 }
 0x1fd   : > { %9180 = vst [vmem:[#allocation53_spill] sm:$0xff] %v7109_v44  ;;  %1708 = vmax.xlane.f32.xlu0 %v7042_v17  ;;  %v7112_v45 = vpop.f32.mrb[29].mxu0  ;;  %v7114_v46 = vpop.f32.mrb[28].mxu1  ;;  %v7320_v17 = vld [vmem:[#allocation2 + $0x48] sm:$0xff] }
 0x1fe   : > { %9181 = vst [vmem:[#allocation54_spill] sm:$0xff] %v7112_v45  ;;  %9182 = vst [vmem:[#allocation55_spill] sm:$0xff] %v7114_v46  ;;  %1710 = vmax.xlane.f32.xlu1 %v7039_v16  ;;  %v7117_v47 = vpop.f32.mrb[29].mxu1 }
 0x1ff   : > { %9183 = vst [vmem:[#allocation56_spill] sm:$0xff] %v7117_v47 }
 0x200   : > { %v7119_v48 = vpop.f32.mrb[30].mxu0 }
 0x201   : > { %9184 = vst [vmem:[#allocation57_spill] sm:$0xff] %v7119_v48  ;;  %1772 = vmax.xlane.f32.xlu0 %v7047_v19  ;;  %v7122_v49 = vpop.f32.mrb[31].mxu0  ;;  %v7124_v50 = vpop.f32.mrb[30].mxu1 }
 0x202   : > { %9185 = vst [vmem:[#allocation58_spill] sm:$0xff] %v7122_v49  ;;  %9186 = vst [vmem:[#allocation59_spill] sm:$0xff] %v7124_v50  ;;  %1774 = vmax.xlane.f32.xlu1 %v7044_v18  ;;  %v7127_v6 = vpop.f32.mrb[31].mxu1 }
 0x203   : > { %9187 = vst [vmem:[#allocation60_spill] sm:$0xff] %v7127_v6 }
 0x205   : > { %1712 = vmax.xlane.f32.xlu0 %v7052_v21 }
 0x206   : > { %1714 = vmax.xlane.f32.xlu1 %v7049_v20  ;;  %v876_v20 = vld [vmem:[%s6352_s23 + $0xf8] sm:$0xff] }
 0x209   : > { %1776 = vmax.xlane.f32.xlu0 %v7057_v23 }
 0x20a   : > { %1778 = vmax.xlane.f32.xlu1 %v7054_v22  ;;  %v7263_v22 = vld [vmem:[#allocation2 + $0x120] sm:$0xff] }
 0x20d   : > { %1716 = vmax.xlane.f32.xlu0 %v7062_v25 }
 0x20e   : > { %1718 = vmax.xlane.f32.xlu1 %v7059_v24  ;;  %v873_v24 = vld [vmem:[%s6352_s23 + $0xe0] sm:$0xff] }
 0x211   : > { %1780 = vmax.xlane.f32.xlu0 %v7067_v27  ;;  %v7242_v27 = vld [vmem:[#allocation2 + $0x20] sm:$0xff] }
 0x212   : > { %1782 = vmax.xlane.f32.xlu1 %v7064_v26 }
 0x215   : > { %1720 = vmax.xlane.f32.xlu0 %v7072_v29  ;;  %v871_v29 = vld [vmem:[%s6352_s23 + $0xd0] sm:$0xff] }
 0x216   : > { %1722 = vmax.xlane.f32.xlu1 %v7069_v28  ;;  %v872_v28 = vld [vmem:[%s6352_s23 + $0xd8] sm:$0xff] }
 0x217   : > { %v5585_v26 = vpack.c.bf16 %v872_v28, %v871_v29 }
 0x219   : > { %1784 = vmax.xlane.f32.xlu0 %v7077_v31  ;;  %v7222_v31 = vld [vmem:[#allocation2 + $0x110] sm:$0xff] }
 0x21a   : > { %1786 = vmax.xlane.f32.xlu1 %v7074_v30 }
 0x21d   : > { %1724 = vmax.xlane.f32.xlu0 %v7082_v33 }
 0x21e   : > { %1726 = vmax.xlane.f32.xlu1 %v7079_v32  ;;  %v870_v32 = vld [vmem:[%s6352_s23 + $0xc8] sm:$0xff] }
 0x221   : > { %1788 = vmax.xlane.f32.xlu0 %v7087_v35  ;;  %v7203_v35 = vld [vmem:[#allocation2 + $0x100] sm:$0xff] }
 0x222   : > { %1790 = vmax.xlane.f32.xlu1 %v7084_v34 }
 0x225   : > { %1728 = vmax.xlane.f32.xlu0 %v7092_v37  ;;  %v867_v37 = vld [vmem:[%s6352_s23 + $0xb0] sm:$0xff] }
 0x226   : > { %1730 = vmax.xlane.f32.xlu1 %v7089_v36  ;;  %v868_v36 = vld [vmem:[%s6352_s23 + $0xb8] sm:$0xff] }
 0x227   : > { %v5577_v34 = vpack.c.bf16 %v868_v36, %v867_v37  ;;  %v869_v37 = vld [vmem:[%s6352_s23 + $0xc0] sm:$0xff] }
 0x228   : > { %v5581_v30 = vpack.c.bf16 %v870_v32, %v869_v37 }
 0x229   : > { %1792 = vmax.xlane.f32.xlu0 %v7097_v39  ;;  %v849_v39 = vld [vmem:[%s6352_s23 + $0x20] sm:$0xff] }
 0x22a   : > { %1794 = vmax.xlane.f32.xlu1 %v7094_v38  ;;  %v850_v38 = vld [vmem:[%s6352_s23 + $0x28] sm:$0xff] }
 0x22d   : > { %1732 = vmax.xlane.f32.xlu0 %v7102_v41  ;;  %v861_v41 = vld [vmem:[%s6352_s23 + $0x80] sm:$0xff] }
 0x22e   : > { %1734 = vmax.xlane.f32.xlu1 %v7099_v40  ;;  %v863_v40 = vld [vmem:[%s6352_s23 + $0x90] sm:$0xff] }
 0x231   : > { %1796 = vmax.xlane.f32.xlu0 %v7107_v43  ;;  %v845_v43 = vld [vmem:[%s6352_s23] sm:$0xff] }
 0x232   : > { %1798 = vmax.xlane.f32.xlu1 %v7104_v42 }
 0x235   : > { %1736 = vmax.xlane.f32.xlu0 %v7112_v45  ;;  %v846_v45 = vld [vmem:[%s6352_s23 + $0x8] sm:$0xff] }
 0x236   : > { %1738 = vmax.xlane.f32.xlu1 %v7109_v44  ;;  %v5533_v42 = vpack.c.bf16 %v846_v45, %v845_v43  ;;  %v862_v44 = vld [vmem:[%s6352_s23 + $0x88] sm:$0xff] }
 0x237   : > { %v7171_v45 = vld [vmem:[#allocation2 + $0x108] sm:$0xff] }
 0x238   : > { %5534 = vmatprep.subr.bf16.mxu0 %v5533_v42 }
 0x239   : > { %1800 = vmax.xlane.f32.xlu0 %v7117_v47  ;;  %v5565_v47 = vpack.c.bf16 %v862_v44, %v861_v41  ;;  %5536 = vmatpush3.bf16.msra.mxu0 %v5533_v42  ;;  %v5541_v42 = vpack.c.bf16 %v850_v38, %v849_v39  ;;  %v7188_v38 = vld [vmem:[#allocation2 + $0x18] sm:$0xff]  ;;  %v851_v39 = vld [vmem:[%s6352_s23 + $0x30] sm:$0xff] }
 0x23a   : > { %1802 = vmax.xlane.f32.xlu1 %v7114_v46  ;;  %v847_v46 = vld [vmem:[%s6352_s23 + $0x10] sm:$0xff] }
 0x23b   : > { %5566 = vmatprep.subr.bf16.mxu1 %v5565_v47 }
 0x23c   : > { %5568 = vmatpush3.bf16.msra.mxu1 %v5565_v47  ;;  %v865_v47 = vld [vmem:[%s6352_s23 + $0xa0] sm:$0xff] }
 0x23d   : > { %1740 = vmax.xlane.f32.xlu0 %v7122_v49  ;;  %v848_v49 = vld [vmem:[%s6352_s23 + $0x18] sm:$0xff] }
 0x23e   : > { %1742 = vmax.xlane.f32.xlu1 %v7119_v48  ;;  %v5537_v48 = vpack.c.bf16 %v848_v49, %v847_v46  ;;  %v866_v49 = vld [vmem:[%s6352_s23 + $0xa8] sm:$0xff] }
 0x240   : > { %5538 = vmatprep.subr.bf16.mxu0 %v5537_v48 }
 0x241   : > { %1804 = vmax.xlane.f32.xlu0 %v7127_v6  ;;  %v864_v6 = vld [vmem:[%s6352_s23 + $0x98] sm:$0xff]  ;;  %5540 = vmatpush3.bf16.msra.mxu0 %v5537_v48  ;;  %v5573_v48 = vpack.c.bf16 %v866_v49, %v865_v47 }
 0x242   : > { %1806 = vmax.xlane.f32.xlu1 %v7124_v50  ;;  %v7169_v50 = vld [vmem:[#allocation2 + $0x8] sm:$0xff]  ;;  %v5569_v43 = vpack.c.bf16 %v864_v6, %v863_v40  ;;  %v7183_v6 = vld [vmem:[#allocation2] sm:$0xff]  ;;  %5542 = vmatprep.subr.bf16.mxu0 %v5541_v42 }
 0x244   : > { %5570 = vmatprep.subr.bf16.mxu1 %v5569_v43 }
 0x245   : > { %5572 = vmatpush3.bf16.msra.mxu1 %v5569_v43  ;;  %5544 = vmatpush3.bf16.msra.mxu0 %v5541_v42  ;;  %v852_v43 = vld [vmem:[%s6352_s23 + $0x38] sm:$0xff] }
 0x246   : > { %5574 = vmatprep.subr.bf16.mxu1 %v5573_v48 }
 0x249   : > { %5576 = vmatpush3.bf16.msra.mxu1 %v5573_v48 }
 0x24a   : > { %5578 = vmatprep.subr.bf16.mxu1 %v5577_v34 }
 0x24d   : > { %5580 = vmatpush3.bf16.msra.mxu1 %v5577_v34  ;;  %v855_v34 = vld [vmem:[%s6352_s23 + $0x50] sm:$0xff] }
 0x24e   : > { %5582 = vmatprep.subr.bf16.mxu1 %v5581_v30 }
 0x251   : > { %5584 = vmatpush3.bf16.msra.mxu1 %v5581_v30  ;;  %v857_v30 = vld [vmem:[%s6352_s23 + $0x60] sm:$0xff] }
 0x252   : > { %v1683_v41 = vpop.xlane.xlu0 %1682  ;;  %5586 = vmatprep.subr.bf16.mxu1 %v5585_v26 }
 0x253   : > { %v1747_v44 = vpop.xlane.xlu1 %1746  ;;  %v7176_v46 = vmax.f32 %v7169_v50, %v1683_v41 }
 0x254   : > { %v7181_v40 = vmax.f32 %v7171_v45, %v1747_v44  ;;  %v5545_v44 = vpack.c.bf16 %v852_v43, %v851_v39  ;;  %v7207_v39 = vld [vmem:[#allocation2 + $0x118] sm:$0xff]  ;;  %v853_v43 = vld [vmem:[%s6352_s23 + $0x40] sm:$0xff] }
 0x255   : > { %3989 = vst.msk [vmem:[#allocation2 + $0x8] sm:$0xff] %vm2896_vm4, %v7176_v46  ;;  %2071 = vperm.xlu1 %5657, %v7176_v46   ;;  %5588 = vmatpush3.bf16.msra.mxu1 %v5585_v26  ;;  %v859_v26 = vld [vmem:[%s6352_s23 + $0x70] sm:$0xff]  ;;  %v1873_v16 = vsub.f32 %v7169_v50, %v7176_v46 }
 0x256   : > { %4021 = vst.msk [vmem:[#allocation2 + $0x108] sm:$0xff] %vm2896_vm4, %v7181_v40  ;;  %v1681_v41 = vpop.xlane.xlu0 %1680  ;;  %5546 = vmatprep.subr.bf16.mxu0 %v5545_v44  ;;  %v1905_v28 = vsub.f32 %v7171_v45, %v7181_v40  ;;  %v860_v45 = vld [vmem:[%s6352_s23 + $0x78] sm:$0xff] }
 0x257   : > { %v7195_v47 = vmax.f32 %v7183_v6, %v1681_v41  ;;  %v1687_v49 = vpop.xlane.xlu1 %1686  ;;  %2231 = vperm.xlu0 %5658, %v7181_v40   ;;  %5548 = vmatpush3.bf16.msra.mxu0 %v5545_v44  ;;  %v854_v41 = vld [vmem:[%s6352_s23 + $0x48] sm:$0xff] }
 0x258   : > { %v7201_v42 = vmax.f32 %v7188_v38, %v1687_v49  ;;  %v5549_v49 = vpack.c.bf16 %v854_v41, %v853_v43  ;;  %v7227_v43 = vld [vmem:[#allocation2 + $0x10] sm:$0xff]  ;;  %v856_v41 = vld [vmem:[%s6352_s23 + $0x58] sm:$0xff] }
 0x259   : > { %3988 = vst.msk [vmem:[#allocation2] sm:$0xff] %vm2896_vm4, %v7195_v47 }
 0x25a   : > { %3991 = vst.msk [vmem:[#allocation2 + $0x18] sm:$0xff] %vm2896_vm4, %v7201_v42  ;;  %v1745_v48 = vpop.xlane.xlu0 %1744  ;;  %5550 = vmatprep.subr.bf16.mxu0 %v5549_v49 }
 0x25b   : > { %v7214_v33 = vmax.f32 %v7203_v35, %v1745_v48  ;;  %v1751_v36 = vpop.xlane.xlu1 %1750  ;;  %2066 = vperm.xlu0 %5658, %v7195_v47   ;;  %5552 = vmatpush3.bf16.msra.mxu0 %v5549_v49 }
 0x25c   : > { %v7220_v44 = vmax.f32 %v7207_v39, %v1751_v36  ;;  %v5553_v36 = vpack.c.bf16 %v856_v41, %v855_v34  ;;  %v7247_v34 = vld [vmem:[#allocation2 + $0x28] sm:$0xff] }
 0x25d   : > { %4020 = vst.msk [vmem:[#allocation2 + $0x100] sm:$0xff] %vm2896_vm4, %v7214_v33  ;;  %2226 = vperm.xlu1 %5657, %v7214_v33   ;;  %v858_v41 = vld [vmem:[%s6352_s23 + $0x68] sm:$0xff] }
 0x25e   : > { %4023 = vst.msk [vmem:[#allocation2 + $0x118] sm:$0xff] %vm2896_vm4, %v7220_v44  ;;  %v1749_v48 = vpop.xlane.xlu0 %1748  ;;  %5554 = vmatprep.subr.bf16.mxu0 %v5553_v36  ;;  %v1907_v46 = vsub.f32 %v7207_v39, %v7220_v44 }
 0x25f   : > { %v7234_v32 = vmax.f32 %v7222_v31, %v1749_v48  ;;  %v1685_v37 = vpop.xlane.xlu1 %1684  ;;  %2241 = vperm.xlu0 %5658, %v7220_v44   ;;  %5556 = vmatpush3.bf16.msra.mxu0 %v5553_v36  ;;  %v874_v36 = vld [vmem:[%s6352_s23 + $0xe8] sm:$0xff] }
 0x260   : > { %v7240_v49 = vmax.f32 %v7227_v43, %v1685_v37  ;;  %v5557_v37 = vpack.c.bf16 %v858_v41, %v857_v30  ;;  %v5589_v21 = vpack.c.bf16 %v874_v36, %v873_v24  ;;  %v7266_v30 = vld [vmem:[#allocation2 + $0x128] sm:$0xff]  ;;  %v5561_v41 = vpack.c.bf16 %v860_v45, %v859_v26  ;;  %v875_v36 = vld [vmem:[%s6352_s23 + $0xf0] sm:$0xff] }
 0x261   : > { %4022 = vst.msk [vmem:[#allocation2 + $0x110] sm:$0xff] %vm2896_vm4, %v7234_v32  ;;  %2081 = vperm.xlu1 %5657, %v7201_v42   ;;  %v5593_v18 = vpack.c.bf16 %v876_v20, %v875_v36  ;;  %v2006_v44 = vmul.f32 1.442695, %v1907_v46 }
 0x262   : > { %3990 = vst.msk [vmem:[#allocation2 + $0x10] sm:$0xff] %vm2896_vm4, %v7240_v49  ;;  %v1689_v48 = vpop.xlane.xlu0 %1688  ;;  %5558 = vmatprep.subr.bf16.mxu0 %v5557_v37  ;;  %5590 = vmatprep.subr.bf16.mxu1 %v5589_v21 }
 0x263   : > { %v1691_v29 = vpop.xlane.xlu1 %1690  ;;  %v7256_v25 = vmax.f32 %v7242_v27, %v1689_v48  ;;  %5560 = vmatpush3.bf16.msra.mxu0 %v5557_v37  ;;  %v2002_v48 = vmul.f32 1.442695, %v1905_v28  ;;  %5592 = vmatpush3.bf16.msra.mxu1 %v5589_v21  ;;  %v7282_v37 = vld [vmem:[#allocation2 + $0x30] sm:$0xff]  ;;  %v7287_v28 = vld [vmem:[#allocation2 + $0x38] sm:$0xff] }
 0x264   : > { %v7261_v23 = vmax.f32 %v7247_v34, %v1691_v29  ;;  %5562 = vmatprep.subr.bf16.mxu0 %v5561_v41  ;;  %5594 = vmatprep.subr.bf16.mxu1 %v5593_v18 }
 0x265   : > { %2076 = vperm.xlu1 %5657, %v7240_v49   ;;  %3992 = vst.msk [vmem:[#allocation2 + $0x20] sm:$0xff] %vm2896_vm4, %v7256_v25  ;;  %5659 = vpow2.f32 %v2002_v48 }
 0x266   : > { %3993 = vst.msk [vmem:[#allocation2 + $0x28] sm:$0xff] %vm2896_vm4, %v7261_v23  ;;  %v1753_v40 = vpop.xlane.xlu0 %1752  ;;  %v1877_v9 = vsub.f32 %v7247_v34, %v7261_v23  ;;  %v1906_v34 = vsub.f32 %v7222_v31, %v7234_v32 }
 0x267   : > { %v1755_v29 = vpop.xlane.xlu1 %1754  ;;  %v7275_v24 = vmax.f32 %v7263_v22, %v1753_v40  ;;  %5564 = vmatpush3.bf16.msra.mxu0 %v5561_v41  ;;  %5596 = vmatpush3.bf16.msra.mxu1 %v5593_v18  ;;  %v7298_v40 = vld [vmem:[#allocation2 + $0x130] sm:$0xff]  ;;  %v7301_v41 = vld [vmem:[#allocation2 + $0x138] sm:$0xff] }
 0x268   : > { %v7280_v19 = vmax.f32 %v7266_v30, %v1755_v29  ;;  %v1872_v29 = vsub.f32 %v7183_v6, %v7195_v47 }
 0x269   : > { %2236 = vperm.xlu1 %5657, %v7234_v32   ;;  %4024 = vst.msk [vmem:[#allocation2 + $0x120] sm:$0xff] %vm2896_vm4, %v7275_v24  ;;  %v7449_v32 = vld [vmem:[#allocation2 + $0x70] sm:$0xff] }
 0x26a   : > { %4025 = vst.msk [vmem:[#allocation2 + $0x128] sm:$0xff] %vm2896_vm4, %v7280_v19  ;;  %2251 = vperm.xlu0 %5658, %v7280_v19   ;;  %v1693_v21 = vpop.xlane.xlu0 %1692  ;;  %v1936_v47 = vmul.f32 1.442695, %v1872_v29  ;;  %v1904_v29 = vsub.f32 %v7203_v35, %v7214_v33  ;;  %v7366_v35 = vld [vmem:[#allocation2 + $0x58] sm:$0xff]  ;;  %v7377_v33 = vld [vmem:[#allocation2 + $0x150] sm:$0xff] }
 0x26b   : > { %v1695_v26 = vpop.xlane.xlu1 %1694  ;;  %v7293_v45 = vmax.f32 %v7282_v37, %v1693_v21 }
 0x26c   : > { %v7296_v20 = vmax.f32 %v7287_v28, %v1695_v26  ;;  %v7315_v26 = vld [vmem:[#allocation2 + $0x40] sm:$0xff]  ;;  %5661 = vpow2.f32 %v1936_v47  ;;  %v2000_v39 = vmul.f32 1.442695, %v1904_v29  ;;  %v7384_v29 = vld [vmem:[#allocation2 + $0x158] sm:$0xff] }
 0x26d   : > { %2091 = vperm.xlu1 %5657, %v7261_v23   ;;  %3994 = vst.msk [vmem:[#allocation2 + $0x30] sm:$0xff] %vm2896_vm4, %v7293_v45  ;;  %v7430_v23 = vld [vmem:[#allocation2 + $0x168] sm:$0xff] }
 0x26e   : > { %3995 = vst.msk [vmem:[#allocation2 + $0x38] sm:$0xff] %vm2896_vm4, %v7296_v20  ;;  %v1757_v48 = vpop.xlane.xlu0 %1756  ;;  %9193 = vst [vmem:[#allocation66_spill] sm:$0xff] %v7430_v23 }
 0x26f   : > { %v1759_v18 = vpop.xlane.xlu1 %1758  ;;  %v7310_v36 = vmax.f32 %v7298_v40, %v1757_v48  ;;  %v1875_v48 = vsub.f32 %v7188_v38, %v7201_v42  ;;  %v7337_v50 = vpop.eup %5659  ;;  %v7344_v38 = vld [vmem:[#allocation2 + $0x148] sm:$0xff]  ;;  %v1938_v42 = vmul.f32 1.442695, %v1873_v16 }
 0x270   : > { %v7313_v21 = vmax.f32 %v7301_v41, %v1759_v18  ;;  %9188 = vst [vmem:[#allocation61_spill] sm:$0xff] %v7337_v50 }
 0x271   : > { %2086 = vperm.xlu1 %5657, %v7256_v25   ;;  %4026 = vst.msk [vmem:[#allocation2 + $0x130] sm:$0xff] %vm2896_vm4, %v7310_v36  ;;  %5663 = vpow2.f32 %v1938_v42  ;;  %v7395_v42 = vld [vmem:[#allocation2 + $0x60] sm:$0xff] }
 0x272   : > { %4027 = vst.msk [vmem:[#allocation2 + $0x138] sm:$0xff] %vm2896_vm4, %v7313_v21  ;;  %2261 = vperm.xlu0 %5658, %v7313_v21   ;;  %v1697_v6 = vpop.xlane.xlu0 %1696 }
 0x273   : > { %v1699_v18 = vpop.xlane.xlu1 %1698  ;;  %v7330_v15 = vmax.f32 %v7315_v26, %v1697_v6 }
 0x274   : > { %v7333_v14 = vmax.f32 %v7320_v17, %v1699_v18  ;;  %v1942_v18 = vmul.f32 1.442695, %v1875_v48 }
 0x275   : > { %2246 = vperm.xlu1 %5657, %v7275_v24   ;;  %3996 = vst.msk [vmem:[#allocation2 + $0x40] sm:$0xff] %vm2896_vm4, %v7330_v15 }
 0x276   : > { %3997 = vst.msk [vmem:[#allocation2 + $0x48] sm:$0xff] %vm2896_vm4, %v7333_v14  ;;  %3192 = vperm.xlu0 %5658, %v7337_v50   ;;  %v1761_v6 = vpop.xlane.xlu0 %1760  ;;  %5665 = vpow2.f32 %v1942_v18  ;;  %v7397_v50 = vpop.eup %5661 }
 0x277   : > { %v1763_v12 = vpop.xlane.xlu1 %1762  ;;  %v7354_v11 = vmax.f32 %v7335_v13, %v1761_v6  ;;  %5667 = vpow2.f32 %v2000_v39  ;;  %9189 = vst [vmem:[#allocation62_spill] sm:$0xff] %v7397_v50 }
 0x278   : > { %v7357_v16 = vmax.f32 %v7344_v38, %v1763_v12  ;;  %5669 = vpow2.f32 %v2006_v44  ;;  %v7404_v44 = vld [vmem:[#allocation2 + $0x68] sm:$0xff] }
 0x279   : > { %2101 = vperm.xlu1 %5657, %v7296_v20   ;;  %4028 = vst.msk [vmem:[#allocation2 + $0x140] sm:$0xff] %vm2896_vm4, %v7354_v11 }
 0x27a   : > { %4029 = vst.msk [vmem:[#allocation2 + $0x148] sm:$0xff] %vm2896_vm4, %v7357_v16  ;;  %2111 = vperm.xlu0 %5658, %v7333_v14   ;;  %v1701_v12 = vpop.xlane.xlu0 %1700 }
 0x27b   : > { %v1703_v47 = vpop.xlane.xlu1 %1702  ;;  %v7372_v48 = vmax.f32 %v7359_v10, %v1701_v12  ;;  %v7416_v7 = vpop.eup %5663 }
 0x27c   : > { %v7375_v6 = vmax.f32 %v7366_v35, %v1703_v47  ;;  %9190 = vst [vmem:[#allocation63_spill] sm:$0xff] %v7416_v7 }
 0x27d   : > { %2096 = vperm.xlu1 %5657, %v7293_v45   ;;  %3998 = vst.msk [vmem:[#allocation2 + $0x50] sm:$0xff] %vm2896_vm4, %v7372_v48 }
 0x27e   : > { %3999 = vst.msk [vmem:[#allocation2 + $0x58] sm:$0xff] %vm2896_vm4, %v7375_v6  ;;  %2271 = vperm.xlu0 %5658, %v7357_v16   ;;  %v1765_v46 = vpop.xlane.xlu0 %1764 }
 0x27f   : > { %v1767_v18 = vpop.xlane.xlu1 %1766  ;;  %v7390_v12 = vmax.f32 %v7377_v33, %v1765_v46  ;;  %v1874_v46 = vsub.f32 %v7227_v43, %v7240_v49  ;;  %v1909_v49 = vsub.f32 %v7266_v30, %v7280_v19  ;;  %v7458_v19 = vld [vmem:[#allocation2 + $0x78] sm:$0xff]  ;;  %v2004_v30 = vmul.f32 1.442695, %v1906_v34  ;;  %v7471_v34 = vld [vmem:[#allocation2 + $0x170] sm:$0xff] }
 0x280   : > { %v7393_v47 = vmax.f32 %v7384_v29, %v1767_v18  ;;  %v7423_v43 = vpop.eup %5665  ;;  %9198 = vst [vmem:[#allocation71_spill] sm:$0xff] %v7471_v34 }
 0x281   : > { %2256 = vperm.xlu1 %5657, %v7310_v36   ;;  %4030 = vst.msk [vmem:[#allocation2 + $0x150] sm:$0xff] %vm2896_vm4, %v7390_v12  ;;  %9192 = vst [vmem:[#allocation65_spill] sm:$0xff] %v7423_v43  ;;  %v7444_v1 = vpop.eup %5667 }
 0x282   : > { %4031 = vst.msk [vmem:[#allocation2 + $0x158] sm:$0xff] %vm2896_vm4, %v7393_v47  ;;  %3027 = vperm.xlu0 %5658, %v7397_v50   ;;  %v1705_v18 = vpop.xlane.xlu0 %1704  ;;  %9195 = vst [vmem:[#allocation68_spill] sm:$0xff] %v7444_v1 }
 0x283   : > { %v1707_v8 = vpop.xlane.xlu1 %1706  ;;  %v7414_v39 = vmax.f32 %v7395_v42, %v1705_v18  ;;  %v1940_v18 = vmul.f32 1.442695, %v1874_v46  ;;  %v7451_v46 = vpop.eup %5669 }
 0x284   : > { %v7419_v5 = vmax.f32 %v7404_v44, %v1707_v8  ;;  %9197 = vst [vmem:[#allocation70_spill] sm:$0xff] %v7451_v46  ;;  %v2010_v8 = vmul.f32 1.442695, %v1909_v49 }
 0x285   : > { %3032 = vperm.xlu1 %5657, %v7416_v7   ;;  %4000 = vst.msk [vmem:[#allocation2 + $0x60] sm:$0xff] %vm2896_vm4, %v7414_v39  ;;  %v1946_v7 = vmul.f32 1.442695, %v1877_v9  ;;  %5671 = vpow2.f32 %v1940_v18 }
 0x286   : > { %4001 = vst.msk [vmem:[#allocation2 + $0x68] sm:$0xff] %vm2896_vm4, %v7419_v5  ;;  %3042 = vperm.xlu0 %5658, %v7423_v43   ;;  %v1769_v50 = vpop.xlane.xlu0 %1768 }
 0x287   : > { %v1771_v3 = vpop.xlane.xlu1 %1770  ;;  %v7442_v2 = vmax.f32 %v7421_v4, %v1769_v50  ;;  %5673 = vpow2.f32 %v1946_v7  ;;  %v7498_v7 = vld [vmem:[#allocation2 + $0x88] sm:$0xff] }
 0x288   : > { %v7447_v31 = vmax.f32 %v7430_v23, %v1771_v3  ;;  %v7478_v3 = vld [vmem:[#allocation2 + $0x178] sm:$0xff]  ;;  %5675 = vpow2.f32 %v2004_v30  ;;  %v1879_v30 = vsub.f32 %v7287_v28, %v7296_v20  ;;  %v7526_v28 = vld [vmem:[#allocation2 + $0x188] sm:$0xff] }
 0x289   : > { %9194 = vst [vmem:[#allocation67_spill] sm:$0xff] %v7442_v2  ;;  %3187 = vperm.xlu1 %5657, %v7444_v1   ;;  %4032 = vst.msk [vmem:[#allocation2 + $0x160] sm:$0xff] %vm2896_vm4, %v7442_v2  ;;  %5677 = vpow2.f32 %v2010_v8  ;;  %v1876_v8 = vsub.f32 %v7242_v27, %v7256_v25  ;;  %v7517_v27 = vld [vmem:[#allocation2 + $0x180] sm:$0xff] }
 0x28a   : > { %9196 = vst [vmem:[#allocation69_spill] sm:$0xff] %v7447_v31  ;;  %4033 = vst.msk [vmem:[#allocation2 + $0x168] sm:$0xff] %vm2896_vm4, %v7447_v31  ;;  %3202 = vperm.xlu0 %5658, %v7451_v46   ;;  %v1709_v50 = vpop.xlane.xlu0 %1708  ;;  %v7491_v46 = vld [vmem:[#allocation2 + $0x80] sm:$0xff]  ;;  %v1950_v0 = vmul.f32 1.442695, %v1879_v30 }
 0x28b   : > { %v1711_v43 = vpop.xlane.xlu1 %1710  ;;  %v7466_v9 = vmax.f32 %v7449_v32, %v1709_v50  ;;  %9199 = vst [vmem:[#allocation72_spill] sm:$0xff] %v7478_v3  ;;  %9202 = vst [vmem:[#allocation75_spill] sm:$0xff] %v7517_v27  ;;  %v1944_v20 = vmul.f32 1.442695, %v1876_v8 }
 0x28c   : > { %v7469_v1 = vmax.f32 %v7458_v19, %v1711_v43  ;;  %9204 = vst [vmem:[#allocation77_spill] sm:$0xff] %v7526_v28 }
 0x28d   : > { %2106 = vperm.xlu1 %5657, %v7330_v15   ;;  %4002 = vst.msk [vmem:[#allocation2 + $0x70] sm:$0xff] %vm2896_vm4, %v7466_v9  ;;  %5679 = vpow2.f32 %v1944_v20  ;;  %v7567_v20 = vld [vmem:[#allocation2 + $0x190] sm:$0xff] }
 0x28e   : > { %4003 = vst.msk [vmem:[#allocation2 + $0x78] sm:$0xff] %vm2896_vm4, %v7469_v1  ;;  %2121 = vperm.xlu0 %5658, %v7375_v6   ;;  %v1773_v43 = vpop.xlane.xlu0 %1772  ;;  %5681 = vpow2.f32 %v1950_v0  ;;  %9208 = vst [vmem:[#allocation81_spill] sm:$0xff] %v7567_v20  ;;  %v7594_v0 = vld [vmem:[#allocation2 + $0xa8] sm:$0xff] }
 0x28f   : > { %v1775_v49 = vpop.xlane.xlu1 %1774  ;;  %v7486_v50 = vmax.f32 %v7471_v34, %v1773_v43  ;;  %v7512_v23 = vpop.eup %5671 }
 0x290   : > { %v7489_v18 = vmax.f32 %v7478_v3, %v1775_v49  ;;  %9201 = vst [vmem:[#allocation74_spill] sm:$0xff] %v7512_v23  ;;  %v1911_v3 = vsub.f32 %v7301_v41, %v7313_v21  ;;  %v7554_v41 = vld [vmem:[#allocation2 + $0x98] sm:$0xff] }
 0x291   : > { %2266 = vperm.xlu1 %5657, %v7354_v11   ;;  %4034 = vst.msk [vmem:[#allocation2 + $0x170] sm:$0xff] %vm2896_vm4, %v7486_v50  ;;  %v7519_v43 = vpop.eup %5673 }
 0x292   : > { %9200 = vst [vmem:[#allocation73_spill] sm:$0xff] %v7489_v18  ;;  %4035 = vst.msk [vmem:[#allocation2 + $0x178] sm:$0xff] %vm2896_vm4, %v7489_v18  ;;  %2281 = vperm.xlu0 %5658, %v7393_v47   ;;  %v1713_v49 = vpop.xlane.xlu0 %1712  ;;  %v7540_v8 = vpop.eup %5675 }
 0x293   : > { %v1715_v34 = vpop.xlane.xlu1 %1714  ;;  %v7510_v4 = vmax.f32 %v7491_v46, %v1713_v49  ;;  %9203 = vst [vmem:[#allocation76_spill] sm:$0xff] %v7519_v43  ;;  %v1908_v49 = vsub.f32 %v7263_v22, %v7275_v24  ;;  %9205 = vst [vmem:[#allocation78_spill] sm:$0xff] %v7540_v8  ;;  %v7545_v24 = vld [vmem:[#allocation2 + $0x90] sm:$0xff] }
 0x294   : > { %v7515_v25 = vmax.f32 %v7498_v7, %v1715_v34  ;;  %9206 = vst [vmem:[#allocation79_spill] sm:$0xff] %v7545_v24  ;;  %v7547_v34 = vpop.eup %5677 }
 0x295   : > { %3037 = vperm.xlu1 %5657, %v7512_v23   ;;  %4004 = vst.msk [vmem:[#allocation2 + $0x80] sm:$0xff] %vm2896_vm4, %v7510_v4  ;;  %9207 = vst [vmem:[#allocation80_spill] sm:$0xff] %v7547_v34  ;;  %v2008_v21 = vmul.f32 1.442695, %v1908_v49 }
 0x296   : > { %4005 = vst.msk [vmem:[#allocation2 + $0x88] sm:$0xff] %vm2896_vm4, %v7515_v25  ;;  %3052 = vperm.xlu0 %5658, %v7519_v43   ;;  %v1777_v23 = vpop.xlane.xlu0 %1776  ;;  %v2014_v43 = vmul.f32 1.442695, %v1911_v3 }
 0x297   : > { %v1779_v63 = vpop.xlane.xlu1 %1778  ;;  %v7538_v62 = vmax.f32 %v7517_v27, %v1777_v23  ;;  %5683 = vpow2.f32 %v2008_v21  ;;  %v1881_v21 = vsub.f32 %v7320_v17, %v7333_v14  ;;  %v1910_v17 = vsub.f32 %v7298_v40, %v7310_v36  ;;  %v7639_v36 = vld [vmem:[#allocation2 + $0xb0] sm:$0xff] }
 0x298   : > { %v7543_v22 = vmax.f32 %v7526_v28, %v1779_v63  ;;  %v7574_v63 = vld [vmem:[#allocation2 + $0x198] sm:$0xff]  ;;  %5685 = vpow2.f32 %v2014_v43  ;;  %v1878_v43 = vsub.f32 %v7282_v37, %v7293_v45  ;;  %v7613_v45 = vld [vmem:[#allocation2 + $0x1a0] sm:$0xff]  ;;  %9216 = vst [vmem:[#allocation89_spill] sm:$0xff] %v7639_v36 }
 0x299   : > { %3197 = vperm.xlu1 %5657, %v7540_v8   ;;  %4036 = vst.msk [vmem:[#allocation2 + $0x180] sm:$0xff] %vm2896_vm4, %v7538_v62  ;;  %9209 = vst [vmem:[#allocation82_spill] sm:$0xff] %v7574_v63 }
 0x29a   : > { %4037 = vst.msk [vmem:[#allocation2 + $0x188] sm:$0xff] %vm2896_vm4, %v7543_v22  ;;  %3212 = vperm.xlu0 %5658, %v7547_v34   ;;  %v1717_v23 = vpop.xlane.xlu0 %1716  ;;  %v7587_v34 = vld [vmem:[#allocation2 + $0xa0] sm:$0xff]  ;;  %9212 = vst [vmem:[#allocation85_spill] sm:$0xff] %v7613_v45  ;;  %v1948_v14 = vmul.f32 1.442695, %v1878_v43 }
 0x29b   : > { %v1719_v8 = vpop.xlane.xlu1 %1718  ;;  %v7562_v30 = vmax.f32 %v7545_v24, %v1717_v23  ;;  %9210 = vst [vmem:[#allocation83_spill] sm:$0xff] %v7587_v34  ;;  %v7608_v24 = vpop.eup %5679 }
 0x29c   : > { %v7565_v27 = vmax.f32 %v7554_v41, %v1719_v8  ;;  %9211 = vst [vmem:[#allocation84_spill] sm:$0xff] %v7608_v24  ;;  %5687 = vpow2.f32 %v1948_v14  ;;  %v7659_v14 = vld [vmem:[#allocation2 + $0x1b0] sm:$0xff] }
 0x29d   : > { %2116 = vperm.xlu1 %5657, %v7372_v48   ;;  %4006 = vst.msk [vmem:[#allocation2 + $0x90] sm:$0xff] %vm2896_vm4, %v7562_v30  ;;  %9219 = vst [vmem:[#allocation92_spill] sm:$0xff] %v7659_v14 }
 0x29e   : > { %4007 = vst.msk [vmem:[#allocation2 + $0x98] sm:$0xff] %vm2896_vm4, %v7565_v27  ;;  %2131 = vperm.xlu0 %5658, %v7419_v5   ;;  %v1781_v3 = vpop.xlane.xlu0 %1780 }
 0x29f   : > { %v1783_v8 = vpop.xlane.xlu1 %1782  ;;  %v7582_v23 = vmax.f32 %v7567_v20, %v1781_v3  ;;  %v7615_v3 = vpop.eup %5681 }
 0x2a0   : > { %v7585_v49 = vmax.f32 %v7574_v63, %v1783_v8  ;;  %9213 = vst [vmem:[#allocation86_spill] sm:$0xff] %v7615_v3  ;;  %v7620_v63 = vld [vmem:[#allocation2 + $0x1a8] sm:$0xff] }
 0x2a1   : > { %2276 = vperm.xlu1 %5657, %v7390_v12   ;;  %4038 = vst.msk [vmem:[#allocation2 + $0x190] sm:$0xff] %vm2896_vm4, %v7582_v23  ;;  %9214 = vst [vmem:[#allocation87_spill] sm:$0xff] %v7620_v63  ;;  %v7634_v43 = vpop.eup %5683 }
 0x2a2   : > { %4039 = vst.msk [vmem:[#allocation2 + $0x198] sm:$0xff] %vm2896_vm4, %v7585_v49  ;;  %2291 = vperm.xlu0 %5658, %v7447_v31   ;;  %v1721_v8 = vpop.xlane.xlu0 %1720  ;;  %v1954_v31 = vmul.f32 1.442695, %v1881_v21  ;;  %9215 = vst [vmem:[#allocation88_spill] sm:$0xff] %v7634_v43  ;;  %v7646_v21 = vld [vmem:[#allocation2 + $0xb8] sm:$0xff] }
 0x2a3   : > { %v1723_v20 = vpop.xlane.xlu1 %1722  ;;  %v7606_v28 = vmax.f32 %v7587_v34, %v1721_v8  ;;  %v7641_v8 = vpop.eup %5685  ;;  %9218 = vst [vmem:[#allocation91_spill] sm:$0xff] %v7646_v21 }
 0x2a4   : > { %v7611_v37 = vmax.f32 %v7594_v0, %v1723_v20  ;;  %9217 = vst [vmem:[#allocation90_spill] sm:$0xff] %v7641_v8  ;;  %5689 = vpow2.f32 %v1954_v31 }
 0x2a5   : > { %3047 = vperm.xlu1 %5657, %v7608_v24   ;;  %4008 = vst.msk [vmem:[#allocation2 + $0xa0] sm:$0xff] %vm2896_vm4, %v7606_v28  ;;  %v1913_v24 = vsub.f32 %v7344_v38, %v7357_v16  ;;  %v2012_v38 = vmul.f32 1.442695, %v1910_v17  ;;  %v7664_v17 = vld [vmem:[#allocation2 + $0x1b8] sm:$0xff] }
 0x2a6   : > { %4009 = vst.msk [vmem:[#allocation2 + $0xa8] sm:$0xff] %vm2896_vm4, %v7611_v37  ;;  %3062 = vperm.xlu0 %5658, %v7615_v3   ;;  %v1785_v20 = vpop.xlane.xlu0 %1784  ;;  %9220 = vst [vmem:[#allocation93_spill] sm:$0xff] %v7664_v17 }
 0x2a7   : > { %v1787_v34 = vpop.xlane.xlu1 %1786  ;;  %v7632_v61 = vmax.f32 %v7613_v45, %v1785_v20  ;;  %v2018_v20 = vmul.f32 1.442695, %v1913_v24  ;;  %5691 = vpow2.f32 %v2012_v38  ;;  %v7682_v38 = vld [vmem:[#allocation2 + $0xc8] sm:$0xff] }
 0x2a8   : > { %v7637_v40 = vmax.f32 %v7620_v63, %v1787_v34  ;;  %9222 = vst [vmem:[#allocation95_spill] sm:$0xff] %v7682_v38  ;;  %v7694_v63 = vpop.eup %5687 }
 0x2a9   : > { %3207 = vperm.xlu1 %5657, %v7634_v43   ;;  %4040 = vst.msk [vmem:[#allocation2 + $0x1a0] sm:$0xff] %vm2896_vm4, %v7632_v61  ;;  %5693 = vpow2.f32 %v2018_v20  ;;  %9224 = vst [vmem:[#allocation97_spill] sm:$0xff] %v7694_v63 }
 0x2aa   : > { %4041 = vst.msk [vmem:[#allocation2 + $0x1a8] sm:$0xff] %vm2896_vm4, %v7637_v40  ;;  %3222 = vperm.xlu0 %5658, %v7641_v8   ;;  %v1725_v34 = vpop.xlane.xlu0 %1724  ;;  %v7677_v8 = vld [vmem:[#allocation2 + $0xc0] sm:$0xff] }
 0x2ab   : > { %v1727_v3 = vpop.xlane.xlu1 %1726  ;;  %v7654_v43 = vmax.f32 %v7639_v36, %v1725_v34  ;;  %9221 = vst [vmem:[#allocation94_spill] sm:$0xff] %v7677_v8  ;;  %v7699_v36 = vld [vmem:[#allocation2 + $0x1c0] sm:$0xff] }
 0x2ac   : > { %v7657_v45 = vmax.f32 %v7646_v21, %v1727_v3  ;;  %9225 = vst [vmem:[#allocation98_spill] sm:$0xff] %v7699_v36 }
 0x2ad   : > { %2126 = vperm.xlu1 %5657, %v7414_v39   ;;  %4010 = vst.msk [vmem:[#allocation2 + $0xb0] sm:$0xff] %vm2896_vm4, %v7654_v43 }
 0x2ae   : > { %4011 = vst.msk [vmem:[#allocation2 + $0xb8] sm:$0xff] %vm2896_vm4, %v7657_v45  ;;  %2141 = vperm.xlu0 %5658, %v7469_v1   ;;  %v1789_v24 = vpop.xlane.xlu0 %1788  ;;  %v7701_v31 = vpop.eup %5689 }
 0x2af   : > { %v1791_v3 = vpop.xlane.xlu1 %1790  ;;  %v7672_v34 = vmax.f32 %v7659_v14, %v1789_v24  ;;  %v1883_v24 = vsub.f32 %v7366_v35, %v7375_v6  ;;  %9226 = vst [vmem:[#allocation99_spill] sm:$0xff] %v7701_v31  ;;  %v9228_v35 = vsub.f32 %v7315_v26, %v7330_v15  ;;  %v7726_v26 = vld [vmem:[#allocation2 + $0xd0] sm:$0xff] }
 0x2b0   : > { %v7675_v16 = vmax.f32 %v7664_v17, %v1791_v3  ;;  %v7706_v17 = vld [vmem:[#allocation2 + $0x1c8] sm:$0xff]  ;;  %9230 = vst [vmem:[#allocation102_spill] sm:$0xff] %v7726_v26 }
 0x2b1   : > { %2286 = vperm.xlu1 %5657, %v7442_v2   ;;  %4042 = vst.msk [vmem:[#allocation2 + $0x1b0] sm:$0xff] %vm2896_vm4, %v7672_v34  ;;  %9227 = vst [vmem:[#allocation100_spill] sm:$0xff] %v7706_v17  ;;  %v1952_v6 = vmul.f32 1.442695, %v9228_v35 }
 0x2b2   : > { %4043 = vst.msk [vmem:[#allocation2 + $0x1b8] sm:$0xff] %vm2896_vm4, %v7675_v16  ;;  %2301 = vperm.xlu0 %5658, %v7489_v18   ;;  %v1729_v20 = vpop.xlane.xlu0 %1728 }
 0x2b3   : > { %v1731_v3 = vpop.xlane.xlu1 %1730  ;;  %v7692_v14 = vmax.f32 %v7677_v8, %v1729_v20  ;;  %v1958_v8 = vmul.f32 1.442695, %v1883_v24  ;;  %v7733_v24 = vld [vmem:[#allocation2 + $0xd8] sm:$0xff]  ;;  %5695 = vpow2.f32 %v1952_v6 }
 0x2b4   : > { %v7697_v2 = vmax.f32 %v7682_v38, %v1731_v3  ;;  %9232 = vst [vmem:[#allocation104_spill] sm:$0xff] %v7733_v24 }
 0x2b5   : > { %9223 = vst [vmem:[#allocation96_spill] sm:$0xff] %v7692_v14  ;;  %3057 = vperm.xlu1 %5657, %v7694_v63   ;;  %4012 = vst.msk [vmem:[#allocation2 + $0xc0] sm:$0xff] %vm2896_vm4, %v7692_v14  ;;  %v1915_v63 = vsub.f32 %v7384_v29, %v7393_v47  ;;  %v7721_v14 = vpop.eup %5691  ;;  %v9233_v29 = vsub.f32 %v7335_v13, %v7354_v11  ;;  %5697 = vpow2.f32 %v1958_v8  ;;  %v7749_v11 = vld [vmem:[#allocation2 + $0x1d0] sm:$0xff]  ;;  %v7754_v13 = vld [vmem:[#allocation2 + $0x1d8] sm:$0xff] }
 0x2b6   : > { %4013 = vst.msk [vmem:[#allocation2 + $0xc8] sm:$0xff] %vm2896_vm4, %v7697_v2  ;;  %3072 = vperm.xlu0 %5658, %v7701_v31   ;;  %v1793_v3 = vpop.xlane.xlu0 %1792  ;;  %9229 = vst [vmem:[#allocation101_spill] sm:$0xff] %v7721_v14  ;;  %v7728_v35 = vpop.eup %5693 }
 0x2b7   : > { %v1795_v18 = vpop.xlane.xlu1 %1794  ;;  %v7719_v21 = vmax.f32 %v7699_v36, %v1793_v3  ;;  %9231 = vst [vmem:[#allocation103_spill] sm:$0xff] %v7728_v35  ;;  %v2016_v47 = vmul.f32 1.442695, %v9233_v29  ;;  %v2022_v20 = vmul.f32 1.442695, %v1915_v63  ;;  %9234 = vst [vmem:[#allocation105_spill] sm:$0xff] %v7749_v11 }
 0x2b8   : > { %v7724_v15 = vmax.f32 %v7706_v17, %v1795_v18  ;;  %9235 = vst [vmem:[#allocation106_spill] sm:$0xff] %v7754_v13  ;;  %v7767_v18 = vld [vmem:[#allocation2 + $0xe0] sm:$0xff]  ;;  %v7794_v63 = vld [vmem:[#allocation2 + $0x1e8] sm:$0xff] }
 0x2b9   : > { %3217 = vperm.xlu1 %5657, %v7721_v14   ;;  %4044 = vst.msk [vmem:[#allocation2 + $0x1c0] sm:$0xff] %vm2896_vm4, %v7719_v21  ;;  %5699 = vpow2.f32 %v2016_v47  ;;  %9236 = vst [vmem:[#allocation107_spill] sm:$0xff] %v7767_v18  ;;  %v7772_v47 = vld [vmem:[#allocation2 + $0xe8] sm:$0xff] }
 0x2ba   : > { %4045 = vst.msk [vmem:[#allocation2 + $0x1c8] sm:$0xff] %vm2896_vm4, %v7724_v15  ;;  %3232 = vperm.xlu0 %5658, %v7728_v35   ;;  %v1733_v3 = vpop.xlane.xlu0 %1732  ;;  %5701 = vpow2.f32 %v2022_v20  ;;  %9237 = vst [vmem:[#allocation108_spill] sm:$0xff] %v7772_v47 }
 0x2bb   : > { %v1735_v31 = vpop.xlane.xlu1 %1734  ;;  %v7744_v14 = vmax.f32 %v7726_v26, %v1733_v3  ;;  %v7787_v26 = vld [vmem:[#allocation2 + $0x1e0] sm:$0xff] }
 0x2bc   : > { %v7747_v6 = vmax.f32 %v7733_v24, %v1735_v31 }
 0x2bd   : > { %2136 = vperm.xlu1 %5657, %v7466_v9   ;;  %4014 = vst.msk [vmem:[#allocation2 + $0xd0] sm:$0xff] %vm2896_vm4, %v7744_v14  ;;  %v7782_v35 = vpop.eup %5695 }
 0x2be   : > { %4015 = vst.msk [vmem:[#allocation2 + $0xd8] sm:$0xff] %vm2896_vm4, %v7747_v6  ;;  %2151 = vperm.xlu0 %5658, %v7515_v25   ;;  %v1797_v8 = vpop.xlane.xlu0 %1796  ;;  %9238 = vst [vmem:[#allocation109_spill] sm:$0xff] %v7782_v35 }
 0x2bf   : > { %v1799_v31 = vpop.xlane.xlu1 %1798  ;;  %v7762_v29 = vmax.f32 %v7749_v11, %v1797_v8  ;;  %v7789_v36 = vpop.eup %5697 }
 0x2c0   : > { %v7765_v3 = vmax.f32 %v7754_v13, %v1799_v31  ;;  %9239 = vst [vmem:[#allocation110_spill] sm:$0xff] %v7789_v36 }
 0x2c1   : > { %2296 = vperm.xlu1 %5657, %v7486_v50   ;;  %4046 = vst.msk [vmem:[#allocation2 + $0x1d0] sm:$0xff] %vm2896_vm4, %v7762_v29 }
 0x2c2   : > { %4047 = vst.msk [vmem:[#allocation2 + $0x1d8] sm:$0xff] %vm2896_vm4, %v7765_v3  ;;  %2311 = vperm.xlu0 %5658, %v7543_v22   ;;  %v1737_v20 = vpop.xlane.xlu0 %1736 }
 0x2c3   : > { %v1739_v8 = vpop.xlane.xlu1 %1738  ;;  %v7780_v31 = vmax.f32 %v7767_v18, %v1737_v20  ;;  %v9240_v20 = vsub.f32 %v7359_v10, %v7372_v48  ;;  %v7808_v17 = vpop.eup %5699  ;;  %v7813_v10 = vld [vmem:[#allocation2 + $0xf0] sm:$0xff] }
 0x2c4   : > { %v7785_v11 = vmax.f32 %v7772_v47, %v1739_v8  ;;  %v9241_v47 = vsub.f32 %v7404_v44, %v7419_v5  ;;  %9242 = vst [vmem:[#allocation111_spill] sm:$0xff] %v7808_v17  ;;  %9243 = vst [vmem:[#allocation112_spill] sm:$0xff] %v7813_v10  ;;  %v7815_v48 = vpop.eup %5701  ;;  %v7820_v5 = vld [vmem:[#allocation2 + $0xf8] sm:$0xff]  ;;  %v9245_v44 = vsub.f32 %v7377_v33, %v7390_v12 }
 0x2c5   : > { %3067 = vperm.xlu1 %5657, %v7782_v35   ;;  %4016 = vst.msk [vmem:[#allocation2 + $0xe0] sm:$0xff] %vm2896_vm4, %v7780_v31  ;;  %v1956_v18 = vmul.f32 1.442695, %v9240_v20  ;;  %9244 = vst [vmem:[#allocation113_spill] sm:$0xff] %v7815_v48  ;;  %v7839_v33 = vld [vmem:[#allocation2 + $0x1f8] sm:$0xff] }
 0x2c6   : > { %4017 = vst.msk [vmem:[#allocation2 + $0xe8] sm:$0xff] %vm2896_vm4, %v7785_v11  ;;  %3082 = vperm.xlu0 %5658, %v7789_v36   ;;  %v1801_v8 = vpop.xlane.xlu0 %1800  ;;  %v1962_v13 = vmul.f32 1.442695, %v9241_v47  ;;  %v2020_v47 = vmul.f32 1.442695, %v9245_v44  ;;  %9247 = vst [vmem:[#allocation115_spill] sm:$0xff] %v7839_v33 }
 0x2c7   : > { %v1803_v35 = vpop.xlane.xlu1 %1802  ;;  %v7806_v24 = vmax.f32 %v7787_v26, %v1801_v8  ;;  %5703 = vpow2.f32 %v1956_v18 }
 0x2c8   : > { %v7811_v38 = vmax.f32 %v7794_v63, %v1803_v35  ;;  %5705 = vpow2.f32 %v1962_v13 }
 0x2c9   : > { %3227 = vperm.xlu1 %5657, %v7808_v17   ;;  %4048 = vst.msk [vmem:[#allocation2 + $0x1e0] sm:$0xff] %vm2896_vm4, %v7806_v24  ;;  %v7834_v17 = vld [vmem:[#allocation2 + $0x1f0] sm:$0xff]  ;;  %5707 = vpow2.f32 %v2020_v47  ;;  %v9250_v47 = vsub.f32 %v7458_v19, %v7469_v1 }
 0x2ca   : > { %4049 = vst.msk [vmem:[#allocation2 + $0x1e8] sm:$0xff] %vm2896_vm4, %v7811_v38  ;;  %3242 = vperm.xlu0 %5658, %v7815_v48   ;;  %v1741_v35 = vpop.xlane.xlu0 %1740  ;;  %9246 = vst [vmem:[#allocation114_spill] sm:$0xff] %v7834_v17  ;;  %v9253_v48 = vsub.f32 %v7395_v42, %v7414_v39 }
 0x2cb   : > { %v1743_v20 = vpop.xlane.xlu1 %1742  ;;  %v7829_v8 = vmax.f32 %v7813_v10, %v1741_v35  ;;  %v1966_v35 = vmul.f32 1.442695, %v9250_v47 }
 0x2cc   : > { %v7832_v36 = vmax.f32 %v7820_v5, %v1743_v20 }
 0x2cd   : > { %2146 = vperm.xlu1 %5657, %v7510_v4   ;;  %4018 = vst.msk [vmem:[#allocation2 + $0xf0] sm:$0xff] %vm2896_vm4, %v7829_v8  ;;  %5709 = vpow2.f32 %v1966_v35 }
 0x2ce   : > { %4019 = vst.msk [vmem:[#allocation2 + $0xf8] sm:$0xff] %vm2896_vm4, %v7832_v36  ;;  %2161 = vperm.xlu0 %5658, %v7565_v27   ;;  %v1805_v12 = vpop.xlane.xlu0 %1804 }
 0x2cf   : > { %v1807_v18 = vpop.xlane.xlu1 %1806  ;;  %v7845_v13 = vmax.f32 %v7834_v17, %v1805_v12  ;;  %v1960_v17 = vmul.f32 1.442695, %v9253_v48 }
 0x2d0   : > { %v7848_v44 = vmax.f32 %v7839_v33, %v1807_v18 }
 0x2d1   : > { %9248 = vst [vmem:[#allocation116_spill] sm:$0xff] %v7845_v13  ;;  %2306 = vperm.xlu1 %5657, %v7538_v62   ;;  %4050 = vst.msk [vmem:[#allocation2 + $0x1f0] sm:$0xff] %vm2896_vm4, %v7845_v13  ;;  %v7859_v20 = vpop.eup %5703  ;;  %5711 = vpow2.f32 %v1960_v17 }
 0x2d2   : > { %9249 = vst [vmem:[#allocation117_spill] sm:$0xff] %v7848_v44  ;;  %4051 = vst.msk [vmem:[#allocation2 + $0x1f8] sm:$0xff] %vm2896_vm4, %v7848_v44  ;;  %2321 = vperm.xlu0 %5658, %v7585_v49   ;;  %v7861_v12 = vpop.eup %5705 }
 0x2d3   : > { %9251 = vst [vmem:[#allocation118_spill] sm:$0xff] %v7859_v20  ;;  %9252 = vst [vmem:[#allocation119_spill] sm:$0xff] %v7861_v12  ;;  %v7868_v10 = vpop.eup %5707 }
 0x2d4   : > { %v2072_v18 = vpop.permute.xlu1 %2071  ;;  %9254 = vst [vmem:[#allocation120_spill] sm:$0xff] %v7868_v10 }
 0x2d5   : > { %3077 = vperm.xlu1 %5657, %v7859_v20   ;;  %v2385_v1 = vsub.f32 %v6969_v51, %v2072_v18  ;;  %v9255_v51 = vsub.f32 %v7498_v7, %v7515_v25 }
 0x2d6   : > { %3092 = vperm.xlu0 %5658, %v7861_v12   ;;  %v2232_v33 = vpop.permute.xlu0 %2231 }
 0x2d7   : > { %v2417_v19 = vsub.f32 %v6971_v52, %v2232_v33  ;;  %v2450_v42 = vmul.f32 1.442695, %v2385_v1  ;;  %v1970_v17 = vmul.f32 1.442695, %v9255_v51  ;;  %v7881_v18 = vpop.eup %5709 }
 0x2d8   : > { %9256 = vst [vmem:[#allocation121_spill] sm:$0xff] %v7881_v18 }
 0x2d9   : > { %3237 = vperm.xlu1 %5657, %v7868_v10   ;;  %v2514_v35 = vmul.f32 1.442695, %v2417_v19 }
 0x2da   : > { %2171 = vperm.xlu0 %5658, %v7611_v37   ;;  %v2067_v47 = vpop.permute.xlu0 %2066 }
 0x2db   : > { %v2384_v20 = vsub.f32 %v6974_v53, %v2067_v47  ;;  %v9257_v53 = vsub.f32 %v7449_v32, %v7466_v9  ;;  %v7889_v25 = vpop.eup %5711 }
 0x2dc   : > { %v2227_v39 = vpop.permute.xlu1 %2226  ;;  %9258 = vst [vmem:[#allocation122_spill] sm:$0xff] %v7889_v25 }
 0x2dd   : > { %v2448_v48 = vmul.f32 1.442695, %v2384_v20  ;;  %v2416_v12 = vsub.f32 %v6977_v54, %v2227_v39  ;;  %2156 = vperm.xlu1 %5657, %v7562_v30   ;;  %v1964_v54 = vmul.f32 1.442695, %v9257_v53 }
 0x2de   : > { %2331 = vperm.xlu0 %5658, %v7637_v40   ;;  %v2242_v7 = vpop.permute.xlu0 %2241 }
 0x2df   : > { %5713 = vpow2.f32 %v2448_v48  ;;  %v2512_v52 = vmul.f32 1.442695, %v2416_v12  ;;  %v2419_v19 = vsub.f32 %v6984_v57, %v2242_v7  ;;  %v9259_v48 = vsub.f32 %v7554_v41, %v7565_v27 }
 0x2e0   : > { %5715 = vpow2.f32 %v2450_v42  ;;  %v2082_v33 = vpop.permute.xlu1 %2081  ;;  %v9261_v27 = vsub.f32 %v7491_v46, %v7510_v4 }
 0x2e1   : > { %5717 = vpow2.f32 %v2512_v52  ;;  %2316 = vperm.xlu1 %5657, %v7582_v23   ;;  %v2387_v20 = vsub.f32 %v6979_v55, %v2082_v33 }
 0x2e2   : > { %5719 = vpow2.f32 %v2514_v35  ;;  %3102 = vperm.xlu0 %5658, %v7881_v18   ;;  %v1974_v35 = vmul.f32 1.442695, %v9259_v48  ;;  %v1968_v41 = vmul.f32 1.442695, %v9261_v27 }
 0x2e3   : > { %5721 = vpow2.f32 %v1970_v17  ;;  %v2454_v47 = vmul.f32 1.442695, %v2387_v20 }
 0x2e4   : > { %v2077_v12 = vpop.permute.xlu1 %2076  ;;  %5723 = vpow2.f32 %v1964_v54 }
 0x2e5   : > { %v2386_v1 = vsub.f32 %v6982_v56, %v2077_v12  ;;  %3087 = vperm.xlu1 %5657, %v7889_v25   ;;  %v2518_v56 = vmul.f32 1.442695, %v2419_v19 }
 0x2e6   : > { %2181 = vperm.xlu0 %5658, %v7657_v45  }
 0x2e7   : > { %v2452_v32 = vmul.f32 1.442695, %v2386_v1  ;;  %v9263_v1 = vld [vmem:[#allocation7_spill] sm:$0xff] }
 0x2e8   : > { %v2237_v9 = vpop.permute.xlu1 %2236 }
 0x2e9   : > { %v7895_v55 = vpop.eup %5713  ;;  %5725 = vpow2.f32 %v2452_v32  ;;  %v2418_v42 = vsub.f32 %v6987_v58, %v2237_v9  ;;  %2166 = vperm.xlu1 %5657, %v7606_v28   ;;  %v2252_v33 = vpop.permute.xlu0 %2251  ;;  %v9264_v9 = vld [vmem:[#allocation8_spill] sm:$0xff] }
 0x2ea   : > { %v7899_v39 = vpop.eup %5715  ;;  %5727 = vpow2.f32 %v2454_v47  ;;  %2341 = vperm.xlu0 %5658, %v7675_v16   ;;  %5309 = vmatprep.mubr.f32.mxu0 %v7895_v55  ;;  %v2421_v19 = vsub.f32 %v9263_v1, %v2252_v33 }
 0x2eb   : > { %v7903_v57 = vpop.eup %5717  ;;  %v2516_v51 = vmul.f32 1.442695, %v2418_v42  ;;  %5310 = vmatmul.mubr.f32.vlgmr.msra.gmra.mrb[32].mxu0 %v7899_v39 }
 0x2ec   : > { %v7909_v58 = vpop.eup %5719  ;;  %5389 = vmatprep.mubr.f32.mxu1 %v7903_v57  ;;  %v2092_v17 = vpop.permute.xlu1 %2091 }
 0x2ed   : > { %v7912_v52 = vpop.eup %5721  ;;  %5729 = vpow2.f32 %v2516_v51  ;;  %2326 = vperm.xlu1 %5657, %v7632_v61   ;;  %5390 = vmatmul.mubr.f32.vlgmr.msra.gmra.mrb[32].mxu1 %v7909_v58  ;;  %v2389_v53 = vsub.f32 %v6989_v59, %v2092_v17 }
 0x2ee   : > { %9260 = vst [vmem:[#allocation123_spill] sm:$0xff] %v7912_v52  ;;  %5731 = vpow2.f32 %v2518_v56  ;;  %3112 = vperm.xlu0 %5658, %v7912_v52   ;;  %v7921_v54 = vpop.eup %5723  ;;  %v2522_v56 = vmul.f32 1.442695, %v2421_v19 }
 0x2ef   : > { %5733 = vpow2.f32 %v1974_v35  ;;  %9262 = vst [vmem:[#allocation124_spill] sm:$0xff] %v7921_v54  ;;  %v2458_v47 = vmul.f32 1.442695, %v2389_v53  ;;  %v9266_v35 = vsub.f32 %v7594_v0, %v7611_v37  ;;  %v9270_v0 = vld [vmem:[#allocation9_spill] sm:$0xff] }
 0x2f0   : > { %v2087_v20 = vpop.permute.xlu1 %2086  ;;  %5735 = vpow2.f32 %v1968_v41 }
 0x2f1   : > { %v2388_v7 = vsub.f32 %v6992_v60, %v2087_v20  ;;  %v2262_v12 = vpop.permute.xlu0 %2261  ;;  %3097 = vperm.xlu1 %5657, %v7921_v54   ;;  %v1978_v51 = vmul.f32 1.442695, %v9266_v35  ;;  %v9268_v20 = vld [vmem:[#allocation79_spill] sm:$0xff]  ;;  %v9289_v54 = vld [vmem:[#allocation66_spill] sm:$0xff] }
 0x2f2   : > { %2191 = vperm.xlu0 %5658, %v7697_v2  }
 0x2f3   : > { %v7927_v4 = vpop.eup %5725  ;;  %v2456_v59 = vmul.f32 1.442695, %v2388_v7  ;;  %v9269_v7 = vsub.f32 %v9268_v20, %v7562_v30  ;;  %v9274_v20 = vld [vmem:[#allocation12_spill] sm:$0xff] }
 0x2f4   : > { %v7929_v46 = vpop.eup %5727  ;;  %v2247_v32 = vpop.permute.xlu1 %2246  ;;  %5312 = vmatprep.mubr.f32.mxu0 %v7927_v4 }
 0x2f5   : > { %5737 = vpow2.f32 %v2456_v59  ;;  %v2420_v60 = vsub.f32 %v9264_v9, %v2247_v32  ;;  %v7933_v42 = vpop.permute.xlu0 %3192  ;;  %2176 = vperm.xlu1 %5657, %v7654_v43   ;;  %5313 = vmatmul.mubr.f32.gmra.mrb[34].mxu0 %v7929_v46  ;;  %v1972_v1 = vmul.f32 1.442695, %v9269_v7  ;;  %v9272_v59 = vld [vmem:[#allocation10_spill] sm:$0xff] }
 0x2f6   : > { %9265 = vst [vmem:[#allocation7_spill] sm:$0xff] %v7933_v42  ;;  %5739 = vpow2.f32 %v2458_v47  ;;  %2351 = vperm.xlu0 %5658, %v7724_v15  }
 0x2f7   : > { %v7938_v48 = vpop.eup %5729  ;;  %v2520_v17 = vmul.f32 1.442695, %v2420_v60  ;;  %v9273_v60 = vld [vmem:[#allocation11_spill] sm:$0xff] }
 0x2f8   : > { %v7943_v33 = vpop.eup %5731  ;;  %v2102_v27 = vpop.permute.xlu1 %2101  ;;  %5392 = vmatprep.mubr.f32.mxu1 %v7938_v48  ;;  %v2423_v35 = vsub.f32 %v9273_v60, %v2262_v12  ;;  %v9277_v12 = vld [vmem:[#allocation83_spill] sm:$0xff] }
 0x2f9   : > { %v7946_v41 = vpop.eup %5733  ;;  %5741 = vpow2.f32 %v2520_v17  ;;  %v2112_v53 = vpop.permute.xlu0 %2111  ;;  %2336 = vperm.xlu1 %5657, %v7672_v34   ;;  %5393 = vmatmul.mubr.f32.gmra.mrb[34].mxu1 %v7943_v33  ;;  %v2391_v37 = vsub.f32 %v9270_v0, %v2102_v27 }
 0x2fa   : > { %9267 = vst [vmem:[#allocation8_spill] sm:$0xff] %v7946_v41  ;;  %5743 = vpow2.f32 %v2522_v56  ;;  %3122 = vperm.xlu0 %5658, %v7946_v41   ;;  %v7955_v19 = vpop.eup %5735 }
 0x2fb   : > { %5745 = vpow2.f32 %v1978_v51  ;;  %9271 = vst [vmem:[#allocation79_spill] sm:$0xff] %v7955_v19  ;;  %v2462_v30 = vmul.f32 1.442695, %v2391_v37  ;;  %v2526_v37 = vmul.f32 1.442695, %v2423_v35 }
 0x2fc   : > { %v2097_v47 = vpop.permute.xlu1 %2096  ;;  %5747 = vpow2.f32 %v1972_v1  ;;  %v1892_v1 = vsub.f32 %v9277_v12, %v7606_v28  ;;  %v9285_v12 = vld [vmem:[#allocation13_spill] sm:$0xff] }
 0x2fd   : > { %v2390_v32 = vsub.f32 %v9272_v59, %v2097_v47  ;;  %v7958_v9 = vpop.permute.xlu0 %2271  ;;  %3107 = vperm.xlu1 %5657, %v7955_v19   ;;  %v9276_v47 = vld [vmem:[#allocation96_spill] sm:$0xff] }
 0x2fe   : > { %2201 = vperm.xlu0 %5658, %v7747_v6   ;;  %v1976_v35 = vmul.f32 1.442695, %v1892_v1 }
 0x2ff   : > { %v7963_v56 = vpop.eup %5737  ;;  %v2460_v17 = vmul.f32 1.442695, %v2390_v32  ;;  %v9278_v32 = vld [vmem:[#allocation91_spill] sm:$0xff] }
 0x300   : > { %v7965_v27 = vpop.eup %5739  ;;  %v2257_v51 = vpop.permute.xlu1 %2256  ;;  %5315 = vmatprep.mubr.f32.mxu0 %v7963_v56  ;;  %v9279_v60 = vsub.f32 %v9278_v32, %v7657_v45  ;;  %v2393_v32 = vsub.f32 %v9285_v12, %v2112_v53 }
 0x301   : > { %5749 = vpow2.f32 %v2460_v17  ;;  %v2422_v7 = vsub.f32 %v9274_v20, %v2257_v51  ;;  %v7969_v0 = vpop.permute.xlu0 %3027  ;;  %2186 = vperm.xlu1 %5657, %v9276_v47   ;;  %5316 = vmatmul.mubr.f32.gmra.mrb[36].mxu0 %v7965_v27 }
 0x302   : > { %9275 = vst [vmem:[#allocation9_spill] sm:$0xff] %v7969_v0  ;;  %5751 = vpow2.f32 %v2462_v30  ;;  %2361 = vperm.xlu0 %5658, %v7765_v3   ;;  %v1982_v17 = vmul.f32 1.442695, %v9279_v60  ;;  %v2466_v53 = vmul.f32 1.442695, %v2393_v32  ;;  %v9293_v32 = vld [vmem:[#allocation16_spill] sm:$0xff] }
 0x303   : > { %v7976_v59 = vpop.eup %5741  ;;  %v2524_v51 = vmul.f32 1.442695, %v2422_v7 }
 0x304   : > { %v7981_v20 = vpop.eup %5743  ;;  %v7983_v41 = vpop.permute.xlu1 %3032  ;;  %5395 = vmatprep.mubr.f32.mxu1 %v7976_v59 }
 0x305   : > { %v7986_v52 = vpop.eup %5745  ;;  %5753 = vpow2.f32 %v2524_v51  ;;  %v7988_v28 = vpop.permute.xlu0 %3042  ;;  %2346 = vperm.xlu1 %5657, %v7719_v21   ;;  %5396 = vmatmul.mubr.f32.gmra.mrb[36].mxu1 %v7981_v20 }
 0x306   : > { %9280 = vst [vmem:[#allocation10_spill] sm:$0xff] %v7986_v52  ;;  %9281 = vst [vmem:[#allocation11_spill] sm:$0xff] %v7988_v28  ;;  %5755 = vpow2.f32 %v2526_v37  ;;  %3132 = vperm.xlu0 %5658, %v7986_v52   ;;  %v7993_v45 = vpop.eup %5747  ;;  %v9286_v37 = vld [vmem:[#allocation89_spill] sm:$0xff]  ;;  %v9287_v52 = vld [vmem:[#allocation14_spill] sm:$0xff] }
 0x307   : > { %5757 = vpow2.f32 %v1982_v17  ;;  %9282 = vst [vmem:[#allocation12_spill] sm:$0xff] %v7993_v45  ;;  %v1894_v17 = vsub.f32 %v9286_v37, %v7654_v43  ;;  %v9290_v43 = vld [vmem:[#allocation69_spill] sm:$0xff] }
 0x308   : > { %v7995_v30 = vpop.permute.xlu1 %3187  ;;  %5759 = vpow2.f32 %v1976_v35  ;;  %v9288_v35 = vld [vmem:[#allocation15_spill] sm:$0xff]  ;;  %v9291_v37 = vsub.f32 %v9289_v54, %v9290_v43 }
 0x309   : > { %9283 = vst [vmem:[#allocation96_spill] sm:$0xff] %v7995_v30  ;;  %v7997_v7 = vpop.permute.xlu0 %3202  ;;  %3117 = vperm.xlu1 %5657, %v7993_v45   ;;  %v2425_v12 = vsub.f32 %v9288_v35, %v7958_v9 }
 0x30a   : > { %9284 = vst [vmem:[#allocation83_spill] sm:$0xff] %v7997_v7  ;;  %2211 = vperm.xlu0 %5658, %v7785_v11   ;;  %v2026_v25 = vmul.f32 1.442695, %v9291_v37 }
 0x30b   : > { %v8002_v60 = vpop.eup %5749  ;;  %v2530_v54 = vmul.f32 1.442695, %v2425_v12 }
 0x30c   : > { %v8004_v1 = vpop.eup %5751  ;;  %v2107_v51 = vpop.permute.xlu1 %2106  ;;  %5318 = vmatprep.mubr.f32.mxu0 %v8002_v60 }
 0x30d   : > { %v2392_v18 = vsub.f32 %v9287_v52, %v2107_v51  ;;  %v2122_v19 = vpop.permute.xlu0 %2121  ;;  %2196 = vperm.xlu1 %5657, %v7744_v14   ;;  %5319 = vmatmul.mubr.f32.gmra.mrb[38].mxu0 %v8004_v1  ;;  %v1980_v52 = vmul.f32 1.442695, %v1894_v17  ;;  %v9295_v17 = vld [vmem:[#allocation73_spill] sm:$0xff] }
 0x30e   : > { %2371 = vperm.xlu0 %5658, %v7811_v38  }
 0x30f   : > { %v8015_v45 = vpop.eup %5753  ;;  %v2464_v10 = vmul.f32 1.442695, %v2392_v18  ;;  %v9294_v18 = vld [vmem:[#allocation72_spill] sm:$0xff] }
 0x310   : > { %v8020_v7 = vpop.eup %5755  ;;  %v2267_v51 = vpop.permute.xlu1 %2266  ;;  %5398 = vmatprep.mubr.f32.mxu1 %v8015_v45  ;;  %v9296_v43 = vsub.f32 %v9294_v18, %v9295_v17 }
 0x311   : > { %v8023_v28 = vpop.eup %5757  ;;  %5761 = vpow2.f32 %v2464_v10  ;;  %v2424_v9 = vsub.f32 %v9293_v32, %v2267_v51  ;;  %v2282_v35 = vpop.permute.xlu0 %2281  ;;  %2356 = vperm.xlu1 %5657, %v7762_v29   ;;  %5399 = vmatmul.mubr.f32.gmra.mrb[38].mxu1 %v8020_v7 }
 0x312   : > { %9292 = vst [vmem:[#allocation91_spill] sm:$0xff] %v8023_v28  ;;  %5763 = vpow2.f32 %v2466_v53  ;;  %3142 = vperm.xlu0 %5658, %v8023_v28   ;;  %v2030_v37 = vmul.f32 1.442695, %v9296_v43  ;;  %v8032_v42 = vpop.eup %5759 }
 0x313   : > { %5765 = vpow2.f32 %v2026_v25  ;;  %v2528_v30 = vmul.f32 1.442695, %v2424_v9  ;;  %9297 = vst [vmem:[#allocation13_spill] sm:$0xff] %v8032_v42  ;;  %v9300_v25 = vld [vmem:[#allocation77_spill] sm:$0xff] }
 0x314   : > { %5767 = vpow2.f32 %v1980_v52  ;;  %v8034_v10 = vpop.permute.xlu1 %3037  ;;  %v9301_v53 = vsub.f32 %v9300_v25, %v7543_v22  ;;  %v9304_v52 = vld [vmem:[#allocation17_spill] sm:$0xff]  ;;  %v9307_v22 = vld [vmem:[#allocation64_spill] sm:$0xff]  ;;  %v9308_v25 = vld [vmem:[#allocation67_spill] sm:$0xff] }
 0x315   : > { %9298 = vst [vmem:[#allocation89_spill] sm:$0xff] %v8034_v10  ;;  %5769 = vpow2.f32 %v2528_v30  ;;  %v8036_v51 = vpop.permute.xlu0 %3052  ;;  %3127 = vperm.xlu1 %5657, %v8032_v42   ;;  %v2395_v30 = vsub.f32 %v9304_v52, %v2122_v19  ;;  %v9311_v19 = vld [vmem:[#allocation18_spill] sm:$0xff] }
 0x316   : > { %9299 = vst [vmem:[#allocation14_spill] sm:$0xff] %v8036_v51  ;;  %5771 = vpow2.f32 %v2530_v54  ;;  %2221 = vperm.xlu0 %5658, %v7832_v36   ;;  %v2034_v12 = vmul.f32 1.442695, %v9301_v53  ;;  %v9305_v54 = vld [vmem:[#allocation82_spill] sm:$0xff]  ;;  %v9309_v53 = vsub.f32 %v9307_v22, %v9308_v25  ;;  %v9314_v25 = vld [vmem:[#allocation87_spill] sm:$0xff] }
 0x317   : > { %5773 = vpow2.f32 %v2030_v37  ;;  %v9306_v17 = vsub.f32 %v9305_v54, %v7585_v49  ;;  %v9313_v54 = vld [vmem:[#allocation19_spill] sm:$0xff] }
 0x318   : > { %v8043_v32 = vpop.permute.xlu1 %3197  ;;  %5775 = vpow2.f32 %v2034_v12  ;;  %v2024_v28 = vmul.f32 1.442695, %v9309_v53  ;;  %v2470_v12 = vmul.f32 1.442695, %v2395_v30  ;;  %v9315_v53 = vsub.f32 %v9314_v25, %v7637_v40 }
 0x319   : > { %9302 = vst [vmem:[#allocation15_spill] sm:$0xff] %v8043_v32  ;;  %v8045_v9 = vpop.permute.xlu0 %3212  ;;  %2206 = vperm.xlu1 %5657, %v7780_v31   ;;  %v2038_v43 = vmul.f32 1.442695, %v9306_v17  ;;  %v2427_v17 = vsub.f32 %v9313_v54, %v2282_v35  ;;  %v9316_v32 = vld [vmem:[#allocation71_spill] sm:$0xff]  ;;  %v9319_v54 = vld [vmem:[#allocation20_spill] sm:$0xff] }
 0x31a   : > { %9303 = vst [vmem:[#allocation66_spill] sm:$0xff] %v8045_v9  ;;  %2381 = vperm.xlu0 %5658, %v7848_v44   ;;  %v9317_v10 = vsub.f32 %v9316_v32, %v7486_v50  ;;  %v9320_v50 = vld [vmem:[#allocation93_spill] sm:$0xff] }
 0x31b   : > { %v8050_v18 = vpop.eup %5761  ;;  %5777 = vpow2.f32 %v2038_v43  ;;  %v2534_v40 = vmul.f32 1.442695, %v2427_v17 }
 0x31c   : > { %v8055_v37 = vpop.eup %5763  ;;  %v2117_v42 = vpop.permute.xlu1 %2116  ;;  %5321 = vmatprep.mubr.f32.mxu0 %v8050_v18  ;;  %5779 = vpow2.f32 %v2024_v28  ;;  %v2028_v0 = vmul.f32 1.442695, %v9317_v10  ;;  %v9321_v28 = vsub.f32 %v9320_v50, %v7675_v16  ;;  %v9325_v16 = vld [vmem:[#allocation95_spill] sm:$0xff] }
 0x31d   : > { %v8061_v9 = vpop.eup %5765  ;;  %v2394_v52 = vsub.f32 %v9311_v19, %v2117_v42  ;;  %v8064_v44 = vpop.permute.xlu0 %2131  ;;  %2366 = vperm.xlu1 %5657, %v7806_v24   ;;  %5322 = vmatmul.mubr.f32.gmra.mrb[40].mxu0 %v8055_v37  ;;  %v2042_v42 = vmul.f32 1.442695, %v9315_v53 }
 0x31e   : > { %9310 = vst [vmem:[#allocation69_spill] sm:$0xff] %v8061_v9  ;;  %v8068_v49 = vpop.eup %5767  ;;  %3252 = vperm.xlu0 %5658, %v8061_v9   ;;  %v2046_v10 = vmul.f32 1.442695, %v9321_v28 }
 0x31f   : > { %9312 = vst [vmem:[#allocation16_spill] sm:$0xff] %v8068_v49  ;;  %v8072_v22 = vpop.eup %5769  ;;  %v2468_v19 = vmul.f32 1.442695, %v2394_v52 }
 0x320   : > { %v8077_v51 = vpop.eup %5771  ;;  %v2277_v30 = vpop.permute.xlu1 %2276  ;;  %5401 = vmatprep.mubr.f32.mxu1 %v8072_v22 }
 0x321   : > { %v8083_v35 = vpop.eup %5773  ;;  %5781 = vpow2.f32 %v2468_v19  ;;  %v2426_v43 = vsub.f32 %v9319_v54, %v2277_v30  ;;  %v8086_v9 = vpop.permute.xlu0 %2291  ;;  %3137 = vperm.xlu1 %5657, %v8068_v49   ;;  %5402 = vmatmul.mubr.f32.gmra.mrb[40].mxu1 %v8077_v51  ;;  %v9327_v30 = vld [vmem:[#allocation85_spill] sm:$0xff] }
 0x322   : > { %9318 = vst [vmem:[#allocation72_spill] sm:$0xff] %v8083_v35  ;;  %5783 = vpow2.f32 %v2470_v12  ;;  %3262 = vperm.xlu0 %5658, %v8083_v35   ;;  %v8096_v25 = vpop.eup %5775  ;;  %v9323_v12 = vld [vmem:[#allocation75_spill] sm:$0xff]  ;;  %v1924_v54 = vsub.f32 %v9327_v30, %v7632_v61 }
 0x323   : > { %5785 = vpow2.f32 %v2042_v42  ;;  %v2532_v32 = vmul.f32 1.442695, %v2426_v43  ;;  %9322 = vst [vmem:[#allocation73_spill] sm:$0xff] %v8096_v25  ;;  %v9324_v17 = vsub.f32 %v9323_v12, %v7538_v62 }
 0x324   : > { %5787 = vpow2.f32 %v2028_v0  ;;  %v8094_v52 = vpop.permute.xlu1 %3047  ;;  %v9326_v0 = vsub.f32 %v9325_v16, %v7697_v2  ;;  %v9332_v2 = vld [vmem:[#allocation21_spill] sm:$0xff] }
 0x325   : > { %5789 = vpow2.f32 %v2532_v32  ;;  %v8098_v53 = vpop.permute.xlu0 %3062  ;;  %2216 = vperm.xlu1 %5657, %v7829_v8   ;;  %v2032_v19 = vmul.f32 1.442695, %v9324_v17  ;;  %v8112_v50 = vpop.eup %5777  ;;  %v2397_v12 = vsub.f32 %v9332_v2, %v8064_v44  ;;  %v9333_v17 = vld [vmem:[#allocation100_spill] sm:$0xff]  ;;  %v9337_v44 = vld [vmem:[#allocation22_spill] sm:$0xff] }
 0x326   : > { %5791 = vpow2.f32 %v2534_v40  ;;  %3272 = vperm.xlu0 %5658, %v8096_v25   ;;  %v1986_v42 = vmul.f32 1.442695, %v9326_v0  ;;  %9328 = vst [vmem:[#allocation77_spill] sm:$0xff] %v8112_v50  ;;  %v8117_v62 = vpop.eup %5779  ;;  %v9330_v40 = vld [vmem:[#allocation81_spill] sm:$0xff]  ;;  %v9334_v16 = vsub.f32 %v9333_v17, %v7724_v15  ;;  %v2040_v25 = vmul.f32 1.442695, %v1924_v54 }
 0x327   : > { %5793 = vpow2.f32 %v2046_v10  ;;  %9329 = vst [vmem:[#allocation17_spill] sm:$0xff] %v8117_v62  ;;  %v9331_v10 = vsub.f32 %v9330_v40, %v7582_v23  ;;  %v9339_v54 = vld [vmem:[#allocation23_spill] sm:$0xff] }
 0x328   : > { %v8110_v43 = vpop.permute.xlu1 %3207  ;;  %5795 = vpow2.f32 %v2032_v19  ;;  %v2050_v0 = vmul.f32 1.442695, %v9334_v16  ;;  %v9335_v19 = vld [vmem:[#allocation92_spill] sm:$0xff] }
 0x329   : > { %v8114_v28 = vpop.permute.xlu0 %3222  ;;  %2376 = vperm.xlu1 %5657, %v7845_v13   ;;  %v2036_v32 = vmul.f32 1.442695, %v9331_v10  ;;  %5797 = vpow2.f32 %v1986_v42  ;;  %v1926_v49 = vsub.f32 %v9335_v19, %v7672_v34  ;;  %v2474_v42 = vmul.f32 1.442695, %v2397_v12  ;;  %v9340_v16 = vld [vmem:[#allocation104_spill] sm:$0xff]  ;;  %v9393_v13 = vld [vmem:[#allocation38_spill] sm:$0xff] }
 0x32a   : > { %3282 = vperm.xlu0 %5658, %v8112_v50   ;;  %v2429_v34 = vsub.f32 %v9339_v54, %v8086_v9  ;;  %v9341_v19 = vsub.f32 %v9340_v16, %v7747_v6  ;;  %v9343_v9 = vld [vmem:[#allocation24_spill] sm:$0xff]  ;;  %v9344_v6 = vld [vmem:[#allocation94_spill] sm:$0xff] }
 0x32b   : > { %v8125_v61 = vpop.eup %5781  ;;  %5799 = vpow2.f32 %v2036_v32  ;;  %v2044_v35 = vmul.f32 1.442695, %v1926_v49  ;;  %v9345_v49 = vld [vmem:[#allocation106_spill] sm:$0xff] }
 0x32c   : > { %v8130_v30 = vpop.eup %5783  ;;  %v2127_v23 = vpop.permute.xlu1 %2126  ;;  %5324 = vmatprep.mubr.f32.mxu0 %v8125_v61  ;;  %5801 = vpow2.f32 %v2050_v0  ;;  %v1896_v0 = vsub.f32 %v9344_v6, %v9276_v47 }
 0x32d   : > { %v8135_v40 = vpop.eup %5785  ;;  %v2396_v10 = vsub.f32 %v9337_v44, %v2127_v23  ;;  %v8138_v2 = vpop.permute.xlu0 %2141  ;;  %3247 = vperm.xlu1 %5657, %v8117_v62   ;;  %5325 = vmatmul.mubr.f32.gmra.mrb[42].mxu0 %v8130_v30  ;;  %v1990_v23 = vmul.f32 1.442695, %v9341_v19  ;;  %5803 = vpow2.f32 %v2040_v25  ;;  %v2538_v25 = vmul.f32 1.442695, %v2429_v34 }
 0x32e   : > { %9336 = vst [vmem:[#allocation82_spill] sm:$0xff] %v8135_v40  ;;  %v8142_v15 = vpop.eup %5787  ;;  %3292 = vperm.xlu0 %5658, %v8135_v40  }
 0x32f   : > { %9338 = vst [vmem:[#allocation64_spill] sm:$0xff] %v8142_v15  ;;  %v8147_v17 = vpop.eup %5789  ;;  %v2472_v44 = vmul.f32 1.442695, %v2396_v10  ;;  %v9346_v10 = vsub.f32 %v9345_v49, %v7765_v3  ;;  %v9350_v3 = vld [vmem:[#allocation98_spill] sm:$0xff] }
 0x330   : > { %v8152_v50 = vpop.eup %5791  ;;  %v2287_v62 = vpop.permute.xlu1 %2286  ;;  %5404 = vmatprep.mubr.f32.mxu1 %v8147_v17  ;;  %v1928_v34 = vsub.f32 %v9350_v3, %v7719_v21  ;;  %v9357_v3 = vld [vmem:[#allocation105_spill] sm:$0xff] }
 0x331   : > { %v8155_v32 = vpop.eup %5793  ;;  %5805 = vpow2.f32 %v2472_v44  ;;  %v2428_v12 = vsub.f32 %v9343_v9, %v2287_v62  ;;  %v8158_v54 = vpop.permute.xlu0 %2301  ;;  %3257 = vperm.xlu1 %5657, %v8142_v15   ;;  %5405 = vmatmul.mubr.f32.gmra.mrb[42].mxu1 %v8152_v50  ;;  %v2054_v16 = vmul.f32 1.442695, %v9346_v10  ;;  %v9347_v62 = vld [vmem:[#allocation108_spill] sm:$0xff] }
 0x332   : > { %9342 = vst [vmem:[#allocation67_spill] sm:$0xff] %v8155_v32  ;;  %5807 = vpow2.f32 %v2474_v42  ;;  %3302 = vperm.xlu0 %5658, %v8155_v32   ;;  %v1901_v19 = vsub.f32 %v9347_v62, %v7785_v11  ;;  %v8170_v9 = vpop.eup %5795  ;;  %v1984_v42 = vmul.f32 1.442695, %v1896_v0  ;;  %v1903_v62 = vsub.f32 %v7820_v5, %v7832_v36 }
 0x333   : > { %5809 = vpow2.f32 %v1990_v23  ;;  %v2536_v44 = vmul.f32 1.442695, %v2428_v12  ;;  %9348 = vst [vmem:[#allocation18_spill] sm:$0xff] %v8170_v9  ;;  %v8174_v15 = vpop.eup %5797  ;;  %v9352_v12 = vld [vmem:[#allocation102_spill] sm:$0xff] }
 0x334   : > { %5811 = vpow2.f32 %v2044_v35  ;;  %v8172_v40 = vpop.permute.xlu1 %3057  ;;  %9349 = vst [vmem:[#allocation19_spill] sm:$0xff] %v8174_v15  ;;  %v1994_v11 = vmul.f32 1.442695, %v1901_v19  ;;  %v1933_v35 = vsub.f32 %v7794_v63, %v7811_v38  ;;  %v1898_v6 = vsub.f32 %v9352_v12, %v7744_v14 }
 0x335   : > { %5813 = vpow2.f32 %v2536_v44  ;;  %v8176_v47 = vpop.permute.xlu0 %3072  ;;  %3267 = vperm.xlu1 %5657, %v8170_v9   ;;  %v8184_v23 = vpop.eup %5799  ;;  %v1930_v12 = vsub.f32 %v9357_v3, %v7762_v29 }
 0x336   : > { %5815 = vpow2.f32 %v2538_v25  ;;  %3152 = vperm.xlu0 %5658, %v8174_v15   ;;  %9351 = vst [vmem:[#allocation87_spill] sm:$0xff] %v8184_v23  ;;  %v8190_v10 = vpop.eup %5801  ;;  %v2048_v25 = vmul.f32 1.442695, %v1928_v34  ;;  %v2058_v14 = vmul.f32 1.442695, %v1933_v35 }
 0x337   : > { %5817 = vpow2.f32 %v2054_v16  ;;  %9353 = vst [vmem:[#allocation71_spill] sm:$0xff] %v8190_v10  ;;  %v8195_v21 = vpop.eup %5803  ;;  %v9356_v16 = vld [vmem:[#allocation25_spill] sm:$0xff]  ;;  %v1988_v44 = vmul.f32 1.442695, %v1898_v6  ;;  %v1998_v6 = vmul.f32 1.442695, %v1903_v62 }
 0x338   : > { %v8188_v49 = vpop.permute.xlu1 %3217  ;;  %9355 = vst [vmem:[#allocation93_spill] sm:$0xff] %v8195_v21  ;;  %5819 = vpow2.f32 %v1984_v42  ;;  %v2399_v38 = vsub.f32 %v9356_v16, %v8138_v2  ;;  %v9359_v2 = vld [vmem:[#allocation26_spill] sm:$0xff] }
 0x339   : > { %v8192_v0 = vpop.permute.xlu0 %3232  ;;  %3277 = vperm.xlu1 %5657, %v8184_v23   ;;  %5821 = vpow2.f32 %v1994_v11  ;;  %v9361_v11 = vld [vmem:[#allocation27_spill] sm:$0xff] }
 0x33a   : > { %9354 = vst [vmem:[#allocation20_spill] sm:$0xff] %v8192_v0  ;;  %3312 = vperm.xlu0 %5658, %v8190_v10   ;;  %5823 = vpow2.f32 %v2048_v25  ;;  %v2478_v5 = vmul.f32 1.442695, %v2399_v38  ;;  %v2431_v29 = vsub.f32 %v9361_v11, %v8158_v54  ;;  %v9363_v25 = vld [vmem:[#allocation28_spill] sm:$0xff] }
 0x33b   : > { %v8200_v63 = vpop.eup %5805  ;;  %5825 = vpow2.f32 %v2058_v14  ;;  %v9364_v14 = vld [vmem:[#allocation107_spill] sm:$0xff] }
 0x33c   : > { %v8204_v19 = vpop.eup %5807  ;;  %v2137_v42 = vpop.permute.xlu1 %2136  ;;  %5327 = vmatprep.mubr.f32.mxu0 %v8200_v63  ;;  %5827 = vpow2.f32 %v1988_v44  ;;  %v1900_v62 = vsub.f32 %v9364_v14, %v7780_v31  ;;  %v1932_v31 = vsub.f32 %v7787_v26, %v7806_v24  ;;  %v9375_v24 = vld [vmem:[#allocation29_spill] sm:$0xff] }
 0x33d   : > { %v8209_v34 = vpop.eup %5809  ;;  %v2398_v16 = vsub.f32 %v9359_v2, %v2137_v42  ;;  %v8212_v10 = vpop.permute.xlu0 %2151  ;;  %3287 = vperm.xlu1 %5657, %v8195_v21   ;;  %5328 = vmatmul.mubr.f32.gmra.mrb[44].mxu0 %v8204_v19  ;;  %v2052_v2 = vmul.f32 1.442695, %v1930_v12 }
 0x33e   : > { %9358 = vst [vmem:[#allocation75_spill] sm:$0xff] %v8209_v34  ;;  %v8216_v36 = vpop.eup %5811  ;;  %3162 = vperm.xlu0 %5658, %v8209_v34   ;;  %v2056_v26 = vmul.f32 1.442695, %v1932_v31  ;;  %v9377_v34 = vld [vmem:[#allocation30_spill] sm:$0xff]  ;;  %v9379_v31 = vld [vmem:[#allocation31_spill] sm:$0xff] }
 0x33f   : > { %9360 = vst [vmem:[#allocation95_spill] sm:$0xff] %v8216_v36  ;;  %v8221_v35 = vpop.eup %5813  ;;  %v2476_v3 = vmul.f32 1.442695, %v2398_v16  ;;  %v2542_v16 = vmul.f32 1.442695, %v2431_v29  ;;  %v9370_v29 = vld [vmem:[#allocation112_spill] sm:$0xff] }
 0x340   : > { %v8223_v42 = vpop.eup %5815  ;;  %v2297_v15 = vpop.permute.xlu1 %2296  ;;  %5407 = vmatprep.mubr.f32.mxu1 %v8221_v35 }
 0x341   : > { %v8226_v32 = vpop.eup %5817  ;;  %5829 = vpow2.f32 %v2476_v3  ;;  %v2430_v38 = vsub.f32 %v9363_v25, %v2297_v15  ;;  %v2312_v54 = vpop.permute.xlu0 %2311  ;;  %3297 = vperm.xlu1 %5657, %v8216_v36   ;;  %5408 = vmatmul.mubr.f32.gmra.mrb[44].mxu1 %v8223_v42  ;;  %v1992_v25 = vmul.f32 1.442695, %v1900_v62 }
 0x342   : > { %9362 = vst [vmem:[#allocation85_spill] sm:$0xff] %v8226_v32  ;;  %5831 = vpow2.f32 %v2478_v5  ;;  %3322 = vperm.xlu0 %5658, %v8226_v32   ;;  %v8234_v12 = vpop.eup %5819 }
 0x343   : > { %5833 = vpow2.f32 %v1998_v6  ;;  %v2540_v44 = vmul.f32 1.442695, %v2430_v38  ;;  %9365 = vst [vmem:[#allocation81_spill] sm:$0xff] %v8234_v12  ;;  %v8238_v15 = vpop.eup %5821  ;;  %v1902_v6 = vsub.f32 %v9370_v29, %v7829_v8 }
 0x344   : > { %5835 = vpow2.f32 %v2052_v2  ;;  %v8236_v11 = vpop.permute.xlu1 %3067  ;;  %9367 = vst [vmem:[#allocation100_spill] sm:$0xff] %v8238_v15  ;;  %v8246_v5 = vpop.eup %5823 }
 0x345   : > { %9366 = vst [vmem:[#allocation21_spill] sm:$0xff] %v8236_v11  ;;  %5837 = vpow2.f32 %v2540_v44  ;;  %v8240_v3 = vpop.permute.xlu0 %3082  ;;  %3147 = vperm.xlu1 %5657, %v8234_v12   ;;  %9369 = vst [vmem:[#allocation22_spill] sm:$0xff] %v8246_v5  ;;  %v8252_v38 = vpop.eup %5825  ;;  %v1996_v29 = vmul.f32 1.442695, %v1902_v6 }
 0x346   : > { %9368 = vst [vmem:[#allocation92_spill] sm:$0xff] %v8240_v3  ;;  %5839 = vpow2.f32 %v2542_v16  ;;  %3172 = vperm.xlu0 %5658, %v8238_v15   ;;  %9372 = vst [vmem:[#allocation104_spill] sm:$0xff] %v8252_v38  ;;  %v8257_v62 = vpop.eup %5827  ;;  %v2401_v16 = vsub.f32 %v9375_v24, %v8212_v10  ;;  %v2433_v24 = vsub.f32 %v9379_v31, %v2312_v54 }
 0x347   : > { %9374 = vst [vmem:[#allocation94_spill] sm:$0xff] %v8257_v62  ;;  %5841 = vpow2.f32 %v1992_v25 }
 0x348   : > { %v8250_v2 = vpop.permute.xlu1 %3227  ;;  %5843 = vpow2.f32 %v2056_v26  ;;  %v2482_v25 = vmul.f32 1.442695, %v2401_v16  ;;  %v2546_v54 = vmul.f32 1.442695, %v2433_v24 }
 0x349   : > { %9371 = vst [vmem:[#allocation23_spill] sm:$0xff] %v8250_v2  ;;  %v8254_v14 = vpop.permute.xlu0 %3242  ;;  %3307 = vperm.xlu1 %5657, %v8246_v5   ;;  %5845 = vpow2.f32 %v1996_v29 }
 0x34a   : > { %9373 = vst [vmem:[#allocation24_spill] sm:$0xff] %v8254_v14  ;;  %3332 = vperm.xlu0 %5658, %v8252_v38   ;;  %v9390_v14 = vld [vmem:[#allocation36_spill] sm:$0xff] }
 0x34b   : > { %v8262_v44 = vpop.eup %5829 }
 0x34c   : > { %v8264_v8 = vpop.eup %5831  ;;  %v2147_v15 = vpop.permute.xlu1 %2146  ;;  %5330 = vmatprep.mubr.f32.mxu0 %v8262_v44 }
 0x34d   : > { %v8267_v32 = vpop.eup %5833  ;;  %v2400_v5 = vsub.f32 %v9377_v34, %v2147_v15  ;;  %v2162_v12 = vpop.permute.xlu0 %2161  ;;  %3157 = vperm.xlu1 %5657, %v8257_v62   ;;  %5331 = vmatmul.mubr.f32.gmra.mrb[46].mxu0 %v8264_v8  ;;  %v9380_v15 = vld [vmem:[#allocation32_spill] sm:$0xff] }
 0x34e   : > { %9376 = vst [vmem:[#allocation106_spill] sm:$0xff] %v8267_v32  ;;  %v8272_v10 = vpop.eup %5835  ;;  %3182 = vperm.xlu0 %5658, %v8267_v32  }
 0x34f   : > { %9378 = vst [vmem:[#allocation108_spill] sm:$0xff] %v8272_v10  ;;  %v8276_v6 = vpop.eup %5837  ;;  %v2480_v38 = vmul.f32 1.442695, %v2400_v5 }
 0x350   : > { %v8278_v36 = vpop.eup %5839  ;;  %v2307_v34 = vpop.permute.xlu1 %2306  ;;  %5410 = vmatprep.mubr.f32.mxu1 %v8276_v6 }
 0x351   : > { %5847 = vpow2.f32 %v2480_v38  ;;  %v2432_v62 = vsub.f32 %v9380_v15, %v2307_v34  ;;  %v2322_v21 = vpop.permute.xlu0 %2321  ;;  %3317 = vperm.xlu1 %5657, %v8272_v10   ;;  %5411 = vmatmul.mubr.f32.gmra.mrb[46].mxu1 %v8278_v36  ;;  %v8284_v16 = vpop.eup %5841 }
 0x352   : > { %5849 = vpow2.f32 %v2482_v25  ;;  %9381 = vst [vmem:[#allocation98_spill] sm:$0xff] %v8284_v16  ;;  %v8291_v38 = vpop.eup %5843 }
 0x353   : > { %v2544_v26 = vmul.f32 1.442695, %v2432_v62  ;;  %9384 = vst [vmem:[#allocation105_spill] sm:$0xff] %v8291_v38  ;;  %v8296_v25 = vpop.eup %5845  ;;  %v9387_v62 = vld [vmem:[#allocation33_spill] sm:$0xff] }
 0x354   : > { %v8286_v5 = vpop.permute.xlu1 %3077  ;;  %9386 = vst [vmem:[#allocation27_spill] sm:$0xff] %v8296_v25  ;;  %v2403_v24 = vsub.f32 %v9387_v62, %v2162_v12 }
 0x355   : > { %9382 = vst [vmem:[#allocation102_spill] sm:$0xff] %v8286_v5  ;;  %5851 = vpow2.f32 %v2544_v26  ;;  %v8288_v29 = vpop.permute.xlu0 %3092  ;;  %3167 = vperm.xlu1 %5657, %v8284_v16   ;;  %v9388_v16 = vld [vmem:[#allocation34_spill] sm:$0xff] }
 0x356   : > { %9383 = vst [vmem:[#allocation25_spill] sm:$0xff] %v8288_v29  ;;  %5853 = vpow2.f32 %v2546_v54  ;;  %v2486_v23 = vmul.f32 1.442695, %v2403_v24 }
 0x358   : > { %v8293_v31 = vpop.permute.xlu1 %3237 }
 0x359   : > { %9385 = vst [vmem:[#allocation26_spill] sm:$0xff] %v8293_v31  ;;  %v2172_v34 = vpop.permute.xlu0 %2171  ;;  %3327 = vperm.xlu1 %5657, %v8291_v38   ;;  %v9389_v38 = vld [vmem:[#allocation35_spill] sm:$0xff] }
 0x35a   : > { %v2435_v9 = vsub.f32 %v9389_v38, %v2322_v21  ;;  %v9392_v38 = vld [vmem:[#allocation37_spill] sm:$0xff] }
 0x35b   : > { %v8299_v15 = vpop.eup %5847 }
 0x35c   : > { %v8301_v32 = vpop.eup %5849  ;;  %v2157_v26 = vpop.permute.xlu1 %2156  ;;  %5333 = vmatprep.mubr.f32.mxu0 %v8299_v15 }
 0x35d   : > { %v2402_v54 = vsub.f32 %v9388_v16, %v2157_v26  ;;  %v2332_v10 = vpop.permute.xlu0 %2331  ;;  %3177 = vperm.xlu1 %5657, %v8296_v25   ;;  %5334 = vmatmul.mubr.f32.gmra.mrb[48].mxu0 %v8301_v32  ;;  %v2550_v26 = vmul.f32 1.442695, %v2435_v9 }
 0x35f   : > { %v8308_v29 = vpop.eup %5851  ;;  %v2484_v12 = vmul.f32 1.442695, %v2402_v54  ;;  %v2405_v54 = vsub.f32 %v9392_v38, %v2172_v34 }
 0x360   : > { %v8310_v62 = vpop.eup %5853  ;;  %v2317_v31 = vpop.permute.xlu1 %2316  ;;  %5413 = vmatprep.mubr.f32.mxu1 %v8308_v29 }
 0x361   : > { %5855 = vpow2.f32 %v2484_v12  ;;  %v2434_v5 = vsub.f32 %v9390_v14, %v2317_v31  ;;  %v8314_v16 = vpop.permute.xlu0 %3102  ;;  %5414 = vmatmul.mubr.f32.gmra.mrb[48].mxu1 %v8310_v62  ;;  %v2490_v0 = vmul.f32 1.442695, %v2405_v54  ;;  %v9394_v14 = vld [vmem:[#allocation39_spill] sm:$0xff]  ;;  %v9399_v54 = vld [vmem:[#allocation42_spill] sm:$0xff] }
 0x362   : > { %9391 = vst [vmem:[#allocation28_spill] sm:$0xff] %v8314_v16  ;;  %5857 = vpow2.f32 %v2486_v23  ;;  %v2437_v31 = vsub.f32 %v9394_v14, %v2332_v10 }
 0x363   : > { %v2548_v24 = vmul.f32 1.442695, %v2434_v5  ;;  %v9395_v5 = vld [vmem:[#allocation40_spill] sm:$0xff] }
 0x364   : > { %v8317_v25 = vpop.permute.xlu1 %3087 }
 0x365   : > { %5859 = vpow2.f32 %v2548_v24  ;;  %v2182_v21 = vpop.permute.xlu0 %2181 }
 0x366   : > { %5861 = vpow2.f32 %v2550_v26 }
 0x368   : > { %v2167_v3 = vpop.permute.xlu1 %2166 }
 0x369   : > { %v2404_v2 = vsub.f32 %v9393_v13, %v2167_v3  ;;  %v2342_v12 = vpop.permute.xlu0 %2341  ;;  %v2554_v13 = vmul.f32 1.442695, %v2437_v31 }
 0x36b   : > { %v8322_v16 = vpop.eup %5855  ;;  %v2488_v11 = vmul.f32 1.442695, %v2404_v2 }
 0x36c   : > { %v8324_v23 = vpop.eup %5857  ;;  %v2327_v9 = vpop.permute.xlu1 %2326  ;;  %5336 = vmatprep.mubr.f32.mxu0 %v8322_v16 }
 0x36d   : > { %5863 = vpow2.f32 %v2488_v11  ;;  %v2436_v26 = vsub.f32 %v9395_v5, %v2327_v9  ;;  %2706 = vadd.xlane.f32.xlu0 %v7899_v39  ;;  %v8329_v34 = vpop.permute.xlu0 %3112  ;;  %5337 = vmatmul.mubr.f32.gmra.mrb[50].mxu0 %v8324_v23  ;;  %v9398_v39 = vld [vmem:[#allocation41_spill] sm:$0xff] }
 0x36e   : > { %9396 = vst [vmem:[#allocation107_spill] sm:$0xff] %v8329_v34  ;;  %5865 = vpow2.f32 %v2490_v0  ;;  %v2407_v38 = vsub.f32 %v9398_v39, %v2182_v21 }
 0x36f   : > { %v8332_v3 = vpop.eup %5859  ;;  %v2552_v10 = vmul.f32 1.442695, %v2436_v26  ;;  %v9400_v26 = vld [vmem:[#allocation43_spill] sm:$0xff] }
 0x370   : > { %v8334_v2 = vpop.eup %5861  ;;  %v8336_v24 = vpop.permute.xlu1 %3097  ;;  %5416 = vmatprep.mubr.f32.mxu1 %v8332_v3  ;;  %v2494_v5 = vmul.f32 1.442695, %v2407_v38  ;;  %v2439_v34 = vsub.f32 %v9400_v26, %v2342_v12 }
 0x371   : > { %9397 = vst [vmem:[#allocation112_spill] sm:$0xff] %v8336_v24  ;;  %5867 = vpow2.f32 %v2552_v10  ;;  %2768 = vadd.xlane.f32.xlu0 %v7903_v57  ;;  %v2192_v11 = vpop.permute.xlu0 %2191  ;;  %5417 = vmatmul.mubr.f32.gmra.mrb[50].mxu1 %v8334_v2 }
 0x372   : > { %5869 = vpow2.f32 %v2554_v13  ;;  %v9401_v13 = vld [vmem:[#allocation44_spill] sm:$0xff]  ;;  %v2558_v38 = vmul.f32 1.442695, %v2439_v34 }
 0x374   : > { %v2177_v0 = vpop.permute.xlu1 %2176 }
 0x375   : > { %v2406_v14 = vsub.f32 %v9399_v54, %v2177_v0  ;;  %2708 = vadd.xlane.f32.xlu0 %v7927_v4  ;;  %v2352_v31 = vpop.permute.xlu0 %2351 }
 0x377   : > { %v8344_v9 = vpop.eup %5863  ;;  %v2492_v10 = vmul.f32 1.442695, %v2406_v14 }
 0x378   : > { %v8347_v24 = vpop.eup %5865  ;;  %v2337_v57 = vpop.permute.xlu1 %2336  ;;  %5339 = vmatprep.mubr.f32.mxu0 %v8344_v9 }
 0x379   : > { %5871 = vpow2.f32 %v2492_v10  ;;  %v2438_v21 = vsub.f32 %v9401_v13, %v2337_v57  ;;  %2772 = vadd.xlane.f32.xlu0 %v7938_v48  ;;  %v8352_v39 = vpop.permute.xlu0 %3122  ;;  %5340 = vmatmul.mubr.f32.gmra.mrb[52].mxu0 %v8347_v24  ;;  %v9404_v48 = vld [vmem:[#allocation45_spill] sm:$0xff]  ;;  %v9405_v57 = vld [vmem:[#allocation46_spill] sm:$0xff] }
 0x37a   : > { %9402 = vst [vmem:[#allocation29_spill] sm:$0xff] %v8352_v39  ;;  %5873 = vpow2.f32 %v2494_v5  ;;  %v2409_v26 = vsub.f32 %v9404_v48, %v2192_v11  ;;  %v9407_v11 = vld [vmem:[#allocation48_spill] sm:$0xff] }
 0x37b   : > { %v8355_v4 = vpop.eup %5867  ;;  %v2556_v12 = vmul.f32 1.442695, %v2438_v21 }
 0x37c   : > { %v8357_v0 = vpop.eup %5869  ;;  %v8359_v54 = vpop.permute.xlu1 %3107  ;;  %5419 = vmatprep.mubr.f32.mxu1 %v8355_v4  ;;  %v2498_v21 = vmul.f32 1.442695, %v2409_v26 }
 0x37d   : > { %9403 = vst [vmem:[#allocation30_spill] sm:$0xff] %v8359_v54  ;;  %5875 = vpow2.f32 %v2556_v12  ;;  %2712 = vadd.xlane.f32.xlu0 %v7963_v56  ;;  %v2202_v14 = vpop.permute.xlu0 %2201  ;;  %5420 = vmatmul.mubr.f32.gmra.mrb[52].mxu1 %v8357_v0  ;;  %v9406_v12 = vld [vmem:[#allocation47_spill] sm:$0xff] }
 0x37e   : > { %5877 = vpow2.f32 %v2558_v38  ;;  %v2441_v39 = vsub.f32 %v9406_v12, %v2352_v31 }
 0x380   : > { %v2187_v10 = vpop.permute.xlu1 %2186  ;;  %v2562_v31 = vmul.f32 1.442695, %v2441_v39  ;;  %v9409_v39 = vld [vmem:[#allocation50_spill] sm:$0xff] }
 0x381   : > { %v2408_v5 = vsub.f32 %v9405_v57, %v2187_v10  ;;  %2776 = vadd.xlane.f32.xlu0 %v7976_v59  ;;  %v2362_v34 = vpop.permute.xlu0 %2361  ;;  %2770 = vadd.xlane.f32.xlu1 %v7909_v58 }
 0x383   : > { %v8368_v13 = vpop.eup %5871  ;;  %v2496_v56 = vmul.f32 1.442695, %v2408_v5 }
 0x384   : > { %v2347_v54 = vpop.permute.xlu1 %2346  ;;  %5342 = vmatprep.mubr.f32.mxu0 %v8368_v13  ;;  %v8372_v38 = vpop.eup %5873 }
 0x385   : > { %5879 = vpow2.f32 %v2496_v56  ;;  %v2440_v48 = vsub.f32 %v9407_v11, %v2347_v54  ;;  %2716 = vadd.xlane.f32.xlu0 %v8002_v60  ;;  %2704 = vadd.xlane.f32.xlu1 %v7895_v55  ;;  %v8377_v59 = vpop.permute.xlu0 %3132  ;;  %v9408_v55 = vld [vmem:[#allocation49_spill] sm:$0xff]  ;;  %v9410_v11 = vld [vmem:[#allocation51_spill] sm:$0xff] }
 0x386   : > { %5343 = vmatmul.mubr.f32.gmra.mrb[54].mxu0 %v8372_v38  ;;  %5881 = vpow2.f32 %v2498_v21  ;;  %v2411_v60 = vsub.f32 %v9408_v55, %v2202_v14  ;;  %v9411_v14 = vld [vmem:[#allocation52_spill] sm:$0xff] }
 0x387   : > { %v8380_v58 = vpop.eup %5875  ;;  %v2560_v26 = vmul.f32 1.442695, %v2440_v48 }
 0x388   : > { %v8382_v10 = vpop.permute.xlu1 %3117  ;;  %5422 = vmatprep.mubr.f32.mxu1 %v8380_v58  ;;  %v8385_v57 = vpop.eup %5877  ;;  %v2502_v56 = vmul.f32 1.442695, %v2411_v60 }
 0x389   : > { %5883 = vpow2.f32 %v2560_v26  ;;  %2780 = vadd.xlane.f32.xlu0 %v8015_v45  ;;  %2710 = vadd.xlane.f32.xlu1 %v7929_v46  ;;  %v2212_v54 = vpop.permute.xlu0 %2211  ;;  %v2443_v45 = vsub.f32 %v9410_v11, %v2362_v34 }
 0x38a   : > { %5423 = vmatmul.mubr.f32.gmra.mrb[54].mxu1 %v8385_v57  ;;  %5885 = vpow2.f32 %v2562_v31 }
 0x38b   : > { %v2566_v34 = vmul.f32 1.442695, %v2443_v45 }
 0x38c   : > { %v2197_v5 = vpop.permute.xlu1 %2196 }
 0x38d   : > { %v2410_v21 = vsub.f32 %v9409_v39, %v2197_v5  ;;  %2720 = vadd.xlane.f32.xlu0 %v8050_v18  ;;  %2774 = vadd.xlane.f32.xlu1 %v7943_v33  ;;  %v2372_v18 = vpop.permute.xlu0 %2371 }
 0x38f   : > { %v8394_v12 = vpop.eup %5879  ;;  %v2500_v48 = vmul.f32 1.442695, %v2410_v21 }
 0x390   : > { %v2357_v46 = vpop.permute.xlu1 %2356  ;;  %5345 = vmatprep.mubr.f32.mxu0 %v8394_v12  ;;  %v8398_v31 = vpop.eup %5881 }
 0x391   : > { %5887 = vpow2.f32 %v2500_v48  ;;  %v2442_v26 = vsub.f32 %v9411_v14, %v2357_v46  ;;  %2784 = vadd.xlane.f32.xlu0 %v8072_v22  ;;  %2714 = vadd.xlane.f32.xlu1 %v7965_v27  ;;  %v9412_v27 = vld [vmem:[#allocation53_spill] sm:$0xff]  ;;  %v8415_v39 = vpop.permute.xlu0 %3142 }
 0x392   : > { %5346 = vmatmul.mubr.f32.gmra.mrb[56].mxu0 %v8398_v31  ;;  %5889 = vpow2.f32 %v2502_v56  ;;  %v2413_v22 = vsub.f32 %v9412_v27, %v2212_v54  ;;  %v9413_v56 = vld [vmem:[#allocation54_spill] sm:$0xff]  ;;  %v9415_v54 = vld [vmem:[#allocation56_spill] sm:$0xff] }
 0x393   : > { %v8404_v33 = vpop.eup %5883  ;;  %v2564_v55 = vmul.f32 1.442695, %v2442_v26 }
 0x394   : > { %v8406_v60 = vpop.permute.xlu1 %3127  ;;  %5425 = vmatprep.mubr.f32.mxu1 %v8404_v33  ;;  %v8409_v5 = vpop.eup %5885  ;;  %v2506_v48 = vmul.f32 1.442695, %v2413_v22 }
 0x395   : > { %5891 = vpow2.f32 %v2564_v55  ;;  %2724 = vadd.xlane.f32.xlu0 %v8125_v61  ;;  %2778 = vadd.xlane.f32.xlu1 %v7981_v20  ;;  %v9414_v61 = vld [vmem:[#allocation55_spill] sm:$0xff] }
 0x396   : > { %5426 = vmatmul.mubr.f32.gmra.mrb[56].mxu1 %v8409_v5  ;;  %5893 = vpow2.f32 %v2566_v34  ;;  %v2445_v46 = vsub.f32 %v9414_v61, %v2372_v18 }
 0x398   : > { %v2207_v21 = vpop.permute.xlu1 %2206  ;;  %v2570_v18 = vmul.f32 1.442695, %v2445_v46 }
 0x399   : > { %v2412_v11 = vsub.f32 %v9413_v56, %v2207_v21  ;;  %2788 = vadd.xlane.f32.xlu0 %v8147_v17  ;;  %2718 = vadd.xlane.f32.xlu1 %v8004_v1  ;;  %v2222_v17 = vpop.permute.xlu0 %2221 }
 0x39b   : > { %v8420_v45 = vpop.eup %5887  ;;  %v2504_v20 = vmul.f32 1.442695, %v2412_v11  ;;  %v9417_v11 = vld [vmem:[#allocation58_spill] sm:$0xff] }
 0x39c   : > { %v2367_v14 = vpop.permute.xlu1 %2366  ;;  %5348 = vmatprep.mubr.f32.mxu0 %v8420_v45  ;;  %v8424_v26 = vpop.eup %5889 }
 0x39d   : > { %5895 = vpow2.f32 %v2504_v20  ;;  %v2444_v34 = vsub.f32 %v9415_v54, %v2367_v14  ;;  %2728 = vadd.xlane.f32.xlu0 %v8200_v63  ;;  %2782 = vadd.xlane.f32.xlu1 %v8020_v7  ;;  %v9416_v7 = vld [vmem:[#allocation57_spill] sm:$0xff]  ;;  %v2382_v21 = vpop.permute.xlu0 %2381  ;;  %v9418_v20 = vld [vmem:[#allocation59_spill] sm:$0xff] }
 0x39e   : > { %5349 = vmatmul.mubr.f32.gmra.mrb[58].mxu0 %v8424_v26  ;;  %5897 = vpow2.f32 %v2506_v48  ;;  %v2415_v63 = vsub.f32 %v9416_v7, %v2222_v17 }
 0x39f   : > { %v8430_v1 = vpop.eup %5891  ;;  %v2568_v55 = vmul.f32 1.442695, %v2444_v34  ;;  %v9419_v34 = vld [vmem:[#allocation60_spill] sm:$0xff] }
 0x3a0   : > { %v8432_v27 = vpop.permute.xlu1 %3137  ;;  %5428 = vmatprep.mubr.f32.mxu1 %v8430_v1  ;;  %v8435_v22 = vpop.eup %5893  ;;  %v2510_v46 = vmul.f32 1.442695, %v2415_v63 }
 0x3a1   : > { %5899 = vpow2.f32 %v2568_v55  ;;  %2792 = vadd.xlane.f32.xlu0 %v8221_v35  ;;  %2722 = vadd.xlane.f32.xlu1 %v8055_v37  ;;  %v2447_v35 = vsub.f32 %v9418_v20, %v2382_v21  ;;  %v8461_v7 = vpop.permute.xlu0 %3252  ;;  %v2994_v21 = vld [vmem:[#allocation4 + $0x108] sm:$0xff] }
 0x3a2   : > { %5429 = vmatmul.mubr.f32.gmra.mrb[58].mxu1 %v8435_v22  ;;  %5901 = vpow2.f32 %v2570_v18 }
 0x3a4   : > { %v2217_v56 = vpop.permute.xlu1 %2216 }
 0x3a5   : > { %v2414_v48 = vsub.f32 %v9417_v11, %v2217_v56  ;;  %2732 = vadd.xlane.f32.xlu0 %v8262_v44  ;;  %2786 = vadd.xlane.f32.xlu1 %v8077_v51  ;;  %v2574_v44 = vmul.f32 1.442695, %v2447_v35  ;;  %v2993_v56 = vld [vmem:[#allocation4 + $0x100] sm:$0xff]  ;;  %v9420_v11 = vld [vmem:[#allocation9_spill] sm:$0xff] }
 0x3a7   : > { %v8444_v61 = vpop.eup %5895  ;;  %v2508_v14 = vmul.f32 1.442695, %v2414_v48 }
 0x3a8   : > { %v2377_v37 = vpop.permute.xlu1 %2376  ;;  %5351 = vmatprep.mubr.f32.mxu0 %v8444_v61  ;;  %v8448_v54 = vpop.eup %5897 }
 0x3a9   : > { %5903 = vpow2.f32 %v2508_v14  ;;  %v2446_v17 = vsub.f32 %v9419_v34, %v2377_v37  ;;  %2796 = vadd.xlane.f32.xlu0 %v8276_v6  ;;  %2726 = vadd.xlane.f32.xlu1 %v8130_v30  ;;  %v8468_v6 = vpop.permute.xlu0 %3262  ;;  %v9422_v14 = vld [vmem:[#allocation96_spill] sm:$0xff] }
 0x3aa   : > { %5352 = vmatmul.mubr.f32.gmra.mrb[60].mxu0 %v8448_v54  ;;  %5905 = vpow2.f32 %v2510_v46  ;;  %v3377_v37 = vmul.f32 %v9422_v14, %v2993_v56  ;;  %v9424_v56 = vld [vmem:[#allocation89_spill] sm:$0xff]  ;;  %v9426_v14 = vld [vmem:[#allocation15_spill] sm:$0xff] }
 0x3ab   : > { %v8454_v51 = vpop.eup %5899  ;;  %v2572_v18 = vmul.f32 1.442695, %v2446_v17 }
 0x3ac   : > { %5431 = vmatprep.mubr.f32.mxu1 %v8454_v51  ;;  %v8457_v55 = vpop.eup %5901 }
 0x3ad   : > { %5907 = vpow2.f32 %v2572_v18  ;;  %2736 = vadd.xlane.f32.xlu0 %v8299_v15  ;;  %2790 = vadd.xlane.f32.xlu1 %v8152_v50  ;;  %v8483_v15 = vpop.permute.xlu0 %3272 }
 0x3ae   : > { %5432 = vmatmul.mubr.f32.gmra.mrb[60].mxu1 %v8457_v55  ;;  %5909 = vpow2.f32 %v2574_v44 }
 0x3b1   : > { %2800 = vadd.xlane.f32.xlu0 %v8308_v29  ;;  %2730 = vadd.xlane.f32.xlu1 %v8204_v19  ;;  %v2962_v19 = vld [vmem:[#allocation4 + $0x8] sm:$0xff]  ;;  %v8492_v34 = vpop.permute.xlu0 %3282 }
 0x3b3   : > { %v8466_v30 = vpop.eup %5903 }
 0x3b4   : > { %5354 = vmatprep.mubr.f32.mxu0 %v8466_v30  ;;  %v8471_v63 = vpop.eup %5905 }
 0x3b5   : > { %2740 = vadd.xlane.f32.xlu0 %v8322_v16  ;;  %2794 = vadd.xlane.f32.xlu1 %v8223_v42  ;;  %v2961_v16 = vld [vmem:[#allocation4] sm:$0xff]  ;;  %v3346_v42 = vmul.f32 %v7983_v41, %v2962_v19  ;;  %v2964_v19 = vld [vmem:[#allocation4 + $0x18] sm:$0xff] }
 0x3b6   : > { %5355 = vmatmul.mubr.f32.gmra.mrb[62].mxu0 %v8471_v63  ;;  %v3345_v48 = vmul.f32 %v9420_v11, %v2961_v16  ;;  %v2963_v16 = vld [vmem:[#allocation4 + $0x10] sm:$0xff] }
 0x3b7   : > { %v8476_v50 = vpop.eup %5907  ;;  %v3347_v11 = vmul.f32 %v9424_v56, %v2963_v16 }
 0x3b8   : > { %5434 = vmatprep.mubr.f32.mxu1 %v8476_v50  ;;  %v8479_v29 = vpop.eup %5909 }
 0x3b9   : > { %2804 = vadd.xlane.f32.xlu0 %v8332_v3  ;;  %2734 = vadd.xlane.f32.xlu1 %v8264_v8  ;;  %v9421_v3 = vld [vmem:[#allocation7_spill] sm:$0xff] }
 0x3ba   : > { %5435 = vmatmul.mubr.f32.gmra.mrb[62].mxu1 %v8479_v29  ;;  %v3378_v8 = vmul.f32 %v9421_v3, %v2994_v21  ;;  %v8504_v21 = vpop.permute.xlu0 %3292  ;;  %v2995_v3 = vld [vmem:[#allocation4 + $0x110] sm:$0xff] }
 0x3bd   : > { %2744 = vadd.xlane.f32.xlu0 %v8344_v9  ;;  %2798 = vadd.xlane.f32.xlu1 %v8278_v36  ;;  %v8497_v9 = vpop.permute.xlu1 %3247 }
 0x3be   : > { %v5311_v46 = vpop.f32.mrb[32].mxu0 }
 0x3bf   : > { %v3860_v20 = vadd.f32 %v5311_v46, %v3346_v42  ;;  %v3475_v35 = vpop.f32.mrb[33].mxu0 }
 0x3c0   : > { %v3859_v17 = vadd.f32 %v3475_v35, %v3345_v48  ;;  %v5391_v44 = vpop.f32.mrb[32].mxu1  ;;  %v9425_v35 = vld [vmem:[#allocation83_spill] sm:$0xff] }
 0x3c1   : > { %3925 = vst.msk [vmem:[#allocation4 + $0x8] sm:$0xff] %vm3923_vm5, %v3860_v20  ;;  %v3892_v41 = vadd.f32 %v5391_v44, %v3378_v8  ;;  %2808 = vadd.xlane.f32.xlu0 %v8355_v4  ;;  %v3700_v36 = vpop.f32.mrb[33].mxu1  ;;  %2738 = vadd.xlane.f32.xlu1 %v8301_v32  ;;  %v9423_v4 = vld [vmem:[#allocation11_spill] sm:$0xff]  ;;  %v2996_v32 = vld [vmem:[#allocation4 + $0x118] sm:$0xff]  ;;  %v8508_v48 = vpop.permute.xlu1 %3257 }
 0x3c2   : > { %3924 = vst.msk [vmem:[#allocation4] sm:$0xff] %vm3923_vm5, %v3859_v17  ;;  %v3891_v18 = vadd.f32 %v3700_v36, %v3377_v37  ;;  %v3348_v42 = vmul.f32 %v9423_v4, %v2964_v19  ;;  %v3379_v37 = vmul.f32 %v9426_v14, %v2995_v3  ;;  %v8515_v17 = vpop.permute.xlu0 %3302  ;;  %v2965_v19 = vld [vmem:[#allocation4 + $0x20] sm:$0xff]  ;;  %v9427_v4 = vld [vmem:[#allocation14_spill] sm:$0xff] }
 0x3c3   : > { %3957 = vst.msk [vmem:[#allocation4 + $0x108] sm:$0xff] %vm3923_vm5, %v3892_v41  ;;  %v2968_v14 = vld [vmem:[#allocation4 + $0x38] sm:$0xff] }
 0x3c4   : > { %3956 = vst.msk [vmem:[#allocation4 + $0x100] sm:$0xff] %vm3923_vm5, %v3891_v18  ;;  %v2966_v18 = vld [vmem:[#allocation4 + $0x28] sm:$0xff] }
 0x3c5   : > { %2748 = vadd.xlane.f32.xlu0 %v8368_v13  ;;  %2802 = vadd.xlane.f32.xlu1 %v8310_v62  ;;  %v3380_v62 = vmul.f32 %v9425_v35, %v2996_v32 }
 0x3c6   : > { %v8526_v16 = vpop.permute.xlu0 %3152 }
 0x3c8   : > { %v5314_v46 = vpop.f32.mrb[34].mxu0 }
 0x3c9   : > { %v3862_v8 = vadd.f32 %v5314_v46, %v3348_v42  ;;  %2812 = vadd.xlane.f32.xlu0 %v8380_v58  ;;  %v3485_v20 = vpop.f32.mrb[35].mxu0  ;;  %2742 = vadd.xlane.f32.xlu1 %v8324_v23  ;;  %v8520_v58 = vpop.permute.xlu1 %3267  ;;  %v2998_v42 = vld [vmem:[#allocation4 + $0x128] sm:$0xff] }
 0x3ca   : > { %v3861_v13 = vadd.f32 %v3485_v20, %v3347_v11  ;;  %v2997_v11 = vld [vmem:[#allocation4 + $0x120] sm:$0xff] }
 0x3cb   : > { %3927 = vst.msk [vmem:[#allocation4 + $0x18] sm:$0xff] %vm3923_vm5, %v3862_v8  ;;  %v9428_v8 = vld [vmem:[#allocation66_spill] sm:$0xff]  ;;  %v3381_v20 = vmul.f32 %v8110_v43, %v2997_v11  ;;  %v2967_v43 = vld [vmem:[#allocation4 + $0x30] sm:$0xff] }
 0x3cc   : > { %3926 = vst.msk [vmem:[#allocation4 + $0x10] sm:$0xff] %vm3923_vm5, %v3861_v13  ;;  %v5394_v44 = vpop.f32.mrb[34].mxu1  ;;  %v8537_v13 = vpop.permute.xlu0 %3312 }
 0x3cd   : > { %v3894_v41 = vadd.f32 %v5394_v44, %v3380_v62  ;;  %2752 = vadd.xlane.f32.xlu0 %v8394_v12  ;;  %v3710_v36 = vpop.f32.mrb[35].mxu1  ;;  %2806 = vadd.xlane.f32.xlu1 %v8334_v2  ;;  %v3350_v12 = vmul.f32 %v9427_v4, %v2966_v18  ;;  %v3349_v2 = vmul.f32 %v8094_v52, %v2965_v19  ;;  %v8530_v32 = vpop.permute.xlu1 %3277  ;;  %v3000_v44 = vld [vmem:[#allocation4 + $0x138] sm:$0xff] }
 0x3ce   : > { %v3893_v23 = vadd.f32 %v3710_v36, %v3379_v37 }
 0x3cf   : > { %3959 = vst.msk [vmem:[#allocation4 + $0x118] sm:$0xff] %vm3923_vm5, %v3894_v41 }
 0x3d0   : > { %3958 = vst.msk [vmem:[#allocation4 + $0x110] sm:$0xff] %vm3923_vm5, %v3893_v23  ;;  %v8548_v37 = vpop.permute.xlu0 %3162  ;;  %v2999_v23 = vld [vmem:[#allocation4 + $0x130] sm:$0xff] }
 0x3d1   : > { %2816 = vadd.xlane.f32.xlu0 %v8404_v33  ;;  %2746 = vadd.xlane.f32.xlu1 %v8347_v24  ;;  %v3382_v24 = vmul.f32 %v9428_v8, %v2998_v42  ;;  %v9431_v8 = vld [vmem:[#allocation21_spill] sm:$0xff] }
 0x3d4   : > { %v5317_v56 = vpop.f32.mrb[36].mxu0  ;;  %v8559_v4 = vpop.permute.xlu0 %3322 }
 0x3d5   : > { %v3864_v46 = vadd.f32 %v5317_v56, %v3350_v12  ;;  %2756 = vadd.xlane.f32.xlu0 %v8420_v45  ;;  %v3495_v3 = vpop.f32.mrb[37].mxu0  ;;  %2810 = vadd.xlane.f32.xlu1 %v8357_v0  ;;  %v8542_v45 = vpop.permute.xlu1 %3287 }
 0x3d6   : > { %v3863_v33 = vadd.f32 %v3495_v3, %v3349_v2  ;;  %v9430_v2 = vld [vmem:[#allocation115_spill] sm:$0xff] }
 0x3d7   : > { %3929 = vst.msk [vmem:[#allocation4 + $0x28] sm:$0xff] %vm3923_vm5, %v3864_v46 }
 0x3d8   : > { %3928 = vst.msk [vmem:[#allocation4 + $0x20] sm:$0xff] %vm3923_vm5, %v3863_v33  ;;  %v5397_v52 = vpop.f32.mrb[36].mxu1  ;;  %v3002_v33 = vld [vmem:[#allocation4 + $0x148] sm:$0xff] }
 0x3d9   : > { %v3896_v35 = vadd.f32 %v5397_v52, %v3382_v24  ;;  %2820 = vadd.xlane.f32.xlu0 %v8430_v1  ;;  %v3720_v62 = vpop.f32.mrb[37].mxu1  ;;  %2750 = vadd.xlane.f32.xlu1 %v8372_v38  ;;  %v3352_v1 = vmul.f32 %v8098_v53, %v2968_v14  ;;  %v3351_v38 = vmul.f32 %v8172_v40, %v2967_v43  ;;  %v8552_v41 = vpop.permute.xlu1 %3297  ;;  %v9432_v14 = vld [vmem:[#allocation20_spill] sm:$0xff] }
 0x3da   : > { %v3895_v0 = vadd.f32 %v3720_v62, %v3381_v20  ;;  %v3383_v53 = vmul.f32 %v8188_v49, %v2999_v23  ;;  %v9429_v49 = vld [vmem:[#allocation117_spill] sm:$0xff]  ;;  %v3001_v20 = vld [vmem:[#allocation4 + $0x140] sm:$0xff]  ;;  %v3386_v43 = vmul.f32 %v9432_v14, %v3002_v33  ;;  %v2577_v23 = vld [vmem:[#allocation3 + $0x8] sm:$0xff] }
 0x3db   : > { %3961 = vst.msk [vmem:[#allocation4 + $0x128] sm:$0xff] %vm3923_vm5, %v3896_v35  ;;  %v1935_v56 = vsub.f32 %v9430_v2, %v9429_v49  ;;  %v2971_v49 = vld [vmem:[#allocation4 + $0x50] sm:$0xff]  ;;  %v9437_v2 = vld [vmem:[#allocation68_spill] sm:$0xff] }
 0x3dc   : > { %3960 = vst.msk [vmem:[#allocation4 + $0x120] sm:$0xff] %vm3923_vm5, %v3895_v0  ;;  %v9438_v33 = vld [vmem:[#allocation92_spill] sm:$0xff] }
 0x3dd   : > { %2760 = vadd.xlane.f32.xlu0 %v8444_v61  ;;  %2814 = vadd.xlane.f32.xlu1 %v8385_v57  ;;  %v3384_v57 = vmul.f32 %v8114_v28, %v3000_v44  ;;  %v8570_v28 = vpop.permute.xlu0 %3172  ;;  %v2062_v3 = vmul.f32 1.442695, %v1935_v56 }
 0x3df   : > { %5911 = vpow2.f32 %v2062_v3 }
 0x3e0   : > { %v5320_v36 = vpop.f32.mrb[38].mxu0 }
 0x3e1   : > { %v3866_v18 = vadd.f32 %v5320_v36, %v3352_v1  ;;  %2824 = vadd.xlane.f32.xlu0 %v8454_v51  ;;  %v3505_v19 = vpop.f32.mrb[39].mxu0  ;;  %2754 = vadd.xlane.f32.xlu1 %v8398_v31  ;;  %v8564_v51 = vpop.permute.xlu1 %3147 }
 0x3e2   : > { %v3865_v61 = vadd.f32 %v3505_v19, %v3351_v38  ;;  %v9434_v19 = vld [vmem:[#allocation63_spill] sm:$0xff] }
 0x3e3   : > { %3931 = vst.msk [vmem:[#allocation4 + $0x38] sm:$0xff] %vm3923_vm5, %v3866_v18 }
 0x3e4   : > { %3930 = vst.msk [vmem:[#allocation4 + $0x30] sm:$0xff] %vm3923_vm5, %v3865_v61  ;;  %v5400_v40 = vpop.f32.mrb[38].mxu1  ;;  %v2641_v61 = vmul.f32 %v9434_v19, %v2577_v23  ;;  %v9442_v19 = vld [vmem:[#allocation26_spill] sm:$0xff] }
 0x3e5   : > { %v3898_v12 = vadd.f32 %v5400_v40, %v3384_v57  ;;  %2764 = vadd.xlane.f32.xlu0 %v8466_v30  ;;  %v3730_v42 = vpop.f32.mrb[39].mxu1  ;;  %2818 = vadd.xlane.f32.xlu1 %v8409_v5  ;;  %v2970_v30 = vld [vmem:[#allocation4 + $0x48] sm:$0xff]  ;;  %v8574_v11 = vpop.permute.xlu1 %3307  ;;  %v2969_v5 = vld [vmem:[#allocation4 + $0x40] sm:$0xff] }
 0x3e6   : > { %v3897_v31 = vadd.f32 %v3730_v42, %v3383_v53  ;;  %v3354_v46 = vmul.f32 %v8176_v47, %v2970_v30  ;;  %v3353_v24 = vmul.f32 %v9431_v8, %v2969_v5  ;;  %v9433_v47 = vld [vmem:[#allocation23_spill] sm:$0xff]  ;;  %v9435_v40 = vld [vmem:[#allocation116_spill] sm:$0xff] }
 0x3e7   : > { %3963 = vst.msk [vmem:[#allocation4 + $0x138] sm:$0xff] %vm3923_vm5, %v3898_v12  ;;  %v2608_v53 = vld [vmem:[#allocation3 + $0x100] sm:$0xff]  ;;  %v9436_v12 = vld [vmem:[#allocation114_spill] sm:$0xff] }
 0x3e8   : > { %3962 = vst.msk [vmem:[#allocation4 + $0x130] sm:$0xff] %vm3923_vm5, %v3897_v31  ;;  %v1934_v42 = vsub.f32 %v9436_v12, %v9435_v40  ;;  %v2972_v31 = vld [vmem:[#allocation4 + $0x58] sm:$0xff]  ;;  %v2672_v56 = vmul.f32 %v9437_v2, %v2608_v53  ;;  %v2580_v2 = vld [vmem:[#allocation3 + $0x20] sm:$0xff] }
 0x3e9   : > { %2828 = vadd.xlane.f32.xlu0 %v8476_v50  ;;  %2758 = vadd.xlane.f32.xlu1 %v8424_v26  ;;  %v8579_v50 = vpop.permute.xlu0 %3332  ;;  %v8582_v62 = vpop.permute.xlu1 %3157  ;;  %v3356_v8 = vmul.f32 %v9438_v33, %v2972_v31 }
 0x3ea   : > { %v8602_v30 = vpop.eup %5911  ;;  %v2060_v3 = vmul.f32 1.442695, %v1934_v42  ;;  %v9443_v42 = vld [vmem:[#allocation78_spill] sm:$0xff] }
 0x3ec   : > { %5913 = vpow2.f32 %v2060_v3 }
 0x3ed   : > { %2822 = vadd.xlane.f32.xlu1 %v8435_v22  ;;  %v3385_v22 = vmul.f32 %v9433_v47, %v3001_v20  ;;  %v8589_v36 = vpop.permute.xlu0 %3182  ;;  %v8592_v18 = vpop.permute.xlu1 %3317  ;;  %v9439_v20 = vld [vmem:[#allocation102_spill] sm:$0xff] }
 0x3f0   : > { %v5323_v26 = vpop.f32.mrb[40].mxu0 }
 0x3f1   : > { %v3868_v52 = vadd.f32 %v5323_v26, %v3354_v46  ;;  %v3515_v35 = vpop.f32.mrb[41].mxu0  ;;  %2762 = vadd.xlane.f32.xlu1 %v8448_v54  ;;  %v8604_v5 = vpop.permute.xlu1 %3167  ;;  %v2578_v46 = vld [vmem:[#allocation3 + $0x10] sm:$0xff]  ;;  %v3004_v26 = vld [vmem:[#allocation4 + $0x158] sm:$0xff] }
 0x3f2   : > { %v3867_v0 = vadd.f32 %v3515_v35, %v3353_v24 }
 0x3f3   : > { %3933 = vst.msk [vmem:[#allocation4 + $0x48] sm:$0xff] %vm3923_vm5, %v3868_v52  ;;  %v3355_v52 = vmul.f32 %v9439_v20, %v2971_v49  ;;  %v2974_v20 = vld [vmem:[#allocation4 + $0x68] sm:$0xff] }
 0x3f4   : > { %3932 = vst.msk [vmem:[#allocation4 + $0x40] sm:$0xff] %vm3923_vm5, %v3867_v0  ;;  %v5403_v1 = vpop.f32.mrb[40].mxu1  ;;  %v3003_v0 = vld [vmem:[#allocation4 + $0x150] sm:$0xff] }
 0x3f5   : > { %v3900_v44 = vadd.f32 %v5403_v1, %v3386_v43  ;;  %v3740_v38 = vpop.f32.mrb[41].mxu1  ;;  %2826 = vadd.xlane.f32.xlu1 %v8457_v55  ;;  %v9440_v43 = vld [vmem:[#allocation74_spill] sm:$0xff] }
 0x3f6   : > { %v3899_v54 = vadd.f32 %v3740_v38, %v3385_v22  ;;  %v2642_v47 = vmul.f32 %v9440_v43, %v2578_v46  ;;  %v9441_v38 = vld [vmem:[#allocation24_spill] sm:$0xff] }
 0x3f7   : > { %3965 = vst.msk [vmem:[#allocation4 + $0x148] sm:$0xff] %vm3923_vm5, %v3900_v44  ;;  %v2610_v44 = vld [vmem:[#allocation3 + $0x110] sm:$0xff] }
 0x3f8   : > { %3964 = vst.msk [vmem:[#allocation4 + $0x140] sm:$0xff] %vm3923_vm5, %v3899_v54  ;;  %v3388_v54 = vmul.f32 %v9441_v38, %v3004_v26  ;;  %v9447_v38 = vld [vmem:[#allocation25_spill] sm:$0xff] }
 0x3f9   : > { %2766 = vadd.xlane.f32.xlu1 %v8471_v63 }
 0x3fa   : > { %v2707_v57 = vpop.xlane.xlu0 %2706 }
 0x3fb   : > { %v2833_v55 = vadd.f32 %v2707_v57, %v2641_v61  ;;  %v3387_v61 = vmul.f32 %v9442_v19, %v3003_v0  ;;  %v8614_v57 = vpop.permute.xlu1 %3327  ;;  %v9445_v0 = vld [vmem:[#allocation88_spill] sm:$0xff] }
 0x3fd   : > { %2898 = vst.msk [vmem:[#allocation3 + $0x8] sm:$0xff] %vm2896_vm4, %v2833_v55  ;;  %2830 = vadd.xlane.f32.xlu1 %v8479_v29  ;;  %v2674_v55 = vmul.f32 %v9443_v42, %v2610_v44  ;;  %v2576_v44 = vld [vmem:[#allocation3] sm:$0xff] }
 0x3fe   : > { %v2769_v63 = vpop.xlane.xlu0 %2768 }
 0x3ff   : > { %v2864_v24 = vadd.f32 %v2769_v63, %v2672_v56  ;;  %3342 = vperm.xlu0 %5658, %v8602_v30   ;;  %v9444_v63 = vld [vmem:[#allocation84_spill] sm:$0xff]  ;;  %v8623_v3 = vpop.permute.xlu1 %3177 }
 0x400   : > { %v5326_v35 = vpop.f32.mrb[42].mxu0  ;;  %v2644_v46 = vmul.f32 %v9444_v63, %v2580_v2  ;;  %v9449_v2 = vld [vmem:[#allocation62_spill] sm:$0xff] }
 0x401   : > { %2929 = vst.msk [vmem:[#allocation3 + $0x100] sm:$0xff] %vm2896_vm4, %v2864_v24  ;;  %v3870_v29 = vadd.f32 %v5326_v35, %v3356_v8  ;;  %v3525_v14 = vpop.f32.mrb[43].mxu0  ;;  %v2612_v8 = vld [vmem:[#allocation3 + $0x120] sm:$0xff]  ;;  %v2609_v24 = vld [vmem:[#allocation3 + $0x108] sm:$0xff] }
 0x402   : > { %v3869_v22 = vadd.f32 %v3525_v14, %v3355_v52  ;;  %v2709_v1 = vpop.xlane.xlu0 %2708  ;;  %v8625_v52 = vpop.eup %5913  ;;  %v2973_v35 = vld [vmem:[#allocation4 + $0x60] sm:$0xff]  ;;  %v9446_v14 = vld [vmem:[#allocation61_spill] sm:$0xff] }
 0x403   : > { %3935 = vst.msk [vmem:[#allocation4 + $0x58] sm:$0xff] %vm3923_vm5, %v3870_v29  ;;  %v2834_v23 = vadd.f32 %v2709_v1, %v2642_v47  ;;  %v2676_v29 = vmul.f32 %v9445_v0, %v2612_v8  ;;  %v2673_v43 = vmul.f32 %v9446_v14, %v2609_v24  ;;  %v2582_v1 = vld [vmem:[#allocation3 + $0x30] sm:$0xff]  ;;  %v2579_v24 = vld [vmem:[#allocation3 + $0x18] sm:$0xff] }
 0x404   : > { %3934 = vst.msk [vmem:[#allocation4 + $0x50] sm:$0xff] %vm3923_vm5, %v3869_v22  ;;  %v5406_v53 = vpop.f32.mrb[42].mxu1  ;;  %v2614_v8 = vld [vmem:[#allocation3 + $0x130] sm:$0xff] }
 0x405   : > { %2899 = vst.msk [vmem:[#allocation3 + $0x10] sm:$0xff] %vm2896_vm4, %v2834_v23  ;;  %v3902_v40 = vadd.f32 %v5406_v53, %v3388_v54  ;;  %v3750_v12 = vpop.f32.mrb[43].mxu1  ;;  %v3358_v54 = vmul.f32 %v9447_v38, %v2974_v20  ;;  %v3006_v53 = vld [vmem:[#allocation4 + $0x168] sm:$0xff] }
 0x406   : > { %v3901_v31 = vadd.f32 %v3750_v12, %v3387_v61  ;;  %v2773_v49 = vpop.xlane.xlu0 %2772  ;;  %v3357_v61 = vmul.f32 %v8317_v25, %v2973_v35  ;;  %v3005_v12 = vld [vmem:[#allocation4 + $0x160] sm:$0xff]  ;;  %v3390_v25 = vmul.f32 %v8461_v7, %v3006_v53 }
 0x407   : > { %3967 = vst.msk [vmem:[#allocation4 + $0x158] sm:$0xff] %vm3923_vm5, %v3902_v40  ;;  %v2866_v56 = vadd.f32 %v2773_v49, %v2674_v55  ;;  %v3389_v35 = vmul.f32 %v8497_v9, %v3005_v12 }
 0x408   : > { %3966 = vst.msk [vmem:[#allocation4 + $0x150] sm:$0xff] %vm3923_vm5, %v3901_v31  ;;  %v9448_v31 = vld [vmem:[#allocation97_spill] sm:$0xff] }
 0x409   : > { %2931 = vst.msk [vmem:[#allocation3 + $0x110] sm:$0xff] %vm2896_vm4, %v2866_v56  ;;  %v2646_v49 = vmul.f32 %v9448_v31, %v2582_v1  ;;  %v2640_v56 = vmul.f32 %v9449_v2, %v2576_v44  ;;  %v2616_v31 = vld [vmem:[#allocation3 + $0x140] sm:$0xff] }
 0x40a   : > { %v2713_v33 = vpop.xlane.xlu0 %2712 }
 0x40b   : > { %v2836_v26 = vadd.f32 %v2713_v33, %v2644_v46 }
 0x40d   : > { %2901 = vst.msk [vmem:[#allocation3 + $0x20] sm:$0xff] %vm2896_vm4, %v2836_v26 }
 0x40e   : > { %v2777_v47 = vpop.xlane.xlu0 %2776  ;;  %v2771_v22 = vpop.xlane.xlu1 %2770  ;;  %3337 = vperm.xlu1 %5657, %v8625_v52  }
 0x40f   : > { %v2868_v23 = vadd.f32 %v2777_v47, %v2676_v29  ;;  %v2865_v19 = vadd.f32 %v2771_v22, %v2673_v43  ;;  %v9450_v43 = vld [vmem:[#allocation101_spill] sm:$0xff] }
 0x410   : > { %v5329_v40 = vpop.f32.mrb[44].mxu0  ;;  %v2678_v47 = vmul.f32 %v9450_v43, %v2614_v8  ;;  %v9451_v22 = vld [vmem:[#allocation65_spill] sm:$0xff] }
 0x411   : > { %2933 = vst.msk [vmem:[#allocation3 + $0x120] sm:$0xff] %vm2896_vm4, %v2868_v23  ;;  %2930 = vst.msk [vmem:[#allocation3 + $0x108] sm:$0xff] %vm2896_vm4, %v2865_v19  ;;  %v3872_v42 = vadd.f32 %v5329_v40, %v3358_v54  ;;  %v3535_v55 = vpop.f32.mrb[45].mxu0  ;;  %v2643_v1 = vmul.f32 %v9451_v22, %v2579_v24  ;;  %v2584_v54 = vld [vmem:[#allocation3 + $0x40] sm:$0xff]  ;;  %v2611_v23 = vld [vmem:[#allocation3 + $0x118] sm:$0xff] }
 0x412   : > { %v3871_v63 = vadd.f32 %v3535_v55, %v3357_v61  ;;  %v2717_v46 = vpop.xlane.xlu0 %2716  ;;  %v2705_v33 = vpop.xlane.xlu1 %2704  ;;  %v9452_v61 = vld [vmem:[#allocation109_spill] sm:$0xff]  ;;  %v9453_v40 = vld [vmem:[#allocation70_spill] sm:$0xff]  ;;  %v9455_v24 = vld [vmem:[#allocation76_spill] sm:$0xff] }
 0x413   : > { %3937 = vst.msk [vmem:[#allocation4 + $0x68] sm:$0xff] %vm3923_vm5, %v3872_v42  ;;  %v2838_v26 = vadd.f32 %v2717_v46, %v2646_v49  ;;  %v2832_v20 = vadd.f32 %v2705_v33, %v2640_v56  ;;  %v2648_v53 = vmul.f32 %v9452_v61, %v2584_v54  ;;  %v2675_v12 = vmul.f32 %v9453_v40, %v2611_v23  ;;  %v2581_v49 = vld [vmem:[#allocation3 + $0x28] sm:$0xff]  ;;  %v2975_v46 = vld [vmem:[#allocation4 + $0x70] sm:$0xff]  ;;  %v9454_v33 = vld [vmem:[#allocation111_spill] sm:$0xff] }
 0x414   : > { %3936 = vst.msk [vmem:[#allocation4 + $0x60] sm:$0xff] %vm3923_vm5, %v3871_v63  ;;  %v5409_v0 = vpop.f32.mrb[44].mxu1  ;;  %v2976_v63 = vld [vmem:[#allocation4 + $0x78] sm:$0xff]  ;;  %v2680_v8 = vmul.f32 %v9454_v33, %v2616_v31  ;;  %v9457_v22 = vld [vmem:[#allocation112_spill] sm:$0xff] }
 0x415   : > { %2903 = vst.msk [vmem:[#allocation3 + $0x30] sm:$0xff] %vm2896_vm4, %v2838_v26  ;;  %2897 = vst.msk [vmem:[#allocation3] sm:$0xff] %vm2896_vm4, %v2832_v20  ;;  %v3904_v29 = vadd.f32 %v5409_v0, %v3390_v25  ;;  %v3760_v14 = vpop.f32.mrb[45].mxu1  ;;  %v2645_v25 = vmul.f32 %v9455_v24, %v2581_v49  ;;  %v2613_v0 = vld [vmem:[#allocation3 + $0x128] sm:$0xff]  ;;  %v2583_v31 = vld [vmem:[#allocation3 + $0x38] sm:$0xff] }
 0x416   : > { %v3903_v7 = vadd.f32 %v3760_v14, %v3389_v35  ;;  %v2781_v44 = vpop.xlane.xlu0 %2780  ;;  %v2711_v38 = vpop.xlane.xlu1 %2710  ;;  %v2586_v35 = vld [vmem:[#allocation3 + $0x50] sm:$0xff]  ;;  %v9459_v61 = vld [vmem:[#allocation80_spill] sm:$0xff] }
 0x417   : > { %3969 = vst.msk [vmem:[#allocation4 + $0x168] sm:$0xff] %vm3923_vm5, %v3904_v29  ;;  %v2870_v9 = vadd.f32 %v2781_v44, %v2678_v47  ;;  %v2835_v19 = vadd.f32 %v2711_v38, %v2643_v1  ;;  %v9456_v29 = vld [vmem:[#allocation28_spill] sm:$0xff]  ;;  %v3359_v1 = vmul.f32 %v9457_v22, %v2975_v46  ;;  %v3007_v38 = vld [vmem:[#allocation4 + $0x170] sm:$0xff] }
 0x418   : > { %3968 = vst.msk [vmem:[#allocation4 + $0x160] sm:$0xff] %vm3923_vm5, %v3903_v7  ;;  %v3360_v14 = vmul.f32 %v9456_v29, %v2976_v63  ;;  %v3008_v7 = vld [vmem:[#allocation4 + $0x178] sm:$0xff]  ;;  %v3391_v63 = vmul.f32 %v8508_v48, %v3007_v38  ;;  %v9460_v24 = vld [vmem:[#allocation120_spill] sm:$0xff]  ;;  %v2588_v29 = vld [vmem:[#allocation3 + $0x60] sm:$0xff] }
 0x419   : > { %2935 = vst.msk [vmem:[#allocation3 + $0x130] sm:$0xff] %vm2896_vm4, %v2870_v9  ;;  %2900 = vst.msk [vmem:[#allocation3 + $0x18] sm:$0xff] %vm2896_vm4, %v2835_v19  ;;  %v9458_v9 = vld [vmem:[#allocation118_spill] sm:$0xff]  ;;  %v3392_v49 = vmul.f32 %v8468_v6, %v3008_v7 }
 0x41a   : > { %v2721_v42 = vpop.xlane.xlu0 %2720  ;;  %v2775_v55 = vpop.xlane.xlu1 %2774  ;;  %v2650_v19 = vmul.f32 %v9458_v9, %v2586_v35 }
 0x41b   : > { %v2840_v2 = vadd.f32 %v2721_v42, %v2648_v53  ;;  %v2867_v56 = vadd.f32 %v2775_v55, %v2675_v12  ;;  %v2677_v53 = vmul.f32 %v9459_v61, %v2613_v0  ;;  %v2618_v55 = vld [vmem:[#allocation3 + $0x150] sm:$0xff]  ;;  %v2978_v61 = vld [vmem:[#allocation4 + $0x88] sm:$0xff] }
 0x41d   : > { %2905 = vst.msk [vmem:[#allocation3 + $0x40] sm:$0xff] %vm2896_vm4, %v2840_v2  ;;  %2932 = vst.msk [vmem:[#allocation3 + $0x118] sm:$0xff] %vm2896_vm4, %v2867_v56 }
 0x41e   : > { %v2785_v26 = vpop.xlane.xlu0 %2784  ;;  %v2715_v20 = vpop.xlane.xlu1 %2714 }
 0x41f   : > { %v2872_v43 = vadd.f32 %v2785_v26, %v2680_v8  ;;  %v2837_v47 = vadd.f32 %v2715_v20, %v2645_v25  ;;  %v2682_v25 = vmul.f32 %v9460_v24, %v2618_v55  ;;  %v9461_v26 = vld [vmem:[#allocation86_spill] sm:$0xff] }
 0x420   : > { %v5332_v44 = vpop.f32.mrb[46].mxu0  ;;  %v2647_v20 = vmul.f32 %v9461_v26, %v2583_v31  ;;  %v9467_v24 = vld [vmem:[#allocation30_spill] sm:$0xff]  ;;  %v3010_v26 = vld [vmem:[#allocation4 + $0x188] sm:$0xff] }
 0x421   : > { %2937 = vst.msk [vmem:[#allocation3 + $0x140] sm:$0xff] %vm2896_vm4, %v2872_v43  ;;  %2902 = vst.msk [vmem:[#allocation3 + $0x28] sm:$0xff] %vm2896_vm4, %v2837_v47  ;;  %v3874_v54 = vadd.f32 %v5332_v44, %v3360_v14  ;;  %v3545_v23 = vpop.f32.mrb[47].mxu0  ;;  %v2615_v14 = vld [vmem:[#allocation3 + $0x138] sm:$0xff] }
 0x422   : > { %v3873_v40 = vadd.f32 %v3545_v23, %v3359_v1  ;;  %v2725_v12 = vpop.xlane.xlu0 %2724  ;;  %v2779_v42 = vpop.xlane.xlu1 %2778  ;;  %v9462_v47 = vld [vmem:[#allocation122_spill] sm:$0xff]  ;;  %v2585_v23 = vld [vmem:[#allocation3 + $0x48] sm:$0xff] }
 0x423   : > { %3939 = vst.msk [vmem:[#allocation4 + $0x78] sm:$0xff] %vm3923_vm5, %v3874_v54  ;;  %v2842_v2 = vadd.f32 %v2725_v12, %v2650_v19  ;;  %v2869_v56 = vadd.f32 %v2779_v42, %v2677_v53  ;;  %v2652_v22 = vmul.f32 %v9462_v47, %v2588_v29  ;;  %v9463_v1 = vld [vmem:[#allocation90_spill] sm:$0xff]  ;;  %v2620_v54 = vld [vmem:[#allocation3 + $0x160] sm:$0xff]  ;;  %v9468_v29 = vld [vmem:[#allocation124_spill] sm:$0xff] }
 0x424   : > { %3938 = vst.msk [vmem:[#allocation4 + $0x70] sm:$0xff] %vm3923_vm5, %v3873_v40  ;;  %v5412_v46 = vpop.f32.mrb[46].mxu1  ;;  %v2679_v7 = vmul.f32 %v9463_v1, %v2615_v14  ;;  %v2977_v53 = vld [vmem:[#allocation4 + $0x80] sm:$0xff]  ;;  %v9464_v40 = vld [vmem:[#allocation17_spill] sm:$0xff] }
 0x425   : > { %2907 = vst.msk [vmem:[#allocation3 + $0x50] sm:$0xff] %vm2896_vm4, %v2842_v2  ;;  %2934 = vst.msk [vmem:[#allocation3 + $0x128] sm:$0xff] %vm2896_vm4, %v2869_v56  ;;  %v3906_v33 = vadd.f32 %v5412_v46, %v3392_v49  ;;  %v3770_v8 = vpop.f32.mrb[47].mxu1  ;;  %v2684_v12 = vmul.f32 %v9464_v40, %v2620_v54  ;;  %v9465_v42 = vld [vmem:[#allocation99_spill] sm:$0xff]  ;;  %v2590_v2 = vld [vmem:[#allocation3 + $0x70] sm:$0xff] }
 0x426   : > { %v3905_v6 = vadd.f32 %v3770_v8, %v3391_v63  ;;  %v2789_v35 = vpop.xlane.xlu0 %2788  ;;  %v2719_v0 = vpop.xlane.xlu1 %2718  ;;  %v2649_v55 = vmul.f32 %v9465_v42, %v2585_v23  ;;  %v2617_v56 = vld [vmem:[#allocation3 + $0x148] sm:$0xff]  ;;  %v9466_v63 = vld [vmem:[#allocation107_spill] sm:$0xff]  ;;  %v2654_v14 = vmul.f32 %v9468_v29, %v2590_v2  ;;  %v9471_v42 = vld [vmem:[#allocation110_spill] sm:$0xff] }
 0x427   : > { %3971 = vst.msk [vmem:[#allocation4 + $0x178] sm:$0xff] %vm3923_vm5, %v3906_v33  ;;  %v2874_v48 = vadd.f32 %v2789_v35, %v2682_v25  ;;  %v2839_v43 = vadd.f32 %v2719_v0, %v2647_v20  ;;  %v3362_v46 = vmul.f32 %v9466_v63, %v2978_v61  ;;  %v3361_v25 = vmul.f32 %v9467_v24, %v2977_v53  ;;  %v9470_v40 = vld [vmem:[#allocation64_spill] sm:$0xff]  ;;  %v2592_v2 = vld [vmem:[#allocation3 + $0x80] sm:$0xff]  ;;  %v2980_v29 = vld [vmem:[#allocation4 + $0x98] sm:$0xff] }
 0x428   : > { %3970 = vst.msk [vmem:[#allocation4 + $0x170] sm:$0xff] %vm3923_vm5, %v3905_v6  ;;  %v3009_v6 = vld [vmem:[#allocation4 + $0x180] sm:$0xff] }
 0x429   : > { %2939 = vst.msk [vmem:[#allocation3 + $0x150] sm:$0xff] %vm2896_vm4, %v2874_v48  ;;  %2904 = vst.msk [vmem:[#allocation3 + $0x38] sm:$0xff] %vm2896_vm4, %v2839_v43  ;;  %v9469_v48 = vld [vmem:[#allocation103_spill] sm:$0xff] }
 0x42a   : > { %v2729_v44 = vpop.xlane.xlu0 %2728  ;;  %v2783_v38 = vpop.xlane.xlu1 %2782  ;;  %v2681_v43 = vmul.f32 %v9469_v48, %v2617_v56  ;;  %v2619_v56 = vld [vmem:[#allocation3 + $0x158] sm:$0xff] }
 0x42b   : > { %v2844_v9 = vadd.f32 %v2729_v44, %v2652_v22  ;;  %v2871_v19 = vadd.f32 %v2783_v38, %v2679_v7  ;;  %v2622_v7 = vld [vmem:[#allocation3 + $0x170] sm:$0xff]  ;;  %v2587_v44 = vld [vmem:[#allocation3 + $0x58] sm:$0xff]  ;;  %v3394_v38 = vmul.f32 %v8483_v15, %v3010_v26 }
 0x42c   : > { %v9474_v48 = vld [vmem:[#allocation18_spill] sm:$0xff] }
 0x42d   : > { %2909 = vst.msk [vmem:[#allocation3 + $0x60] sm:$0xff] %vm2896_vm4, %v2844_v9  ;;  %2936 = vst.msk [vmem:[#allocation3 + $0x138] sm:$0xff] %vm2896_vm4, %v2871_v19  ;;  %v3393_v9 = vmul.f32 %v8520_v58, %v3009_v6  ;;  %v2589_v6 = vld [vmem:[#allocation3 + $0x68] sm:$0xff] }
 0x42e   : > { %v2793_v31 = vpop.xlane.xlu0 %2792  ;;  %v2723_v49 = vpop.xlane.xlu1 %2722 }
 0x42f   : > { %v2876_v33 = vadd.f32 %v2793_v31, %v2684_v12  ;;  %v2841_v8 = vadd.f32 %v2723_v49, %v2649_v55  ;;  %v2686_v12 = vmul.f32 %v9470_v40, %v2622_v7  ;;  %v2651_v55 = vmul.f32 %v9471_v42, %v2587_v44  ;;  %v2594_v44 = vld [vmem:[#allocation3 + $0x90] sm:$0xff] }
 0x430   : > { %v5335_v20 = vpop.f32.mrb[48].mxu0 }
 0x431   : > { %2941 = vst.msk [vmem:[#allocation3 + $0x160] sm:$0xff] %vm2896_vm4, %v2876_v33  ;;  %2906 = vst.msk [vmem:[#allocation3 + $0x48] sm:$0xff] %vm2896_vm4, %v2841_v8  ;;  %v3876_v35 = vadd.f32 %v5335_v20, %v3362_v46  ;;  %v3555_v0 = vpop.f32.mrb[49].mxu0  ;;  %v9472_v46 = vld [vmem:[#allocation79_spill] sm:$0xff]  ;;  %v9473_v8 = vld [vmem:[#allocation113_spill] sm:$0xff] }
 0x432   : > { %v3875_v47 = vadd.f32 %v3555_v0, %v3361_v25  ;;  %v2733_v22 = vpop.xlane.xlu0 %2732  ;;  %v2787_v1 = vpop.xlane.xlu1 %2786  ;;  %v2656_v33 = vmul.f32 %v9472_v46, %v2592_v2  ;;  %v2683_v24 = vmul.f32 %v9473_v8, %v2619_v56  ;;  %v2624_v20 = vld [vmem:[#allocation3 + $0x180] sm:$0xff]  ;;  %v2626_v46 = vld [vmem:[#allocation3 + $0x190] sm:$0xff] }
 0x433   : > { %3941 = vst.msk [vmem:[#allocation4 + $0x88] sm:$0xff] %vm3923_vm5, %v3876_v35  ;;  %v2846_v54 = vadd.f32 %v2733_v22, %v2654_v14  ;;  %v2873_v23 = vadd.f32 %v2787_v1, %v2681_v43  ;;  %v2979_v14 = vld [vmem:[#allocation4 + $0x90] sm:$0xff]  ;;  %v2688_v43 = vmul.f32 %v9474_v48, %v2624_v20 }
 0x434   : > { %3940 = vst.msk [vmem:[#allocation4 + $0x80] sm:$0xff] %vm3923_vm5, %v3875_v47  ;;  %v5415_v19 = vpop.f32.mrb[48].mxu1  ;;  %v9475_v47 = vld [vmem:[#allocation119_spill] sm:$0xff] }
 0x435   : > { %2911 = vst.msk [vmem:[#allocation3 + $0x70] sm:$0xff] %vm2896_vm4, %v2846_v54  ;;  %2938 = vst.msk [vmem:[#allocation3 + $0x148] sm:$0xff] %vm2896_vm4, %v2873_v23  ;;  %v3908_v61 = vadd.f32 %v5415_v19, %v3394_v38  ;;  %v3780_v53 = vpop.f32.mrb[49].mxu1  ;;  %v2653_v22 = vmul.f32 %v9475_v47, %v2589_v6  ;;  %v2621_v38 = vld [vmem:[#allocation3 + $0x168] sm:$0xff]  ;;  %v9476_v54 = vld [vmem:[#allocation29_spill] sm:$0xff] }
 0x436   : > { %v3907_v15 = vadd.f32 %v3780_v53, %v3393_v9  ;;  %v2797_v31 = vpop.xlane.xlu0 %2796  ;;  %v2727_v49 = vpop.xlane.xlu1 %2726  ;;  %v3364_v23 = vmul.f32 %v9476_v54, %v2980_v29  ;;  %v3012_v53 = vld [vmem:[#allocation4 + $0x198] sm:$0xff]  ;;  %v9480_v29 = vld [vmem:[#allocation121_spill] sm:$0xff]  ;;  %v2596_v47 = vld [vmem:[#allocation3 + $0xa0] sm:$0xff] }
 0x437   : > { %3973 = vst.msk [vmem:[#allocation4 + $0x188] sm:$0xff] %vm3923_vm5, %v3908_v61  ;;  %v2878_v58 = vadd.f32 %v2797_v31, %v2686_v12  ;;  %v2843_v63 = vadd.f32 %v2727_v49, %v2651_v55  ;;  %v3363_v61 = vmul.f32 %v8382_v10, %v2979_v14  ;;  %v3011_v12 = vld [vmem:[#allocation4 + $0x190] sm:$0xff]  ;;  %v3396_v10 = vmul.f32 %v8492_v34, %v3012_v53  ;;  %v2628_v53 = vld [vmem:[#allocation3 + $0x1a0] sm:$0xff] }
 0x438   : > { %3972 = vst.msk [vmem:[#allocation4 + $0x180] sm:$0xff] %vm3923_vm5, %v3907_v15  ;;  %v9477_v15 = vld [vmem:[#allocation12_spill] sm:$0xff]  ;;  %v9478_v49 = vld [vmem:[#allocation69_spill] sm:$0xff] }
 0x439   : > { %2943 = vst.msk [vmem:[#allocation3 + $0x170] sm:$0xff] %vm2896_vm4, %v2878_v58  ;;  %2908 = vst.msk [vmem:[#allocation3 + $0x58] sm:$0xff] %vm2896_vm4, %v2843_v63  ;;  %v2658_v31 = vmul.f32 %v9477_v15, %v2594_v44  ;;  %v2685_v2 = vmul.f32 %v9478_v49, %v2621_v38  ;;  %v2981_v44 = vld [vmem:[#allocation4 + $0xa0] sm:$0xff]  ;;  %v9481_v38 = vld [vmem:[#allocation13_spill] sm:$0xff] }
 0x43a   : > { %v2737_v25 = vpop.xlane.xlu0 %2736  ;;  %v2791_v26 = vpop.xlane.xlu1 %2790  ;;  %v2660_v54 = vmul.f32 %v9481_v38, %v2596_v47  ;;  %v3365_v15 = vmul.f32 %v8406_v60, %v2981_v44  ;;  %v2984_v38 = vld [vmem:[#allocation4 + $0xb8] sm:$0xff] }
 0x43b   : > { %v2848_v35 = vadd.f32 %v2737_v25, %v2656_v33  ;;  %v2875_v0 = vadd.f32 %v2791_v26, %v2683_v24  ;;  %v2591_v33 = vld [vmem:[#allocation3 + $0x78] sm:$0xff]  ;;  %v3395_v25 = vmul.f32 %v8530_v32, %v3011_v12 }
 0x43c   : > { %v2655_v14 = vmul.f32 %v9480_v29, %v2591_v33  ;;  %v9484_v33 = vld [vmem:[#allocation123_spill] sm:$0xff] }
 0x43d   : > { %2913 = vst.msk [vmem:[#allocation3 + $0x80] sm:$0xff] %vm2896_vm4, %v2848_v35  ;;  %2940 = vst.msk [vmem:[#allocation3 + $0x158] sm:$0xff] %vm2896_vm4, %v2875_v0  ;;  %v9479_v35 = vld [vmem:[#allocation87_spill] sm:$0xff] }
 0x43e   : > { %v2801_v1 = vpop.xlane.xlu0 %2800  ;;  %v2731_v7 = vpop.xlane.xlu1 %2730  ;;  %v2690_v0 = vmul.f32 %v9479_v35, %v2626_v46 }
 0x43f   : > { %v2880_v9 = vadd.f32 %v2801_v1, %v2688_v43  ;;  %v2845_v19 = vadd.f32 %v2731_v7, %v2653_v22  ;;  %v2623_v22 = vld [vmem:[#allocation3 + $0x178] sm:$0xff]  ;;  %v2982_v7 = vld [vmem:[#allocation4 + $0xa8] sm:$0xff] }
 0x440   : > { %v5338_v40 = vpop.f32.mrb[50].mxu0  ;;  %v3366_v12 = vmul.f32 %v8377_v59, %v2982_v7  ;;  %v2595_v7 = vld [vmem:[#allocation3 + $0x98] sm:$0xff] }
 0x441   : > { %2945 = vst.msk [vmem:[#allocation3 + $0x180] sm:$0xff] %vm2896_vm4, %v2880_v9  ;;  %2910 = vst.msk [vmem:[#allocation3 + $0x68] sm:$0xff] %vm2896_vm4, %v2845_v19  ;;  %v3878_v42 = vadd.f32 %v5338_v40, %v3364_v23  ;;  %v3565_v55 = vpop.f32.mrb[51].mxu0  ;;  %v9482_v23 = vld [vmem:[#allocation72_spill] sm:$0xff] }
 0x442   : > { %v3877_v56 = vadd.f32 %v3565_v55, %v3363_v61  ;;  %v2741_v58 = vpop.xlane.xlu0 %2740  ;;  %v2795_v63 = vpop.xlane.xlu1 %2794  ;;  %v2687_v9 = vmul.f32 %v9482_v23, %v2623_v22  ;;  %v2593_v40 = vld [vmem:[#allocation3 + $0x88] sm:$0xff] }
 0x443   : > { %3943 = vst.msk [vmem:[#allocation4 + $0x98] sm:$0xff] %vm3923_vm5, %v3878_v42  ;;  %v2850_v8 = vadd.f32 %v2741_v58, %v2658_v31  ;;  %v2877_v24 = vadd.f32 %v2795_v63, %v2685_v2  ;;  %v3014_v31 = vld [vmem:[#allocation4 + $0x1a8] sm:$0xff]  ;;  %v3013_v2 = vld [vmem:[#allocation4 + $0x1a0] sm:$0xff]  ;;  %v9483_v63 = vld [vmem:[#allocation93_spill] sm:$0xff] }
 0x444   : > { %3942 = vst.msk [vmem:[#allocation4 + $0x90] sm:$0xff] %vm3923_vm5, %v3877_v56  ;;  %v5418_v26 = vpop.f32.mrb[50].mxu1  ;;  %v2692_v46 = vmul.f32 %v9483_v63, %v2628_v53  ;;  %v3398_v60 = vmul.f32 %v8504_v21, %v3014_v31  ;;  %v3397_v35 = vmul.f32 %v8542_v45, %v3013_v2  ;;  %v3368_v31 = vmul.f32 %v8415_v39, %v2984_v38  ;;  %v3016_v2 = vld [vmem:[#allocation4 + $0x1b8] sm:$0xff] }
 0x445   : > { %2915 = vst.msk [vmem:[#allocation3 + $0x90] sm:$0xff] %vm2896_vm4, %v2850_v8  ;;  %2942 = vst.msk [vmem:[#allocation3 + $0x168] sm:$0xff] %vm2896_vm4, %v2877_v24  ;;  %v3910_v20 = vadd.f32 %v5418_v26, %v3396_v10  ;;  %v3790_v6 = vpop.f32.mrb[51].mxu1  ;;  %v2657_v10 = vmul.f32 %v9484_v33, %v2593_v40  ;;  %v2625_v26 = vld [vmem:[#allocation3 + $0x188] sm:$0xff] }
 0x446   : > { %v3909_v34 = vadd.f32 %v3790_v6, %v3395_v25  ;;  %v2805_v48 = vpop.xlane.xlu0 %2804  ;;  %v2735_v43 = vpop.xlane.xlu1 %2734  ;;  %v2598_v25 = vld [vmem:[#allocation3 + $0xb0] sm:$0xff] }
 0x447   : > { %3975 = vst.msk [vmem:[#allocation4 + $0x198] sm:$0xff] %vm3923_vm5, %v3910_v20  ;;  %v2882_v32 = vadd.f32 %v2805_v48, %v2690_v0  ;;  %v2847_v1 = vadd.f32 %v2735_v43, %v2655_v14  ;;  %v9486_v43 = vld [vmem:[#allocation73_spill] sm:$0xff] }
 0x448   : > { %3974 = vst.msk [vmem:[#allocation4 + $0x190] sm:$0xff] %vm3923_vm5, %v3909_v34  ;;  %v9485_v34 = vld [vmem:[#allocation16_spill] sm:$0xff]  ;;  %v2689_v47 = vmul.f32 %v9486_v43, %v2625_v26 }
 0x449   : > { %2947 = vst.msk [vmem:[#allocation3 + $0x190] sm:$0xff] %vm2896_vm4, %v2882_v32  ;;  %2912 = vst.msk [vmem:[#allocation3 + $0x78] sm:$0xff] %vm2896_vm4, %v2847_v1  ;;  %v2662_v48 = vmul.f32 %v9485_v34, %v2598_v25  ;;  %v2630_v1 = vld [vmem:[#allocation3 + $0x1b0] sm:$0xff]  ;;  %v2632_v25 = vld [vmem:[#allocation3 + $0x1c0] sm:$0xff] }
 0x44a   : > { %v2745_v19 = vpop.xlane.xlu0 %2744  ;;  %v2799_v61 = vpop.xlane.xlu1 %2798 }
 0x44b   : > { %v2852_v42 = vadd.f32 %v2745_v19, %v2660_v54  ;;  %v2879_v55 = vadd.f32 %v2799_v61, %v2687_v9  ;;  %v9487_v54 = vld [vmem:[#allocation95_spill] sm:$0xff]  ;;  %v9488_v9 = vld [vmem:[#allocation8_spill] sm:$0xff]  ;;  %v2983_v61 = vld [vmem:[#allocation4 + $0xb0] sm:$0xff] }
 0x44c   : > { %v5341_v49 = vpop.f32.mrb[52].mxu0  ;;  %v2694_v23 = vmul.f32 %v9487_v54, %v2630_v1  ;;  %v2659_v19 = vmul.f32 %v9488_v9, %v2595_v7  ;;  %v2629_v7 = vld [vmem:[#allocation3 + $0x1a8] sm:$0xff]  ;;  %v2985_v54 = vld [vmem:[#allocation4 + $0xc0] sm:$0xff]  ;;  %v9494_v9 = vld [vmem:[#allocation82_spill] sm:$0xff] }
 0x44d   : > { %2917 = vst.msk [vmem:[#allocation3 + $0xa0] sm:$0xff] %vm2896_vm4, %v2852_v42  ;;  %2944 = vst.msk [vmem:[#allocation3 + $0x178] sm:$0xff] %vm2896_vm4, %v2879_v55  ;;  %v3880_v56 = vadd.f32 %v5341_v49, %v3366_v12  ;;  %v3575_v58 = vpop.f32.mrb[53].mxu0  ;;  %v2600_v12 = vld [vmem:[#allocation3 + $0xc0] sm:$0xff]  ;;  %v3367_v49 = vmul.f32 %v8432_v27, %v2983_v61  ;;  %v3400_v27 = vmul.f32 %v8515_v17, %v3016_v2  ;;  %v2602_v17 = vld [vmem:[#allocation3 + $0xd0] sm:$0xff] }
 0x44e   : > { %v3879_v8 = vadd.f32 %v3575_v58, %v3365_v15  ;;  %v2809_v24 = vpop.xlane.xlu0 %2808  ;;  %v2739_v59 = vpop.xlane.xlu1 %2738  ;;  %v2627_v15 = vld [vmem:[#allocation3 + $0x198] sm:$0xff]  ;;  %v9489_v58 = vld [vmem:[#allocation81_spill] sm:$0xff]  ;;  %v9495_v2 = vld [vmem:[#allocation108_spill] sm:$0xff] }
 0x44f   : > { %3945 = vst.msk [vmem:[#allocation4 + $0xa8] sm:$0xff] %vm3923_vm5, %v3880_v56  ;;  %v2884_v20 = vadd.f32 %v2809_v24, %v2692_v46  ;;  %v2849_v6 = vadd.f32 %v2739_v59, %v2657_v10  ;;  %v2664_v63 = vmul.f32 %v9489_v58, %v2600_v12  ;;  %v3015_v46 = vld [vmem:[#allocation4 + $0x1b0] sm:$0xff]  ;;  %v2599_v12 = vld [vmem:[#allocation3 + $0xb8] sm:$0xff]  ;;  %v3017_v58 = vld [vmem:[#allocation4 + $0x1c0] sm:$0xff] }
 0x450   : > { %3944 = vst.msk [vmem:[#allocation4 + $0xa0] sm:$0xff] %vm3923_vm5, %v3879_v8  ;;  %v5421_v0 = vpop.f32.mrb[52].mxu1  ;;  %v9490_v24 = vld [vmem:[#allocation77_spill] sm:$0xff] }
 0x451   : > { %2949 = vst.msk [vmem:[#allocation3 + $0x1a0] sm:$0xff] %vm2896_vm4, %v2884_v20  ;;  %2914 = vst.msk [vmem:[#allocation3 + $0x88] sm:$0xff] %vm2896_vm4, %v2849_v6  ;;  %v3912_v29 = vadd.f32 %v5421_v0, %v3398_v60  ;;  %v3800_v14 = vpop.f32.mrb[53].mxu1  ;;  %v2691_v59 = vmul.f32 %v9490_v24, %v2627_v15  ;;  %v2597_v20 = vld [vmem:[#allocation3 + $0xa8] sm:$0xff]  ;;  %v2634_v61 = vld [vmem:[#allocation3 + $0x1d0] sm:$0xff] }
 0x452   : > { %v3911_v21 = vadd.f32 %v3800_v14, %v3397_v35  ;;  %v2749_v22 = vpop.xlane.xlu0 %2748  ;;  %v2803_v32 = vpop.xlane.xlu1 %2802  ;;  %v3399_v35 = vmul.f32 %v8552_v41, %v3015_v46  ;;  %v3018_v15 = vld [vmem:[#allocation4 + $0x1c8] sm:$0xff]  ;;  %v2604_v24 = vld [vmem:[#allocation3 + $0xe0] sm:$0xff] }
 0x453   : > { %3977 = vst.msk [vmem:[#allocation4 + $0x1a8] sm:$0xff] %vm3923_vm5, %v3912_v29  ;;  %v2854_v45 = vadd.f32 %v2749_v22, %v2662_v48  ;;  %v2881_v44 = vadd.f32 %v2803_v32, %v2689_v47  ;;  %v9491_v29 = vld [vmem:[#allocation22_spill] sm:$0xff] }
 0x454   : > { %3976 = vst.msk [vmem:[#allocation4 + $0x1a0] sm:$0xff] %vm3923_vm5, %v3911_v21  ;;  %v2696_v14 = vmul.f32 %v9491_v29, %v2632_v25  ;;  %v9492_v47 = vld [vmem:[#allocation10_spill] sm:$0xff] }
 0x455   : > { %2919 = vst.msk [vmem:[#allocation3 + $0xb0] sm:$0xff] %vm2896_vm4, %v2854_v45  ;;  %2946 = vst.msk [vmem:[#allocation3 + $0x188] sm:$0xff] %vm2896_vm4, %v2881_v44  ;;  %v2661_v21 = vmul.f32 %v9492_v47, %v2597_v20  ;;  %v2986_v45 = vld [vmem:[#allocation4 + $0xc8] sm:$0xff]  ;;  %v9493_v44 = vld [vmem:[#allocation94_spill] sm:$0xff] }
 0x456   : > { %v2813_v53 = vpop.xlane.xlu0 %2812  ;;  %v2743_v40 = vpop.xlane.xlu1 %2742  ;;  %v2666_v38 = vmul.f32 %v9493_v44, %v2602_v17  ;;  %v2988_v17 = vld [vmem:[#allocation4 + $0xd8] sm:$0xff]  ;;  %v2606_v44 = vld [vmem:[#allocation3 + $0xf0] sm:$0xff] }
 0x457   : > { %v2886_v42 = vadd.f32 %v2813_v53, %v2694_v23  ;;  %v2851_v55 = vadd.f32 %v2743_v40, %v2659_v19  ;;  %v2693_v19 = vmul.f32 %v9494_v9, %v2629_v7  ;;  %v3372_v9 = vmul.f32 %v8548_v37, %v2988_v17 }
 0x459   : > { %2951 = vst.msk [vmem:[#allocation3 + $0x1b0] sm:$0xff] %vm2896_vm4, %v2886_v42  ;;  %2916 = vst.msk [vmem:[#allocation3 + $0x98] sm:$0xff] %vm2896_vm4, %v2851_v55  ;;  %v5344_v56 = vpop.f32.mrb[54].mxu0  ;;  %v3370_v42 = vmul.f32 %v8526_v16, %v2986_v45 }
 0x45a   : > { %v3882_v33 = vadd.f32 %v5344_v56, %v3368_v31  ;;  %v3585_v10 = vpop.f32.mrb[55].mxu0  ;;  %v2753_v8 = vpop.xlane.xlu0 %2752  ;;  %v3369_v31 = vmul.f32 %v8564_v51, %v2985_v54  ;;  %v2698_v56 = vmul.f32 %v9495_v2, %v2634_v61  ;;  %v3402_v51 = vmul.f32 %v8537_v13, %v3018_v15  ;;  %v2636_v13 = vld [vmem:[#allocation3 + $0x1e0] sm:$0xff]  ;;  %v3020_v61 = vld [vmem:[#allocation4 + $0x1d8] sm:$0xff] }
 0x45b   : > { %v3881_v26 = vadd.f32 %v3585_v10, %v3367_v49  ;;  %v2856_v60 = vadd.f32 %v2753_v8, %v2664_v63  ;;  %v2807_v39 = vpop.xlane.xlu1 %2806  ;;  %v9496_v10 = vld [vmem:[#allocation91_spill] sm:$0xff] }
 0x45c   : > { %3947 = vst.msk [vmem:[#allocation4 + $0xb8] sm:$0xff] %vm3923_vm5, %v3882_v33  ;;  %v2883_v6 = vadd.f32 %v2807_v39, %v2691_v59  ;;  %v2663_v8 = vmul.f32 %v9496_v10, %v2599_v12  ;;  %v3401_v39 = vmul.f32 %v8574_v11, %v3017_v58  ;;  %v9501_v12 = vld [vmem:[#allocation27_spill] sm:$0xff]  ;;  %v2638_v58 = vld [vmem:[#allocation3 + $0x1f0] sm:$0xff] }
 0x45d   : > { %3946 = vst.msk [vmem:[#allocation4 + $0xb0] sm:$0xff] %vm3923_vm5, %v3881_v26  ;;  %v5424_v0 = vpop.f32.mrb[54].mxu1  ;;  %v2631_v26 = vld [vmem:[#allocation3 + $0x1b8] sm:$0xff]  ;;  %v9502_v2 = vld [vmem:[#allocation71_spill] sm:$0xff] }
 0x45e   : > { %2921 = vst.msk [vmem:[#allocation3 + $0xc0] sm:$0xff] %vm2896_vm4, %v2856_v60  ;;  %2948 = vst.msk [vmem:[#allocation3 + $0x198] sm:$0xff] %vm2896_vm4, %v2883_v6  ;;  %v3914_v34 = vadd.f32 %v5424_v0, %v3400_v27  ;;  %v3810_v48 = vpop.f32.mrb[55].mxu1  ;;  %v2817_v43 = vpop.xlane.xlu0 %2816  ;;  %v9497_v27 = vld [vmem:[#allocation98_spill] sm:$0xff] }
 0x45f   : > { %v3913_v22 = vadd.f32 %v3810_v48, %v3399_v35  ;;  %v2888_v32 = vadd.f32 %v2817_v43, %v2696_v14  ;;  %v2747_v1 = vpop.xlane.xlu1 %2746  ;;  %v2668_v6 = vmul.f32 %v9497_v27, %v2604_v24  ;;  %v9498_v14 = vld [vmem:[#allocation67_spill] sm:$0xff]  ;;  %v2635_v27 = vld [vmem:[#allocation3 + $0x1d8] sm:$0xff] }
 0x460   : > { %3979 = vst.msk [vmem:[#allocation4 + $0x1b8] sm:$0xff] %vm3923_vm5, %v3914_v34  ;;  %v2853_v41 = vadd.f32 %v2747_v1, %v2661_v21  ;;  %v2695_v34 = vmul.f32 %v9498_v14, %v2631_v26  ;;  %v2601_v21 = vld [vmem:[#allocation3 + $0xc8] sm:$0xff]  ;;  %v2987_v1 = vld [vmem:[#allocation4 + $0xd0] sm:$0xff] }
 0x461   : > { %3978 = vst.msk [vmem:[#allocation4 + $0x1b0] sm:$0xff] %vm3923_vm5, %v3913_v22  ;;  %v9499_v22 = vld [vmem:[#allocation105_spill] sm:$0xff]  ;;  %v2605_v14 = vld [vmem:[#allocation3 + $0xe8] sm:$0xff] }
 0x462   : > { %2953 = vst.msk [vmem:[#allocation3 + $0x1c0] sm:$0xff] %vm2896_vm4, %v2888_v32  ;;  %2918 = vst.msk [vmem:[#allocation3 + $0xa8] sm:$0xff] %vm2896_vm4, %v2853_v41  ;;  %v2757_v23 = vpop.xlane.xlu0 %2756  ;;  %v2700_v32 = vmul.f32 %v9499_v22, %v2636_v13  ;;  %v9500_v41 = vld [vmem:[#allocation19_spill] sm:$0xff]  ;;  %v9505_v22 = vld [vmem:[#allocation100_spill] sm:$0xff] }
 0x463   : > { %v2858_v53 = vadd.f32 %v2757_v23, %v2666_v38  ;;  %v2811_v40 = vpop.xlane.xlu1 %2810  ;;  %v2665_v45 = vmul.f32 %v9500_v41, %v2601_v21  ;;  %v2633_v23 = vld [vmem:[#allocation3 + $0x1c8] sm:$0xff]  ;;  %v3021_v21 = vld [vmem:[#allocation4 + $0x1e0] sm:$0xff] }
 0x464   : > { %v2885_v55 = vadd.f32 %v2811_v40, %v2693_v19  ;;  %v2637_v41 = vld [vmem:[#allocation3 + $0x1e8] sm:$0xff] }
 0x465   : > { %2923 = vst.msk [vmem:[#allocation3 + $0xd0] sm:$0xff] %vm2896_vm4, %v2858_v53  ;;  %v5347_v49 = vpop.f32.mrb[56].mxu0  ;;  %v3371_v53 = vmul.f32 %v8582_v62, %v2987_v1  ;;  %v3404_v62 = vmul.f32 %v8559_v4, %v3020_v61 }
 0x466   : > { %2950 = vst.msk [vmem:[#allocation3 + $0x1a8] sm:$0xff] %vm2896_vm4, %v2885_v55  ;;  %v3884_v63 = vadd.f32 %v5347_v49, %v3370_v42  ;;  %v3595_v46 = vpop.f32.mrb[57].mxu0  ;;  %v2821_v33 = vpop.xlane.xlu0 %2820  ;;  %v2670_v42 = vmul.f32 %v9501_v12, %v2606_v44  ;;  %v3019_v55 = vld [vmem:[#allocation4 + $0x1d0] sm:$0xff]  ;;  %v3405_v44 = vmul.f32 %v8614_v57, %v3021_v21  ;;  %v9507_v57 = vld [vmem:[#allocation106_spill] sm:$0xff] }
 0x467   : > { %v3883_v59 = vadd.f32 %v3595_v46, %v3369_v31  ;;  %v2890_v16 = vadd.f32 %v2821_v33, %v2698_v56  ;;  %v2751_v25 = vpop.xlane.xlu1 %2750  ;;  %v2697_v56 = vmul.f32 %v9502_v2, %v2633_v23  ;;  %v2603_v33 = vld [vmem:[#allocation3 + $0xd8] sm:$0xff]  ;;  %v9506_v23 = vld [vmem:[#allocation104_spill] sm:$0xff]  ;;  %v2991_v12 = vld [vmem:[#allocation4 + $0xf0] sm:$0xff] }
 0x468   : > { %3949 = vst.msk [vmem:[#allocation4 + $0xc8] sm:$0xff] %vm3923_vm5, %v3884_v63  ;;  %v2855_v60 = vadd.f32 %v2751_v25, %v2663_v8  ;;  %v3403_v8 = vmul.f32 %v8592_v18, %v3019_v55  ;;  %v3375_v2 = vmul.f32 %v8623_v3, %v2991_v12 }
 0x469   : > { %3948 = vst.msk [vmem:[#allocation4 + $0xc0] sm:$0xff] %vm3923_vm5, %v3883_v59  ;;  %v5427_v20 = vpop.f32.mrb[56].mxu1  ;;  %v2702_v59 = vmul.f32 %v8625_v52, %v2638_v58  ;;  %v2989_v52 = vld [vmem:[#allocation4 + $0xe0] sm:$0xff] }
 0x46a   : > { %2955 = vst.msk [vmem:[#allocation3 + $0x1d0] sm:$0xff] %vm2896_vm4, %v2890_v16  ;;  %2920 = vst.msk [vmem:[#allocation3 + $0xb8] sm:$0xff] %vm2896_vm4, %v2855_v60  ;;  %v3916_v35 = vadd.f32 %v5427_v20, %v3402_v51  ;;  %v3820_v0 = vpop.f32.mrb[57].mxu1  ;;  %v2761_v29 = vpop.xlane.xlu0 %2760  ;;  %v9503_v51 = vld [vmem:[#allocation75_spill] sm:$0xff] }
 0x46b   : > { %v3915_v48 = vadd.f32 %v3820_v0, %v3401_v39  ;;  %v2860_v43 = vadd.f32 %v2761_v29, %v2668_v6  ;;  %v2815_v47 = vpop.xlane.xlu1 %2814  ;;  %v2667_v60 = vmul.f32 %v9503_v51, %v2603_v33  ;;  %v2990_v6 = vld [vmem:[#allocation4 + $0xe8] sm:$0xff] }
 0x46c   : > { %3981 = vst.msk [vmem:[#allocation4 + $0x1c8] sm:$0xff] %vm3923_vm5, %v3916_v35  ;;  %v2887_v11 = vadd.f32 %v2815_v47, %v2695_v34  ;;  %v9504_v35 = vld [vmem:[#allocation85_spill] sm:$0xff]  ;;  %v3374_v34 = vmul.f32 %v8570_v28, %v2990_v6  ;;  %v4127_v6 = vld [vmem:[#allocation3 + $0x38] sm:$0xff] (!%p4920_p12) }
 0x46d   : > { %3980 = vst.msk [vmem:[#allocation4 + $0x1c0] sm:$0xff] %vm3923_vm5, %v3915_v48  ;;  %v2699_v0 = vmul.f32 %v9504_v35, %v2635_v27  ;;  %v3022_v48 = vld [vmem:[#allocation4 + $0x1e8] sm:$0xff] }
 0x46e   : > { %2925 = vst.msk [vmem:[#allocation3 + $0xe0] sm:$0xff] %vm2896_vm4, %v2860_v43  ;;  %2952 = vst.msk [vmem:[#allocation3 + $0x1b8] sm:$0xff] %vm2896_vm4, %v2887_v11  ;;  %v2825_v7 = vpop.xlane.xlu0 %2824  ;;  %v3373_v43 = vmul.f32 %v8604_v5, %v2989_v52  ;;  %v4125_v27 = vld [vmem:[#allocation3 + $0x28] sm:$0xff] (!%p4920_p12)  ;;  %v4126_v52 = vld [vmem:[#allocation3 + $0x30] sm:$0xff] (!%p4920_p12) }
 0x46f   : > { %v2892_v38 = vadd.f32 %v2825_v7, %v2700_v32  ;;  %v2755_v54 = vpop.xlane.xlu1 %2754  ;;  %v2669_v32 = vmul.f32 %v9505_v22, %v2605_v14  ;;  %v4132_v22 = vld [vmem:[#allocation3 + $0x60] sm:$0xff] (!%p4920_p12) }
 0x470   : > { %v2857_v19 = vadd.f32 %v2755_v54, %v2665_v45  ;;  %v3406_v45 = vmul.f32 %v8579_v50, %v3022_v48  ;;  %v4131_v48 = vld [vmem:[#allocation3 + $0x58] sm:$0xff] (!%p4920_p12) }
 0x471   : > { %2957 = vst.msk [vmem:[#allocation3 + $0x1e0] sm:$0xff] %vm2896_vm4, %v2892_v38  ;;  %v5350_v40 = vpop.f32.mrb[58].mxu0  ;;  %v4143_v12 = vld [vmem:[#allocation3 + $0xb8] sm:$0xff] (!%p4920_p12) }
 0x472   : > { %2922 = vst.msk [vmem:[#allocation3 + $0xc8] sm:$0xff] %vm2896_vm4, %v2857_v19  ;;  %v3886_v15 = vadd.f32 %v5350_v40, %v3372_v9  ;;  %v3605_v31 = vpop.f32.mrb[59].mxu0  ;;  %v2765_v49 = vpop.xlane.xlu0 %2764  ;;  %v2701_v9 = vmul.f32 %v9506_v23, %v2637_v41  ;;  %v2992_v40 = vld [vmem:[#allocation4 + $0xf8] sm:$0xff]  ;;  %v4134_v41 = vld [vmem:[#allocation3 + $0x70] sm:$0xff] (!%p4920_p12) }
 0x473   : > { %v3885_v63 = vadd.f32 %v3605_v31, %v3371_v53  ;;  %v2862_v37 = vadd.f32 %v2765_v49, %v2670_v42  ;;  %v2819_v46 = vpop.xlane.xlu1 %2818  ;;  %v2607_v53 = vld [vmem:[#allocation3 + $0xf8] sm:$0xff]  ;;  %v3376_v31 = vmul.f32 %v8589_v36, %v2992_v40 }
 0x474   : > { %3951 = vst.msk [vmem:[#allocation4 + $0xd8] sm:$0xff] %vm3923_vm5, %v3886_v15  ;;  %v2889_v10 = vadd.f32 %v2819_v46, %v2697_v56  ;;  %v2671_v42 = vmul.f32 %v9507_v57, %v2607_v53  ;;  %v2639_v15 = vld [vmem:[#allocation3 + $0x1f8] sm:$0xff] }
 0x475   : > { %3950 = vst.msk [vmem:[#allocation4 + $0xd0] sm:$0xff] %vm3923_vm5, %v3885_v63  ;;  %v5430_v24 = vpop.f32.mrb[58].mxu1  ;;  %v3024_v56 = vld [vmem:[#allocation4 + $0x1f8] sm:$0xff]  ;;  %v2703_v33 = vmul.f32 %v8602_v30, %v2639_v15  ;;  %v4122_v30 = vld [vmem:[#allocation3 + $0x10] sm:$0xff] (!%p4920_p12) }
 0x476   : > { %2927 = vst.msk [vmem:[#allocation3 + $0xf0] sm:$0xff] %vm2896_vm4, %v2862_v37  ;;  %2954 = vst.msk [vmem:[#allocation3 + $0x1c8] sm:$0xff] %vm2896_vm4, %v2889_v10  ;;  %v3918_v16 = vadd.f32 %v5430_v24, %v3404_v62  ;;  %v3830_v25 = vpop.f32.mrb[59].mxu1  ;;  %v2829_v26 = vpop.xlane.xlu0 %2828  ;;  %5917 = vrcp.f32 (!%p4920_p12), %v4122_v30 }
 0x477   : > { %v3917_v4 = vadd.f32 %v3830_v25, %v3403_v8  ;;  %v2894_v39 = vadd.f32 %v2829_v26, %v2702_v59  ;;  %v2759_v20 = vpop.xlane.xlu1 %2758  ;;  %v3023_v59 = vld [vmem:[#allocation4 + $0x1f0] sm:$0xff] }
 0x478   : > { %3983 = vst.msk [vmem:[#allocation4 + $0x1d8] sm:$0xff] %vm3923_vm5, %v3918_v16  ;;  %v2859_v18 = vadd.f32 %v2759_v20, %v2667_v60  ;;  %v4120_v60 = vld [vmem:[#allocation3] sm:$0xff] (!%p4920_p12)  ;;  %v4121_v20 = vld [vmem:[#allocation3 + $0x8] sm:$0xff] (!%p4920_p12) }
 0x479   : > { %3982 = vst.msk [vmem:[#allocation4 + $0x1d0] sm:$0xff] %vm3923_vm5, %v3917_v4  ;;  %v4123_v4 = vld [vmem:[#allocation3 + $0x18] sm:$0xff] (!%p4920_p12)  ;;  %5919 = vrcp.f32 (!%p4920_p12), %v4120_v60  ;;  %v4145_v15 = vld [vmem:[#allocation3 + $0xc8] sm:$0xff] (!%p4920_p12)  ;;  %v4154_v60 = vld [vmem:[#allocation3 + $0x110] sm:$0xff] (!%p4920_p12) }
 0x47a   : > { %2959 = vst.msk [vmem:[#allocation3 + $0x1f0] sm:$0xff] %vm2896_vm4, %v2894_v39  ;;  %2924 = vst.msk [vmem:[#allocation3 + $0xd8] sm:$0xff] %vm2896_vm4, %v2859_v18  ;;  %v6104_v39 = vmov (!%p4920_p12), 0   ;;  %5921 = vrcp.f32 (!%p4920_p12), %v4123_v4  ;;  %v4124_v18 = vld [vmem:[#allocation3 + $0x20] sm:$0xff] (!%p4920_p12) }
 0x47b   : > { %v2823_v29 = vpop.xlane.xlu1 %2822  ;;  %5916 = vset.pattern.permute.xlu1 (!%p4920_p12), %v6104_v39  ;;  %5915 = vset.pattern.permute.xlu0 (!%p4920_p12), %v6104_v39  ;;  %5923 = vrcp.f32 (!%p4920_p12), %v4121_v20  ;;  %v4157_v39 = vld [vmem:[#allocation3 + $0x128] sm:$0xff] (!%p4920_p12) }
 0x47c   : > { %v2891_v13 = vadd.f32 %v2823_v29, %v2699_v0  ;;  %5925 = vrcp.f32 (!%p4920_p12), %v4125_v27  ;;  %v4129_v29 = vld [vmem:[#allocation3 + $0x48] sm:$0xff] (!%p4920_p12)  ;;  %v4156_v27 = vld [vmem:[#allocation3 + $0x120] sm:$0xff] (!%p4920_p12) }
 0x47d   : > { %v5353_v47 = vpop.f32.mrb[60].mxu0  ;;  %5927 = vrcp.f32 (!%p4920_p12), %v4124_v18 }
 0x47e   : > { %2956 = vst.msk [vmem:[#allocation3 + $0x1d8] sm:$0xff] %vm2896_vm4, %v2891_v13  ;;  %v3888_v11 = vadd.f32 %v5353_v47, %v3374_v34  ;;  %v3615_v17 = vpop.f32.mrb[61].mxu0  ;;  %v3343_v58 = vpop.permute.xlu0 %3342  ;;  %5929 = vrcp.f32 (!%p4920_p12), %v4127_v6  ;;  %v4128_v34 = vld [vmem:[#allocation3 + $0x40] sm:$0xff] (!%p4920_p12)  ;;  %v4130_v47 = vld [vmem:[#allocation3 + $0x50] sm:$0xff] (!%p4920_p12)  ;;  %v4159_v6 = vld [vmem:[#allocation3 + $0x138] sm:$0xff] (!%p4920_p12) }
 0x47f   : > { %v3887_v1 = vadd.f32 %v3615_v17, %v3373_v43  ;;  %v2763_v7 = vpop.xlane.xlu1 %2762  ;;  %v3408_v8 = vmul.f32 %v3343_v58, %v3024_v56  ;;  %5931 = vrcp.f32 (!%p4920_p12), %v4126_v52 }
 0x480   : > { %3953 = vst.msk [vmem:[#allocation4 + $0xe8] sm:$0xff] %vm3923_vm5, %v3888_v11  ;;  %v2861_v28 = vadd.f32 %v2763_v7, %v2669_v32  ;;  %v5918_v35 = vpop.eup (!%p4920_p12), %5917  ;;  %5933 = vrcp.f32 (!%p4920_p12), %v4129_v29  ;;  %v4133_v11 = vld [vmem:[#allocation3 + $0x68] sm:$0xff] (!%p4920_p12) }
 0x481   : > { %3952 = vst.msk [vmem:[#allocation4 + $0xe0] sm:$0xff] %vm3923_vm5, %v3887_v1  ;;  %v5433_v5 = vpop.f32.mrb[60].mxu1  ;;  %4260 = vperm.xlu1 (!%p4920_p12), %5916, %v5918_v35   ;;  %5935 = vrcp.f32 (!%p4920_p12), %v4128_v34  ;;  %v4135_v1 = vld [vmem:[#allocation3 + $0x78] sm:$0xff] (!%p4920_p12)  ;;  %v4158_v35 = vld [vmem:[#allocation3 + $0x130] sm:$0xff] (!%p4920_p12)  ;;  %v4161_v29 = vld [vmem:[#allocation3 + $0x148] sm:$0xff] (!%p4920_p12) }
 0x482   : > { %2926 = vst.msk [vmem:[#allocation3 + $0xe8] sm:$0xff] %vm2896_vm4, %v2861_v28  ;;  %v3920_v38 = vadd.f32 %v5433_v5, %v3406_v45  ;;  %v3840_v54 = vpop.f32.mrb[61].mxu1  ;;  %5937 = vrcp.f32 (!%p4920_p12), %v4131_v48  ;;  %v4137_v28 = vld [vmem:[#allocation3 + $0x88] sm:$0xff] (!%p4920_p12)  ;;  %v4136_v5 = vld [vmem:[#allocation3 + $0x80] sm:$0xff] (!%p4920_p12)  ;;  %v4147_v56 = vld [vmem:[#allocation3 + $0xd8] sm:$0xff] (!%p4920_p12) }
 0x483   : > { %v3919_v19 = vadd.f32 %v3840_v54, %v3405_v44  ;;  %v2827_v61 = vpop.xlane.xlu1 %2826  ;;  %v5920_v0 = vpop.eup (!%p4920_p12), %5919  ;;  %5939 = vrcp.f32 (!%p4920_p12), %v4130_v47  ;;  %v4139_v54 = vld [vmem:[#allocation3 + $0x98] sm:$0xff] (!%p4920_p12)  ;;  %v4160_v34 = vld [vmem:[#allocation3 + $0x140] sm:$0xff] (!%p4920_p12)  ;;  %v4162_v47 = vld [vmem:[#allocation3 + $0x150] sm:$0xff] (!%p4920_p12) }
 0x484   : > { %3985 = vst.msk [vmem:[#allocation4 + $0x1e8] sm:$0xff] %vm3923_vm5, %v3920_v38  ;;  %v2893_v50 = vadd.f32 %v2827_v61, %v2701_v9  ;;  %v5922_v14 = vpop.eup (!%p4920_p12), %5921  ;;  %4250 = vperm.xlu0 (!%p4920_p12), %5915, %v5920_v0   ;;  %5941 = vrcp.f32 (!%p4920_p12), %v4133_v11  ;;  %v4138_v9 = vld [vmem:[#allocation3 + $0x90] sm:$0xff] (!%p4920_p12)  ;;  %v4141_v61 = vld [vmem:[#allocation3 + $0xa8] sm:$0xff] (!%p4920_p12)  ;;  %v4163_v48 = vld [vmem:[#allocation3 + $0x158] sm:$0xff] (!%p4920_p12) }
 0x485   : > { %3984 = vst.msk [vmem:[#allocation4 + $0x1e0] sm:$0xff] %vm3923_vm5, %v3919_v19  ;;  %v5924_v13 = vpop.eup (!%p4920_p12), %5923  ;;  %4265 = vperm.xlu1 (!%p4920_p12), %5916, %v5922_v14   ;;  %5943 = vrcp.f32 (!%p4920_p12), %v4132_v22  ;;  %v4165_v11 = vld [vmem:[#allocation3 + $0x168] sm:$0xff] (!%p4920_p12)  ;;  %v4164_v22 = vld [vmem:[#allocation3 + $0x160] sm:$0xff] (!%p4920_p12) }
 0x486   : > { %2958 = vst.msk [vmem:[#allocation3 + $0x1e8] sm:$0xff] %vm2896_vm4, %v2893_v50  ;;  %v5926_v43 = vpop.eup (!%p4920_p12), %5925  ;;  %5945 = vrcp.f32 (!%p4920_p12), %v4135_v1  ;;  %v4140_v50 = vld [vmem:[#allocation3 + $0xa0] sm:$0xff] (!%p4920_p12)  ;;  %v4167_v1 = vld [vmem:[#allocation3 + $0x178] sm:$0xff] (!%p4920_p12) }
 0x487   : > { %v2767_v55 = vpop.xlane.xlu1 %2766  ;;  %v5928_v21 = vpop.eup (!%p4920_p12), %5927  ;;  %5947 = vrcp.f32 (!%p4920_p12), %v4134_v41  ;;  %v4166_v41 = vld [vmem:[#allocation3 + $0x170] sm:$0xff] (!%p4920_p12) }
 0x488   : > { %v2863_v49 = vadd.f32 %v2767_v55, %v2671_v42  ;;  %4255 = vperm.xlu0 (!%p4920_p12), %5915, %v5924_v13   ;;  %v5930_v17 = vpop.eup (!%p4920_p12), %5929  ;;  %5949 = vrcp.f32 (!%p4920_p12), %v4137_v28  ;;  %v4142_v42 = vld [vmem:[#allocation3 + $0xb0] sm:$0xff] (!%p4920_p12)  ;;  %v4169_v28 = vld [vmem:[#allocation3 + $0x188] sm:$0xff] (!%p4920_p12) }
 0x489   : > { %v5356_v63 = vpop.f32.mrb[62].mxu0  ;;  %4275 = vperm.xlu1 (!%p4920_p12), %5916, %v5926_v43   ;;  %v5932_v32 = vpop.eup (!%p4920_p12), %5931  ;;  %5951 = vrcp.f32 (!%p4920_p12), %v4136_v5  ;;  %v4168_v5 = vld [vmem:[#allocation3 + $0x180] sm:$0xff] (!%p4920_p12) }
 0x48a   : > { %2928 = vst.msk [vmem:[#allocation3 + $0xf8] sm:$0xff] %vm2896_vm4, %v2863_v49  ;;  %v3890_v37 = vadd.f32 %v5356_v63, %v3376_v31  ;;  %v3625_v46 = vpop.f32.mrb[63].mxu0  ;;  %v5934_v7 = vpop.eup (!%p4920_p12), %5933  ;;  %5953 = vrcp.f32 (!%p4920_p12), %v4139_v54  ;;  %v4144_v49 = vld [vmem:[#allocation3 + $0xc0] sm:$0xff] (!%p4920_p12)  ;;  %v4146_v63 = vld [vmem:[#allocation3 + $0xd0] sm:$0xff] (!%p4920_p12)  ;;  %v4171_v54 = vld [vmem:[#allocation3 + $0x198] sm:$0xff] (!%p4920_p12) }
 0x48b   : > { %v3889_v62 = vadd.f32 %v3625_v46, %v3375_v2  ;;  %v2831_v10 = vpop.xlane.xlu1 %2830  ;;  %v5936_v45 = vpop.eup (!%p4920_p12), %5935  ;;  %5955 = vrcp.f32 (!%p4920_p12), %v4138_v9  ;;  %v4149_v46 = vld [vmem:[#allocation3 + $0xe8] sm:$0xff] (!%p4920_p12)  ;;  %v4170_v9 = vld [vmem:[#allocation3 + $0x190] sm:$0xff] (!%p4920_p12) }
 0x48c   : > { %3955 = vst.msk [vmem:[#allocation4 + $0xf8] sm:$0xff] %vm3923_vm5, %v3890_v37  ;;  %v2895_v24 = vadd.f32 %v2831_v10, %v2703_v33  ;;  %4270 = vperm.xlu0 (!%p4920_p12), %5915, %v5928_v21   ;;  %v5938_v44 = vpop.eup (!%p4920_p12), %5937  ;;  %5957 = vrcp.f32 (!%p4920_p12), %v4141_v61  ;;  %v4173_v61 = vld [vmem:[#allocation3 + $0x1a8] sm:$0xff] (!%p4920_p12) }
 0x48d   : > { %3954 = vst.msk [vmem:[#allocation4 + $0xf0] sm:$0xff] %vm3923_vm5, %v3889_v62  ;;  %v5436_v36 = vpop.f32.mrb[62].mxu1  ;;  %4285 = vperm.xlu1 (!%p4920_p12), %5916, %v5930_v17   ;;  %v5940_v38 = vpop.eup (!%p4920_p12), %5939  ;;  %5959 = vrcp.f32 (!%p4920_p12), %v4140_v50  ;;  %v4148_v62 = vld [vmem:[#allocation3 + $0xe0] sm:$0xff] (!%p4920_p12) }
 0x48e   : > { %2960 = vst.msk [vmem:[#allocation3 + $0x1f8] sm:$0xff] %vm2896_vm4, %v2895_v24  ;;  %v3922_v3 = vadd.f32 %v5436_v36, %v3408_v8  ;;  %v3850_v16 = vpop.f32.mrb[63].mxu1  ;;  %4055 = sbr.rel (%p4920_p12) target bundleno = 1411 (0x583), region = 116  ;;  %v5942_v23 = vpop.eup (!%p4920_p12), %5941  ;;  %5961 = vrcp.f32 (!%p4920_p12), %v4143_v12  ;;  %v4150_v36 = vld [vmem:[#allocation3 + $0xf0] sm:$0xff] (!%p4920_p12)  ;;  %v4172_v50 = vld [vmem:[#allocation3 + $0x1a0] sm:$0xff] (!%p4920_p12)  ;;  %v4175_v12 = vld [vmem:[#allocation3 + $0x1b8] sm:$0xff] (!%p4920_p12) }
 0x48f   : > { %v3338_v25 = vpop.permute.xlu1 %3337  ;;  %v5944_v19 = vpop.eup (!%p4920_p12), %5943  ;;  %5963 = vrcp.f32 (!%p4920_p12), %v4142_v42  ;;  %v4174_v42 = vld [vmem:[#allocation3 + $0x1b0] sm:$0xff] (!%p4920_p12) }
 0x490   : > { %3987 = vst.msk [vmem:[#allocation4 + $0x1f8] sm:$0xff] %vm3923_vm5, %v3922_v3  ;;  %v3407_v26 = vmul.f32 %v3338_v25, %v3023_v59  ;;  %4280 = vperm.xlu0 (!%p4920_p12), %5915, %v5932_v32   ;;  %v5946_v53 = vpop.eup (!%p4920_p12), %5945  ;;  %5965 = vrcp.f32 (!%p4920_p12), %v4145_v15  ;;  %v4153_v3 = vld [vmem:[#allocation3 + $0x108] sm:$0xff] (!%p4920_p12)  ;;  %v4152_v25 = vld [vmem:[#allocation3 + $0x100] sm:$0xff] (!%p4920_p12) }
 0x491   : > { %4295 = vperm.xlu1 (!%p4920_p12), %5916, %v5934_v7   ;;  %v5948_v40 = vpop.eup (!%p4920_p12), %5947  ;;  %5967 = vrcp.f32 (!%p4920_p12), %v4144_v49  ;;  %v4151_v8 = vld [vmem:[#allocation3 + $0xf8] sm:$0xff] (!%p4920_p12)  ;;  %v4177_v15 = vld [vmem:[#allocation3 + $0x1c8] sm:$0xff] (!%p4920_p12)  ;;  %v4176_v49 = vld [vmem:[#allocation3 + $0x1c0] sm:$0xff] (!%p4920_p12) }
 0x492   : > { %v3921_v51 = vadd.f32 %v3850_v16, %v3407_v26  ;;  %v5950_v57 = vpop.eup (!%p4920_p12), %5949  ;;  %5969 = vrcp.f32 (!%p4920_p12), %v4147_v56  ;;  %v4179_v56 = vld [vmem:[#allocation3 + $0x1d8] sm:$0xff] (!%p4920_p12) }
 0x493   : > { %v5952_v55 = vpop.eup (!%p4920_p12), %5951  ;;  %5971 = vrcp.f32 (!%p4920_p12), %v4146_v63  ;;  %v4178_v63 = vld [vmem:[#allocation3 + $0x1d0] sm:$0xff] (!%p4920_p12) }
 0x494   : > { %3986 = vst.msk [vmem:[#allocation4 + $0x1f0] sm:$0xff] %vm3923_vm5, %v3921_v51  ;;  %4290 = vperm.xlu0 (!%p4920_p12), %5915, %v5936_v45   ;;  %v5954_v31 = vpop.eup (!%p4920_p12), %5953  ;;  %5973 = vrcp.f32 (!%p4920_p12), %v4149_v46  ;;  %v4155_v51 = vld [vmem:[#allocation3 + $0x118] sm:$0xff] (!%p4920_p12)  ;;  %v4181_v46 = vld [vmem:[#allocation3 + $0x1e8] sm:$0xff] (!%p4920_p12) }
 0x495   : > { %4305 = vperm.xlu1 %5916, %v5938_v44   ;;  %v5956_v2 = vpop.eup %5955  ;;  %5975 = vrcp.f32 %v4148_v62  ;;  %v4180_v62 = vld [vmem:[#allocation3 + $0x1e0] sm:$0xff] }
 0x496   : > { %v5958_v58 = vpop.eup %5957  ;;  %5977 = vrcp.f32 %v4151_v8  ;;  %v4183_v8 = vld [vmem:[#allocation3 + $0x1f8] sm:$0xff] }
 0x497   : > { %v5960_v37 = vpop.eup %5959  ;;  %5979 = vrcp.f32 %v4150_v36  ;;  %v4182_v36 = vld [vmem:[#allocation3 + $0x1f0] sm:$0xff] }
 0x498   : > { %4300 = vperm.xlu0 %5915, %v5940_v38   ;;  %v5962_v33 = vpop.eup %5961  ;;  %5981 = vrcp.f32 %v4153_v3 }
 0x499   : > { %4315 = vperm.xlu1 %5916, %v5942_v23   ;;  %v5964_v10 = vpop.eup %5963  ;;  %5983 = vrcp.f32 %v4152_v25 }
 0x49a   : > { %v5966_v24 = vpop.eup %5965  ;;  %5985 = vrcp.f32 %v4155_v51 }
 0x49b   : > { %v5968_v59 = vpop.eup %5967  ;;  %5987 = vrcp.f32 %v4154_v60  ;;  %v4058_v60 = vld [vmem:[#allocation4 + $0x10] sm:$0xff] }
 0x49c   : > { %4310 = vperm.xlu0 %5915, %v5944_v19   ;;  %v5970_v16 = vpop.eup %5969  ;;  %5989 = vrcp.f32 %v4157_v39 }
 0x49d   : > { %4325 = vperm.xlu1 %5916, %v5946_v53   ;;  %v5972_v26 = vpop.eup %5971  ;;  %5991 = vrcp.f32 %v4156_v27 }
 0x49e   : > { %v5974_v30 = vpop.eup %5973  ;;  %5993 = vrcp.f32 %v4159_v6  ;;  %v4059_v6 = vld [vmem:[#allocation4 + $0x18] sm:$0xff] }
 0x49f   : > { %v5976_v4 = vpop.eup %5975  ;;  %5995 = vrcp.f32 %v4158_v35 }
 0x4a0   : > { %4320 = vperm.xlu0 %5915, %v5948_v40   ;;  %v5978_v20 = vpop.eup %5977  ;;  %5997 = vrcp.f32 %v4161_v29 }
 0x4a1   : > { %4335 = vperm.xlu1 %5916, %v5950_v57   ;;  %v5980_v18 = vpop.eup %5979  ;;  %5999 = vrcp.f32 %v4160_v34  ;;  %v4061_v34 = vld [vmem:[#allocation4 + $0x28] sm:$0xff] }
 0x4a2   : > { %v5982_v52 = vpop.eup %5981  ;;  %6001 = vrcp.f32 %v4163_v48 }
 0x4a3   : > { %v5984_v0 = vpop.eup %5983  ;;  %6003 = vrcp.f32 %v4162_v47 }
 0x4a4   : > { %4330 = vperm.xlu0 %5915, %v5952_v55   ;;  %v5986_v14 = vpop.eup %5985  ;;  %6005 = vrcp.f32 %v4165_v11  ;;  %v4063_v11 = vld [vmem:[#allocation4 + $0x38] sm:$0xff] }
 0x4a5   : > { %4345 = vperm.xlu1 %5916, %v5954_v31   ;;  %v5988_v13 = vpop.eup %5987  ;;  %6007 = vrcp.f32 %v4164_v22 }
 0x4a6   : > { %v5990_v43 = vpop.eup %5989  ;;  %6009 = vrcp.f32 %v4167_v1 }
 0x4a7   : > { %v5992_v21 = vpop.eup %5991  ;;  %6011 = vrcp.f32 %v4166_v41  ;;  %v4065_v41 = vld [vmem:[#allocation4 + $0x48] sm:$0xff] }
 0x4a8   : > { %4340 = vperm.xlu0 %5915, %v5956_v2   ;;  %v5994_v17 = vpop.eup %5993  ;;  %6013 = vrcp.f32 %v4169_v28 }
 0x4a9   : > { %4355 = vperm.xlu1 %5916, %v5958_v58   ;;  %v5996_v32 = vpop.eup %5995  ;;  %6015 = vrcp.f32 %v4168_v5 }
 0x4aa   : > { %v5998_v7 = vpop.eup %5997  ;;  %6017 = vrcp.f32 %v4171_v54  ;;  %v4067_v54 = vld [vmem:[#allocation4 + $0x58] sm:$0xff] }
 0x4ab   : > { %v6000_v45 = vpop.eup %5999  ;;  %6019 = vrcp.f32 %v4170_v9 }
 0x4ac   : > { %4350 = vperm.xlu0 %5915, %v5960_v37   ;;  %v6002_v44 = vpop.eup %6001  ;;  %6021 = vrcp.f32 %v4173_v61 }
 0x4ad   : > { %4365 = vperm.xlu1 %5916, %v5962_v33   ;;  %v6004_v38 = vpop.eup %6003  ;;  %6023 = vrcp.f32 %v4172_v50  ;;  %v4069_v50 = vld [vmem:[#allocation4 + $0x68] sm:$0xff] }
 0x4ae   : > { %v6006_v23 = vpop.eup %6005  ;;  %6025 = vrcp.f32 %v4175_v12 }
 0x4af   : > { %v6008_v19 = vpop.eup %6007  ;;  %6027 = vrcp.f32 %v4174_v42 }
 0x4b0   : > { %4360 = vperm.xlu0 %5915, %v5964_v10   ;;  %v6010_v53 = vpop.eup %6009  ;;  %6029 = vrcp.f32 %v4177_v15  ;;  %v4071_v15 = vld [vmem:[#allocation4 + $0x78] sm:$0xff] }
 0x4b1   : > { %4375 = vperm.xlu1 %5916, %v5966_v24   ;;  %v6012_v40 = vpop.eup %6011  ;;  %6031 = vrcp.f32 %v4176_v49 }
 0x4b2   : > { %v6014_v57 = vpop.eup %6013  ;;  %6033 = vrcp.f32 %v4179_v56 }
 0x4b3   : > { %v6016_v55 = vpop.eup %6015  ;;  %6035 = vrcp.f32 %v4178_v63  ;;  %v4073_v63 = vld [vmem:[#allocation4 + $0x88] sm:$0xff] }
 0x4b4   : > { %4370 = vperm.xlu0 %5915, %v5968_v59   ;;  %v6018_v31 = vpop.eup %6017  ;;  %6037 = vrcp.f32 %v4181_v46 }
 0x4b5   : > { %4385 = vperm.xlu1 %5916, %v5970_v16   ;;  %v6020_v2 = vpop.eup %6019  ;;  %6039 = vrcp.f32 %v4180_v62 }
 0x4b6   : > { %v6022_v58 = vpop.eup %6021  ;;  %6041 = vrcp.f32 %v4183_v8  ;;  %v4075_v8 = vld [vmem:[#allocation4 + $0x98] sm:$0xff] }
 0x4b7   : > { %v6024_v37 = vpop.eup %6023  ;;  %6043 = vrcp.f32 %v4182_v36 }
 0x4b8   : > { %4380 = vperm.xlu0 %5915, %v5972_v26   ;;  %v6026_v33 = vpop.eup %6025 }
 0x4b9   : > { %4395 = vperm.xlu1 %5916, %v5974_v30   ;;  %v6028_v10 = vpop.eup %6027 }
 0x4ba   : > { %v6030_v24 = vpop.eup %6029 }
 0x4bb   : > { %v6032_v59 = vpop.eup %6031 }
 0x4bc   : > { %4390 = vperm.xlu0 %5915, %v5976_v4   ;;  %v6034_v3 = vpop.eup %6033  ;;  %v4056_v4 = vld [vmem:[#allocation4] sm:$0xff] }
 0x4bd   : > { %4405 = vperm.xlu1 %5916, %v5978_v20   ;;  %v6036_v16 = vpop.eup %6035 }
 0x4be   : > { %v6038_v25 = vpop.eup %6037 }
 0x4bf   : > { %v6040_v26 = vpop.eup %6039 }
 0x4c0   : > { %4400 = vperm.xlu0 %5915, %v5980_v18   ;;  %v6042_v51 = vpop.eup %6041 }
 0x4c1   : > { %4415 = vperm.xlu1 %5916, %v5982_v52   ;;  %v6044_v30 = vpop.eup %6043  ;;  %v4057_v52 = vld [vmem:[#allocation4 + $0x8] sm:$0xff] }
 0x4c4   : > { %4410 = vperm.xlu0 %5915, %v5984_v0  }
 0x4c5   : > { %4425 = vperm.xlu1 %5916, %v5986_v14  }
 0x4c8   : > { %4420 = vperm.xlu0 %5915, %v5988_v13   ;;  %v4060_v13 = vld [vmem:[#allocation4 + $0x20] sm:$0xff] }
 0x4c9   : > { %4435 = vperm.xlu1 %5916, %v5990_v43  }
 0x4cc   : > { %4430 = vperm.xlu0 %5915, %v5992_v21  }
 0x4cd   : > { %4445 = vperm.xlu1 %5916, %v5994_v17   ;;  %v4062_v17 = vld [vmem:[#allocation4 + $0x30] sm:$0xff] }
 0x4d0   : > { %4440 = vperm.xlu0 %5915, %v5996_v32  }
 0x4d1   : > { %4455 = vperm.xlu1 %5916, %v5998_v7  }
 0x4d4   : > { %4450 = vperm.xlu0 %5915, %v6000_v45   ;;  %v4064_v45 = vld [vmem:[#allocation4 + $0x40] sm:$0xff] }
 0x4d5   : > { %4465 = vperm.xlu1 %5916, %v6002_v44  }
 0x4d8   : > { %4460 = vperm.xlu0 %5915, %v6004_v38  }
 0x4d9   : > { %4475 = vperm.xlu1 %5916, %v6006_v23   ;;  %v4066_v23 = vld [vmem:[#allocation4 + $0x50] sm:$0xff] }
 0x4dc   : > { %4470 = vperm.xlu0 %5915, %v6008_v19  }
 0x4dd   : > { %4485 = vperm.xlu1 %5916, %v6010_v53  }
 0x4e0   : > { %4480 = vperm.xlu0 %5915, %v6012_v40   ;;  %v4068_v40 = vld [vmem:[#allocation4 + $0x60] sm:$0xff] }
 0x4e1   : > { %4495 = vperm.xlu1 %5916, %v6014_v57  }
 0x4e4   : > { %4490 = vperm.xlu0 %5915, %v6016_v55  }
 0x4e5   : > { %4505 = vperm.xlu1 %5916, %v6018_v31   ;;  %v4070_v31 = vld [vmem:[#allocation4 + $0x70] sm:$0xff] }
 0x4e8   : > { %4500 = vperm.xlu0 %5915, %v6020_v2  }
 0x4e9   : > { %4515 = vperm.xlu1 %5916, %v6022_v58  }
 0x4ec   : > { %4510 = vperm.xlu0 %5915, %v6024_v37   ;;  %v4072_v37 = vld [vmem:[#allocation4 + $0x80] sm:$0xff] }
 0x4ed   : > { %4525 = vperm.xlu1 %5916, %v6026_v33  }
 0x4f0   : > { %4520 = vperm.xlu0 %5915, %v6028_v10  }
 0x4f1   : > { %4535 = vperm.xlu1 %5916, %v6030_v24   ;;  %v4074_v24 = vld [vmem:[#allocation4 + $0x90] sm:$0xff] }
 0x4f4   : > { %4530 = vperm.xlu0 %5915, %v6032_v59  }
 0x4f5   : > { %4545 = vperm.xlu1 %5916, %v6034_v3  }
 0x4f8   : > { %4540 = vperm.xlu0 %5915, %v6036_v16  }
 0x4f9   : > { %4555 = vperm.xlu1 %5916, %v6038_v25   ;;  %v4077_v25 = vld [vmem:[#allocation4 + $0xa8] sm:$0xff] }
 0x4fc   : > { %4550 = vperm.xlu0 %5915, %v6040_v26   ;;  %v4076_v26 = vld [vmem:[#allocation4 + $0xa0] sm:$0xff] }
 0x4fd   : > { %4565 = vperm.xlu1 %5916, %v6042_v51  }
 0x500   : > { %4560 = vperm.xlu0 %5915, %v6044_v30   ;;  %v4261_v39 = vpop.permute.xlu1 %4260 }
 0x501   : > { %v4570_v20 = vmul.f32 %v4261_v39, %v4058_v60  ;;  %v4079_v39 = vld [vmem:[#allocation4 + $0xb8] sm:$0xff] }
 0x503   : > { %v4251_v27 = vpop.permute.xlu0 %4250  ;;  %4634 = vst.msk [vmem:[%s6348_s11 + $0x10] sm:$0xff] %vm3923_vm5, %v4570_v20  ;;  %v4078_v20 = vld [vmem:[#allocation4 + $0xb0] sm:$0xff] }
 0x504   : > { %v4568_v18 = vmul.f32 %v4251_v27, %v4056_v4  ;;  %v4266_v35 = vpop.permute.xlu1 %4265 }
 0x505   : > { %v4571_v0 = vmul.f32 %v4266_v35, %v4059_v6  ;;  %v4081_v35 = vld [vmem:[#allocation4 + $0xc8] sm:$0xff] }
 0x506   : > { %4632 = vst.msk [vmem:[%s6348_s11] sm:$0xff] %vm3923_vm5, %v4568_v18 }
 0x507   : > { %v4256_v29 = vpop.permute.xlu0 %4255  ;;  %4635 = vst.msk [vmem:[%s6348_s11 + $0x18] sm:$0xff] %vm3923_vm5, %v4571_v0  ;;  %v4080_v0 = vld [vmem:[#allocation4 + $0xc0] sm:$0xff] }
 0x508   : > { %v4569_v14 = vmul.f32 %v4256_v29, %v4057_v52  ;;  %v4276_v48 = vpop.permute.xlu1 %4275 }
 0x509   : > { %v4573_v43 = vmul.f32 %v4276_v48, %v4061_v34  ;;  %v4083_v48 = vld [vmem:[#allocation4 + $0xd8] sm:$0xff] }
 0x50a   : > { %4633 = vst.msk [vmem:[%s6348_s11 + $0x8] sm:$0xff] %vm3923_vm5, %v4569_v14 }
 0x50b   : > { %v4271_v47 = vpop.permute.xlu0 %4270  ;;  %4637 = vst.msk [vmem:[%s6348_s11 + $0x28] sm:$0xff] %vm3923_vm5, %v4573_v43  ;;  %v4082_v43 = vld [vmem:[#allocation4 + $0xd0] sm:$0xff] }
 0x50c   : > { %v4572_v21 = vmul.f32 %v4271_v47, %v4060_v13  ;;  %v4286_v22 = vpop.permute.xlu1 %4285 }
 0x50d   : > { %v4575_v32 = vmul.f32 %v4286_v22, %v4063_v11  ;;  %v4085_v22 = vld [vmem:[#allocation4 + $0xe8] sm:$0xff] }
 0x50e   : > { %4636 = vst.msk [vmem:[%s6348_s11 + $0x20] sm:$0xff] %vm3923_vm5, %v4572_v21 }
 0x50f   : > { %v4281_v1 = vpop.permute.xlu0 %4280  ;;  %4639 = vst.msk [vmem:[%s6348_s11 + $0x38] sm:$0xff] %vm3923_vm5, %v4575_v32  ;;  %v4084_v32 = vld [vmem:[#allocation4 + $0xe0] sm:$0xff] }
 0x510   : > { %v4574_v7 = vmul.f32 %v4281_v1, %v4062_v17  ;;  %v4296_v28 = vpop.permute.xlu1 %4295 }
 0x511   : > { %v4577_v44 = vmul.f32 %v4296_v28, %v4065_v41  ;;  %v4087_v28 = vld [vmem:[#allocation4 + $0xf8] sm:$0xff] }
 0x512   : > { %4638 = vst.msk [vmem:[%s6348_s11 + $0x30] sm:$0xff] %vm3923_vm5, %v4574_v7 }
 0x513   : > { %v4291_v5 = vpop.permute.xlu0 %4290  ;;  %4641 = vst.msk [vmem:[%s6348_s11 + $0x48] sm:$0xff] %vm3923_vm5, %v4577_v44  ;;  %v4086_v44 = vld [vmem:[#allocation4 + $0xf0] sm:$0xff] }
 0x514   : > { %v4576_v38 = vmul.f32 %v4291_v5, %v4064_v45  ;;  %v4306_v9 = vpop.permute.xlu1 %4305 }
 0x515   : > { %v4579_v19 = vmul.f32 %v4306_v9, %v4067_v54  ;;  %v4089_v9 = vld [vmem:[#allocation4 + $0x108] sm:$0xff] }
 0x516   : > { %4640 = vst.msk [vmem:[%s6348_s11 + $0x40] sm:$0xff] %vm3923_vm5, %v4576_v38 }
 0x517   : > { %v4301_v61 = vpop.permute.xlu0 %4300  ;;  %4643 = vst.msk [vmem:[%s6348_s11 + $0x58] sm:$0xff] %vm3923_vm5, %v4579_v19  ;;  %v4088_v19 = vld [vmem:[#allocation4 + $0x100] sm:$0xff] }
 0x518   : > { %v4578_v53 = vmul.f32 %v4301_v61, %v4066_v23  ;;  %v4316_v12 = vpop.permute.xlu1 %4315 }
 0x519   : > { %v4581_v57 = vmul.f32 %v4316_v12, %v4069_v50  ;;  %v4091_v12 = vld [vmem:[#allocation4 + $0x118] sm:$0xff] }
 0x51a   : > { %4642 = vst.msk [vmem:[%s6348_s11 + $0x50] sm:$0xff] %vm3923_vm5, %v4578_v53 }
 0x51b   : > { %v4311_v42 = vpop.permute.xlu0 %4310  ;;  %4645 = vst.msk [vmem:[%s6348_s11 + $0x68] sm:$0xff] %vm3923_vm5, %v4581_v57  ;;  %v4090_v57 = vld [vmem:[#allocation4 + $0x110] sm:$0xff] }
 0x51c   : > { %v4580_v55 = vmul.f32 %v4311_v42, %v4068_v40  ;;  %v4326_v49 = vpop.permute.xlu1 %4325 }
 0x51d   : > { %v4583_v2 = vmul.f32 %v4326_v49, %v4071_v15  ;;  %v4093_v49 = vld [vmem:[#allocation4 + $0x128] sm:$0xff] }
 0x51e   : > { %4644 = vst.msk [vmem:[%s6348_s11 + $0x60] sm:$0xff] %vm3923_vm5, %v4580_v55 }
 0x51f   : > { %v4321_v56 = vpop.permute.xlu0 %4320  ;;  %4647 = vst.msk [vmem:[%s6348_s11 + $0x78] sm:$0xff] %vm3923_vm5, %v4583_v2  ;;  %v4092_v2 = vld [vmem:[#allocation4 + $0x120] sm:$0xff] }
 0x520   : > { %v4582_v58 = vmul.f32 %v4321_v56, %v4070_v31  ;;  %v4336_v46 = vpop.permute.xlu1 %4335 }
 0x521   : > { %v4585_v33 = vmul.f32 %v4336_v46, %v4073_v63  ;;  %v4095_v46 = vld [vmem:[#allocation4 + $0x138] sm:$0xff] }
 0x522   : > { %4646 = vst.msk [vmem:[%s6348_s11 + $0x70] sm:$0xff] %vm3923_vm5, %v4582_v58 }
 0x523   : > { %v4331_v62 = vpop.permute.xlu0 %4330  ;;  %4649 = vst.msk [vmem:[%s6348_s11 + $0x88] sm:$0xff] %vm3923_vm5, %v4585_v33  ;;  %v4094_v33 = vld [vmem:[#allocation4 + $0x130] sm:$0xff] }
 0x524   : > { %v4584_v10 = vmul.f32 %v4331_v62, %v4072_v37  ;;  %v4346_v36 = vpop.permute.xlu1 %4345 }
 0x525   : > { %v4587_v59 = vmul.f32 %v4346_v36, %v4075_v8  ;;  %v4097_v36 = vld [vmem:[#allocation4 + $0x148] sm:$0xff] }
 0x526   : > { %4648 = vst.msk [vmem:[%s6348_s11 + $0x80] sm:$0xff] %vm3923_vm5, %v4584_v10 }
 0x527   : > { %v4341_v3 = vpop.permute.xlu0 %4340  ;;  %4651 = vst.msk [vmem:[%s6348_s11 + $0x98] sm:$0xff] %vm3923_vm5, %v4587_v59  ;;  %v4096_v59 = vld [vmem:[#allocation4 + $0x140] sm:$0xff] }
 0x528   : > { %v4586_v16 = vmul.f32 %v4341_v3, %v4074_v24  ;;  %v4356_v51 = vpop.permute.xlu1 %4355 }
 0x529   : > { %v4589_v30 = vmul.f32 %v4356_v51, %v4077_v25  ;;  %v4099_v51 = vld [vmem:[#allocation4 + $0x158] sm:$0xff] }
 0x52a   : > { %4650 = vst.msk [vmem:[%s6348_s11 + $0x90] sm:$0xff] %vm3923_vm5, %v4586_v16 }
 0x52b   : > { %v4351_v60 = vpop.permute.xlu0 %4350  ;;  %4653 = vst.msk [vmem:[%s6348_s11 + $0xa8] sm:$0xff] %vm3923_vm5, %v4589_v30  ;;  %v4098_v30 = vld [vmem:[#allocation4 + $0x150] sm:$0xff] }
 0x52c   : > { %v4588_v4 = vmul.f32 %v4351_v60, %v4076_v26  ;;  %v4366_v27 = vpop.permute.xlu1 %4365 }
 0x52d   : > { %v4591_v18 = vmul.f32 %v4366_v27, %v4079_v39  ;;  %v4101_v27 = vld [vmem:[#allocation4 + $0x168] sm:$0xff] }
 0x52e   : > { %4652 = vst.msk [vmem:[%s6348_s11 + $0xa0] sm:$0xff] %vm3923_vm5, %v4588_v4 }
 0x52f   : > { %v4361_v6 = vpop.permute.xlu0 %4360  ;;  %4655 = vst.msk [vmem:[%s6348_s11 + $0xb8] sm:$0xff] %vm3923_vm5, %v4591_v18  ;;  %v4100_v18 = vld [vmem:[#allocation4 + $0x160] sm:$0xff] }
 0x530   : > { %v4590_v52 = vmul.f32 %v4361_v6, %v4078_v20  ;;  %v4376_v29 = vpop.permute.xlu1 %4375 }
 0x531   : > { %v4593_v14 = vmul.f32 %v4376_v29, %v4081_v35  ;;  %v4103_v29 = vld [vmem:[#allocation4 + $0x178] sm:$0xff] }
 0x532   : > { %4654 = vst.msk [vmem:[%s6348_s11 + $0xb0] sm:$0xff] %vm3923_vm5, %v4590_v52 }
 0x533   : > { %v4371_v34 = vpop.permute.xlu0 %4370  ;;  %4657 = vst.msk [vmem:[%s6348_s11 + $0xc8] sm:$0xff] %vm3923_vm5, %v4593_v14  ;;  %v4102_v14 = vld [vmem:[#allocation4 + $0x170] sm:$0xff] }
 0x534   : > { %v4592_v13 = vmul.f32 %v4371_v34, %v4080_v0  ;;  %v4386_v47 = vpop.permute.xlu1 %4385 }
 0x535   : > { %v4595_v21 = vmul.f32 %v4386_v47, %v4083_v48  ;;  %v4105_v47 = vld [vmem:[#allocation4 + $0x188] sm:$0xff] }
 0x536   : > { %4656 = vst.msk [vmem:[%s6348_s11 + $0xc0] sm:$0xff] %vm3923_vm5, %v4592_v13 }
 0x537   : > { %v4381_v11 = vpop.permute.xlu0 %4380  ;;  %4659 = vst.msk [vmem:[%s6348_s11 + $0xd8] sm:$0xff] %vm3923_vm5, %v4595_v21  ;;  %v4104_v21 = vld [vmem:[#allocation4 + $0x180] sm:$0xff] }
 0x538   : > { %v4594_v17 = vmul.f32 %v4381_v11, %v4082_v43  ;;  %v4396_v1 = vpop.permute.xlu1 %4395 }
 0x539   : > { %v4597_v7 = vmul.f32 %v4396_v1, %v4085_v22  ;;  %v4107_v1 = vld [vmem:[#allocation4 + $0x198] sm:$0xff] }
 0x53a   : > { %4658 = vst.msk [vmem:[%s6348_s11 + $0xd0] sm:$0xff] %vm3923_vm5, %v4594_v17 }
 0x53b   : > { %v4391_v41 = vpop.permute.xlu0 %4390  ;;  %4661 = vst.msk [vmem:[%s6348_s11 + $0xe8] sm:$0xff] %vm3923_vm5, %v4597_v7  ;;  %v4106_v7 = vld [vmem:[#allocation4 + $0x190] sm:$0xff] }
 0x53c   : > { %v4596_v45 = vmul.f32 %v4391_v41, %v4084_v32  ;;  %v4406_v5 = vpop.permute.xlu1 %4405 }
 0x53d   : > { %v4599_v38 = vmul.f32 %v4406_v5, %v4087_v28  ;;  %v4109_v5 = vld [vmem:[#allocation4 + $0x1a8] sm:$0xff] }
 0x53e   : > { %4660 = vst.msk [vmem:[%s6348_s11 + $0xe0] sm:$0xff] %vm3923_vm5, %v4596_v45 }
 0x53f   : > { %v4401_v54 = vpop.permute.xlu0 %4400  ;;  %4663 = vst.msk [vmem:[%s6348_s11 + $0xf8] sm:$0xff] %vm3923_vm5, %v4599_v38  ;;  %v4108_v38 = vld [vmem:[#allocation4 + $0x1a0] sm:$0xff] }
 0x540   : > { %v4598_v23 = vmul.f32 %v4401_v54, %v4086_v44  ;;  %v4416_v61 = vpop.permute.xlu1 %4415 }
 0x541   : > { %v4601_v53 = vmul.f32 %v4416_v61, %v4089_v9  ;;  %v4111_v61 = vld [vmem:[#allocation4 + $0x1b8] sm:$0xff] }
 0x542   : > { %4662 = vst.msk [vmem:[%s6348_s11 + $0xf0] sm:$0xff] %vm3923_vm5, %v4598_v23 }
 0x543   : > { %v4411_v50 = vpop.permute.xlu0 %4410  ;;  %4665 = vst.msk [vmem:[%s6348_s11 + $0x108] sm:$0xff] %vm3923_vm5, %v4601_v53  ;;  %v4110_v53 = vld [vmem:[#allocation4 + $0x1b0] sm:$0xff] }
 0x544   : > { %v4600_v40 = vmul.f32 %v4411_v50, %v4088_v19  ;;  %v4426_v42 = vpop.permute.xlu1 %4425 }
 0x545   : > { %v4603_v55 = vmul.f32 %v4426_v42, %v4091_v12  ;;  %v4113_v42 = vld [vmem:[#allocation4 + $0x1c8] sm:$0xff] }
 0x546   : > { %4664 = vst.msk [vmem:[%s6348_s11 + $0x100] sm:$0xff] %vm3923_vm5, %v4600_v40 }
 0x547   : > { %v4421_v15 = vpop.permute.xlu0 %4420  ;;  %4667 = vst.msk [vmem:[%s6348_s11 + $0x118] sm:$0xff] %vm3923_vm5, %v4603_v55  ;;  %v4112_v55 = vld [vmem:[#allocation4 + $0x1c0] sm:$0xff] }
 0x548   : > { %v4602_v31 = vmul.f32 %v4421_v15, %v4090_v57  ;;  %v4436_v56 = vpop.permute.xlu1 %4435 }
 0x549   : > { %v4605_v58 = vmul.f32 %v4436_v56, %v4093_v49  ;;  %v4115_v56 = vld [vmem:[#allocation4 + $0x1d8] sm:$0xff] }
 0x54a   : > { %4666 = vst.msk [vmem:[%s6348_s11 + $0x110] sm:$0xff] %vm3923_vm5, %v4602_v31 }
 0x54b   : > { %v4431_v63 = vpop.permute.xlu0 %4430  ;;  %4669 = vst.msk [vmem:[%s6348_s11 + $0x128] sm:$0xff] %vm3923_vm5, %v4605_v58  ;;  %v4114_v58 = vld [vmem:[#allocation4 + $0x1d0] sm:$0xff] }
 0x54c   : > { %v4604_v37 = vmul.f32 %v4431_v63, %v4092_v2  ;;  %v4446_v62 = vpop.permute.xlu1 %4445 }
 0x54d   : > { %v4607_v10 = vmul.f32 %v4446_v62, %v4095_v46  ;;  %v4117_v62 = vld [vmem:[#allocation4 + $0x1e8] sm:$0xff] }
 0x54e   : > { %4668 = vst.msk [vmem:[%s6348_s11 + $0x120] sm:$0xff] %vm3923_vm5, %v4604_v37 }
 0x54f   : > { %v4441_v8 = vpop.permute.xlu0 %4440  ;;  %4671 = vst.msk [vmem:[%s6348_s11 + $0x138] sm:$0xff] %vm3923_vm5, %v4607_v10  ;;  %v4116_v10 = vld [vmem:[#allocation4 + $0x1e0] sm:$0xff] }
 0x550   : > { %v4606_v24 = vmul.f32 %v4441_v8, %v4094_v33  ;;  %v4456_v3 = vpop.permute.xlu1 %4455 }
 0x551   : > { %v4609_v16 = vmul.f32 %v4456_v3, %v4097_v36  ;;  %v4119_v3 = vld [vmem:[#allocation4 + $0x1f8] sm:$0xff] }
 0x552   : > { %4670 = vst.msk [vmem:[%s6348_s11 + $0x130] sm:$0xff] %vm3923_vm5, %v4606_v24 }
 0x553   : > { %v4451_v25 = vpop.permute.xlu0 %4450  ;;  %4673 = vst.msk [vmem:[%s6348_s11 + $0x148] sm:$0xff] %vm3923_vm5, %v4609_v16  ;;  %v4118_v16 = vld [vmem:[#allocation4 + $0x1f0] sm:$0xff] }
 0x554   : > { %v4608_v26 = vmul.f32 %v4451_v25, %v4096_v59  ;;  %v4466_v60 = vpop.permute.xlu1 %4465 }
 0x555   : > { %v4611_v4 = vmul.f32 %v4466_v60, %v4099_v51 }
 0x556   : > { %4672 = vst.msk [vmem:[%s6348_s11 + $0x140] sm:$0xff] %vm3923_vm5, %v4608_v26 }
 0x557   : > { %v4461_v39 = vpop.permute.xlu0 %4460  ;;  %4675 = vst.msk [vmem:[%s6348_s11 + $0x158] sm:$0xff] %vm3923_vm5, %v4611_v4 }
 0x558   : > { %v4610_v20 = vmul.f32 %v4461_v39, %v4098_v30  ;;  %v4476_v6 = vpop.permute.xlu1 %4475 }
 0x559   : > { %v4613_v52 = vmul.f32 %v4476_v6, %v4101_v27 }
 0x55a   : > { %4674 = vst.msk [vmem:[%s6348_s11 + $0x150] sm:$0xff] %vm3923_vm5, %v4610_v20 }
 0x55b   : > { %v4471_v35 = vpop.permute.xlu0 %4470  ;;  %4677 = vst.msk [vmem:[%s6348_s11 + $0x168] sm:$0xff] %vm3923_vm5, %v4613_v52 }
 0x55c   : > { %v4612_v0 = vmul.f32 %v4471_v35, %v4100_v18  ;;  %v4486_v34 = vpop.permute.xlu1 %4485 }
 0x55d   : > { %v4615_v13 = vmul.f32 %v4486_v34, %v4103_v29 }
 0x55e   : > { %4676 = vst.msk [vmem:[%s6348_s11 + $0x160] sm:$0xff] %vm3923_vm5, %v4612_v0 }
 0x55f   : > { %v4481_v48 = vpop.permute.xlu0 %4480  ;;  %4679 = vst.msk [vmem:[%s6348_s11 + $0x178] sm:$0xff] %vm3923_vm5, %v4615_v13 }
 0x560   : > { %v4614_v43 = vmul.f32 %v4481_v48, %v4102_v14  ;;  %v4496_v11 = vpop.permute.xlu1 %4495 }
 0x561   : > { %v4617_v17 = vmul.f32 %v4496_v11, %v4105_v47 }
 0x562   : > { %4678 = vst.msk [vmem:[%s6348_s11 + $0x170] sm:$0xff] %vm3923_vm5, %v4614_v43 }
 0x563   : > { %v4491_v22 = vpop.permute.xlu0 %4490  ;;  %4681 = vst.msk [vmem:[%s6348_s11 + $0x188] sm:$0xff] %vm3923_vm5, %v4617_v17 }
 0x564   : > { %v4616_v32 = vmul.f32 %v4491_v22, %v4104_v21  ;;  %v4506_v41 = vpop.permute.xlu1 %4505 }
 0x565   : > { %v4619_v45 = vmul.f32 %v4506_v41, %v4107_v1 }
 0x566   : > { %4680 = vst.msk [vmem:[%s6348_s11 + $0x180] sm:$0xff] %vm3923_vm5, %v4616_v32 }
 0x567   : > { %v4501_v28 = vpop.permute.xlu0 %4500  ;;  %4683 = vst.msk [vmem:[%s6348_s11 + $0x198] sm:$0xff] %vm3923_vm5, %v4619_v45 }
 0x568   : > { %v4618_v44 = vmul.f32 %v4501_v28, %v4106_v7  ;;  %v4516_v54 = vpop.permute.xlu1 %4515 }
 0x569   : > { %v4621_v23 = vmul.f32 %v4516_v54, %v4109_v5 }
 0x56a   : > { %4682 = vst.msk [vmem:[%s6348_s11 + $0x190] sm:$0xff] %vm3923_vm5, %v4618_v44 }
 0x56b   : > { %v4511_v9 = vpop.permute.xlu0 %4510  ;;  %4685 = vst.msk [vmem:[%s6348_s11 + $0x1a8] sm:$0xff] %vm3923_vm5, %v4621_v23 }
 0x56c   : > { %v4620_v19 = vmul.f32 %v4511_v9, %v4108_v38  ;;  %v4526_v50 = vpop.permute.xlu1 %4525 }
 0x56d   : > { %v4623_v40 = vmul.f32 %v4526_v50, %v4111_v61 }
 0x56e   : > { %4684 = vst.msk [vmem:[%s6348_s11 + $0x1a0] sm:$0xff] %vm3923_vm5, %v4620_v19 }
 0x56f   : > { %v4521_v12 = vpop.permute.xlu0 %4520  ;;  %4687 = vst.msk [vmem:[%s6348_s11 + $0x1b8] sm:$0xff] %vm3923_vm5, %v4623_v40 }
 0x570   : > { %v4622_v57 = vmul.f32 %v4521_v12, %v4110_v53  ;;  %v4536_v15 = vpop.permute.xlu1 %4535 }
 0x571   : > { %v4625_v31 = vmul.f32 %v4536_v15, %v4113_v42 }
 0x572   : > { %4686 = vst.msk [vmem:[%s6348_s11 + $0x1b0] sm:$0xff] %vm3923_vm5, %v4622_v57 }
 0x573   : > { %v4531_v49 = vpop.permute.xlu0 %4530  ;;  %4689 = vst.msk [vmem:[%s6348_s11 + $0x1c8] sm:$0xff] %vm3923_vm5, %v4625_v31 }
 0x574   : > { %v4624_v2 = vmul.f32 %v4531_v49, %v4112_v55  ;;  %v4546_v63 = vpop.permute.xlu1 %4545 }
 0x575   : > { %v4627_v37 = vmul.f32 %v4546_v63, %v4115_v56 }
 0x576   : > { %4688 = vst.msk [vmem:[%s6348_s11 + $0x1c0] sm:$0xff] %vm3923_vm5, %v4624_v2 }
 0x577   : > { %v4541_v46 = vpop.permute.xlu0 %4540  ;;  %4691 = vst.msk [vmem:[%s6348_s11 + $0x1d8] sm:$0xff] %vm3923_vm5, %v4627_v37 }
 0x578   : > { %v4626_v33 = vmul.f32 %v4541_v46, %v4114_v58  ;;  %v4556_v8 = vpop.permute.xlu1 %4555 }
 0x579   : > { %v4629_v24 = vmul.f32 %v4556_v8, %v4117_v62 }
 0x57a   : > { %4690 = vst.msk [vmem:[%s6348_s11 + $0x1d0] sm:$0xff] %vm3923_vm5, %v4626_v33 }
 0x57b   : > { %v4551_v36 = vpop.permute.xlu0 %4550  ;;  %4693 = vst.msk [vmem:[%s6348_s11 + $0x1e8] sm:$0xff] %vm3923_vm5, %v4629_v24 }
 0x57c   : > { %v4628_v59 = vmul.f32 %v4551_v36, %v4116_v10  ;;  %v4566_v25 = vpop.permute.xlu1 %4565 }
 0x57d   : > { %v4631_v26 = vmul.f32 %v4566_v25, %v4119_v3 }
 0x57e   : > { %4692 = vst.msk [vmem:[%s6348_s11 + $0x1e0] sm:$0xff] %vm3923_vm5, %v4628_v59 }
 0x57f   : > { %v4561_v51 = vpop.permute.xlu0 %4560  ;;  %4695 = vst.msk [vmem:[%s6348_s11 + $0x1f8] sm:$0xff] %vm3923_vm5, %v4631_v26 }
 0x580   : > { %v4630_v30 = vmul.f32 %v4561_v51, %v4118_v16 }
 0x582   : > { %4694 = vst.msk [vmem:[%s6348_s11 + $0x1f0] sm:$0xff] %vm3923_vm5, %v4630_v30 }
 0x583 PF: > { %s13_s18 = sadd.s32 1, %s6099_s18   ;;  %s9508_s12 = smov %s6079_s13 }
 0x584   : > { %p10_p13 = scmp.ge.s32.totalorder %s13_s18, 6   ;;  %s9509_s13 = smov %s6180_s26 }
 0x585   : > { %s9510_s14 = smov %s6091_s16  ;;  %s9511_s15 = smov %s6095_s17 }
 0x586   : > { %s9512_s16 = smov %s9515_s19  ;;  %s9513_s17 = smov %s9519_s20 }
 0x587   :  { %12 = sbr.rel (!%p10_p13) target bundleno = 4 (0x4), region = 162 }

</bundles_post_ra>
